<compile_context>
chip_gen: v6e
topology: v6e:2x2x1
jax: 0.10.0
libtpu: 0.0.40
codegen_flags: <defaults>
</compile_context>

<pallas_src>
import functools

import jax
import jax.numpy as jnp
from jax.experimental import pallas as pl
from jax.experimental.pallas import tpu as pltpu


def _round_up(x, m):
    return ((x + m - 1) // m) * m


def _cdiv(a, b):
    return -(-a // b)


def _lstm_kernel(gx_ref, h0_ref, c0_ref, whh_ref,
                 out_ref, hf_ref, cf_ref,
                 h_sc, c_sc, *, hidden_pad, t_blk, seq_len):
    """One grid step == T_BLK timesteps of the LSTM recurrence for one batch tile.

    Refs (VMEM tiles):
      gx_ref  : (T_BLK, Bt, 4Hp)  precomputed x @ W_ih^T + bias for this block
      h0_ref  : (Bt, Hp)          initial hidden state (read only at t-block 0)
      c0_ref  : (Bt, Hp)          initial cell state   (read only at t-block 0)
      whh_ref : (Hp, 4Hp)         hidden->gates weights (transposed, gate-major cols)
      out_ref : (T_BLK, Bt, Hp)   hidden states for this block of timesteps
      hf_ref  : (Bt, Hp)          final hidden state (written on last t-block)
      cf_ref  : (Bt, Hp)          final cell state   (written on last t-block)
      h_sc,c_sc : (Bt, Hp) f32 scratch carrying the recurrent state across t-blocks
    """
    tb = pl.program_id(1)           # seq-block index (serial / "arbitrary" axis)
    n_tb = pl.num_programs(1)
    Hp = hidden_pad
    needs_mask = (seq_len % t_blk) != 0   # static (trace-time) decision
    w_dtype = whh_ref.dtype

    @pl.when(tb == 0)
    def _():
        h_sc[...] = h0_ref[...].astype(jnp.float32)
        c_sc[...] = c0_ref[...].astype(jnp.float32)

    h = h_sc[...]
    c = c_sc[...]

    # Statically unrolled inner loop over T_BLK timesteps.
    for t in range(t_blk):
        gx_t = gx_ref.at[t]                 # (Bt, 4Hp) ref view, no load yet
        h_lo = h.astype(w_dtype)            # matmul operand dtype (bf16 or f32)

        def gate(k, h_lo=h_lo, gx_t=gx_t):
            # One Hp-wide (lane-aligned) gate pre-activation slab in f32.
            pre = gx_t[:, k * Hp:(k + 1) * Hp].astype(jnp.float32)
            pre = pre + jnp.dot(h_lo, whh_ref[:, k * Hp:(k + 1) * Hp],
                                preferred_element_type=jnp.float32)
            return pre

        # Fold gates incrementally (f, then i*g, then o) so the peak live f32 data
        # is ~2 (Bt, Hp) slabs instead of one (Bt, 4Hp) slab.
        c_new = jax.nn.sigmoid(gate(1)) * c                              # f * c
        c_new = c_new + jax.nn.sigmoid(gate(0)) * jnp.tanh(gate(2))      # + i * g
        h_new = jax.nn.sigmoid(gate(3)) * jnp.tanh(c_new)                # o * tanh(c)

        out_ref[t] = h_new.astype(out_ref.dtype)

        if needs_mask:
            # Sequence was padded up to a multiple of T_BLK: don't let padded
            # timesteps pollute the recurrent carry / final state.
            valid = (tb * t_blk + t) < seq_len
            h = jnp.where(valid, h_new, h)
            c = jnp.where(valid, c_new, c)
        else:
            h, c = h_new, c_new

    h_sc[...] = h
    c_sc[...] = c

    @pl.when(tb == n_tb - 1)
    def _():
        hf_ref[...] = h.astype(hf_ref.dtype)
        cf_ref[...] = c.astype(cf_ref.dtype)


def _vmem_budget_bytes():
    """Usable VMEM budget with headroom for compiler internal scratch."""
    try:
        cap = int(pltpu.get_tpu_info().vmem_capacity_bytes)
    except Exception:
        cap = 64 << 20      # conservative fallback (v7x-sized), safe everywhere
    budget = min(int(cap * 0.82), cap - (12 << 20))   # ~52 MiB on v7x, ~105 MiB v5e/v6e
    budget = max(budget, 16 << 20)
    return cap, budget


def modified_lstm_cell_forward(x, init_states, params, *,
                               compute_dtype=jnp.bfloat16,
                               out_dtype=None,
                               t_blk=None):
    """JAX/Pallas equivalent of ModifiedLSTMcell.forward (default config).

    Args:
      x: (seq, batch, input) float32
      init_states: (h0, c0), each (1, batch, hidden)
      params: dict with weight_ih (4H, I), weight_hh (4H, H), bias_ih (4H,), bias_hh (4H,)
      compute_dtype: matmul operand dtype inside / feeding the kernel (bf16 default;
                     accumulation and the recurrent carry stay f32; pass jnp.float32
                     for an exact path)
      out_dtype: dtype of outputs / final states (default: x.dtype; bf16 halves the
                 store + HBM writeback cost, biggest win on v5e)
      t_blk: max timesteps per grid step (None = auto per VMEM budget)

    Returns:
      outputs: (seq, batch, hidden)
      (h_n, c_n): each (1, batch, hidden)
    """
    seq_sz, batch_sz, input_sz = x.shape
    h0, c0 = init_states
    h0 = jnp.squeeze(h0, axis=0)   # squeeze(Dim.seq)
    c0 = jnp.squeeze(c0, axis=0)
    hidden_sz = h0.shape[-1]
    if out_dtype is None:
        out_dtype = x.dtype

    if seq_sz == 0:  # edge case: nothing to do
        return (jnp.zeros((0, batch_sz, hidden_sz), out_dtype),
                (h0[None].astype(out_dtype), c0[None].astype(out_dtype)))

    # ---- VMEM-budget-driven tile selection -------------------------------------
    vmem_cap, vmem_budget = _vmem_budget_bytes()

    Hp = _round_up(hidden_sz, 128)          # lane-aligned hidden size
    cbytes = jnp.dtype(compute_dtype).itemsize
    obytes = jnp.dtype(out_dtype).itemsize

    Bp8 = _round_up(batch_sz, 8)            # sublane-aligned batch
    # Balanced batch tiles with at most ~256 rows each (fills MXU rows on v6e/v7x),
    # and at least 2 tiles when batch >= 16 so both v7x TensorCores get work.
    n_bt = max(1, _cdiv(Bp8, 256))
    if n_bt == 1 and Bp8 >= 16:
        n_bt = 2
    b_tile = _round_up(_cdiv(Bp8, n_bt), 8)

    if t_blk is None:
        t_blk = 32 if vmem_budget >= (80 << 20) else 16   # v5e/v6e vs v7x default
    T_BLK = max(1, min(t_blk, seq_sz))

    def _wset(tb_, bt_):
        # Conservative working-set estimate: assume double buffering everywhere so
        # the no-Buffered(1) fallback path also fits.
        return (2 * tb_ * bt_ * 4 * Hp * cbytes      # gates_x block
                + 2 * tb_ * bt_ * Hp * obytes        # output block
                + 2 * Hp * 4 * Hp * cbytes           # W_hh^T
                + 2 * 2 * bt_ * Hp * 4               # h0 + c0 (f32)
                + 2 * 2 * bt_ * Hp * obytes          # h_n + c_n
                + 2 * bt_ * Hp * 4)                  # f32 scratch carries

    while _wset(T_BLK, b_tile) > vmem_budget:
        if T_BLK > 8:
            T_BLK = max(8, T_BLK // 2)
        elif b_tile > 128:
            b_tile = _round_up(max(128, b_tile // 2), 8)
        elif T_BLK > 2:
            T_BLK = max(2, T_BLK // 2)
        elif b_tile > 8:
            b_tile = _round_up(max(8, b_tile // 2), 8)
        elif T_BLK > 1:
            T_BLK = 1
        else:
            break

    # Re-balance batch tiles for the final per-tile cap.
    n_bt = max(1, _cdiv(Bp8, b_tile))
    if n_bt == 1 and Bp8 >= 16:
        n_bt = 2
    b_tile = _round_up(_cdiv(Bp8, n_bt), 8)
    Bp = n_bt * b_tile

    seq_p = _round_up(seq_sz, T_BLK)
    wset = _wset(T_BLK, b_tile)
    vmem_limit = int(min(vmem_cap, max(vmem_budget, wset + (2 << 20))))

    # ---- weight prep (plain XLA): gate-wise pad to Hp, transpose, fuse biases --
    w_ih = params["weight_ih"].reshape(4, hidden_sz, input_sz)
    w_hh = params["weight_hh"].reshape(4, hidden_sz, hidden_sz)
    b = (params["bias_ih"] + params["bias_hh"]).reshape(4, hidden_sz)

    w_ih_p = jnp.pad(w_ih, ((0, 0), (0, Hp - hidden_sz), (0, 0)))               # (4,Hp,I)
    w_hh_p = jnp.pad(w_hh, ((0, 0), (0, Hp - hidden_sz), (0, Hp - hidden_sz)))  # (4,Hp,Hp)
    b_p = jnp.pad(b, ((0, 0), (0, Hp - hidden_sz)))                             # (4,Hp)

    w_ih_t = jnp.transpose(w_ih_p, (2, 0, 1)).reshape(input_sz, 4 * Hp)         # (I, 4Hp)
    w_hh_t = jnp.transpose(w_hh_p, (2, 0, 1)).reshape(Hp, 4 * Hp)               # (Hp, 4Hp)
    bias = b_p.reshape(1, 4 * Hp).astype(jnp.float32)

    # ---- hoisted input projection: one big batched matmul (no seq dependency) --
    x_p = jnp.pad(x, ((0, seq_p - seq_sz), (0, Bp - batch_sz), (0, 0)))
    x2 = x_p.reshape(seq_p * Bp, input_sz).astype(compute_dtype)
    gates_x = jnp.dot(x2, w_ih_t.astype(compute_dtype),
                      preferred_element_type=jnp.float32) + bias
    gates_x = gates_x.reshape(seq_p, Bp, 4 * Hp).astype(compute_dtype)

    h0_p = jnp.pad(h0, ((0, Bp - batch_sz), (0, Hp - hidden_sz)))
    c0_p = jnp.pad(c0, ((0, Bp - batch_sz), (0, Hp - hidden_sz)))
    w_hh_c = w_hh_t.astype(compute_dtype)

    kernel = functools.partial(_lstm_kernel, hidden_pad=Hp, t_blk=T_BLK, seq_len=seq_sz)

    out_shapes = (
        jax.ShapeDtypeStruct((seq_p, Bp, Hp), out_dtype),   # outputs (padded)
        jax.ShapeDtypeStruct((Bp, Hp), out_dtype),          # h_n (padded)
        jax.ShapeDtypeStruct((Bp, Hp), out_dtype),          # c_n (padded)
    )
    grid = (Bp // b_tile, seq_p // T_BLK)   # (parallel batch tiles, serial seq blocks)

    def _call(single_buffer_consts):
        # Single-buffer the constant-index inputs (W_hh and the init states): they
        # never change across the serial seq axis, so double-buffering them only
        # wastes VMEM (W_hh alone can be multiple MiB).
        const_kw = dict(pipeline_mode=pl.Buffered(1)) if single_buffer_consts else {}
        grid_spec = pltpu.PrefetchScalarGridSpec(
            num_scalar_prefetch=0,
            grid=grid,
            in_specs=[
                pl.BlockSpec((T_BLK, b_tile, 4 * Hp), lambda b, t: (t, b, 0)),  # gates_x
                pl.BlockSpec((b_tile, Hp), lambda b, t: (b, 0), **const_kw),    # h0
                pl.BlockSpec((b_tile, Hp), lambda b, t: (b, 0), **const_kw),    # c0
                pl.BlockSpec((Hp, 4 * Hp), lambda b, t: (0, 0), **const_kw),    # W_hh^T
            ],
            out_specs=[
                pl.BlockSpec((T_BLK, b_tile, Hp), lambda b, t: (t, b, 0)),      # outputs
                pl.BlockSpec((b_tile, Hp), lambda b, t: (b, 0)),                # h_n
                pl.BlockSpec((b_tile, Hp), lambda b, t: (b, 0)),                # c_n
            ],
            scratch_shapes=[
                pltpu.VMEM((b_tile, Hp), jnp.float32),  # h carry
                pltpu.VMEM((b_tile, Hp), jnp.float32),  # c carry
            ],
        )
        return pl.pallas_call(
            kernel,
            out_shape=out_shapes,
            grid_spec=grid_spec,
            compiler_params=pltpu.CompilerParams(
                # batch tiles are independent (megacore-parallel on v7x);
                # the seq-block axis is a serial recurrence.
                dimension_semantics=("parallel", "arbitrary"),
                vmem_limit_bytes=vmem_limit,
            ),
        )(gates_x, h0_p, c0_p, w_hh_c)

    try:
        outputs_p, h_n_p, c_n_p = _call(single_buffer_consts=True)
    except Exception:
        # pipeline_mode=pl.Buffered(1) unsupported on this jax version/backend:
        # fall back to default (double) buffering; correctness is unaffected.
        outputs_p, h_n_p, c_n_p = _call(single_buffer_consts=False)

    outputs = outputs_p[:seq_sz, :batch_sz, :hidden_sz]
    h_n = h_n_p[:batch_sz, :hidden_sz][None]
    c_n = c_n_p[:batch_sz, :hidden_sz][None]
    return outputs, (h_n, c_n)


def _reference_forward(x, init_states, params):
    """Pure-JAX f32 reference of the same recurrence (for correctness check)."""
    h0, c0 = init_states
    h = jnp.squeeze(h0, axis=0)
    c = jnp.squeeze(c0, axis=0)
    H = h.shape[-1]
    w_ih_t = jnp.transpose(params["weight_ih"])
    w_hh_t = jnp.transpose(params["weight_hh"])
    b = params["bias_ih"] + params["bias_hh"]

    def step(carry, x_t):
        h, c = carry
        gates = x_t @ w_ih_t + h @ w_hh_t + b
        i = jax.nn.sigmoid(gates[:, 0 * H:1 * H])
        f = jax.nn.sigmoid(gates[:, 1 * H:2 * H])
        g = jnp.tanh(gates[:, 2 * H:3 * H])
        o = jax.nn.sigmoid(gates[:, 3 * H:4 * H])
        c_new = f * c + i * g
        h_new = o * jnp.tanh(c_new)
        return (h_new, c_new), h_new

    (h_n, c_n), outs = jax.lax.scan(step, (h, c), x)
    return outs, (h_n[None], c_n[None])


def _make_inputs(key, seq, batch, input_sz, hidden_sz):
    k_x, k_h, k_c, k_wih, k_whh, k_bih, k_bhh = jax.random.split(key, 7)
    x = jax.random.normal(k_x, (seq, batch, input_sz), dtype=jnp.float32)
    h0 = jax.random.normal(k_h, (1, batch, hidden_sz), dtype=jnp.float32)
    c0 = jax.random.normal(k_c, (1, batch, hidden_sz), dtype=jnp.float32)
    bound = 1.0 / (hidden_sz ** 0.5)   # nn.LSTMCell init: U(-1/sqrt(H), 1/sqrt(H))
    params = {
        "weight_ih": jax.random.uniform(k_wih, (4 * hidden_sz, input_sz),
                                        minval=-bound, maxval=bound, dtype=jnp.float32),
        "weight_hh": jax.random.uniform(k_whh, (4 * hidden_sz, hidden_sz),
                                        minval=-bound, maxval=bound, dtype=jnp.float32),
        "bias_ih": jax.random.uniform(k_bih, (4 * hidden_sz,),
                                      minval=-bound, maxval=bound, dtype=jnp.float32),
        "bias_hh": jax.random.uniform(k_bhh, (4 * hidden_sz,),
                                      minval=-bound, maxval=bound, dtype=jnp.float32),
    }
    return x, h0, c0, params


def _run_case(key, seq, batch, input_sz, hidden_sz, compute_dtype, atol, rtol):
    x, h0, c0, params = _make_inputs(key, seq, batch, input_sz, hidden_sz)
    outputs, (h_n, c_n) = modified_lstm_cell_forward(
        x, (h0, c0), params, compute_dtype=compute_dtype)
    jax.block_until_ready((outputs, h_n, c_n))

    ref_out, (ref_h, ref_c) = _reference_forward(x, (h0, c0), params)
    assert outputs.shape == (seq, batch, hidden_sz)
    assert h_n.shape == (1, batch, hidden_sz) and c_n.shape == (1, batch, hidden_sz)
    assert jnp.allclose(outputs, ref_out, atol=atol, rtol=rtol)
    assert jnp.allclose(h_n, ref_h, atol=atol, rtol=rtol)
    assert jnp.allclose(c_n, ref_c, atol=atol, rtol=rtol)


if __name__ == "__main__":
    key = jax.random.PRNGKey(0)
    k1, k2 = jax.random.split(key)

    # Case 1: shapes matching the module's default usage, exact f32 path.
    _run_case(k1, seq=8, batch=8, input_sz=16, hidden_sz=32,
              compute_dtype=jnp.float32, atol=1e-4, rtol=1e-4)

    # Case 2: non-aligned shapes (exercise batch / hidden / seq padding + masking),
    # bf16 matmul path with f32 accumulation and f32 recurrent carry.
    _run_case(k2, seq=20, batch=5, input_sz=16, hidden_sz=40,
              compute_dtype=jnp.bfloat16, atol=5e-2, rtol=5e-2)

    print("KERNEL_OK")
</pallas_src>

<mosaic_0001>
module attributes {stable_mosaic.version = 11 : i64} {
  func.func @_lstm_kernel(%arg0: i32, %arg1: i32, %arg2: memref<8x8x512xf32, #tpu.memory_space<vmem>>, %arg3: memref<8x128xf32, #tpu.memory_space<vmem>>, %arg4: memref<8x128xf32, #tpu.memory_space<vmem>>, %arg5: memref<128x512xf32, #tpu.memory_space<vmem>>, %arg6: memref<8x8x128xf32, #tpu.memory_space<vmem>>, %arg7: memref<8x128xf32, #tpu.memory_space<vmem>>, %arg8: memref<8x128xf32, #tpu.memory_space<vmem>>, %arg9: memref<8x128xf32, #tpu.memory_space<vmem>>, %arg10: memref<8x128xf32, #tpu.memory_space<vmem>>) attributes {dimension_semantics = [#tpu.dimension_semantics<parallel>, #tpu.dimension_semantics<arbitrary>], iteration_bounds = array<i64: 1, 1>, scalar_prefetch = 0 : i64, scratch_operands = 2 : i64, tpu.core_type = #tpu.core_type<tc>, window_params = [{transform_indices = @transform_0, window_bounds = array<i64: 8, 8, 512>}, {pipeline_mode = #tpu.pipeline_mode<synchronous>, transform_indices = @transform_1, window_bounds = array<i64: 8, 128>}, {pipeline_mode = #tpu.pipeline_mode<synchronous>, transform_indices = @transform_2, window_bounds = array<i64: 8, 128>}, {pipeline_mode = #tpu.pipeline_mode<synchronous>, transform_indices = @transform_3, window_bounds = array<i64: 128, 512>}, {transform_indices = @transform_4, window_bounds = array<i64: 8, 8, 128>}, {transform_indices = @transform_5, window_bounds = array<i64: 8, 128>}, {transform_indices = @transform_6, window_bounds = array<i64: 8, 128>}]} {
    %c0_i32 = arith.constant 0 : i32
    %0 = arith.cmpi eq, %arg1, %c0_i32 : i32
    %1 = arith.extui %0 : i1 to i32
    %c0_i32_0 = arith.constant 0 : i32
    %2 = arith.cmpi ne, %1, %c0_i32_0 : i32
    scf.if %2 {
      %c0_296 = arith.constant 0 : index
      %c0_297 = arith.constant 0 : index
      %394 = vector.load %arg3[%c0_296, %c0_297] : memref<8x128xf32, #tpu.memory_space<vmem>>, vector<8x128xf32>
      %c0_298 = arith.constant 0 : index
      %c0_299 = arith.constant 0 : index
      %395 = vector.load %arg9[%c0_298, %c0_299] : memref<8x128xf32, #tpu.memory_space<vmem>>, vector<8x128xf32>
      tpu.vector_store %arg9[%c0_298, %c0_299], %394 {strides = array<i32>} : memref<8x128xf32, #tpu.memory_space<vmem>>, vector<8x128xf32>,
      %c0_300 = arith.constant 0 : index
      %c0_301 = arith.constant 0 : index
      %396 = vector.load %arg4[%c0_300, %c0_301] : memref<8x128xf32, #tpu.memory_space<vmem>>, vector<8x128xf32>
      %c0_302 = arith.constant 0 : index
      %c0_303 = arith.constant 0 : index
      %397 = vector.load %arg10[%c0_302, %c0_303] : memref<8x128xf32, #tpu.memory_space<vmem>>, vector<8x128xf32>
      tpu.vector_store %arg10[%c0_302, %c0_303], %396 {strides = array<i32>} : memref<8x128xf32, #tpu.memory_space<vmem>>, vector<8x128xf32>,
    } else {
    }
    %c0 = arith.constant 0 : index
    %c0_1 = arith.constant 0 : index
    %3 = vector.load %arg9[%c0, %c0_1] : memref<8x128xf32, #tpu.memory_space<vmem>>, vector<8x128xf32>
    %c0_2 = arith.constant 0 : index
    %c0_3 = arith.constant 0 : index
    %4 = vector.load %arg10[%c0_2, %c0_3] : memref<8x128xf32, #tpu.memory_space<vmem>>, vector<8x128xf32>
    %c0_i32_4 = arith.constant 0 : i32
    %c0_i32_5 = arith.constant 0 : i32
    %c0_i32_6 = arith.constant 0 : i32
    %5 = tpu.memref_slice %arg2[%c0_i32_4, %c0_i32_5, %c0_i32_6] : memref<8x8x512xf32, #tpu.memory_space<vmem>> -> memref<1x8x512xf32, #tpu.memory_space<vmem>>
    %6 = tpu.memref_squeeze %5 : memref<1x8x512xf32, #tpu.memory_space<vmem>> -> memref<8x512xf32, #tpu.memory_space<vmem>>
    %c0_7 = arith.constant 0 : index
    %c128 = arith.constant 128 : index
    %7 = vector.load %6[%c0_7, %c128] : memref<8x512xf32, #tpu.memory_space<vmem>>, vector<8x128xf32>
    %c0_8 = arith.constant 0 : index
    %c128_9 = arith.constant 128 : index
    %8 = vector.load %arg5[%c0_8, %c128_9] : memref<128x512xf32, #tpu.memory_space<vmem>>, vector<128x128xf32>
    %cst = arith.constant dense<0.000000e+00> : vector<8x128xf32>
    %9 = tpu.matmul %3, %8, %cst {dimension_numbers = #tpu.dot_dimension_numbers<[1], [0], [0], [1], [0, 0, 1, 1], [], []>} : vector<8x128xf32>, vector<128x128xf32>, vector<8x128xf32> -> vector<8x128xf32>
    %10 = arith.addf %7, %9 : vector<8x128xf32>
    %11 = arith.negf %10 : vector<8x128xf32>
    %12 = math.exp %11 : vector<8x128xf32>
    %cst_10 = arith.constant 1.000000e+00 : f32
    %13 = vector.broadcast %cst_10 : f32 to vector<8x128xf32>
    %14 = arith.addf %13, %12 : vector<8x128xf32>
    %15 = arith.divf %13, %14 : vector<8x128xf32>
    %16 = arith.mulf %15, %4 : vector<8x128xf32>
    %c0_i32_11 = arith.constant 0 : i32
    %c0_i32_12 = arith.constant 0 : i32
    %c0_i32_13 = arith.constant 0 : i32
    %17 = tpu.memref_slice %arg2[%c0_i32_11, %c0_i32_12, %c0_i32_13] : memref<8x8x512xf32, #tpu.memory_space<vmem>> -> memref<1x8x512xf32, #tpu.memory_space<vmem>>
    %18 = tpu.memref_squeeze %17 : memref<1x8x512xf32, #tpu.memory_space<vmem>> -> memref<8x512xf32, #tpu.memory_space<vmem>>
    %c0_14 = arith.constant 0 : index
    %c0_15 = arith.constant 0 : index
    %19 = vector.load %18[%c0_14, %c0_15] : memref<8x512xf32, #tpu.memory_space<vmem>>, vector<8x128xf32>
    %c0_16 = arith.constant 0 : index
    %c0_17 = arith.constant 0 : index
    %20 = vector.load %arg5[%c0_16, %c0_17] : memref<128x512xf32, #tpu.memory_space<vmem>>, vector<128x128xf32>
    %cst_18 = arith.constant dense<0.000000e+00> : vector<8x128xf32>
    %21 = tpu.matmul %3, %20, %cst_18 {dimension_numbers = #tpu.dot_dimension_numbers<[1], [0], [0], [1], [0, 0, 1, 1], [], []>} : vector<8x128xf32>, vector<128x128xf32>, vector<8x128xf32> -> vector<8x128xf32>
    %22 = arith.addf %19, %21 : vector<8x128xf32>
    %23 = arith.negf %22 : vector<8x128xf32>
    %24 = math.exp %23 : vector<8x128xf32>
    %cst_19 = arith.constant 1.000000e+00 : f32
    %25 = vector.broadcast %cst_19 : f32 to vector<8x128xf32>
    %26 = arith.addf %25, %24 : vector<8x128xf32>
    %27 = arith.divf %25, %26 : vector<8x128xf32>
    %c0_i32_20 = arith.constant 0 : i32
    %c0_i32_21 = arith.constant 0 : i32
    %c0_i32_22 = arith.constant 0 : i32
    %28 = tpu.memref_slice %arg2[%c0_i32_20, %c0_i32_21, %c0_i32_22] : memref<8x8x512xf32, #tpu.memory_space<vmem>> -> memref<1x8x512xf32, #tpu.memory_space<vmem>>
    %29 = tpu.memref_squeeze %28 : memref<1x8x512xf32, #tpu.memory_space<vmem>> -> memref<8x512xf32, #tpu.memory_space<vmem>>
    %c0_23 = arith.constant 0 : index
    %c256 = arith.constant 256 : index
    %30 = vector.load %29[%c0_23, %c256] : memref<8x512xf32, #tpu.memory_space<vmem>>, vector<8x128xf32>
    %c0_24 = arith.constant 0 : index
    %c256_25 = arith.constant 256 : index
    %31 = vector.load %arg5[%c0_24, %c256_25] : memref<128x512xf32, #tpu.memory_space<vmem>>, vector<128x128xf32>
    %cst_26 = arith.constant dense<0.000000e+00> : vector<8x128xf32>
    %32 = tpu.matmul %3, %31, %cst_26 {dimension_numbers = #tpu.dot_dimension_numbers<[1], [0], [0], [1], [0, 0, 1, 1], [], []>} : vector<8x128xf32>, vector<128x128xf32>, vector<8x128xf32> -> vector<8x128xf32>
    %33 = arith.addf %30, %32 : vector<8x128xf32>
    %34 = math.tanh %33 : vector<8x128xf32>
    %35 = arith.mulf %27, %34 : vector<8x128xf32>
    %36 = arith.addf %16, %35 : vector<8x128xf32>
    %c0_i32_27 = arith.constant 0 : i32
    %c0_i32_28 = arith.constant 0 : i32
    %c0_i32_29 = arith.constant 0 : i32
    %37 = tpu.memref_slice %arg2[%c0_i32_27, %c0_i32_28, %c0_i32_29] : memref<8x8x512xf32, #tpu.memory_space<vmem>> -> memref<1x8x512xf32, #tpu.memory_space<vmem>>
    %38 = tpu.memref_squeeze %37 : memref<1x8x512xf32, #tpu.memory_space<vmem>> -> memref<8x512xf32, #tpu.memory_space<vmem>>
    %c0_30 = arith.constant 0 : index
    %c384 = arith.constant 384 : index
    %39 = vector.load %38[%c0_30, %c384] : memref<8x512xf32, #tpu.memory_space<vmem>>, vector<8x128xf32>
    %c0_31 = arith.constant 0 : index
    %c384_32 = arith.constant 384 : index
    %40 = vector.load %arg5[%c0_31, %c384_32] : memref<128x512xf32, #tpu.memory_space<vmem>>, vector<128x128xf32>
    %cst_33 = arith.constant dense<0.000000e+00> : vector<8x128xf32>
    %41 = tpu.matmul %3, %40, %cst_33 {dimension_numbers = #tpu.dot_dimension_numbers<[1], [0], [0], [1], [0, 0, 1, 1], [], []>} : vector<8x128xf32>, vector<128x128xf32>, vector<8x128xf32> -> vector<8x128xf32>
    %42 = arith.addf %39, %41 : vector<8x128xf32>
    %43 = arith.negf %42 : vector<8x128xf32>
    %44 = math.exp %43 : vector<8x128xf32>
    %cst_34 = arith.constant 1.000000e+00 : f32
    %45 = vector.broadcast %cst_34 : f32 to vector<8x128xf32>
    %46 = arith.addf %45, %44 : vector<8x128xf32>
    %47 = arith.divf %45, %46 : vector<8x128xf32>
    %48 = math.tanh %36 : vector<8x128xf32>
    %49 = arith.mulf %47, %48 : vector<8x128xf32>
    %c0_35 = arith.constant 0 : index
    %c0_36 = arith.constant 0 : index
    %c0_37 = arith.constant 0 : index
    %50 = vector.load %arg6[%c0_35, %c0_36, %c0_37] : memref<8x8x128xf32, #tpu.memory_space<vmem>>, vector<1x8x128xf32>
    %51 = vector.shape_cast %50 : vector<1x8x128xf32> to vector<8x128xf32>
    %52 = vector.shape_cast %49 : vector<8x128xf32> to vector<1x8x128xf32>
    tpu.vector_store %arg6[%c0_35, %c0_36, %c0_37], %52 {strides = array<i32>} : memref<8x8x128xf32, #tpu.memory_space<vmem>>, vector<1x8x128xf32>,
    %c1_i32 = arith.constant 1 : i32
    %c0_i32_38 = arith.constant 0 : i32
    %c0_i32_39 = arith.constant 0 : i32
    %53 = tpu.memref_slice %arg2[%c1_i32, %c0_i32_38, %c0_i32_39] : memref<8x8x512xf32, #tpu.memory_space<vmem>> -> memref<1x8x512xf32, #tpu.memory_space<vmem>>
    %54 = tpu.memref_squeeze %53 : memref<1x8x512xf32, #tpu.memory_space<vmem>> -> memref<8x512xf32, #tpu.memory_space<vmem>>
    %c0_40 = arith.constant 0 : index
    %c128_41 = arith.constant 128 : index
    %55 = vector.load %54[%c0_40, %c128_41] : memref<8x512xf32, #tpu.memory_space<vmem>>, vector<8x128xf32>
    %c0_42 = arith.constant 0 : index
    %c128_43 = arith.constant 128 : index
    %56 = vector.load %arg5[%c0_42, %c128_43] : memref<128x512xf32, #tpu.memory_space<vmem>>, vector<128x128xf32>
    %cst_44 = arith.constant dense<0.000000e+00> : vector<8x128xf32>
    %57 = tpu.matmul %49, %56, %cst_44 {dimension_numbers = #tpu.dot_dimension_numbers<[1], [0], [0], [1], [0, 0, 1, 1], [], []>} : vector<8x128xf32>, vector<128x128xf32>, vector<8x128xf32> -> vector<8x128xf32>
    %58 = arith.addf %55, %57 : vector<8x128xf32>
    %59 = arith.negf %58 : vector<8x128xf32>
    %60 = math.exp %59 : vector<8x128xf32>
    %cst_45 = arith.constant 1.000000e+00 : f32
    %61 = vector.broadcast %cst_45 : f32 to vector<8x128xf32>
    %62 = arith.addf %61, %60 : vector<8x128xf32>
    %63 = arith.divf %61, %62 : vector<8x128xf32>
    %64 = arith.mulf %63, %36 : vector<8x128xf32>
    %c1_i32_46 = arith.constant 1 : i32
    %c0_i32_47 = arith.constant 0 : i32
    %c0_i32_48 = arith.constant 0 : i32
    %65 = tpu.memref_slice %arg2[%c1_i32_46, %c0_i32_47, %c0_i32_48] : memref<8x8x512xf32, #tpu.memory_space<vmem>> -> memref<1x8x512xf32, #tpu.memory_space<vmem>>
    %66 = tpu.memref_squeeze %65 : memref<1x8x512xf32, #tpu.memory_space<vmem>> -> memref<8x512xf32, #tpu.memory_space<vmem>>
    %c0_49 = arith.constant 0 : index
    %c0_50 = arith.constant 0 : index
    %67 = vector.load %66[%c0_49, %c0_50] : memref<8x512xf32, #tpu.memory_space<vmem>>, vector<8x128xf32>
    %c0_51 = arith.constant 0 : index
    %c0_52 = arith.constant 0 : index
    %68 = vector.load %arg5[%c0_51, %c0_52] : memref<128x512xf32, #tpu.memory_space<vmem>>, vector<128x128xf32>
    %cst_53 = arith.constant dense<0.000000e+00> : vector<8x128xf32>
    %69 = tpu.matmul %49, %68, %cst_53 {dimension_numbers = #tpu.dot_dimension_numbers<[1], [0], [0], [1], [0, 0, 1, 1], [], []>} : vector<8x128xf32>, vector<128x128xf32>, vector<8x128xf32> -> vector<8x128xf32>
    %70 = arith.addf %67, %69 : vector<8x128xf32>
    %71 = arith.negf %70 : vector<8x128xf32>
    %72 = math.exp %71 : vector<8x128xf32>
    %cst_54 = arith.constant 1.000000e+00 : f32
    %73 = vector.broadcast %cst_54 : f32 to vector<8x128xf32>
    %74 = arith.addf %73, %72 : vector<8x128xf32>
    %75 = arith.divf %73, %74 : vector<8x128xf32>
    %c1_i32_55 = arith.constant 1 : i32
    %c0_i32_56 = arith.constant 0 : i32
    %c0_i32_57 = arith.constant 0 : i32
    %76 = tpu.memref_slice %arg2[%c1_i32_55, %c0_i32_56, %c0_i32_57] : memref<8x8x512xf32, #tpu.memory_space<vmem>> -> memref<1x8x512xf32, #tpu.memory_space<vmem>>
    %77 = tpu.memref_squeeze %76 : memref<1x8x512xf32, #tpu.memory_space<vmem>> -> memref<8x512xf32, #tpu.memory_space<vmem>>
    %c0_58 = arith.constant 0 : index
    %c256_59 = arith.constant 256 : index
    %78 = vector.load %77[%c0_58, %c256_59] : memref<8x512xf32, #tpu.memory_space<vmem>>, vector<8x128xf32>
    %c0_60 = arith.constant 0 : index
    %c256_61 = arith.constant 256 : index
    %79 = vector.load %arg5[%c0_60, %c256_61] : memref<128x512xf32, #tpu.memory_space<vmem>>, vector<128x128xf32>
    %cst_62 = arith.constant dense<0.000000e+00> : vector<8x128xf32>
    %80 = tpu.matmul %49, %79, %cst_62 {dimension_numbers = #tpu.dot_dimension_numbers<[1], [0], [0], [1], [0, 0, 1, 1], [], []>} : vector<8x128xf32>, vector<128x128xf32>, vector<8x128xf32> -> vector<8x128xf32>
    %81 = arith.addf %78, %80 : vector<8x128xf32>
    %82 = math.tanh %81 : vector<8x128xf32>
    %83 = arith.mulf %75, %82 : vector<8x128xf32>
    %84 = arith.addf %64, %83 : vector<8x128xf32>
    %c1_i32_63 = arith.constant 1 : i32
    %c0_i32_64 = arith.constant 0 : i32
    %c0_i32_65 = arith.constant 0 : i32
    %85 = tpu.memref_slice %arg2[%c1_i32_63, %c0_i32_64, %c0_i32_65] : memref<8x8x512xf32, #tpu.memory_space<vmem>> -> memref<1x8x512xf32, #tpu.memory_space<vmem>>
    %86 = tpu.memref_squeeze %85 : memref<1x8x512xf32, #tpu.memory_space<vmem>> -> memref<8x512xf32, #tpu.memory_space<vmem>>
    %c0_66 = arith.constant 0 : index
    %c384_67 = arith.constant 384 : index
    %87 = vector.load %86[%c0_66, %c384_67] : memref<8x512xf32, #tpu.memory_space<vmem>>, vector<8x128xf32>
    %c0_68 = arith.constant 0 : index
    %c384_69 = arith.constant 384 : index
    %88 = vector.load %arg5[%c0_68, %c384_69] : memref<128x512xf32, #tpu.memory_space<vmem>>, vector<128x128xf32>
    %cst_70 = arith.constant dense<0.000000e+00> : vector<8x128xf32>
    %89 = tpu.matmul %49, %88, %cst_70 {dimension_numbers = #tpu.dot_dimension_numbers<[1], [0], [0], [1], [0, 0, 1, 1], [], []>} : vector<8x128xf32>, vector<128x128xf32>, vector<8x128xf32> -> vector<8x128xf32>
    %90 = arith.addf %87, %89 : vector<8x128xf32>
    %91 = arith.negf %90 : vector<8x128xf32>
    %92 = math.exp %91 : vector<8x128xf32>
    %cst_71 = arith.constant 1.000000e+00 : f32
    %93 = vector.broadcast %cst_71 : f32 to vector<8x128xf32>
    %94 = arith.addf %93, %92 : vector<8x128xf32>
    %95 = arith.divf %93, %94 : vector<8x128xf32>
    %96 = math.tanh %84 : vector<8x128xf32>
    %97 = arith.mulf %95, %96 : vector<8x128xf32>
    %c1 = arith.constant 1 : index
    %c0_72 = arith.constant 0 : index
    %c0_73 = arith.constant 0 : index
    %98 = vector.load %arg6[%c1, %c0_72, %c0_73] : memref<8x8x128xf32, #tpu.memory_space<vmem>>, vector<1x8x128xf32>
    %99 = vector.shape_cast %98 : vector<1x8x128xf32> to vector<8x128xf32>
    %100 = vector.shape_cast %97 : vector<8x128xf32> to vector<1x8x128xf32>
    tpu.vector_store %arg6[%c1, %c0_72, %c0_73], %100 {strides = array<i32>} : memref<8x8x128xf32, #tpu.memory_space<vmem>>, vector<1x8x128xf32>,
    %c2_i32 = arith.constant 2 : i32
    %c0_i32_74 = arith.constant 0 : i32
    %c0_i32_75 = arith.constant 0 : i32
    %101 = tpu.memref_slice %arg2[%c2_i32, %c0_i32_74, %c0_i32_75] : memref<8x8x512xf32, #tpu.memory_space<vmem>> -> memref<1x8x512xf32, #tpu.memory_space<vmem>>
    %102 = tpu.memref_squeeze %101 : memref<1x8x512xf32, #tpu.memory_space<vmem>> -> memref<8x512xf32, #tpu.memory_space<vmem>>
    %c0_76 = arith.constant 0 : index
    %c128_77 = arith.constant 128 : index
    %103 = vector.load %102[%c0_76, %c128_77] : memref<8x512xf32, #tpu.memory_space<vmem>>, vector<8x128xf32>
    %c0_78 = arith.constant 0 : index
    %c128_79 = arith.constant 128 : index
    %104 = vector.load %arg5[%c0_78, %c128_79] : memref<128x512xf32, #tpu.memory_space<vmem>>, vector<128x128xf32>
    %cst_80 = arith.constant dense<0.000000e+00> : vector<8x128xf32>
    %105 = tpu.matmul %97, %104, %cst_80 {dimension_numbers = #tpu.dot_dimension_numbers<[1], [0], [0], [1], [0, 0, 1, 1], [], []>} : vector<8x128xf32>, vector<128x128xf32>, vector<8x128xf32> -> vector<8x128xf32>
    %106 = arith.addf %103, %105 : vector<8x128xf32>
    %107 = arith.negf %106 : vector<8x128xf32>
    %108 = math.exp %107 : vector<8x128xf32>
    %cst_81 = arith.constant 1.000000e+00 : f32
    %109 = vector.broadcast %cst_81 : f32 to vector<8x128xf32>
    %110 = arith.addf %109, %108 : vector<8x128xf32>
    %111 = arith.divf %109, %110 : vector<8x128xf32>
    %112 = arith.mulf %111, %84 : vector<8x128xf32>
    %c2_i32_82 = arith.constant 2 : i32
    %c0_i32_83 = arith.constant 0 : i32
    %c0_i32_84 = arith.constant 0 : i32
    %113 = tpu.memref_slice %arg2[%c2_i32_82, %c0_i32_83, %c0_i32_84] : memref<8x8x512xf32, #tpu.memory_space<vmem>> -> memref<1x8x512xf32, #tpu.memory_space<vmem>>
    %114 = tpu.memref_squeeze %113 : memref<1x8x512xf32, #tpu.memory_space<vmem>> -> memref<8x512xf32, #tpu.memory_space<vmem>>
    %c0_85 = arith.constant 0 : index
    %c0_86 = arith.constant 0 : index
    %115 = vector.load %114[%c0_85, %c0_86] : memref<8x512xf32, #tpu.memory_space<vmem>>, vector<8x128xf32>
    %c0_87 = arith.constant 0 : index
    %c0_88 = arith.constant 0 : index
    %116 = vector.load %arg5[%c0_87, %c0_88] : memref<128x512xf32, #tpu.memory_space<vmem>>, vector<128x128xf32>
    %cst_89 = arith.constant dense<0.000000e+00> : vector<8x128xf32>
    %117 = tpu.matmul %97, %116, %cst_89 {dimension_numbers = #tpu.dot_dimension_numbers<[1], [0], [0], [1], [0, 0, 1, 1], [], []>} : vector<8x128xf32>, vector<128x128xf32>, vector<8x128xf32> -> vector<8x128xf32>
    %118 = arith.addf %115, %117 : vector<8x128xf32>
    %119 = arith.negf %118 : vector<8x128xf32>
    %120 = math.exp %119 : vector<8x128xf32>
    %cst_90 = arith.constant 1.000000e+00 : f32
    %121 = vector.broadcast %cst_90 : f32 to vector<8x128xf32>
    %122 = arith.addf %121, %120 : vector<8x128xf32>
    %123 = arith.divf %121, %122 : vector<8x128xf32>
    %c2_i32_91 = arith.constant 2 : i32
    %c0_i32_92 = arith.constant 0 : i32
    %c0_i32_93 = arith.constant 0 : i32
    %124 = tpu.memref_slice %arg2[%c2_i32_91, %c0_i32_92, %c0_i32_93] : memref<8x8x512xf32, #tpu.memory_space<vmem>> -> memref<1x8x512xf32, #tpu.memory_space<vmem>>
    %125 = tpu.memref_squeeze %124 : memref<1x8x512xf32, #tpu.memory_space<vmem>> -> memref<8x512xf32, #tpu.memory_space<vmem>>
    %c0_94 = arith.constant 0 : index
    %c256_95 = arith.constant 256 : index
    %126 = vector.load %125[%c0_94, %c256_95] : memref<8x512xf32, #tpu.memory_space<vmem>>, vector<8x128xf32>
    %c0_96 = arith.constant 0 : index
    %c256_97 = arith.constant 256 : index
    %127 = vector.load %arg5[%c0_96, %c256_97] : memref<128x512xf32, #tpu.memory_space<vmem>>, vector<128x128xf32>
    %cst_98 = arith.constant dense<0.000000e+00> : vector<8x128xf32>
    %128 = tpu.matmul %97, %127, %cst_98 {dimension_numbers = #tpu.dot_dimension_numbers<[1], [0], [0], [1], [0, 0, 1, 1], [], []>} : vector<8x128xf32>, vector<128x128xf32>, vector<8x128xf32> -> vector<8x128xf32>
    %129 = arith.addf %126, %128 : vector<8x128xf32>
    %130 = math.tanh %129 : vector<8x128xf32>
    %131 = arith.mulf %123, %130 : vector<8x128xf32>
    %132 = arith.addf %112, %131 : vector<8x128xf32>
    %c2_i32_99 = arith.constant 2 : i32
    %c0_i32_100 = arith.constant 0 : i32
    %c0_i32_101 = arith.constant 0 : i32
    %133 = tpu.memref_slice %arg2[%c2_i32_99, %c0_i32_100, %c0_i32_101] : memref<8x8x512xf32, #tpu.memory_space<vmem>> -> memref<1x8x512xf32, #tpu.memory_space<vmem>>
    %134 = tpu.memref_squeeze %133 : memref<1x8x512xf32, #tpu.memory_space<vmem>> -> memref<8x512xf32, #tpu.memory_space<vmem>>
    %c0_102 = arith.constant 0 : index
    %c384_103 = arith.constant 384 : index
    %135 = vector.load %134[%c0_102, %c384_103] : memref<8x512xf32, #tpu.memory_space<vmem>>, vector<8x128xf32>
    %c0_104 = arith.constant 0 : index
    %c384_105 = arith.constant 384 : index
    %136 = vector.load %arg5[%c0_104, %c384_105] : memref<128x512xf32, #tpu.memory_space<vmem>>, vector<128x128xf32>
    %cst_106 = arith.constant dense<0.000000e+00> : vector<8x128xf32>
    %137 = tpu.matmul %97, %136, %cst_106 {dimension_numbers = #tpu.dot_dimension_numbers<[1], [0], [0], [1], [0, 0, 1, 1], [], []>} : vector<8x128xf32>, vector<128x128xf32>, vector<8x128xf32> -> vector<8x128xf32>
    %138 = arith.addf %135, %137 : vector<8x128xf32>
    %139 = arith.negf %138 : vector<8x128xf32>
    %140 = math.exp %139 : vector<8x128xf32>
    %cst_107 = arith.constant 1.000000e+00 : f32
    %141 = vector.broadcast %cst_107 : f32 to vector<8x128xf32>
    %142 = arith.addf %141, %140 : vector<8x128xf32>
    %143 = arith.divf %141, %142 : vector<8x128xf32>
    %144 = math.tanh %132 : vector<8x128xf32>
    %145 = arith.mulf %143, %144 : vector<8x128xf32>
    %c2 = arith.constant 2 : index
    %c0_108 = arith.constant 0 : index
    %c0_109 = arith.constant 0 : index
    %146 = vector.load %arg6[%c2, %c0_108, %c0_109] : memref<8x8x128xf32, #tpu.memory_space<vmem>>, vector<1x8x128xf32>
    %147 = vector.shape_cast %146 : vector<1x8x128xf32> to vector<8x128xf32>
    %148 = vector.shape_cast %145 : vector<8x128xf32> to vector<1x8x128xf32>
    tpu.vector_store %arg6[%c2, %c0_108, %c0_109], %148 {strides = array<i32>} : memref<8x8x128xf32, #tpu.memory_space<vmem>>, vector<1x8x128xf32>,
    %c3_i32 = arith.constant 3 : i32
    %c0_i32_110 = arith.constant 0 : i32
    %c0_i32_111 = arith.constant 0 : i32
    %149 = tpu.memref_slice %arg2[%c3_i32, %c0_i32_110, %c0_i32_111] : memref<8x8x512xf32, #tpu.memory_space<vmem>> -> memref<1x8x512xf32, #tpu.memory_space<vmem>>
    %150 = tpu.memref_squeeze %149 : memref<1x8x512xf32, #tpu.memory_space<vmem>> -> memref<8x512xf32, #tpu.memory_space<vmem>>
    %c0_112 = arith.constant 0 : index
    %c128_113 = arith.constant 128 : index
    %151 = vector.load %150[%c0_112, %c128_113] : memref<8x512xf32, #tpu.memory_space<vmem>>, vector<8x128xf32>
    %c0_114 = arith.constant 0 : index
    %c128_115 = arith.constant 128 : index
    %152 = vector.load %arg5[%c0_114, %c128_115] : memref<128x512xf32, #tpu.memory_space<vmem>>, vector<128x128xf32>
    %cst_116 = arith.constant dense<0.000000e+00> : vector<8x128xf32>
    %153 = tpu.matmul %145, %152, %cst_116 {dimension_numbers = #tpu.dot_dimension_numbers<[1], [0], [0], [1], [0, 0, 1, 1], [], []>} : vector<8x128xf32>, vector<128x128xf32>, vector<8x128xf32> -> vector<8x128xf32>
    %154 = arith.addf %151, %153 : vector<8x128xf32>
    %155 = arith.negf %154 : vector<8x128xf32>
    %156 = math.exp %155 : vector<8x128xf32>
    %cst_117 = arith.constant 1.000000e+00 : f32
    %157 = vector.broadcast %cst_117 : f32 to vector<8x128xf32>
    %158 = arith.addf %157, %156 : vector<8x128xf32>
    %159 = arith.divf %157, %158 : vector<8x128xf32>
    %160 = arith.mulf %159, %132 : vector<8x128xf32>
    %c3_i32_118 = arith.constant 3 : i32
    %c0_i32_119 = arith.constant 0 : i32
    %c0_i32_120 = arith.constant 0 : i32
    %161 = tpu.memref_slice %arg2[%c3_i32_118, %c0_i32_119, %c0_i32_120] : memref<8x8x512xf32, #tpu.memory_space<vmem>> -> memref<1x8x512xf32, #tpu.memory_space<vmem>>
    %162 = tpu.memref_squeeze %161 : memref<1x8x512xf32, #tpu.memory_space<vmem>> -> memref<8x512xf32, #tpu.memory_space<vmem>>
    %c0_121 = arith.constant 0 : index
    %c0_122 = arith.constant 0 : index
    %163 = vector.load %162[%c0_121, %c0_122] : memref<8x512xf32, #tpu.memory_space<vmem>>, vector<8x128xf32>
    %c0_123 = arith.constant 0 : index
    %c0_124 = arith.constant 0 : index
    %164 = vector.load %arg5[%c0_123, %c0_124] : memref<128x512xf32, #tpu.memory_space<vmem>>, vector<128x128xf32>
    %cst_125 = arith.constant dense<0.000000e+00> : vector<8x128xf32>
    %165 = tpu.matmul %145, %164, %cst_125 {dimension_numbers = #tpu.dot_dimension_numbers<[1], [0], [0], [1], [0, 0, 1, 1], [], []>} : vector<8x128xf32>, vector<128x128xf32>, vector<8x128xf32> -> vector<8x128xf32>
    %166 = arith.addf %163, %165 : vector<8x128xf32>
    %167 = arith.negf %166 : vector<8x128xf32>
    %168 = math.exp %167 : vector<8x128xf32>
    %cst_126 = arith.constant 1.000000e+00 : f32
    %169 = vector.broadcast %cst_126 : f32 to vector<8x128xf32>
    %170 = arith.addf %169, %168 : vector<8x128xf32>
    %171 = arith.divf %169, %170 : vector<8x128xf32>
    %c3_i32_127 = arith.constant 3 : i32
    %c0_i32_128 = arith.constant 0 : i32
    %c0_i32_129 = arith.constant 0 : i32
    %172 = tpu.memref_slice %arg2[%c3_i32_127, %c0_i32_128, %c0_i32_129] : memref<8x8x512xf32, #tpu.memory_space<vmem>> -> memref<1x8x512xf32, #tpu.memory_space<vmem>>
    %173 = tpu.memref_squeeze %172 : memref<1x8x512xf32, #tpu.memory_space<vmem>> -> memref<8x512xf32, #tpu.memory_space<vmem>>
    %c0_130 = arith.constant 0 : index
    %c256_131 = arith.constant 256 : index
    %174 = vector.load %173[%c0_130, %c256_131] : memref<8x512xf32, #tpu.memory_space<vmem>>, vector<8x128xf32>
    %c0_132 = arith.constant 0 : index
    %c256_133 = arith.constant 256 : index
    %175 = vector.load %arg5[%c0_132, %c256_133] : memref<128x512xf32, #tpu.memory_space<vmem>>, vector<128x128xf32>
    %cst_134 = arith.constant dense<0.000000e+00> : vector<8x128xf32>
    %176 = tpu.matmul %145, %175, %cst_134 {dimension_numbers = #tpu.dot_dimension_numbers<[1], [0], [0], [1], [0, 0, 1, 1], [], []>} : vector<8x128xf32>, vector<128x128xf32>, vector<8x128xf32> -> vector<8x128xf32>
    %177 = arith.addf %174, %176 : vector<8x128xf32>
    %178 = math.tanh %177 : vector<8x128xf32>
    %179 = arith.mulf %171, %178 : vector<8x128xf32>
    %180 = arith.addf %160, %179 : vector<8x128xf32>
    %c3_i32_135 = arith.constant 3 : i32
    %c0_i32_136 = arith.constant 0 : i32
    %c0_i32_137 = arith.constant 0 : i32
    %181 = tpu.memref_slice %arg2[%c3_i32_135, %c0_i32_136, %c0_i32_137] : memref<8x8x512xf32, #tpu.memory_space<vmem>> -> memref<1x8x512xf32, #tpu.memory_space<vmem>>
    %182 = tpu.memref_squeeze %181 : memref<1x8x512xf32, #tpu.memory_space<vmem>> -> memref<8x512xf32, #tpu.memory_space<vmem>>
    %c0_138 = arith.constant 0 : index
    %c384_139 = arith.constant 384 : index
    %183 = vector.load %182[%c0_138, %c384_139] : memref<8x512xf32, #tpu.memory_space<vmem>>, vector<8x128xf32>
    %c0_140 = arith.constant 0 : index
    %c384_141 = arith.constant 384 : index
    %184 = vector.load %arg5[%c0_140, %c384_141] : memref<128x512xf32, #tpu.memory_space<vmem>>, vector<128x128xf32>
    %cst_142 = arith.constant dense<0.000000e+00> : vector<8x128xf32>
    %185 = tpu.matmul %145, %184, %cst_142 {dimension_numbers = #tpu.dot_dimension_numbers<[1], [0], [0], [1], [0, 0, 1, 1], [], []>} : vector<8x128xf32>, vector<128x128xf32>, vector<8x128xf32> -> vector<8x128xf32>
    %186 = arith.addf %183, %185 : vector<8x128xf32>
    %187 = arith.negf %186 : vector<8x128xf32>
    %188 = math.exp %187 : vector<8x128xf32>
    %cst_143 = arith.constant 1.000000e+00 : f32
    %189 = vector.broadcast %cst_143 : f32 to vector<8x128xf32>
    %190 = arith.addf %189, %188 : vector<8x128xf32>
    %191 = arith.divf %189, %190 : vector<8x128xf32>
    %192 = math.tanh %180 : vector<8x128xf32>
    %193 = arith.mulf %191, %192 : vector<8x128xf32>
    %c3 = arith.constant 3 : index
    %c0_144 = arith.constant 0 : index
    %c0_145 = arith.constant 0 : index
    %194 = vector.load %arg6[%c3, %c0_144, %c0_145] : memref<8x8x128xf32, #tpu.memory_space<vmem>>, vector<1x8x128xf32>
    %195 = vector.shape_cast %194 : vector<1x8x128xf32> to vector<8x128xf32>
    %196 = vector.shape_cast %193 : vector<8x128xf32> to vector<1x8x128xf32>
    tpu.vector_store %arg6[%c3, %c0_144, %c0_145], %196 {strides = array<i32>} : memref<8x8x128xf32, #tpu.memory_space<vmem>>, vector<1x8x128xf32>,
    %c4_i32 = arith.constant 4 : i32
    %c0_i32_146 = arith.constant 0 : i32
    %c0_i32_147 = arith.constant 0 : i32
    %197 = tpu.memref_slice %arg2[%c4_i32, %c0_i32_146, %c0_i32_147] : memref<8x8x512xf32, #tpu.memory_space<vmem>> -> memref<1x8x512xf32, #tpu.memory_space<vmem>>
    %198 = tpu.memref_squeeze %197 : memref<1x8x512xf32, #tpu.memory_space<vmem>> -> memref<8x512xf32, #tpu.memory_space<vmem>>
    %c0_148 = arith.constant 0 : index
    %c128_149 = arith.constant 128 : index
    %199 = vector.load %198[%c0_148, %c128_149] : memref<8x512xf32, #tpu.memory_space<vmem>>, vector<8x128xf32>
    %c0_150 = arith.constant 0 : index
    %c128_151 = arith.constant 128 : index
    %200 = vector.load %arg5[%c0_150, %c128_151] : memref<128x512xf32, #tpu.memory_space<vmem>>, vector<128x128xf32>
    %cst_152 = arith.constant dense<0.000000e+00> : vector<8x128xf32>
    %201 = tpu.matmul %193, %200, %cst_152 {dimension_numbers = #tpu.dot_dimension_numbers<[1], [0], [0], [1], [0, 0, 1, 1], [], []>} : vector<8x128xf32>, vector<128x128xf32>, vector<8x128xf32> -> vector<8x128xf32>
    %202 = arith.addf %199, %201 : vector<8x128xf32>
    %203 = arith.negf %202 : vector<8x128xf32>
    %204 = math.exp %203 : vector<8x128xf32>
    %cst_153 = arith.constant 1.000000e+00 : f32
    %205 = vector.broadcast %cst_153 : f32 to vector<8x128xf32>
    %206 = arith.addf %205, %204 : vector<8x128xf32>
    %207 = arith.divf %205, %206 : vector<8x128xf32>
    %208 = arith.mulf %207, %180 : vector<8x128xf32>
    %c4_i32_154 = arith.constant 4 : i32
    %c0_i32_155 = arith.constant 0 : i32
    %c0_i32_156 = arith.constant 0 : i32
    %209 = tpu.memref_slice %arg2[%c4_i32_154, %c0_i32_155, %c0_i32_156] : memref<8x8x512xf32, #tpu.memory_space<vmem>> -> memref<1x8x512xf32, #tpu.memory_space<vmem>>
    %210 = tpu.memref_squeeze %209 : memref<1x8x512xf32, #tpu.memory_space<vmem>> -> memref<8x512xf32, #tpu.memory_space<vmem>>
    %c0_157 = arith.constant 0 : index
    %c0_158 = arith.constant 0 : index
    %211 = vector.load %210[%c0_157, %c0_158] : memref<8x512xf32, #tpu.memory_space<vmem>>, vector<8x128xf32>
    %c0_159 = arith.constant 0 : index
    %c0_160 = arith.constant 0 : index
    %212 = vector.load %arg5[%c0_159, %c0_160] : memref<128x512xf32, #tpu.memory_space<vmem>>, vector<128x128xf32>
    %cst_161 = arith.constant dense<0.000000e+00> : vector<8x128xf32>
    %213 = tpu.matmul %193, %212, %cst_161 {dimension_numbers = #tpu.dot_dimension_numbers<[1], [0], [0], [1], [0, 0, 1, 1], [], []>} : vector<8x128xf32>, vector<128x128xf32>, vector<8x128xf32> -> vector<8x128xf32>
    %214 = arith.addf %211, %213 : vector<8x128xf32>
    %215 = arith.negf %214 : vector<8x128xf32>
    %216 = math.exp %215 : vector<8x128xf32>
    %cst_162 = arith.constant 1.000000e+00 : f32
    %217 = vector.broadcast %cst_162 : f32 to vector<8x128xf32>
    %218 = arith.addf %217, %216 : vector<8x128xf32>
    %219 = arith.divf %217, %218 : vector<8x128xf32>
    %c4_i32_163 = arith.constant 4 : i32
    %c0_i32_164 = arith.constant 0 : i32
    %c0_i32_165 = arith.constant 0 : i32
    %220 = tpu.memref_slice %arg2[%c4_i32_163, %c0_i32_164, %c0_i32_165] : memref<8x8x512xf32, #tpu.memory_space<vmem>> -> memref<1x8x512xf32, #tpu.memory_space<vmem>>
    %221 = tpu.memref_squeeze %220 : memref<1x8x512xf32, #tpu.memory_space<vmem>> -> memref<8x512xf32, #tpu.memory_space<vmem>>
    %c0_166 = arith.constant 0 : index
    %c256_167 = arith.constant 256 : index
    %222 = vector.load %221[%c0_166, %c256_167] : memref<8x512xf32, #tpu.memory_space<vmem>>, vector<8x128xf32>
    %c0_168 = arith.constant 0 : index
    %c256_169 = arith.constant 256 : index
    %223 = vector.load %arg5[%c0_168, %c256_169] : memref<128x512xf32, #tpu.memory_space<vmem>>, vector<128x128xf32>
    %cst_170 = arith.constant dense<0.000000e+00> : vector<8x128xf32>
    %224 = tpu.matmul %193, %223, %cst_170 {dimension_numbers = #tpu.dot_dimension_numbers<[1], [0], [0], [1], [0, 0, 1, 1], [], []>} : vector<8x128xf32>, vector<128x128xf32>, vector<8x128xf32> -> vector<8x128xf32>
    %225 = arith.addf %222, %224 : vector<8x128xf32>
    %226 = math.tanh %225 : vector<8x128xf32>
    %227 = arith.mulf %219, %226 : vector<8x128xf32>
    %228 = arith.addf %208, %227 : vector<8x128xf32>
    %c4_i32_171 = arith.constant 4 : i32
    %c0_i32_172 = arith.constant 0 : i32
    %c0_i32_173 = arith.constant 0 : i32
    %229 = tpu.memref_slice %arg2[%c4_i32_171, %c0_i32_172, %c0_i32_173] : memref<8x8x512xf32, #tpu.memory_space<vmem>> -> memref<1x8x512xf32, #tpu.memory_space<vmem>>
    %230 = tpu.memref_squeeze %229 : memref<1x8x512xf32, #tpu.memory_space<vmem>> -> memref<8x512xf32, #tpu.memory_space<vmem>>
    %c0_174 = arith.constant 0 : index
    %c384_175 = arith.constant 384 : index
    %231 = vector.load %230[%c0_174, %c384_175] : memref<8x512xf32, #tpu.memory_space<vmem>>, vector<8x128xf32>
    %c0_176 = arith.constant 0 : index
    %c384_177 = arith.constant 384 : index
    %232 = vector.load %arg5[%c0_176, %c384_177] : memref<128x512xf32, #tpu.memory_space<vmem>>, vector<128x128xf32>
    %cst_178 = arith.constant dense<0.000000e+00> : vector<8x128xf32>
    %233 = tpu.matmul %193, %232, %cst_178 {dimension_numbers = #tpu.dot_dimension_numbers<[1], [0], [0], [1], [0, 0, 1, 1], [], []>} : vector<8x128xf32>, vector<128x128xf32>, vector<8x128xf32> -> vector<8x128xf32>
    %234 = arith.addf %231, %233 : vector<8x128xf32>
    %235 = arith.negf %234 : vector<8x128xf32>
    %236 = math.exp %235 : vector<8x128xf32>
    %cst_179 = arith.constant 1.000000e+00 : f32
    %237 = vector.broadcast %cst_179 : f32 to vector<8x128xf32>
    %238 = arith.addf %237, %236 : vector<8x128xf32>
    %239 = arith.divf %237, %238 : vector<8x128xf32>
    %240 = math.tanh %228 : vector<8x128xf32>
    %241 = arith.mulf %239, %240 : vector<8x128xf32>
    %c4 = arith.constant 4 : index
    %c0_180 = arith.constant 0 : index
    %c0_181 = arith.constant 0 : index
    %242 = vector.load %arg6[%c4, %c0_180, %c0_181] : memref<8x8x128xf32, #tpu.memory_space<vmem>>, vector<1x8x128xf32>
    %243 = vector.shape_cast %242 : vector<1x8x128xf32> to vector<8x128xf32>
    %244 = vector.shape_cast %241 : vector<8x128xf32> to vector<1x8x128xf32>
    tpu.vector_store %arg6[%c4, %c0_180, %c0_181], %244 {strides = array<i32>} : memref<8x8x128xf32, #tpu.memory_space<vmem>>, vector<1x8x128xf32>,
    %c5_i32 = arith.constant 5 : i32
    %c0_i32_182 = arith.constant 0 : i32
    %c0_i32_183 = arith.constant 0 : i32
    %245 = tpu.memref_slice %arg2[%c5_i32, %c0_i32_182, %c0_i32_183] : memref<8x8x512xf32, #tpu.memory_space<vmem>> -> memref<1x8x512xf32, #tpu.memory_space<vmem>>
    %246 = tpu.memref_squeeze %245 : memref<1x8x512xf32, #tpu.memory_space<vmem>> -> memref<8x512xf32, #tpu.memory_space<vmem>>
    %c0_184 = arith.constant 0 : index
    %c128_185 = arith.constant 128 : index
    %247 = vector.load %246[%c0_184, %c128_185] : memref<8x512xf32, #tpu.memory_space<vmem>>, vector<8x128xf32>
    %c0_186 = arith.constant 0 : index
    %c128_187 = arith.constant 128 : index
    %248 = vector.load %arg5[%c0_186, %c128_187] : memref<128x512xf32, #tpu.memory_space<vmem>>, vector<128x128xf32>
    %cst_188 = arith.constant dense<0.000000e+00> : vector<8x128xf32>
    %249 = tpu.matmul %241, %248, %cst_188 {dimension_numbers = #tpu.dot_dimension_numbers<[1], [0], [0], [1], [0, 0, 1, 1], [], []>} : vector<8x128xf32>, vector<128x128xf32>, vector<8x128xf32> -> vector<8x128xf32>
    %250 = arith.addf %247, %249 : vector<8x128xf32>
    %251 = arith.negf %250 : vector<8x128xf32>
    %252 = math.exp %251 : vector<8x128xf32>
    %cst_189 = arith.constant 1.000000e+00 : f32
    %253 = vector.broadcast %cst_189 : f32 to vector<8x128xf32>
    %254 = arith.addf %253, %252 : vector<8x128xf32>
    %255 = arith.divf %253, %254 : vector<8x128xf32>
    %256 = arith.mulf %255, %228 : vector<8x128xf32>
    %c5_i32_190 = arith.constant 5 : i32
    %c0_i32_191 = arith.constant 0 : i32
    %c0_i32_192 = arith.constant 0 : i32
    %257 = tpu.memref_slice %arg2[%c5_i32_190, %c0_i32_191, %c0_i32_192] : memref<8x8x512xf32, #tpu.memory_space<vmem>> -> memref<1x8x512xf32, #tpu.memory_space<vmem>>
    %258 = tpu.memref_squeeze %257 : memref<1x8x512xf32, #tpu.memory_space<vmem>> -> memref<8x512xf32, #tpu.memory_space<vmem>>
    %c0_193 = arith.constant 0 : index
    %c0_194 = arith.constant 0 : index
    %259 = vector.load %258[%c0_193, %c0_194] : memref<8x512xf32, #tpu.memory_space<vmem>>, vector<8x128xf32>
    %c0_195 = arith.constant 0 : index
    %c0_196 = arith.constant 0 : index
    %260 = vector.load %arg5[%c0_195, %c0_196] : memref<128x512xf32, #tpu.memory_space<vmem>>, vector<128x128xf32>
    %cst_197 = arith.constant dense<0.000000e+00> : vector<8x128xf32>
    %261 = tpu.matmul %241, %260, %cst_197 {dimension_numbers = #tpu.dot_dimension_numbers<[1], [0], [0], [1], [0, 0, 1, 1], [], []>} : vector<8x128xf32>, vector<128x128xf32>, vector<8x128xf32> -> vector<8x128xf32>
    %262 = arith.addf %259, %261 : vector<8x128xf32>
    %263 = arith.negf %262 : vector<8x128xf32>
    %264 = math.exp %263 : vector<8x128xf32>
    %cst_198 = arith.constant 1.000000e+00 : f32
    %265 = vector.broadcast %cst_198 : f32 to vector<8x128xf32>
    %266 = arith.addf %265, %264 : vector<8x128xf32>
    %267 = arith.divf %265, %266 : vector<8x128xf32>
    %c5_i32_199 = arith.constant 5 : i32
    %c0_i32_200 = arith.constant 0 : i32
    %c0_i32_201 = arith.constant 0 : i32
    %268 = tpu.memref_slice %arg2[%c5_i32_199, %c0_i32_200, %c0_i32_201] : memref<8x8x512xf32, #tpu.memory_space<vmem>> -> memref<1x8x512xf32, #tpu.memory_space<vmem>>
    %269 = tpu.memref_squeeze %268 : memref<1x8x512xf32, #tpu.memory_space<vmem>> -> memref<8x512xf32, #tpu.memory_space<vmem>>
    %c0_202 = arith.constant 0 : index
    %c256_203 = arith.constant 256 : index
    %270 = vector.load %269[%c0_202, %c256_203] : memref<8x512xf32, #tpu.memory_space<vmem>>, vector<8x128xf32>
    %c0_204 = arith.constant 0 : index
    %c256_205 = arith.constant 256 : index
    %271 = vector.load %arg5[%c0_204, %c256_205] : memref<128x512xf32, #tpu.memory_space<vmem>>, vector<128x128xf32>
    %cst_206 = arith.constant dense<0.000000e+00> : vector<8x128xf32>
    %272 = tpu.matmul %241, %271, %cst_206 {dimension_numbers = #tpu.dot_dimension_numbers<[1], [0], [0], [1], [0, 0, 1, 1], [], []>} : vector<8x128xf32>, vector<128x128xf32>, vector<8x128xf32> -> vector<8x128xf32>
    %273 = arith.addf %270, %272 : vector<8x128xf32>
    %274 = math.tanh %273 : vector<8x128xf32>
    %275 = arith.mulf %267, %274 : vector<8x128xf32>
    %276 = arith.addf %256, %275 : vector<8x128xf32>
    %c5_i32_207 = arith.constant 5 : i32
    %c0_i32_208 = arith.constant 0 : i32
    %c0_i32_209 = arith.constant 0 : i32
    %277 = tpu.memref_slice %arg2[%c5_i32_207, %c0_i32_208, %c0_i32_209] : memref<8x8x512xf32, #tpu.memory_space<vmem>> -> memref<1x8x512xf32, #tpu.memory_space<vmem>>
    %278 = tpu.memref_squeeze %277 : memref<1x8x512xf32, #tpu.memory_space<vmem>> -> memref<8x512xf32, #tpu.memory_space<vmem>>
    %c0_210 = arith.constant 0 : index
    %c384_211 = arith.constant 384 : index
    %279 = vector.load %278[%c0_210, %c384_211] : memref<8x512xf32, #tpu.memory_space<vmem>>, vector<8x128xf32>
    %c0_212 = arith.constant 0 : index
    %c384_213 = arith.constant 384 : index
    %280 = vector.load %arg5[%c0_212, %c384_213] : memref<128x512xf32, #tpu.memory_space<vmem>>, vector<128x128xf32>
    %cst_214 = arith.constant dense<0.000000e+00> : vector<8x128xf32>
    %281 = tpu.matmul %241, %280, %cst_214 {dimension_numbers = #tpu.dot_dimension_numbers<[1], [0], [0], [1], [0, 0, 1, 1], [], []>} : vector<8x128xf32>, vector<128x128xf32>, vector<8x128xf32> -> vector<8x128xf32>
    %282 = arith.addf %279, %281 : vector<8x128xf32>
    %283 = arith.negf %282 : vector<8x128xf32>
    %284 = math.exp %283 : vector<8x128xf32>
    %cst_215 = arith.constant 1.000000e+00 : f32
    %285 = vector.broadcast %cst_215 : f32 to vector<8x128xf32>
    %286 = arith.addf %285, %284 : vector<8x128xf32>
    %287 = arith.divf %285, %286 : vector<8x128xf32>
    %288 = math.tanh %276 : vector<8x128xf32>
    %289 = arith.mulf %287, %288 : vector<8x128xf32>
    %c5 = arith.constant 5 : index
    %c0_216 = arith.constant 0 : index
    %c0_217 = arith.constant 0 : index
    %290 = vector.load %arg6[%c5, %c0_216, %c0_217] : memref<8x8x128xf32, #tpu.memory_space<vmem>>, vector<1x8x128xf32>
    %291 = vector.shape_cast %290 : vector<1x8x128xf32> to vector<8x128xf32>
    %292 = vector.shape_cast %289 : vector<8x128xf32> to vector<1x8x128xf32>
    tpu.vector_store %arg6[%c5, %c0_216, %c0_217], %292 {strides = array<i32>} : memref<8x8x128xf32, #tpu.memory_space<vmem>>, vector<1x8x128xf32>,
    %c6_i32 = arith.constant 6 : i32
    %c0_i32_218 = arith.constant 0 : i32
    %c0_i32_219 = arith.constant 0 : i32
    %293 = tpu.memref_slice %arg2[%c6_i32, %c0_i32_218, %c0_i32_219] : memref<8x8x512xf32, #tpu.memory_space<vmem>> -> memref<1x8x512xf32, #tpu.memory_space<vmem>>
    %294 = tpu.memref_squeeze %293 : memref<1x8x512xf32, #tpu.memory_space<vmem>> -> memref<8x512xf32, #tpu.memory_space<vmem>>
    %c0_220 = arith.constant 0 : index
    %c128_221 = arith.constant 128 : index
    %295 = vector.load %294[%c0_220, %c128_221] : memref<8x512xf32, #tpu.memory_space<vmem>>, vector<8x128xf32>
    %c0_222 = arith.constant 0 : index
    %c128_223 = arith.constant 128 : index
    %296 = vector.load %arg5[%c0_222, %c128_223] : memref<128x512xf32, #tpu.memory_space<vmem>>, vector<128x128xf32>
    %cst_224 = arith.constant dense<0.000000e+00> : vector<8x128xf32>
    %297 = tpu.matmul %289, %296, %cst_224 {dimension_numbers = #tpu.dot_dimension_numbers<[1], [0], [0], [1], [0, 0, 1, 1], [], []>} : vector<8x128xf32>, vector<128x128xf32>, vector<8x128xf32> -> vector<8x128xf32>
    %298 = arith.addf %295, %297 : vector<8x128xf32>
    %299 = arith.negf %298 : vector<8x128xf32>
    %300 = math.exp %299 : vector<8x128xf32>
    %cst_225 = arith.constant 1.000000e+00 : f32
    %301 = vector.broadcast %cst_225 : f32 to vector<8x128xf32>
    %302 = arith.addf %301, %300 : vector<8x128xf32>
    %303 = arith.divf %301, %302 : vector<8x128xf32>
    %304 = arith.mulf %303, %276 : vector<8x128xf32>
    %c6_i32_226 = arith.constant 6 : i32
    %c0_i32_227 = arith.constant 0 : i32
    %c0_i32_228 = arith.constant 0 : i32
    %305 = tpu.memref_slice %arg2[%c6_i32_226, %c0_i32_227, %c0_i32_228] : memref<8x8x512xf32, #tpu.memory_space<vmem>> -> memref<1x8x512xf32, #tpu.memory_space<vmem>>
    %306 = tpu.memref_squeeze %305 : memref<1x8x512xf32, #tpu.memory_space<vmem>> -> memref<8x512xf32, #tpu.memory_space<vmem>>
    %c0_229 = arith.constant 0 : index
    %c0_230 = arith.constant 0 : index
    %307 = vector.load %306[%c0_229, %c0_230] : memref<8x512xf32, #tpu.memory_space<vmem>>, vector<8x128xf32>
    %c0_231 = arith.constant 0 : index
    %c0_232 = arith.constant 0 : index
    %308 = vector.load %arg5[%c0_231, %c0_232] : memref<128x512xf32, #tpu.memory_space<vmem>>, vector<128x128xf32>
    %cst_233 = arith.constant dense<0.000000e+00> : vector<8x128xf32>
    %309 = tpu.matmul %289, %308, %cst_233 {dimension_numbers = #tpu.dot_dimension_numbers<[1], [0], [0], [1], [0, 0, 1, 1], [], []>} : vector<8x128xf32>, vector<128x128xf32>, vector<8x128xf32> -> vector<8x128xf32>
    %310 = arith.addf %307, %309 : vector<8x128xf32>
    %311 = arith.negf %310 : vector<8x128xf32>
    %312 = math.exp %311 : vector<8x128xf32>
    %cst_234 = arith.constant 1.000000e+00 : f32
    %313 = vector.broadcast %cst_234 : f32 to vector<8x128xf32>
    %314 = arith.addf %313, %312 : vector<8x128xf32>
    %315 = arith.divf %313, %314 : vector<8x128xf32>
    %c6_i32_235 = arith.constant 6 : i32
    %c0_i32_236 = arith.constant 0 : i32
    %c0_i32_237 = arith.constant 0 : i32
    %316 = tpu.memref_slice %arg2[%c6_i32_235, %c0_i32_236, %c0_i32_237] : memref<8x8x512xf32, #tpu.memory_space<vmem>> -> memref<1x8x512xf32, #tpu.memory_space<vmem>>
    %317 = tpu.memref_squeeze %316 : memref<1x8x512xf32, #tpu.memory_space<vmem>> -> memref<8x512xf32, #tpu.memory_space<vmem>>
    %c0_238 = arith.constant 0 : index
    %c256_239 = arith.constant 256 : index
    %318 = vector.load %317[%c0_238, %c256_239] : memref<8x512xf32, #tpu.memory_space<vmem>>, vector<8x128xf32>
    %c0_240 = arith.constant 0 : index
    %c256_241 = arith.constant 256 : index
    %319 = vector.load %arg5[%c0_240, %c256_241] : memref<128x512xf32, #tpu.memory_space<vmem>>, vector<128x128xf32>
    %cst_242 = arith.constant dense<0.000000e+00> : vector<8x128xf32>
    %320 = tpu.matmul %289, %319, %cst_242 {dimension_numbers = #tpu.dot_dimension_numbers<[1], [0], [0], [1], [0, 0, 1, 1], [], []>} : vector<8x128xf32>, vector<128x128xf32>, vector<8x128xf32> -> vector<8x128xf32>
    %321 = arith.addf %318, %320 : vector<8x128xf32>
    %322 = math.tanh %321 : vector<8x128xf32>
    %323 = arith.mulf %315, %322 : vector<8x128xf32>
    %324 = arith.addf %304, %323 : vector<8x128xf32>
    %c6_i32_243 = arith.constant 6 : i32
    %c0_i32_244 = arith.constant 0 : i32
    %c0_i32_245 = arith.constant 0 : i32
    %325 = tpu.memref_slice %arg2[%c6_i32_243, %c0_i32_244, %c0_i32_245] : memref<8x8x512xf32, #tpu.memory_space<vmem>> -> memref<1x8x512xf32, #tpu.memory_space<vmem>>
    %326 = tpu.memref_squeeze %325 : memref<1x8x512xf32, #tpu.memory_space<vmem>> -> memref<8x512xf32, #tpu.memory_space<vmem>>
    %c0_246 = arith.constant 0 : index
    %c384_247 = arith.constant 384 : index
    %327 = vector.load %326[%c0_246, %c384_247] : memref<8x512xf32, #tpu.memory_space<vmem>>, vector<8x128xf32>
    %c0_248 = arith.constant 0 : index
    %c384_249 = arith.constant 384 : index
    %328 = vector.load %arg5[%c0_248, %c384_249] : memref<128x512xf32, #tpu.memory_space<vmem>>, vector<128x128xf32>
    %cst_250 = arith.constant dense<0.000000e+00> : vector<8x128xf32>
    %329 = tpu.matmul %289, %328, %cst_250 {dimension_numbers = #tpu.dot_dimension_numbers<[1], [0], [0], [1], [0, 0, 1, 1], [], []>} : vector<8x128xf32>, vector<128x128xf32>, vector<8x128xf32> -> vector<8x128xf32>
    %330 = arith.addf %327, %329 : vector<8x128xf32>
    %331 = arith.negf %330 : vector<8x128xf32>
    %332 = math.exp %331 : vector<8x128xf32>
    %cst_251 = arith.constant 1.000000e+00 : f32
    %333 = vector.broadcast %cst_251 : f32 to vector<8x128xf32>
    %334 = arith.addf %333, %332 : vector<8x128xf32>
    %335 = arith.divf %333, %334 : vector<8x128xf32>
    %336 = math.tanh %324 : vector<8x128xf32>
    %337 = arith.mulf %335, %336 : vector<8x128xf32>
    %c6 = arith.constant 6 : index
    %c0_252 = arith.constant 0 : index
    %c0_253 = arith.constant 0 : index
    %338 = vector.load %arg6[%c6, %c0_252, %c0_253] : memref<8x8x128xf32, #tpu.memory_space<vmem>>, vector<1x8x128xf32>
    %339 = vector.shape_cast %338 : vector<1x8x128xf32> to vector<8x128xf32>
    %340 = vector.shape_cast %337 : vector<8x128xf32> to vector<1x8x128xf32>
    tpu.vector_store %arg6[%c6, %c0_252, %c0_253], %340 {strides = array<i32>} : memref<8x8x128xf32, #tpu.memory_space<vmem>>, vector<1x8x128xf32>,
    %c7_i32 = arith.constant 7 : i32
    %c0_i32_254 = arith.constant 0 : i32
    %c0_i32_255 = arith.constant 0 : i32
    %341 = tpu.memref_slice %arg2[%c7_i32, %c0_i32_254, %c0_i32_255] : memref<8x8x512xf32, #tpu.memory_space<vmem>> -> memref<1x8x512xf32, #tpu.memory_space<vmem>>
    %342 = tpu.memref_squeeze %341 : memref<1x8x512xf32, #tpu.memory_space<vmem>> -> memref<8x512xf32, #tpu.memory_space<vmem>>
    %c0_256 = arith.constant 0 : index
    %c128_257 = arith.constant 128 : index
    %343 = vector.load %342[%c0_256, %c128_257] : memref<8x512xf32, #tpu.memory_space<vmem>>, vector<8x128xf32>
    %c0_258 = arith.constant 0 : index
    %c128_259 = arith.constant 128 : index
    %344 = vector.load %arg5[%c0_258, %c128_259] : memref<128x512xf32, #tpu.memory_space<vmem>>, vector<128x128xf32>
    %cst_260 = arith.constant dense<0.000000e+00> : vector<8x128xf32>
    %345 = tpu.matmul %337, %344, %cst_260 {dimension_numbers = #tpu.dot_dimension_numbers<[1], [0], [0], [1], [0, 0, 1, 1], [], []>} : vector<8x128xf32>, vector<128x128xf32>, vector<8x128xf32> -> vector<8x128xf32>
    %346 = arith.addf %343, %345 : vector<8x128xf32>
    %347 = arith.negf %346 : vector<8x128xf32>
    %348 = math.exp %347 : vector<8x128xf32>
    %cst_261 = arith.constant 1.000000e+00 : f32
    %349 = vector.broadcast %cst_261 : f32 to vector<8x128xf32>
    %350 = arith.addf %349, %348 : vector<8x128xf32>
    %351 = arith.divf %349, %350 : vector<8x128xf32>
    %352 = arith.mulf %351, %324 : vector<8x128xf32>
    %c7_i32_262 = arith.constant 7 : i32
    %c0_i32_263 = arith.constant 0 : i32
    %c0_i32_264 = arith.constant 0 : i32
    %353 = tpu.memref_slice %arg2[%c7_i32_262, %c0_i32_263, %c0_i32_264] : memref<8x8x512xf32, #tpu.memory_space<vmem>> -> memref<1x8x512xf32, #tpu.memory_space<vmem>>
    %354 = tpu.memref_squeeze %353 : memref<1x8x512xf32, #tpu.memory_space<vmem>> -> memref<8x512xf32, #tpu.memory_space<vmem>>
    %c0_265 = arith.constant 0 : index
    %c0_266 = arith.constant 0 : index
    %355 = vector.load %354[%c0_265, %c0_266] : memref<8x512xf32, #tpu.memory_space<vmem>>, vector<8x128xf32>
    %c0_267 = arith.constant 0 : index
    %c0_268 = arith.constant 0 : index
    %356 = vector.load %arg5[%c0_267, %c0_268] : memref<128x512xf32, #tpu.memory_space<vmem>>, vector<128x128xf32>
    %cst_269 = arith.constant dense<0.000000e+00> : vector<8x128xf32>
    %357 = tpu.matmul %337, %356, %cst_269 {dimension_numbers = #tpu.dot_dimension_numbers<[1], [0], [0], [1], [0, 0, 1, 1], [], []>} : vector<8x128xf32>, vector<128x128xf32>, vector<8x128xf32> -> vector<8x128xf32>
    %358 = arith.addf %355, %357 : vector<8x128xf32>
    %359 = arith.negf %358 : vector<8x128xf32>
    %360 = math.exp %359 : vector<8x128xf32>
    %cst_270 = arith.constant 1.000000e+00 : f32
    %361 = vector.broadcast %cst_270 : f32 to vector<8x128xf32>
    %362 = arith.addf %361, %360 : vector<8x128xf32>
    %363 = arith.divf %361, %362 : vector<8x128xf32>
    %c7_i32_271 = arith.constant 7 : i32
    %c0_i32_272 = arith.constant 0 : i32
    %c0_i32_273 = arith.constant 0 : i32
    %364 = tpu.memref_slice %arg2[%c7_i32_271, %c0_i32_272, %c0_i32_273] : memref<8x8x512xf32, #tpu.memory_space<vmem>> -> memref<1x8x512xf32, #tpu.memory_space<vmem>>
    %365 = tpu.memref_squeeze %364 : memref<1x8x512xf32, #tpu.memory_space<vmem>> -> memref<8x512xf32, #tpu.memory_space<vmem>>
    %c0_274 = arith.constant 0 : index
    %c256_275 = arith.constant 256 : index
    %366 = vector.load %365[%c0_274, %c256_275] : memref<8x512xf32, #tpu.memory_space<vmem>>, vector<8x128xf32>
    %c0_276 = arith.constant 0 : index
    %c256_277 = arith.constant 256 : index
    %367 = vector.load %arg5[%c0_276, %c256_277] : memref<128x512xf32, #tpu.memory_space<vmem>>, vector<128x128xf32>
    %cst_278 = arith.constant dense<0.000000e+00> : vector<8x128xf32>
    %368 = tpu.matmul %337, %367, %cst_278 {dimension_numbers = #tpu.dot_dimension_numbers<[1], [0], [0], [1], [0, 0, 1, 1], [], []>} : vector<8x128xf32>, vector<128x128xf32>, vector<8x128xf32> -> vector<8x128xf32>
    %369 = arith.addf %366, %368 : vector<8x128xf32>
    %370 = math.tanh %369 : vector<8x128xf32>
    %371 = arith.mulf %363, %370 : vector<8x128xf32>
    %372 = arith.addf %352, %371 : vector<8x128xf32>
    %c7_i32_279 = arith.constant 7 : i32
    %c0_i32_280 = arith.constant 0 : i32
    %c0_i32_281 = arith.constant 0 : i32
    %373 = tpu.memref_slice %arg2[%c7_i32_279, %c0_i32_280, %c0_i32_281] : memref<8x8x512xf32, #tpu.memory_space<vmem>> -> memref<1x8x512xf32, #tpu.memory_space<vmem>>
    %374 = tpu.memref_squeeze %373 : memref<1x8x512xf32, #tpu.memory_space<vmem>> -> memref<8x512xf32, #tpu.memory_space<vmem>>
    %c0_282 = arith.constant 0 : index
    %c384_283 = arith.constant 384 : index
    %375 = vector.load %374[%c0_282, %c384_283] : memref<8x512xf32, #tpu.memory_space<vmem>>, vector<8x128xf32>
    %c0_284 = arith.constant 0 : index
    %c384_285 = arith.constant 384 : index
    %376 = vector.load %arg5[%c0_284, %c384_285] : memref<128x512xf32, #tpu.memory_space<vmem>>, vector<128x128xf32>
    %cst_286 = arith.constant dense<0.000000e+00> : vector<8x128xf32>
    %377 = tpu.matmul %337, %376, %cst_286 {dimension_numbers = #tpu.dot_dimension_numbers<[1], [0], [0], [1], [0, 0, 1, 1], [], []>} : vector<8x128xf32>, vector<128x128xf32>, vector<8x128xf32> -> vector<8x128xf32>
    %378 = arith.addf %375, %377 : vector<8x128xf32>
    %379 = arith.negf %378 : vector<8x128xf32>
    %380 = math.exp %379 : vector<8x128xf32>
    %cst_287 = arith.constant 1.000000e+00 : f32
    %381 = vector.broadcast %cst_287 : f32 to vector<8x128xf32>
    %382 = arith.addf %381, %380 : vector<8x128xf32>
    %383 = arith.divf %381, %382 : vector<8x128xf32>
    %384 = math.tanh %372 : vector<8x128xf32>
    %385 = arith.mulf %383, %384 : vector<8x128xf32>
    %c7 = arith.constant 7 : index
    %c0_288 = arith.constant 0 : index
    %c0_289 = arith.constant 0 : index
    %386 = vector.load %arg6[%c7, %c0_288, %c0_289] : memref<8x8x128xf32, #tpu.memory_space<vmem>>, vector<1x8x128xf32>
    %387 = vector.shape_cast %386 : vector<1x8x128xf32> to vector<8x128xf32>
    %388 = vector.shape_cast %385 : vector<8x128xf32> to vector<1x8x128xf32>
    tpu.vector_store %arg6[%c7, %c0_288, %c0_289], %388 {strides = array<i32>} : memref<8x8x128xf32, #tpu.memory_space<vmem>>, vector<1x8x128xf32>,
    %c0_290 = arith.constant 0 : index
    %c0_291 = arith.constant 0 : index
    %389 = vector.load %arg9[%c0_290, %c0_291] : memref<8x128xf32, #tpu.memory_space<vmem>>, vector<8x128xf32>
    tpu.vector_store %arg9[%c0_290, %c0_291], %385 {strides = array<i32>} : memref<8x128xf32, #tpu.memory_space<vmem>>, vector<8x128xf32>,
    %c0_292 = arith.constant 0 : index
    %c0_293 = arith.constant 0 : index
    %390 = vector.load %arg10[%c0_292, %c0_293] : memref<8x128xf32, #tpu.memory_space<vmem>>, vector<8x128xf32>
    tpu.vector_store %arg10[%c0_292, %c0_293], %372 {strides = array<i32>} : memref<8x128xf32, #tpu.memory_space<vmem>>, vector<8x128xf32>,
    %c0_i32_294 = arith.constant 0 : i32
    %391 = arith.cmpi eq, %arg1, %c0_i32_294 : i32
    %392 = arith.extui %391 : i1 to i32
    %c0_i32_295 = arith.constant 0 : i32
    %393 = arith.cmpi ne, %392, %c0_i32_295 : i32
    scf.if %393 {
      %c0_296 = arith.constant 0 : index
      %c0_297 = arith.constant 0 : index
      %394 = vector.load %arg7[%c0_296, %c0_297] : memref<8x128xf32, #tpu.memory_space<vmem>>, vector<8x128xf32>
      tpu.vector_store %arg7[%c0_296, %c0_297], %385 {strides = array<i32>} : memref<8x128xf32, #tpu.memory_space<vmem>>, vector<8x128xf32>,
      %c0_298 = arith.constant 0 : index
      %c0_299 = arith.constant 0 : index
      %395 = vector.load %arg8[%c0_298, %c0_299] : memref<8x128xf32, #tpu.memory_space<vmem>>, vector<8x128xf32>
      tpu.vector_store %arg8[%c0_298, %c0_299], %372 {strides = array<i32>} : memref<8x128xf32, #tpu.memory_space<vmem>>, vector<8x128xf32>,
    } else {
    }
    return
  }
  func.func @transform_0(%arg0: i32, %arg1: i32) -> (i32, i32, i32) {
    %c0_i32 = arith.constant 0 : i32
    %c0_i32_0 = arith.constant 0 : i32
    return %arg1, %arg0, %c0_i32 : i32, i32, i32
  }
  func.func @transform_1(%arg0: i32, %arg1: i32) -> (i32, i32) {
    %c0_i32 = arith.constant 0 : i32
    %c0_i32_0 = arith.constant 0 : i32
    return %arg0, %c0_i32 : i32, i32
  }
  func.func @transform_2(%arg0: i32, %arg1: i32) -> (i32, i32) {
    %c0_i32 = arith.constant 0 : i32
    %c0_i32_0 = arith.constant 0 : i32
    return %arg0, %c0_i32 : i32, i32
  }
  func.func @transform_3(%arg0: i32, %arg1: i32) -> (i32, i32) {
    %c0_i32 = arith.constant 0 : i32
    %c0_i32_0 = arith.constant 0 : i32
    %c0_i32_1 = arith.constant 0 : i32
    return %c0_i32, %c0_i32_0 : i32, i32
  }
  func.func @transform_4(%arg0: i32, %arg1: i32) -> (i32, i32, i32) {
    %c0_i32 = arith.constant 0 : i32
    %c0_i32_0 = arith.constant 0 : i32
    return %arg1, %arg0, %c0_i32 : i32, i32, i32
  }
  func.func @transform_5(%arg0: i32, %arg1: i32) -> (i32, i32) {
    %c0_i32 = arith.constant 0 : i32
    %c0_i32_0 = arith.constant 0 : i32
    return %arg0, %c0_i32 : i32, i32
  }
  func.func @transform_6(%arg0: i32, %arg1: i32) -> (i32, i32) {
    %c0_i32 = arith.constant 0 : i32
    %c0_i32_0 = arith.constant 0 : i32
    return %arg0, %c0_i32 : i32, i32
  }
}

module attributes {stable_mosaic.version = 11 : i64} {
  func.func @_lstm_kernel(%arg0: i32, %arg1: i32, %arg2: memref<8x8x512xf32, #tpu.memory_space<vmem>>, %arg3: memref<8x128xf32, #tpu.memory_space<vmem>>, %arg4: memref<8x128xf32, #tpu.memory_space<vmem>>, %arg5: memref<128x512xf32, #tpu.memory_space<vmem>>, %arg6: memref<8x8x128xf32, #tpu.memory_space<vmem>>, %arg7: memref<8x128xf32, #tpu.memory_space<vmem>>, %arg8: memref<8x128xf32, #tpu.memory_space<vmem>>, %arg9: memref<8x128xf32, #tpu.memory_space<vmem>>, %arg10: memref<8x128xf32, #tpu.memory_space<vmem>>) attributes {dimension_semantics = [#tpu.dimension_semantics<parallel>, #tpu.dimension_semantics<arbitrary>], iteration_bounds = array<i64: 1, 1>, scalar_prefetch = 0 : i64, scratch_operands = 2 : i64, tpu.core_type = #tpu.core_type<tc>, window_params = [{transform_indices = @transform_0, window_bounds = array<i64: 8, 8, 512>}, {transform_indices = @transform_1, window_bounds = array<i64: 8, 128>}, {transform_indices = @transform_2, window_bounds = array<i64: 8, 128>}, {pipeline_mode = #tpu.pipeline_mode<synchronous>, transform_indices = @transform_3, window_bounds = array<i64: 128, 512>}, {transform_indices = @transform_4, window_bounds = array<i64: 8, 8, 128>}, {transform_indices = @transform_5, window_bounds = array<i64: 8, 128>}, {transform_indices = @transform_6, window_bounds = array<i64: 8, 128>}]} {
    %c0_i32 = arith.constant 0 : i32
    %0 = arith.cmpi eq, %arg1, %c0_i32 : i32
    %1 = arith.extui %0 : i1 to i32
    %c0_i32_0 = arith.constant 0 : i32
    %2 = arith.cmpi ne, %1, %c0_i32_0 : i32
    scf.if %2 {
      %c0_296 = arith.constant 0 : index
      %c0_297 = arith.constant 0 : index
      %394 = vector.load %arg3[%c0_296, %c0_297] : memref<8x128xf32, #tpu.memory_space<vmem>>, vector<8x128xf32>
      %c0_298 = arith.constant 0 : index
      %c0_299 = arith.constant 0 : index
      %395 = vector.load %arg9[%c0_298, %c0_299] : memref<8x128xf32, #tpu.memory_space<vmem>>, vector<8x128xf32>
      tpu.vector_store %arg9[%c0_298, %c0_299], %394 {strides = array<i32>} : memref<8x128xf32, #tpu.memory_space<vmem>>, vector<8x128xf32>,
      %c0_300 = arith.constant 0 : index
      %c0_301 = arith.constant 0 : index
      %396 = vector.load %arg4[%c0_300, %c0_301] : memref<8x128xf32, #tpu.memory_space<vmem>>, vector<8x128xf32>
      %c0_302 = arith.constant 0 : index
      %c0_303 = arith.constant 0 : index
      %397 = vector.load %arg10[%c0_302, %c0_303] : memref<8x128xf32, #tpu.memory_space<vmem>>, vector<8x128xf32>
      tpu.vector_store %arg10[%c0_302, %c0_303], %396 {strides = array<i32>} : memref<8x128xf32, #tpu.memory_space<vmem>>, vector<8x128xf32>,
    } else {
    }
    %c0 = arith.constant 0 : index
    %c0_1 = arith.constant 0 : index
    %3 = vector.load %arg9[%c0, %c0_1] : memref<8x128xf32, #tpu.memory_space<vmem>>, vector<8x128xf32>
    %c0_2 = arith.constant 0 : index
    %c0_3 = arith.constant 0 : index
    %4 = vector.load %arg10[%c0_2, %c0_3] : memref<8x128xf32, #tpu.memory_space<vmem>>, vector<8x128xf32>
    %c0_i32_4 = arith.constant 0 : i32
    %c0_i32_5 = arith.constant 0 : i32
    %c0_i32_6 = arith.constant 0 : i32
    %5 = tpu.memref_slice %arg2[%c0_i32_4, %c0_i32_5, %c0_i32_6] : memref<8x8x512xf32, #tpu.memory_space<vmem>> -> memref<1x8x512xf32, #tpu.memory_space<vmem>>
    %6 = tpu.memref_squeeze %5 : memref<1x8x512xf32, #tpu.memory_space<vmem>> -> memref<8x512xf32, #tpu.memory_space<vmem>>
    %c0_7 = arith.constant 0 : index
    %c128 = arith.constant 128 : index
    %7 = vector.load %6[%c0_7, %c128] : memref<8x512xf32, #tpu.memory_space<vmem>>, vector<8x128xf32>
    %c0_8 = arith.constant 0 : index
    %c128_9 = arith.constant 128 : index
    %8 = vector.load %arg5[%c0_8, %c128_9] : memref<128x512xf32, #tpu.memory_space<vmem>>, vector<128x128xf32>
    %cst = arith.constant dense<0.000000e+00> : vector<8x128xf32>
    %9 = tpu.matmul %3, %8, %cst {dimension_numbers = #tpu.dot_dimension_numbers<[1], [0], [0], [1], [0, 0, 1, 1], [], []>} : vector<8x128xf32>, vector<128x128xf32>, vector<8x128xf32> -> vector<8x128xf32>
    %10 = arith.addf %7, %9 : vector<8x128xf32>
    %11 = arith.negf %10 : vector<8x128xf32>
    %12 = math.exp %11 : vector<8x128xf32>
    %cst_10 = arith.constant 1.000000e+00 : f32
    %13 = vector.broadcast %cst_10 : f32 to vector<8x128xf32>
    %14 = arith.addf %13, %12 : vector<8x128xf32>
    %15 = arith.divf %13, %14 : vector<8x128xf32>
    %16 = arith.mulf %15, %4 : vector<8x128xf32>
    %c0_i32_11 = arith.constant 0 : i32
    %c0_i32_12 = arith.constant 0 : i32
    %c0_i32_13 = arith.constant 0 : i32
    %17 = tpu.memref_slice %arg2[%c0_i32_11, %c0_i32_12, %c0_i32_13] : memref<8x8x512xf32, #tpu.memory_space<vmem>> -> memref<1x8x512xf32, #tpu.memory_space<vmem>>
    %18 = tpu.memref_squeeze %17 : memref<1x8x512xf32, #tpu.memory_space<vmem>> -> memref<8x512xf32, #tpu.memory_space<vmem>>
    %c0_14 = arith.constant 0 : index
    %c0_15 = arith.constant 0 : index
    %19 = vector.load %18[%c0_14, %c0_15] : memref<8x512xf32, #tpu.memory_space<vmem>>, vector<8x128xf32>
    %c0_16 = arith.constant 0 : index
    %c0_17 = arith.constant 0 : index
    %20 = vector.load %arg5[%c0_16, %c0_17] : memref<128x512xf32, #tpu.memory_space<vmem>>, vector<128x128xf32>
    %cst_18 = arith.constant dense<0.000000e+00> : vector<8x128xf32>
    %21 = tpu.matmul %3, %20, %cst_18 {dimension_numbers = #tpu.dot_dimension_numbers<[1], [0], [0], [1], [0, 0, 1, 1], [], []>} : vector<8x128xf32>, vector<128x128xf32>, vector<8x128xf32> -> vector<8x128xf32>
    %22 = arith.addf %19, %21 : vector<8x128xf32>
    %23 = arith.negf %22 : vector<8x128xf32>
    %24 = math.exp %23 : vector<8x128xf32>
    %cst_19 = arith.constant 1.000000e+00 : f32
    %25 = vector.broadcast %cst_19 : f32 to vector<8x128xf32>
    %26 = arith.addf %25, %24 : vector<8x128xf32>
    %27 = arith.divf %25, %26 : vector<8x128xf32>
    %c0_i32_20 = arith.constant 0 : i32
    %c0_i32_21 = arith.constant 0 : i32
    %c0_i32_22 = arith.constant 0 : i32
    %28 = tpu.memref_slice %arg2[%c0_i32_20, %c0_i32_21, %c0_i32_22] : memref<8x8x512xf32, #tpu.memory_space<vmem>> -> memref<1x8x512xf32, #tpu.memory_space<vmem>>
    %29 = tpu.memref_squeeze %28 : memref<1x8x512xf32, #tpu.memory_space<vmem>> -> memref<8x512xf32, #tpu.memory_space<vmem>>
    %c0_23 = arith.constant 0 : index
    %c256 = arith.constant 256 : index
    %30 = vector.load %29[%c0_23, %c256] : memref<8x512xf32, #tpu.memory_space<vmem>>, vector<8x128xf32>
    %c0_24 = arith.constant 0 : index
    %c256_25 = arith.constant 256 : index
    %31 = vector.load %arg5[%c0_24, %c256_25] : memref<128x512xf32, #tpu.memory_space<vmem>>, vector<128x128xf32>
    %cst_26 = arith.constant dense<0.000000e+00> : vector<8x128xf32>
    %32 = tpu.matmul %3, %31, %cst_26 {dimension_numbers = #tpu.dot_dimension_numbers<[1], [0], [0], [1], [0, 0, 1, 1], [], []>} : vector<8x128xf32>, vector<128x128xf32>, vector<8x128xf32> -> vector<8x128xf32>
    %33 = arith.addf %30, %32 : vector<8x128xf32>
    %34 = math.tanh %33 : vector<8x128xf32>
    %35 = arith.mulf %27, %34 : vector<8x128xf32>
    %36 = arith.addf %16, %35 : vector<8x128xf32>
    %c0_i32_27 = arith.constant 0 : i32
    %c0_i32_28 = arith.constant 0 : i32
    %c0_i32_29 = arith.constant 0 : i32
    %37 = tpu.memref_slice %arg2[%c0_i32_27, %c0_i32_28, %c0_i32_29] : memref<8x8x512xf32, #tpu.memory_space<vmem>> -> memref<1x8x512xf32, #tpu.memory_space<vmem>>
    %38 = tpu.memref_squeeze %37 : memref<1x8x512xf32, #tpu.memory_space<vmem>> -> memref<8x512xf32, #tpu.memory_space<vmem>>
    %c0_30 = arith.constant 0 : index
    %c384 = arith.constant 384 : index
    %39 = vector.load %38[%c0_30, %c384] : memref<8x512xf32, #tpu.memory_space<vmem>>, vector<8x128xf32>
    %c0_31 = arith.constant 0 : index
    %c384_32 = arith.constant 384 : index
    %40 = vector.load %arg5[%c0_31, %c384_32] : memref<128x512xf32, #tpu.memory_space<vmem>>, vector<128x128xf32>
    %cst_33 = arith.constant dense<0.000000e+00> : vector<8x128xf32>
    %41 = tpu.matmul %3, %40, %cst_33 {dimension_numbers = #tpu.dot_dimension_numbers<[1], [0], [0], [1], [0, 0, 1, 1], [], []>} : vector<8x128xf32>, vector<128x128xf32>, vector<8x128xf32> -> vector<8x128xf32>
    %42 = arith.addf %39, %41 : vector<8x128xf32>
    %43 = arith.negf %42 : vector<8x128xf32>
    %44 = math.exp %43 : vector<8x128xf32>
    %cst_34 = arith.constant 1.000000e+00 : f32
    %45 = vector.broadcast %cst_34 : f32 to vector<8x128xf32>
    %46 = arith.addf %45, %44 : vector<8x128xf32>
    %47 = arith.divf %45, %46 : vector<8x128xf32>
    %48 = math.tanh %36 : vector<8x128xf32>
    %49 = arith.mulf %47, %48 : vector<8x128xf32>
    %c0_35 = arith.constant 0 : index
    %c0_36 = arith.constant 0 : index
    %c0_37 = arith.constant 0 : index
    %50 = vector.load %arg6[%c0_35, %c0_36, %c0_37] : memref<8x8x128xf32, #tpu.memory_space<vmem>>, vector<1x8x128xf32>
    %51 = vector.shape_cast %50 : vector<1x8x128xf32> to vector<8x128xf32>
    %52 = vector.shape_cast %49 : vector<8x128xf32> to vector<1x8x128xf32>
    tpu.vector_store %arg6[%c0_35, %c0_36, %c0_37], %52 {strides = array<i32>} : memref<8x8x128xf32, #tpu.memory_space<vmem>>, vector<1x8x128xf32>,
    %c1_i32 = arith.constant 1 : i32
    %c0_i32_38 = arith.constant 0 : i32
    %c0_i32_39 = arith.constant 0 : i32
    %53 = tpu.memref_slice %arg2[%c1_i32, %c0_i32_38, %c0_i32_39] : memref<8x8x512xf32, #tpu.memory_space<vmem>> -> memref<1x8x512xf32, #tpu.memory_space<vmem>>
    %54 = tpu.memref_squeeze %53 : memref<1x8x512xf32, #tpu.memory_space<vmem>> -> memref<8x512xf32, #tpu.memory_space<vmem>>
    %c0_40 = arith.constant 0 : index
    %c128_41 = arith.constant 128 : index
    %55 = vector.load %54[%c0_40, %c128_41] : memref<8x512xf32, #tpu.memory_space<vmem>>, vector<8x128xf32>
    %c0_42 = arith.constant 0 : index
    %c128_43 = arith.constant 128 : index
    %56 = vector.load %arg5[%c0_42, %c128_43] : memref<128x512xf32, #tpu.memory_space<vmem>>, vector<128x128xf32>
    %cst_44 = arith.constant dense<0.000000e+00> : vector<8x128xf32>
    %57 = tpu.matmul %49, %56, %cst_44 {dimension_numbers = #tpu.dot_dimension_numbers<[1], [0], [0], [1], [0, 0, 1, 1], [], []>} : vector<8x128xf32>, vector<128x128xf32>, vector<8x128xf32> -> vector<8x128xf32>
    %58 = arith.addf %55, %57 : vector<8x128xf32>
    %59 = arith.negf %58 : vector<8x128xf32>
    %60 = math.exp %59 : vector<8x128xf32>
    %cst_45 = arith.constant 1.000000e+00 : f32
    %61 = vector.broadcast %cst_45 : f32 to vector<8x128xf32>
    %62 = arith.addf %61, %60 : vector<8x128xf32>
    %63 = arith.divf %61, %62 : vector<8x128xf32>
    %64 = arith.mulf %63, %36 : vector<8x128xf32>
    %c1_i32_46 = arith.constant 1 : i32
    %c0_i32_47 = arith.constant 0 : i32
    %c0_i32_48 = arith.constant 0 : i32
    %65 = tpu.memref_slice %arg2[%c1_i32_46, %c0_i32_47, %c0_i32_48] : memref<8x8x512xf32, #tpu.memory_space<vmem>> -> memref<1x8x512xf32, #tpu.memory_space<vmem>>
    %66 = tpu.memref_squeeze %65 : memref<1x8x512xf32, #tpu.memory_space<vmem>> -> memref<8x512xf32, #tpu.memory_space<vmem>>
    %c0_49 = arith.constant 0 : index
    %c0_50 = arith.constant 0 : index
    %67 = vector.load %66[%c0_49, %c0_50] : memref<8x512xf32, #tpu.memory_space<vmem>>, vector<8x128xf32>
    %c0_51 = arith.constant 0 : index
    %c0_52 = arith.constant 0 : index
    %68 = vector.load %arg5[%c0_51, %c0_52] : memref<128x512xf32, #tpu.memory_space<vmem>>, vector<128x128xf32>
    %cst_53 = arith.constant dense<0.000000e+00> : vector<8x128xf32>
    %69 = tpu.matmul %49, %68, %cst_53 {dimension_numbers = #tpu.dot_dimension_numbers<[1], [0], [0], [1], [0, 0, 1, 1], [], []>} : vector<8x128xf32>, vector<128x128xf32>, vector<8x128xf32> -> vector<8x128xf32>
    %70 = arith.addf %67, %69 : vector<8x128xf32>
    %71 = arith.negf %70 : vector<8x128xf32>
    %72 = math.exp %71 : vector<8x128xf32>
    %cst_54 = arith.constant 1.000000e+00 : f32
    %73 = vector.broadcast %cst_54 : f32 to vector<8x128xf32>
    %74 = arith.addf %73, %72 : vector<8x128xf32>
    %75 = arith.divf %73, %74 : vector<8x128xf32>
    %c1_i32_55 = arith.constant 1 : i32
    %c0_i32_56 = arith.constant 0 : i32
    %c0_i32_57 = arith.constant 0 : i32
    %76 = tpu.memref_slice %arg2[%c1_i32_55, %c0_i32_56, %c0_i32_57] : memref<8x8x512xf32, #tpu.memory_space<vmem>> -> memref<1x8x512xf32, #tpu.memory_space<vmem>>
    %77 = tpu.memref_squeeze %76 : memref<1x8x512xf32, #tpu.memory_space<vmem>> -> memref<8x512xf32, #tpu.memory_space<vmem>>
    %c0_58 = arith.constant 0 : index
    %c256_59 = arith.constant 256 : index
    %78 = vector.load %77[%c0_58, %c256_59] : memref<8x512xf32, #tpu.memory_space<vmem>>, vector<8x128xf32>
    %c0_60 = arith.constant 0 : index
    %c256_61 = arith.constant 256 : index
    %79 = vector.load %arg5[%c0_60, %c256_61] : memref<128x512xf32, #tpu.memory_space<vmem>>, vector<128x128xf32>
    %cst_62 = arith.constant dense<0.000000e+00> : vector<8x128xf32>
    %80 = tpu.matmul %49, %79, %cst_62 {dimension_numbers = #tpu.dot_dimension_numbers<[1], [0], [0], [1], [0, 0, 1, 1], [], []>} : vector<8x128xf32>, vector<128x128xf32>, vector<8x128xf32> -> vector<8x128xf32>
    %81 = arith.addf %78, %80 : vector<8x128xf32>
    %82 = math.tanh %81 : vector<8x128xf32>
    %83 = arith.mulf %75, %82 : vector<8x128xf32>
    %84 = arith.addf %64, %83 : vector<8x128xf32>
    %c1_i32_63 = arith.constant 1 : i32
    %c0_i32_64 = arith.constant 0 : i32
    %c0_i32_65 = arith.constant 0 : i32
    %85 = tpu.memref_slice %arg2[%c1_i32_63, %c0_i32_64, %c0_i32_65] : memref<8x8x512xf32, #tpu.memory_space<vmem>> -> memref<1x8x512xf32, #tpu.memory_space<vmem>>
    %86 = tpu.memref_squeeze %85 : memref<1x8x512xf32, #tpu.memory_space<vmem>> -> memref<8x512xf32, #tpu.memory_space<vmem>>
    %c0_66 = arith.constant 0 : index
    %c384_67 = arith.constant 384 : index
    %87 = vector.load %86[%c0_66, %c384_67] : memref<8x512xf32, #tpu.memory_space<vmem>>, vector<8x128xf32>
    %c0_68 = arith.constant 0 : index
    %c384_69 = arith.constant 384 : index
    %88 = vector.load %arg5[%c0_68, %c384_69] : memref<128x512xf32, #tpu.memory_space<vmem>>, vector<128x128xf32>
    %cst_70 = arith.constant dense<0.000000e+00> : vector<8x128xf32>
    %89 = tpu.matmul %49, %88, %cst_70 {dimension_numbers = #tpu.dot_dimension_numbers<[1], [0], [0], [1], [0, 0, 1, 1], [], []>} : vector<8x128xf32>, vector<128x128xf32>, vector<8x128xf32> -> vector<8x128xf32>
    %90 = arith.addf %87, %89 : vector<8x128xf32>
    %91 = arith.negf %90 : vector<8x128xf32>
    %92 = math.exp %91 : vector<8x128xf32>
    %cst_71 = arith.constant 1.000000e+00 : f32
    %93 = vector.broadcast %cst_71 : f32 to vector<8x128xf32>
    %94 = arith.addf %93, %92 : vector<8x128xf32>
    %95 = arith.divf %93, %94 : vector<8x128xf32>
    %96 = math.tanh %84 : vector<8x128xf32>
    %97 = arith.mulf %95, %96 : vector<8x128xf32>
    %c1 = arith.constant 1 : index
    %c0_72 = arith.constant 0 : index
    %c0_73 = arith.constant 0 : index
    %98 = vector.load %arg6[%c1, %c0_72, %c0_73] : memref<8x8x128xf32, #tpu.memory_space<vmem>>, vector<1x8x128xf32>
    %99 = vector.shape_cast %98 : vector<1x8x128xf32> to vector<8x128xf32>
    %100 = vector.shape_cast %97 : vector<8x128xf32> to vector<1x8x128xf32>
    tpu.vector_store %arg6[%c1, %c0_72, %c0_73], %100 {strides = array<i32>} : memref<8x8x128xf32, #tpu.memory_space<vmem>>, vector<1x8x128xf32>,
    %c2_i32 = arith.constant 2 : i32
    %c0_i32_74 = arith.constant 0 : i32
    %c0_i32_75 = arith.constant 0 : i32
    %101 = tpu.memref_slice %arg2[%c2_i32, %c0_i32_74, %c0_i32_75] : memref<8x8x512xf32, #tpu.memory_space<vmem>> -> memref<1x8x512xf32, #tpu.memory_space<vmem>>
    %102 = tpu.memref_squeeze %101 : memref<1x8x512xf32, #tpu.memory_space<vmem>> -> memref<8x512xf32, #tpu.memory_space<vmem>>
    %c0_76 = arith.constant 0 : index
    %c128_77 = arith.constant 128 : index
    %103 = vector.load %102[%c0_76, %c128_77] : memref<8x512xf32, #tpu.memory_space<vmem>>, vector<8x128xf32>
    %c0_78 = arith.constant 0 : index
    %c128_79 = arith.constant 128 : index
    %104 = vector.load %arg5[%c0_78, %c128_79] : memref<128x512xf32, #tpu.memory_space<vmem>>, vector<128x128xf32>
    %cst_80 = arith.constant dense<0.000000e+00> : vector<8x128xf32>
    %105 = tpu.matmul %97, %104, %cst_80 {dimension_numbers = #tpu.dot_dimension_numbers<[1], [0], [0], [1], [0, 0, 1, 1], [], []>} : vector<8x128xf32>, vector<128x128xf32>, vector<8x128xf32> -> vector<8x128xf32>
    %106 = arith.addf %103, %105 : vector<8x128xf32>
    %107 = arith.negf %106 : vector<8x128xf32>
    %108 = math.exp %107 : vector<8x128xf32>
    %cst_81 = arith.constant 1.000000e+00 : f32
    %109 = vector.broadcast %cst_81 : f32 to vector<8x128xf32>
    %110 = arith.addf %109, %108 : vector<8x128xf32>
    %111 = arith.divf %109, %110 : vector<8x128xf32>
    %112 = arith.mulf %111, %84 : vector<8x128xf32>
    %c2_i32_82 = arith.constant 2 : i32
    %c0_i32_83 = arith.constant 0 : i32
    %c0_i32_84 = arith.constant 0 : i32
    %113 = tpu.memref_slice %arg2[%c2_i32_82, %c0_i32_83, %c0_i32_84] : memref<8x8x512xf32, #tpu.memory_space<vmem>> -> memref<1x8x512xf32, #tpu.memory_space<vmem>>
    %114 = tpu.memref_squeeze %113 : memref<1x8x512xf32, #tpu.memory_space<vmem>> -> memref<8x512xf32, #tpu.memory_space<vmem>>
    %c0_85 = arith.constant 0 : index
    %c0_86 = arith.constant 0 : index
    %115 = vector.load %114[%c0_85, %c0_86] : memref<8x512xf32, #tpu.memory_space<vmem>>, vector<8x128xf32>
    %c0_87 = arith.constant 0 : index
    %c0_88 = arith.constant 0 : index
    %116 = vector.load %arg5[%c0_87, %c0_88] : memref<128x512xf32, #tpu.memory_space<vmem>>, vector<128x128xf32>
    %cst_89 = arith.constant dense<0.000000e+00> : vector<8x128xf32>
    %117 = tpu.matmul %97, %116, %cst_89 {dimension_numbers = #tpu.dot_dimension_numbers<[1], [0], [0], [1], [0, 0, 1, 1], [], []>} : vector<8x128xf32>, vector<128x128xf32>, vector<8x128xf32> -> vector<8x128xf32>
    %118 = arith.addf %115, %117 : vector<8x128xf32>
    %119 = arith.negf %118 : vector<8x128xf32>
    %120 = math.exp %119 : vector<8x128xf32>
    %cst_90 = arith.constant 1.000000e+00 : f32
    %121 = vector.broadcast %cst_90 : f32 to vector<8x128xf32>
    %122 = arith.addf %121, %120 : vector<8x128xf32>
    %123 = arith.divf %121, %122 : vector<8x128xf32>
    %c2_i32_91 = arith.constant 2 : i32
    %c0_i32_92 = arith.constant 0 : i32
    %c0_i32_93 = arith.constant 0 : i32
    %124 = tpu.memref_slice %arg2[%c2_i32_91, %c0_i32_92, %c0_i32_93] : memref<8x8x512xf32, #tpu.memory_space<vmem>> -> memref<1x8x512xf32, #tpu.memory_space<vmem>>
    %125 = tpu.memref_squeeze %124 : memref<1x8x512xf32, #tpu.memory_space<vmem>> -> memref<8x512xf32, #tpu.memory_space<vmem>>
    %c0_94 = arith.constant 0 : index
    %c256_95 = arith.constant 256 : index
    %126 = vector.load %125[%c0_94, %c256_95] : memref<8x512xf32, #tpu.memory_space<vmem>>, vector<8x128xf32>
    %c0_96 = arith.constant 0 : index
    %c256_97 = arith.constant 256 : index
    %127 = vector.load %arg5[%c0_96, %c256_97] : memref<128x512xf32, #tpu.memory_space<vmem>>, vector<128x128xf32>
    %cst_98 = arith.constant dense<0.000000e+00> : vector<8x128xf32>
    %128 = tpu.matmul %97, %127, %cst_98 {dimension_numbers = #tpu.dot_dimension_numbers<[1], [0], [0], [1], [0, 0, 1, 1], [], []>} : vector<8x128xf32>, vector<128x128xf32>, vector<8x128xf32> -> vector<8x128xf32>
    %129 = arith.addf %126, %128 : vector<8x128xf32>
    %130 = math.tanh %129 : vector<8x128xf32>
    %131 = arith.mulf %123, %130 : vector<8x128xf32>
    %132 = arith.addf %112, %131 : vector<8x128xf32>
    %c2_i32_99 = arith.constant 2 : i32
    %c0_i32_100 = arith.constant 0 : i32
    %c0_i32_101 = arith.constant 0 : i32
    %133 = tpu.memref_slice %arg2[%c2_i32_99, %c0_i32_100, %c0_i32_101] : memref<8x8x512xf32, #tpu.memory_space<vmem>> -> memref<1x8x512xf32, #tpu.memory_space<vmem>>
    %134 = tpu.memref_squeeze %133 : memref<1x8x512xf32, #tpu.memory_space<vmem>> -> memref<8x512xf32, #tpu.memory_space<vmem>>
    %c0_102 = arith.constant 0 : index
    %c384_103 = arith.constant 384 : index
    %135 = vector.load %134[%c0_102, %c384_103] : memref<8x512xf32, #tpu.memory_space<vmem>>, vector<8x128xf32>
    %c0_104 = arith.constant 0 : index
    %c384_105 = arith.constant 384 : index
    %136 = vector.load %arg5[%c0_104, %c384_105] : memref<128x512xf32, #tpu.memory_space<vmem>>, vector<128x128xf32>
    %cst_106 = arith.constant dense<0.000000e+00> : vector<8x128xf32>
    %137 = tpu.matmul %97, %136, %cst_106 {dimension_numbers = #tpu.dot_dimension_numbers<[1], [0], [0], [1], [0, 0, 1, 1], [], []>} : vector<8x128xf32>, vector<128x128xf32>, vector<8x128xf32> -> vector<8x128xf32>
    %138 = arith.addf %135, %137 : vector<8x128xf32>
    %139 = arith.negf %138 : vector<8x128xf32>
    %140 = math.exp %139 : vector<8x128xf32>
    %cst_107 = arith.constant 1.000000e+00 : f32
    %141 = vector.broadcast %cst_107 : f32 to vector<8x128xf32>
    %142 = arith.addf %141, %140 : vector<8x128xf32>
    %143 = arith.divf %141, %142 : vector<8x128xf32>
    %144 = math.tanh %132 : vector<8x128xf32>
    %145 = arith.mulf %143, %144 : vector<8x128xf32>
    %c2 = arith.constant 2 : index
    %c0_108 = arith.constant 0 : index
    %c0_109 = arith.constant 0 : index
    %146 = vector.load %arg6[%c2, %c0_108, %c0_109] : memref<8x8x128xf32, #tpu.memory_space<vmem>>, vector<1x8x128xf32>
    %147 = vector.shape_cast %146 : vector<1x8x128xf32> to vector<8x128xf32>
    %148 = vector.shape_cast %145 : vector<8x128xf32> to vector<1x8x128xf32>
    tpu.vector_store %arg6[%c2, %c0_108, %c0_109], %148 {strides = array<i32>} : memref<8x8x128xf32, #tpu.memory_space<vmem>>, vector<1x8x128xf32>,
    %c3_i32 = arith.constant 3 : i32
    %c0_i32_110 = arith.constant 0 : i32
    %c0_i32_111 = arith.constant 0 : i32
    %149 = tpu.memref_slice %arg2[%c3_i32, %c0_i32_110, %c0_i32_111] : memref<8x8x512xf32, #tpu.memory_space<vmem>> -> memref<1x8x512xf32, #tpu.memory_space<vmem>>
    %150 = tpu.memref_squeeze %149 : memref<1x8x512xf32, #tpu.memory_space<vmem>> -> memref<8x512xf32, #tpu.memory_space<vmem>>
    %c0_112 = arith.constant 0 : index
    %c128_113 = arith.constant 128 : index
    %151 = vector.load %150[%c0_112, %c128_113] : memref<8x512xf32, #tpu.memory_space<vmem>>, vector<8x128xf32>
    %c0_114 = arith.constant 0 : index
    %c128_115 = arith.constant 128 : index
    %152 = vector.load %arg5[%c0_114, %c128_115] : memref<128x512xf32, #tpu.memory_space<vmem>>, vector<128x128xf32>
    %cst_116 = arith.constant dense<0.000000e+00> : vector<8x128xf32>
    %153 = tpu.matmul %145, %152, %cst_116 {dimension_numbers = #tpu.dot_dimension_numbers<[1], [0], [0], [1], [0, 0, 1, 1], [], []>} : vector<8x128xf32>, vector<128x128xf32>, vector<8x128xf32> -> vector<8x128xf32>
    %154 = arith.addf %151, %153 : vector<8x128xf32>
    %155 = arith.negf %154 : vector<8x128xf32>
    %156 = math.exp %155 : vector<8x128xf32>
    %cst_117 = arith.constant 1.000000e+00 : f32
    %157 = vector.broadcast %cst_117 : f32 to vector<8x128xf32>
    %158 = arith.addf %157, %156 : vector<8x128xf32>
    %159 = arith.divf %157, %158 : vector<8x128xf32>
    %160 = arith.mulf %159, %132 : vector<8x128xf32>
    %c3_i32_118 = arith.constant 3 : i32
    %c0_i32_119 = arith.constant 0 : i32
    %c0_i32_120 = arith.constant 0 : i32
    %161 = tpu.memref_slice %arg2[%c3_i32_118, %c0_i32_119, %c0_i32_120] : memref<8x8x512xf32, #tpu.memory_space<vmem>> -> memref<1x8x512xf32, #tpu.memory_space<vmem>>
    %162 = tpu.memref_squeeze %161 : memref<1x8x512xf32, #tpu.memory_space<vmem>> -> memref<8x512xf32, #tpu.memory_space<vmem>>
    %c0_121 = arith.constant 0 : index
    %c0_122 = arith.constant 0 : index
    %163 = vector.load %162[%c0_121, %c0_122] : memref<8x512xf32, #tpu.memory_space<vmem>>, vector<8x128xf32>
    %c0_123 = arith.constant 0 : index
    %c0_124 = arith.constant 0 : index
    %164 = vector.load %arg5[%c0_123, %c0_124] : memref<128x512xf32, #tpu.memory_space<vmem>>, vector<128x128xf32>
    %cst_125 = arith.constant dense<0.000000e+00> : vector<8x128xf32>
    %165 = tpu.matmul %145, %164, %cst_125 {dimension_numbers = #tpu.dot_dimension_numbers<[1], [0], [0], [1], [0, 0, 1, 1], [], []>} : vector<8x128xf32>, vector<128x128xf32>, vector<8x128xf32> -> vector<8x128xf32>
    %166 = arith.addf %163, %165 : vector<8x128xf32>
    %167 = arith.negf %166 : vector<8x128xf32>
    %168 = math.exp %167 : vector<8x128xf32>
    %cst_126 = arith.constant 1.000000e+00 : f32
    %169 = vector.broadcast %cst_126 : f32 to vector<8x128xf32>
    %170 = arith.addf %169, %168 : vector<8x128xf32>
    %171 = arith.divf %169, %170 : vector<8x128xf32>
    %c3_i32_127 = arith.constant 3 : i32
    %c0_i32_128 = arith.constant 0 : i32
    %c0_i32_129 = arith.constant 0 : i32
    %172 = tpu.memref_slice %arg2[%c3_i32_127, %c0_i32_128, %c0_i32_129] : memref<8x8x512xf32, #tpu.memory_space<vmem>> -> memref<1x8x512xf32, #tpu.memory_space<vmem>>
    %173 = tpu.memref_squeeze %172 : memref<1x8x512xf32, #tpu.memory_space<vmem>> -> memref<8x512xf32, #tpu.memory_space<vmem>>
    %c0_130 = arith.constant 0 : index
    %c256_131 = arith.constant 256 : index
    %174 = vector.load %173[%c0_130, %c256_131] : memref<8x512xf32, #tpu.memory_space<vmem>>, vector<8x128xf32>
    %c0_132 = arith.constant 0 : index
    %c256_133 = arith.constant 256 : index
    %175 = vector.load %arg5[%c0_132, %c256_133] : memref<128x512xf32, #tpu.memory_space<vmem>>, vector<128x128xf32>
    %cst_134 = arith.constant dense<0.000000e+00> : vector<8x128xf32>
    %176 = tpu.matmul %145, %175, %cst_134 {dimension_numbers = #tpu.dot_dimension_numbers<[1], [0], [0], [1], [0, 0, 1, 1], [], []>} : vector<8x128xf32>, vector<128x128xf32>, vector<8x128xf32> -> vector<8x128xf32>
    %177 = arith.addf %174, %176 : vector<8x128xf32>
    %178 = math.tanh %177 : vector<8x128xf32>
    %179 = arith.mulf %171, %178 : vector<8x128xf32>
    %180 = arith.addf %160, %179 : vector<8x128xf32>
    %c3_i32_135 = arith.constant 3 : i32
    %c0_i32_136 = arith.constant 0 : i32
    %c0_i32_137 = arith.constant 0 : i32
    %181 = tpu.memref_slice %arg2[%c3_i32_135, %c0_i32_136, %c0_i32_137] : memref<8x8x512xf32, #tpu.memory_space<vmem>> -> memref<1x8x512xf32, #tpu.memory_space<vmem>>
    %182 = tpu.memref_squeeze %181 : memref<1x8x512xf32, #tpu.memory_space<vmem>> -> memref<8x512xf32, #tpu.memory_space<vmem>>
    %c0_138 = arith.constant 0 : index
    %c384_139 = arith.constant 384 : index
    %183 = vector.load %182[%c0_138, %c384_139] : memref<8x512xf32, #tpu.memory_space<vmem>>, vector<8x128xf32>
    %c0_140 = arith.constant 0 : index
    %c384_141 = arith.constant 384 : index
    %184 = vector.load %arg5[%c0_140, %c384_141] : memref<128x512xf32, #tpu.memory_space<vmem>>, vector<128x128xf32>
    %cst_142 = arith.constant dense<0.000000e+00> : vector<8x128xf32>
    %185 = tpu.matmul %145, %184, %cst_142 {dimension_numbers = #tpu.dot_dimension_numbers<[1], [0], [0], [1], [0, 0, 1, 1], [], []>} : vector<8x128xf32>, vector<128x128xf32>, vector<8x128xf32> -> vector<8x128xf32>
    %186 = arith.addf %183, %185 : vector<8x128xf32>
    %187 = arith.negf %186 : vector<8x128xf32>
    %188 = math.exp %187 : vector<8x128xf32>
    %cst_143 = arith.constant 1.000000e+00 : f32
    %189 = vector.broadcast %cst_143 : f32 to vector<8x128xf32>
    %190 = arith.addf %189, %188 : vector<8x128xf32>
    %191 = arith.divf %189, %190 : vector<8x128xf32>
    %192 = math.tanh %180 : vector<8x128xf32>
    %193 = arith.mulf %191, %192 : vector<8x128xf32>
    %c3 = arith.constant 3 : index
    %c0_144 = arith.constant 0 : index
    %c0_145 = arith.constant 0 : index
    %194 = vector.load %arg6[%c3, %c0_144, %c0_145] : memref<8x8x128xf32, #tpu.memory_space<vmem>>, vector<1x8x128xf32>
    %195 = vector.shape_cast %194 : vector<1x8x128xf32> to vector<8x128xf32>
    %196 = vector.shape_cast %193 : vector<8x128xf32> to vector<1x8x128xf32>
    tpu.vector_store %arg6[%c3, %c0_144, %c0_145], %196 {strides = array<i32>} : memref<8x8x128xf32, #tpu.memory_space<vmem>>, vector<1x8x128xf32>,
    %c4_i32 = arith.constant 4 : i32
    %c0_i32_146 = arith.constant 0 : i32
    %c0_i32_147 = arith.constant 0 : i32
    %197 = tpu.memref_slice %arg2[%c4_i32, %c0_i32_146, %c0_i32_147] : memref<8x8x512xf32, #tpu.memory_space<vmem>> -> memref<1x8x512xf32, #tpu.memory_space<vmem>>
    %198 = tpu.memref_squeeze %197 : memref<1x8x512xf32, #tpu.memory_space<vmem>> -> memref<8x512xf32, #tpu.memory_space<vmem>>
    %c0_148 = arith.constant 0 : index
    %c128_149 = arith.constant 128 : index
    %199 = vector.load %198[%c0_148, %c128_149] : memref<8x512xf32, #tpu.memory_space<vmem>>, vector<8x128xf32>
    %c0_150 = arith.constant 0 : index
    %c128_151 = arith.constant 128 : index
    %200 = vector.load %arg5[%c0_150, %c128_151] : memref<128x512xf32, #tpu.memory_space<vmem>>, vector<128x128xf32>
    %cst_152 = arith.constant dense<0.000000e+00> : vector<8x128xf32>
    %201 = tpu.matmul %193, %200, %cst_152 {dimension_numbers = #tpu.dot_dimension_numbers<[1], [0], [0], [1], [0, 0, 1, 1], [], []>} : vector<8x128xf32>, vector<128x128xf32>, vector<8x128xf32> -> vector<8x128xf32>
    %202 = arith.addf %199, %201 : vector<8x128xf32>
    %203 = arith.negf %202 : vector<8x128xf32>
    %204 = math.exp %203 : vector<8x128xf32>
    %cst_153 = arith.constant 1.000000e+00 : f32
    %205 = vector.broadcast %cst_153 : f32 to vector<8x128xf32>
    %206 = arith.addf %205, %204 : vector<8x128xf32>
    %207 = arith.divf %205, %206 : vector<8x128xf32>
    %208 = arith.mulf %207, %180 : vector<8x128xf32>
    %c4_i32_154 = arith.constant 4 : i32
    %c0_i32_155 = arith.constant 0 : i32
    %c0_i32_156 = arith.constant 0 : i32
    %209 = tpu.memref_slice %arg2[%c4_i32_154, %c0_i32_155, %c0_i32_156] : memref<8x8x512xf32, #tpu.memory_space<vmem>> -> memref<1x8x512xf32, #tpu.memory_space<vmem>>
    %210 = tpu.memref_squeeze %209 : memref<1x8x512xf32, #tpu.memory_space<vmem>> -> memref<8x512xf32, #tpu.memory_space<vmem>>
    %c0_157 = arith.constant 0 : index
    %c0_158 = arith.constant 0 : index
    %211 = vector.load %210[%c0_157, %c0_158] : memref<8x512xf32, #tpu.memory_space<vmem>>, vector<8x128xf32>
    %c0_159 = arith.constant 0 : index
    %c0_160 = arith.constant 0 : index
    %212 = vector.load %arg5[%c0_159, %c0_160] : memref<128x512xf32, #tpu.memory_space<vmem>>, vector<128x128xf32>
    %cst_161 = arith.constant dense<0.000000e+00> : vector<8x128xf32>
    %213 = tpu.matmul %193, %212, %cst_161 {dimension_numbers = #tpu.dot_dimension_numbers<[1], [0], [0], [1], [0, 0, 1, 1], [], []>} : vector<8x128xf32>, vector<128x128xf32>, vector<8x128xf32> -> vector<8x128xf32>
    %214 = arith.addf %211, %213 : vector<8x128xf32>
    %215 = arith.negf %214 : vector<8x128xf32>
    %216 = math.exp %215 : vector<8x128xf32>
    %cst_162 = arith.constant 1.000000e+00 : f32
    %217 = vector.broadcast %cst_162 : f32 to vector<8x128xf32>
    %218 = arith.addf %217, %216 : vector<8x128xf32>
    %219 = arith.divf %217, %218 : vector<8x128xf32>
    %c4_i32_163 = arith.constant 4 : i32
    %c0_i32_164 = arith.constant 0 : i32
    %c0_i32_165 = arith.constant 0 : i32
    %220 = tpu.memref_slice %arg2[%c4_i32_163, %c0_i32_164, %c0_i32_165] : memref<8x8x512xf32, #tpu.memory_space<vmem>> -> memref<1x8x512xf32, #tpu.memory_space<vmem>>
    %221 = tpu.memref_squeeze %220 : memref<1x8x512xf32, #tpu.memory_space<vmem>> -> memref<8x512xf32, #tpu.memory_space<vmem>>
    %c0_166 = arith.constant 0 : index
    %c256_167 = arith.constant 256 : index
    %222 = vector.load %221[%c0_166, %c256_167] : memref<8x512xf32, #tpu.memory_space<vmem>>, vector<8x128xf32>
    %c0_168 = arith.constant 0 : index
    %c256_169 = arith.constant 256 : index
    %223 = vector.load %arg5[%c0_168, %c256_169] : memref<128x512xf32, #tpu.memory_space<vmem>>, vector<128x128xf32>
    %cst_170 = arith.constant dense<0.000000e+00> : vector<8x128xf32>
    %224 = tpu.matmul %193, %223, %cst_170 {dimension_numbers = #tpu.dot_dimension_numbers<[1], [0], [0], [1], [0, 0, 1, 1], [], []>} : vector<8x128xf32>, vector<128x128xf32>, vector<8x128xf32> -> vector<8x128xf32>
    %225 = arith.addf %222, %224 : vector<8x128xf32>
    %226 = math.tanh %225 : vector<8x128xf32>
    %227 = arith.mulf %219, %226 : vector<8x128xf32>
    %228 = arith.addf %208, %227 : vector<8x128xf32>
    %c4_i32_171 = arith.constant 4 : i32
    %c0_i32_172 = arith.constant 0 : i32
    %c0_i32_173 = arith.constant 0 : i32
    %229 = tpu.memref_slice %arg2[%c4_i32_171, %c0_i32_172, %c0_i32_173] : memref<8x8x512xf32, #tpu.memory_space<vmem>> -> memref<1x8x512xf32, #tpu.memory_space<vmem>>
    %230 = tpu.memref_squeeze %229 : memref<1x8x512xf32, #tpu.memory_space<vmem>> -> memref<8x512xf32, #tpu.memory_space<vmem>>
    %c0_174 = arith.constant 0 : index
    %c384_175 = arith.constant 384 : index
    %231 = vector.load %230[%c0_174, %c384_175] : memref<8x512xf32, #tpu.memory_space<vmem>>, vector<8x128xf32>
    %c0_176 = arith.constant 0 : index
    %c384_177 = arith.constant 384 : index
    %232 = vector.load %arg5[%c0_176, %c384_177] : memref<128x512xf32, #tpu.memory_space<vmem>>, vector<128x128xf32>
    %cst_178 = arith.constant dense<0.000000e+00> : vector<8x128xf32>
    %233 = tpu.matmul %193, %232, %cst_178 {dimension_numbers = #tpu.dot_dimension_numbers<[1], [0], [0], [1], [0, 0, 1, 1], [], []>} : vector<8x128xf32>, vector<128x128xf32>, vector<8x128xf32> -> vector<8x128xf32>
    %234 = arith.addf %231, %233 : vector<8x128xf32>
    %235 = arith.negf %234 : vector<8x128xf32>
    %236 = math.exp %235 : vector<8x128xf32>
    %cst_179 = arith.constant 1.000000e+00 : f32
    %237 = vector.broadcast %cst_179 : f32 to vector<8x128xf32>
    %238 = arith.addf %237, %236 : vector<8x128xf32>
    %239 = arith.divf %237, %238 : vector<8x128xf32>
    %240 = math.tanh %228 : vector<8x128xf32>
    %241 = arith.mulf %239, %240 : vector<8x128xf32>
    %c4 = arith.constant 4 : index
    %c0_180 = arith.constant 0 : index
    %c0_181 = arith.constant 0 : index
    %242 = vector.load %arg6[%c4, %c0_180, %c0_181] : memref<8x8x128xf32, #tpu.memory_space<vmem>>, vector<1x8x128xf32>
    %243 = vector.shape_cast %242 : vector<1x8x128xf32> to vector<8x128xf32>
    %244 = vector.shape_cast %241 : vector<8x128xf32> to vector<1x8x128xf32>
    tpu.vector_store %arg6[%c4, %c0_180, %c0_181], %244 {strides = array<i32>} : memref<8x8x128xf32, #tpu.memory_space<vmem>>, vector<1x8x128xf32>,
    %c5_i32 = arith.constant 5 : i32
    %c0_i32_182 = arith.constant 0 : i32
    %c0_i32_183 = arith.constant 0 : i32
    %245 = tpu.memref_slice %arg2[%c5_i32, %c0_i32_182, %c0_i32_183] : memref<8x8x512xf32, #tpu.memory_space<vmem>> -> memref<1x8x512xf32, #tpu.memory_space<vmem>>
    %246 = tpu.memref_squeeze %245 : memref<1x8x512xf32, #tpu.memory_space<vmem>> -> memref<8x512xf32, #tpu.memory_space<vmem>>
    %c0_184 = arith.constant 0 : index
    %c128_185 = arith.constant 128 : index
    %247 = vector.load %246[%c0_184, %c128_185] : memref<8x512xf32, #tpu.memory_space<vmem>>, vector<8x128xf32>
    %c0_186 = arith.constant 0 : index
    %c128_187 = arith.constant 128 : index
    %248 = vector.load %arg5[%c0_186, %c128_187] : memref<128x512xf32, #tpu.memory_space<vmem>>, vector<128x128xf32>
    %cst_188 = arith.constant dense<0.000000e+00> : vector<8x128xf32>
    %249 = tpu.matmul %241, %248, %cst_188 {dimension_numbers = #tpu.dot_dimension_numbers<[1], [0], [0], [1], [0, 0, 1, 1], [], []>} : vector<8x128xf32>, vector<128x128xf32>, vector<8x128xf32> -> vector<8x128xf32>
    %250 = arith.addf %247, %249 : vector<8x128xf32>
    %251 = arith.negf %250 : vector<8x128xf32>
    %252 = math.exp %251 : vector<8x128xf32>
    %cst_189 = arith.constant 1.000000e+00 : f32
    %253 = vector.broadcast %cst_189 : f32 to vector<8x128xf32>
    %254 = arith.addf %253, %252 : vector<8x128xf32>
    %255 = arith.divf %253, %254 : vector<8x128xf32>
    %256 = arith.mulf %255, %228 : vector<8x128xf32>
    %c5_i32_190 = arith.constant 5 : i32
    %c0_i32_191 = arith.constant 0 : i32
    %c0_i32_192 = arith.constant 0 : i32
    %257 = tpu.memref_slice %arg2[%c5_i32_190, %c0_i32_191, %c0_i32_192] : memref<8x8x512xf32, #tpu.memory_space<vmem>> -> memref<1x8x512xf32, #tpu.memory_space<vmem>>
    %258 = tpu.memref_squeeze %257 : memref<1x8x512xf32, #tpu.memory_space<vmem>> -> memref<8x512xf32, #tpu.memory_space<vmem>>
    %c0_193 = arith.constant 0 : index
    %c0_194 = arith.constant 0 : index
    %259 = vector.load %258[%c0_193, %c0_194] : memref<8x512xf32, #tpu.memory_space<vmem>>, vector<8x128xf32>
    %c0_195 = arith.constant 0 : index
    %c0_196 = arith.constant 0 : index
    %260 = vector.load %arg5[%c0_195, %c0_196] : memref<128x512xf32, #tpu.memory_space<vmem>>, vector<128x128xf32>
    %cst_197 = arith.constant dense<0.000000e+00> : vector<8x128xf32>
    %261 = tpu.matmul %241, %260, %cst_197 {dimension_numbers = #tpu.dot_dimension_numbers<[1], [0], [0], [1], [0, 0, 1, 1], [], []>} : vector<8x128xf32>, vector<128x128xf32>, vector<8x128xf32> -> vector<8x128xf32>
    %262 = arith.addf %259, %261 : vector<8x128xf32>
    %263 = arith.negf %262 : vector<8x128xf32>
    %264 = math.exp %263 : vector<8x128xf32>
    %cst_198 = arith.constant 1.000000e+00 : f32
    %265 = vector.broadcast %cst_198 : f32 to vector<8x128xf32>
    %266 = arith.addf %265, %264 : vector<8x128xf32>
    %267 = arith.divf %265, %266 : vector<8x128xf32>
    %c5_i32_199 = arith.constant 5 : i32
    %c0_i32_200 = arith.constant 0 : i32
    %c0_i32_201 = arith.constant 0 : i32
    %268 = tpu.memref_slice %arg2[%c5_i32_199, %c0_i32_200, %c0_i32_201] : memref<8x8x512xf32, #tpu.memory_space<vmem>> -> memref<1x8x512xf32, #tpu.memory_space<vmem>>
    %269 = tpu.memref_squeeze %268 : memref<1x8x512xf32, #tpu.memory_space<vmem>> -> memref<8x512xf32, #tpu.memory_space<vmem>>
    %c0_202 = arith.constant 0 : index
    %c256_203 = arith.constant 256 : index
    %270 = vector.load %269[%c0_202, %c256_203] : memref<8x512xf32, #tpu.memory_space<vmem>>, vector<8x128xf32>
    %c0_204 = arith.constant 0 : index
    %c256_205 = arith.constant 256 : index
    %271 = vector.load %arg5[%c0_204, %c256_205] : memref<128x512xf32, #tpu.memory_space<vmem>>, vector<128x128xf32>
    %cst_206 = arith.constant dense<0.000000e+00> : vector<8x128xf32>
    %272 = tpu.matmul %241, %271, %cst_206 {dimension_numbers = #tpu.dot_dimension_numbers<[1], [0], [0], [1], [0, 0, 1, 1], [], []>} : vector<8x128xf32>, vector<128x128xf32>, vector<8x128xf32> -> vector<8x128xf32>
    %273 = arith.addf %270, %272 : vector<8x128xf32>
    %274 = math.tanh %273 : vector<8x128xf32>
    %275 = arith.mulf %267, %274 : vector<8x128xf32>
    %276 = arith.addf %256, %275 : vector<8x128xf32>
    %c5_i32_207 = arith.constant 5 : i32
    %c0_i32_208 = arith.constant 0 : i32
    %c0_i32_209 = arith.constant 0 : i32
    %277 = tpu.memref_slice %arg2[%c5_i32_207, %c0_i32_208, %c0_i32_209] : memref<8x8x512xf32, #tpu.memory_space<vmem>> -> memref<1x8x512xf32, #tpu.memory_space<vmem>>
    %278 = tpu.memref_squeeze %277 : memref<1x8x512xf32, #tpu.memory_space<vmem>> -> memref<8x512xf32, #tpu.memory_space<vmem>>
    %c0_210 = arith.constant 0 : index
    %c384_211 = arith.constant 384 : index
    %279 = vector.load %278[%c0_210, %c384_211] : memref<8x512xf32, #tpu.memory_space<vmem>>, vector<8x128xf32>
    %c0_212 = arith.constant 0 : index
    %c384_213 = arith.constant 384 : index
    %280 = vector.load %arg5[%c0_212, %c384_213] : memref<128x512xf32, #tpu.memory_space<vmem>>, vector<128x128xf32>
    %cst_214 = arith.constant dense<0.000000e+00> : vector<8x128xf32>
    %281 = tpu.matmul %241, %280, %cst_214 {dimension_numbers = #tpu.dot_dimension_numbers<[1], [0], [0], [1], [0, 0, 1, 1], [], []>} : vector<8x128xf32>, vector<128x128xf32>, vector<8x128xf32> -> vector<8x128xf32>
    %282 = arith.addf %279, %281 : vector<8x128xf32>
    %283 = arith.negf %282 : vector<8x128xf32>
    %284 = math.exp %283 : vector<8x128xf32>
    %cst_215 = arith.constant 1.000000e+00 : f32
    %285 = vector.broadcast %cst_215 : f32 to vector<8x128xf32>
    %286 = arith.addf %285, %284 : vector<8x128xf32>
    %287 = arith.divf %285, %286 : vector<8x128xf32>
    %288 = math.tanh %276 : vector<8x128xf32>
    %289 = arith.mulf %287, %288 : vector<8x128xf32>
    %c5 = arith.constant 5 : index
    %c0_216 = arith.constant 0 : index
    %c0_217 = arith.constant 0 : index
    %290 = vector.load %arg6[%c5, %c0_216, %c0_217] : memref<8x8x128xf32, #tpu.memory_space<vmem>>, vector<1x8x128xf32>
    %291 = vector.shape_cast %290 : vector<1x8x128xf32> to vector<8x128xf32>
    %292 = vector.shape_cast %289 : vector<8x128xf32> to vector<1x8x128xf32>
    tpu.vector_store %arg6[%c5, %c0_216, %c0_217], %292 {strides = array<i32>} : memref<8x8x128xf32, #tpu.memory_space<vmem>>, vector<1x8x128xf32>,
    %c6_i32 = arith.constant 6 : i32
    %c0_i32_218 = arith.constant 0 : i32
    %c0_i32_219 = arith.constant 0 : i32
    %293 = tpu.memref_slice %arg2[%c6_i32, %c0_i32_218, %c0_i32_219] : memref<8x8x512xf32, #tpu.memory_space<vmem>> -> memref<1x8x512xf32, #tpu.memory_space<vmem>>
    %294 = tpu.memref_squeeze %293 : memref<1x8x512xf32, #tpu.memory_space<vmem>> -> memref<8x512xf32, #tpu.memory_space<vmem>>
    %c0_220 = arith.constant 0 : index
    %c128_221 = arith.constant 128 : index
    %295 = vector.load %294[%c0_220, %c128_221] : memref<8x512xf32, #tpu.memory_space<vmem>>, vector<8x128xf32>
    %c0_222 = arith.constant 0 : index
    %c128_223 = arith.constant 128 : index
    %296 = vector.load %arg5[%c0_222, %c128_223] : memref<128x512xf32, #tpu.memory_space<vmem>>, vector<128x128xf32>
    %cst_224 = arith.constant dense<0.000000e+00> : vector<8x128xf32>
    %297 = tpu.matmul %289, %296, %cst_224 {dimension_numbers = #tpu.dot_dimension_numbers<[1], [0], [0], [1], [0, 0, 1, 1], [], []>} : vector<8x128xf32>, vector<128x128xf32>, vector<8x128xf32> -> vector<8x128xf32>
    %298 = arith.addf %295, %297 : vector<8x128xf32>
    %299 = arith.negf %298 : vector<8x128xf32>
    %300 = math.exp %299 : vector<8x128xf32>
    %cst_225 = arith.constant 1.000000e+00 : f32
    %301 = vector.broadcast %cst_225 : f32 to vector<8x128xf32>
    %302 = arith.addf %301, %300 : vector<8x128xf32>
    %303 = arith.divf %301, %302 : vector<8x128xf32>
    %304 = arith.mulf %303, %276 : vector<8x128xf32>
    %c6_i32_226 = arith.constant 6 : i32
    %c0_i32_227 = arith.constant 0 : i32
    %c0_i32_228 = arith.constant 0 : i32
    %305 = tpu.memref_slice %arg2[%c6_i32_226, %c0_i32_227, %c0_i32_228] : memref<8x8x512xf32, #tpu.memory_space<vmem>> -> memref<1x8x512xf32, #tpu.memory_space<vmem>>
    %306 = tpu.memref_squeeze %305 : memref<1x8x512xf32, #tpu.memory_space<vmem>> -> memref<8x512xf32, #tpu.memory_space<vmem>>
    %c0_229 = arith.constant 0 : index
    %c0_230 = arith.constant 0 : index
    %307 = vector.load %306[%c0_229, %c0_230] : memref<8x512xf32, #tpu.memory_space<vmem>>, vector<8x128xf32>
    %c0_231 = arith.constant 0 : index
    %c0_232 = arith.constant 0 : index
    %308 = vector.load %arg5[%c0_231, %c0_232] : memref<128x512xf32, #tpu.memory_space<vmem>>, vector<128x128xf32>
    %cst_233 = arith.constant dense<0.000000e+00> : vector<8x128xf32>
    %309 = tpu.matmul %289, %308, %cst_233 {dimension_numbers = #tpu.dot_dimension_numbers<[1], [0], [0], [1], [0, 0, 1, 1], [], []>} : vector<8x128xf32>, vector<128x128xf32>, vector<8x128xf32> -> vector<8x128xf32>
    %310 = arith.addf %307, %309 : vector<8x128xf32>
    %311 = arith.negf %310 : vector<8x128xf32>
    %312 = math.exp %311 : vector<8x128xf32>
    %cst_234 = arith.constant 1.000000e+00 : f32
    %313 = vector.broadcast %cst_234 : f32 to vector<8x128xf32>
    %314 = arith.addf %313, %312 : vector<8x128xf32>
    %315 = arith.divf %313, %314 : vector<8x128xf32>
    %c6_i32_235 = arith.constant 6 : i32
    %c0_i32_236 = arith.constant 0 : i32
    %c0_i32_237 = arith.constant 0 : i32
    %316 = tpu.memref_slice %arg2[%c6_i32_235, %c0_i32_236, %c0_i32_237] : memref<8x8x512xf32, #tpu.memory_space<vmem>> -> memref<1x8x512xf32, #tpu.memory_space<vmem>>
    %317 = tpu.memref_squeeze %316 : memref<1x8x512xf32, #tpu.memory_space<vmem>> -> memref<8x512xf32, #tpu.memory_space<vmem>>
    %c0_238 = arith.constant 0 : index
    %c256_239 = arith.constant 256 : index
    %318 = vector.load %317[%c0_238, %c256_239] : memref<8x512xf32, #tpu.memory_space<vmem>>, vector<8x128xf32>
    %c0_240 = arith.constant 0 : index
    %c256_241 = arith.constant 256 : index
    %319 = vector.load %arg5[%c0_240, %c256_241] : memref<128x512xf32, #tpu.memory_space<vmem>>, vector<128x128xf32>
    %cst_242 = arith.constant dense<0.000000e+00> : vector<8x128xf32>
    %320 = tpu.matmul %289, %319, %cst_242 {dimension_numbers = #tpu.dot_dimension_numbers<[1], [0], [0], [1], [0, 0, 1, 1], [], []>} : vector<8x128xf32>, vector<128x128xf32>, vector<8x128xf32> -> vector<8x128xf32>
    %321 = arith.addf %318, %320 : vector<8x128xf32>
    %322 = math.tanh %321 : vector<8x128xf32>
    %323 = arith.mulf %315, %322 : vector<8x128xf32>
    %324 = arith.addf %304, %323 : vector<8x128xf32>
    %c6_i32_243 = arith.constant 6 : i32
    %c0_i32_244 = arith.constant 0 : i32
    %c0_i32_245 = arith.constant 0 : i32
    %325 = tpu.memref_slice %arg2[%c6_i32_243, %c0_i32_244, %c0_i32_245] : memref<8x8x512xf32, #tpu.memory_space<vmem>> -> memref<1x8x512xf32, #tpu.memory_space<vmem>>
    %326 = tpu.memref_squeeze %325 : memref<1x8x512xf32, #tpu.memory_space<vmem>> -> memref<8x512xf32, #tpu.memory_space<vmem>>
    %c0_246 = arith.constant 0 : index
    %c384_247 = arith.constant 384 : index
    %327 = vector.load %326[%c0_246, %c384_247] : memref<8x512xf32, #tpu.memory_space<vmem>>, vector<8x128xf32>
    %c0_248 = arith.constant 0 : index
    %c384_249 = arith.constant 384 : index
    %328 = vector.load %arg5[%c0_248, %c384_249] : memref<128x512xf32, #tpu.memory_space<vmem>>, vector<128x128xf32>
    %cst_250 = arith.constant dense<0.000000e+00> : vector<8x128xf32>
    %329 = tpu.matmul %289, %328, %cst_250 {dimension_numbers = #tpu.dot_dimension_numbers<[1], [0], [0], [1], [0, 0, 1, 1], [], []>} : vector<8x128xf32>, vector<128x128xf32>, vector<8x128xf32> -> vector<8x128xf32>
    %330 = arith.addf %327, %329 : vector<8x128xf32>
    %331 = arith.negf %330 : vector<8x128xf32>
    %332 = math.exp %331 : vector<8x128xf32>
    %cst_251 = arith.constant 1.000000e+00 : f32
    %333 = vector.broadcast %cst_251 : f32 to vector<8x128xf32>
    %334 = arith.addf %333, %332 : vector<8x128xf32>
    %335 = arith.divf %333, %334 : vector<8x128xf32>
    %336 = math.tanh %324 : vector<8x128xf32>
    %337 = arith.mulf %335, %336 : vector<8x128xf32>
    %c6 = arith.constant 6 : index
    %c0_252 = arith.constant 0 : index
    %c0_253 = arith.constant 0 : index
    %338 = vector.load %arg6[%c6, %c0_252, %c0_253] : memref<8x8x128xf32, #tpu.memory_space<vmem>>, vector<1x8x128xf32>
    %339 = vector.shape_cast %338 : vector<1x8x128xf32> to vector<8x128xf32>
    %340 = vector.shape_cast %337 : vector<8x128xf32> to vector<1x8x128xf32>
    tpu.vector_store %arg6[%c6, %c0_252, %c0_253], %340 {strides = array<i32>} : memref<8x8x128xf32, #tpu.memory_space<vmem>>, vector<1x8x128xf32>,
    %c7_i32 = arith.constant 7 : i32
    %c0_i32_254 = arith.constant 0 : i32
    %c0_i32_255 = arith.constant 0 : i32
    %341 = tpu.memref_slice %arg2[%c7_i32, %c0_i32_254, %c0_i32_255] : memref<8x8x512xf32, #tpu.memory_space<vmem>> -> memref<1x8x512xf32, #tpu.memory_space<vmem>>
    %342 = tpu.memref_squeeze %341 : memref<1x8x512xf32, #tpu.memory_space<vmem>> -> memref<8x512xf32, #tpu.memory_space<vmem>>
    %c0_256 = arith.constant 0 : index
    %c128_257 = arith.constant 128 : index
    %343 = vector.load %342[%c0_256, %c128_257] : memref<8x512xf32, #tpu.memory_space<vmem>>, vector<8x128xf32>
    %c0_258 = arith.constant 0 : index
    %c128_259 = arith.constant 128 : index
    %344 = vector.load %arg5[%c0_258, %c128_259] : memref<128x512xf32, #tpu.memory_space<vmem>>, vector<128x128xf32>
    %cst_260 = arith.constant dense<0.000000e+00> : vector<8x128xf32>
    %345 = tpu.matmul %337, %344, %cst_260 {dimension_numbers = #tpu.dot_dimension_numbers<[1], [0], [0], [1], [0, 0, 1, 1], [], []>} : vector<8x128xf32>, vector<128x128xf32>, vector<8x128xf32> -> vector<8x128xf32>
    %346 = arith.addf %343, %345 : vector<8x128xf32>
    %347 = arith.negf %346 : vector<8x128xf32>
    %348 = math.exp %347 : vector<8x128xf32>
    %cst_261 = arith.constant 1.000000e+00 : f32
    %349 = vector.broadcast %cst_261 : f32 to vector<8x128xf32>
    %350 = arith.addf %349, %348 : vector<8x128xf32>
    %351 = arith.divf %349, %350 : vector<8x128xf32>
    %352 = arith.mulf %351, %324 : vector<8x128xf32>
    %c7_i32_262 = arith.constant 7 : i32
    %c0_i32_263 = arith.constant 0 : i32
    %c0_i32_264 = arith.constant 0 : i32
    %353 = tpu.memref_slice %arg2[%c7_i32_262, %c0_i32_263, %c0_i32_264] : memref<8x8x512xf32, #tpu.memory_space<vmem>> -> memref<1x8x512xf32, #tpu.memory_space<vmem>>
    %354 = tpu.memref_squeeze %353 : memref<1x8x512xf32, #tpu.memory_space<vmem>> -> memref<8x512xf32, #tpu.memory_space<vmem>>
    %c0_265 = arith.constant 0 : index
    %c0_266 = arith.constant 0 : index
    %355 = vector.load %354[%c0_265, %c0_266] : memref<8x512xf32, #tpu.memory_space<vmem>>, vector<8x128xf32>
    %c0_267 = arith.constant 0 : index
    %c0_268 = arith.constant 0 : index
    %356 = vector.load %arg5[%c0_267, %c0_268] : memref<128x512xf32, #tpu.memory_space<vmem>>, vector<128x128xf32>
    %cst_269 = arith.constant dense<0.000000e+00> : vector<8x128xf32>
    %357 = tpu.matmul %337, %356, %cst_269 {dimension_numbers = #tpu.dot_dimension_numbers<[1], [0], [0], [1], [0, 0, 1, 1], [], []>} : vector<8x128xf32>, vector<128x128xf32>, vector<8x128xf32> -> vector<8x128xf32>
    %358 = arith.addf %355, %357 : vector<8x128xf32>
    %359 = arith.negf %358 : vector<8x128xf32>
    %360 = math.exp %359 : vector<8x128xf32>
    %cst_270 = arith.constant 1.000000e+00 : f32
    %361 = vector.broadcast %cst_270 : f32 to vector<8x128xf32>
    %362 = arith.addf %361, %360 : vector<8x128xf32>
    %363 = arith.divf %361, %362 : vector<8x128xf32>
    %c7_i32_271 = arith.constant 7 : i32
    %c0_i32_272 = arith.constant 0 : i32
    %c0_i32_273 = arith.constant 0 : i32
    %364 = tpu.memref_slice %arg2[%c7_i32_271, %c0_i32_272, %c0_i32_273] : memref<8x8x512xf32, #tpu.memory_space<vmem>> -> memref<1x8x512xf32, #tpu.memory_space<vmem>>
    %365 = tpu.memref_squeeze %364 : memref<1x8x512xf32, #tpu.memory_space<vmem>> -> memref<8x512xf32, #tpu.memory_space<vmem>>
    %c0_274 = arith.constant 0 : index
    %c256_275 = arith.constant 256 : index
    %366 = vector.load %365[%c0_274, %c256_275] : memref<8x512xf32, #tpu.memory_space<vmem>>, vector<8x128xf32>
    %c0_276 = arith.constant 0 : index
    %c256_277 = arith.constant 256 : index
    %367 = vector.load %arg5[%c0_276, %c256_277] : memref<128x512xf32, #tpu.memory_space<vmem>>, vector<128x128xf32>
    %cst_278 = arith.constant dense<0.000000e+00> : vector<8x128xf32>
    %368 = tpu.matmul %337, %367, %cst_278 {dimension_numbers = #tpu.dot_dimension_numbers<[1], [0], [0], [1], [0, 0, 1, 1], [], []>} : vector<8x128xf32>, vector<128x128xf32>, vector<8x128xf32> -> vector<8x128xf32>
    %369 = arith.addf %366, %368 : vector<8x128xf32>
    %370 = math.tanh %369 : vector<8x128xf32>
    %371 = arith.mulf %363, %370 : vector<8x128xf32>
    %372 = arith.addf %352, %371 : vector<8x128xf32>
    %c7_i32_279 = arith.constant 7 : i32
    %c0_i32_280 = arith.constant 0 : i32
    %c0_i32_281 = arith.constant 0 : i32
    %373 = tpu.memref_slice %arg2[%c7_i32_279, %c0_i32_280, %c0_i32_281] : memref<8x8x512xf32, #tpu.memory_space<vmem>> -> memref<1x8x512xf32, #tpu.memory_space<vmem>>
    %374 = tpu.memref_squeeze %373 : memref<1x8x512xf32, #tpu.memory_space<vmem>> -> memref<8x512xf32, #tpu.memory_space<vmem>>
    %c0_282 = arith.constant 0 : index
    %c384_283 = arith.constant 384 : index
    %375 = vector.load %374[%c0_282, %c384_283] : memref<8x512xf32, #tpu.memory_space<vmem>>, vector<8x128xf32>
    %c0_284 = arith.constant 0 : index
    %c384_285 = arith.constant 384 : index
    %376 = vector.load %arg5[%c0_284, %c384_285] : memref<128x512xf32, #tpu.memory_space<vmem>>, vector<128x128xf32>
    %cst_286 = arith.constant dense<0.000000e+00> : vector<8x128xf32>
    %377 = tpu.matmul %337, %376, %cst_286 {dimension_numbers = #tpu.dot_dimension_numbers<[1], [0], [0], [1], [0, 0, 1, 1], [], []>} : vector<8x128xf32>, vector<128x128xf32>, vector<8x128xf32> -> vector<8x128xf32>
    %378 = arith.addf %375, %377 : vector<8x128xf32>
    %379 = arith.negf %378 : vector<8x128xf32>
    %380 = math.exp %379 : vector<8x128xf32>
    %cst_287 = arith.constant 1.000000e+00 : f32
    %381 = vector.broadcast %cst_287 : f32 to vector<8x128xf32>
    %382 = arith.addf %381, %380 : vector<8x128xf32>
    %383 = arith.divf %381, %382 : vector<8x128xf32>
    %384 = math.tanh %372 : vector<8x128xf32>
    %385 = arith.mulf %383, %384 : vector<8x128xf32>
    %c7 = arith.constant 7 : index
    %c0_288 = arith.constant 0 : index
    %c0_289 = arith.constant 0 : index
    %386 = vector.load %arg6[%c7, %c0_288, %c0_289] : memref<8x8x128xf32, #tpu.memory_space<vmem>>, vector<1x8x128xf32>
    %387 = vector.shape_cast %386 : vector<1x8x128xf32> to vector<8x128xf32>
    %388 = vector.shape_cast %385 : vector<8x128xf32> to vector<1x8x128xf32>
    tpu.vector_store %arg6[%c7, %c0_288, %c0_289], %388 {strides = array<i32>} : memref<8x8x128xf32, #tpu.memory_space<vmem>>, vector<1x8x128xf32>,
    %c0_290 = arith.constant 0 : index
    %c0_291 = arith.constant 0 : index
    %389 = vector.load %arg9[%c0_290, %c0_291] : memref<8x128xf32, #tpu.memory_space<vmem>>, vector<8x128xf32>
    tpu.vector_store %arg9[%c0_290, %c0_291], %385 {strides = array<i32>} : memref<8x128xf32, #tpu.memory_space<vmem>>, vector<8x128xf32>,
    %c0_292 = arith.constant 0 : index
    %c0_293 = arith.constant 0 : index
    %390 = vector.load %arg10[%c0_292, %c0_293] : memref<8x128xf32, #tpu.memory_space<vmem>>, vector<8x128xf32>
    tpu.vector_store %arg10[%c0_292, %c0_293], %372 {strides = array<i32>} : memref<8x128xf32, #tpu.memory_space<vmem>>, vector<8x128xf32>,
    %c0_i32_294 = arith.constant 0 : i32
    %391 = arith.cmpi eq, %arg1, %c0_i32_294 : i32
    %392 = arith.extui %391 : i1 to i32
    %c0_i32_295 = arith.constant 0 : i32
    %393 = arith.cmpi ne, %392, %c0_i32_295 : i32
    scf.if %393 {
      %c0_296 = arith.constant 0 : index
      %c0_297 = arith.constant 0 : index
      %394 = vector.load %arg7[%c0_296, %c0_297] : memref<8x128xf32, #tpu.memory_space<vmem>>, vector<8x128xf32>
      tpu.vector_store %arg7[%c0_296, %c0_297], %385 {strides = array<i32>} : memref<8x128xf32, #tpu.memory_space<vmem>>, vector<8x128xf32>,
      %c0_298 = arith.constant 0 : index
      %c0_299 = arith.constant 0 : index
      %395 = vector.load %arg8[%c0_298, %c0_299] : memref<8x128xf32, #tpu.memory_space<vmem>>, vector<8x128xf32>
      tpu.vector_store %arg8[%c0_298, %c0_299], %372 {strides = array<i32>} : memref<8x128xf32, #tpu.memory_space<vmem>>, vector<8x128xf32>,
    } else {
    }
    return
  }
  func.func @transform_0(%arg0: i32, %arg1: i32) -> (i32, i32, i32) {
    %c0_i32 = arith.constant 0 : i32
    %c0_i32_0 = arith.constant 0 : i32
    return %arg1, %arg0, %c0_i32 : i32, i32, i32
  }
  func.func @transform_1(%arg0: i32, %arg1: i32) -> (i32, i32) {
    %c0_i32 = arith.constant 0 : i32
    %c0_i32_0 = arith.constant 0 : i32
    return %arg0, %c0_i32 : i32, i32
  }
  func.func @transform_2(%arg0: i32, %arg1: i32) -> (i32, i32) {
    %c0_i32 = arith.constant 0 : i32
    %c0_i32_0 = arith.constant 0 : i32
    return %arg0, %c0_i32 : i32, i32
  }
  func.func @transform_3(%arg0: i32, %arg1: i32) -> (i32, i32) {
    %c0_i32 = arith.constant 0 : i32
    %c0_i32_0 = arith.constant 0 : i32
    %c0_i32_1 = arith.constant 0 : i32
    return %c0_i32, %c0_i32_0 : i32, i32
  }
  func.func @transform_4(%arg0: i32, %arg1: i32) -> (i32, i32, i32) {
    %c0_i32 = arith.constant 0 : i32
    %c0_i32_0 = arith.constant 0 : i32
    return %arg1, %arg0, %c0_i32 : i32, i32, i32
  }
  func.func @transform_5(%arg0: i32, %arg1: i32) -> (i32, i32) {
    %c0_i32 = arith.constant 0 : i32
    %c0_i32_0 = arith.constant 0 : i32
    return %arg0, %c0_i32 : i32, i32
  }
  func.func @transform_6(%arg0: i32, %arg1: i32) -> (i32, i32) {
    %c0_i32 = arith.constant 0 : i32
    %c0_i32_0 = arith.constant 0 : i32
    return %arg0, %c0_i32 : i32, i32
  }
}

</mosaic_0001>

<bundles_post_ra>
// kernel: tpu_custom_call.1
= control target key start
LH: loop header
LB: loop body
LE: loop exit
PB: predicated region body
PF: predicated region fallthrough
CT: control target
= control target key end

     0   :  { %12 = vsyncpa [#allocation5], 0  ;;  %s6769_s0 = inlined_call_operand.hbm [shape: f32[8,8,512], index: 0, kind: input, shape index: {}]   ;;  %s6770_s1 = inlined_call_operand.hbm [shape: f32[8,128], index: 1, kind: input, shape index: {}]   ;;  %s6771_s2 = inlined_call_operand.hbm [shape: f32[8,128], index: 2, kind: input, shape index: {}]   ;;  %s6772_s3 = inlined_call_operand.hbm [shape: f32[128,512], index: 3, kind: input, shape index: {}]   ;;  %s6773_s4 = inlined_call_operand.hbm [shape: f32[8,8,128], index: 4, kind: output, shape index: {0}]   ;;  %s6774_s5 = inlined_call_operand.hbm [shape: f32[8,128], index: 5, kind: output, shape index: {1}]   ;;  %s6775_s6 = inlined_call_operand.hbm [shape: f32[8,128], index: 6, kind: output, shape index: {2}]  }
   0x1   :  { %13 = vsyncpa [#allocation8], 0 }
   0x2   :  { %14 = vsyncpa [#allocation11], 0 }
   0x3   :  { %15 = vsyncpa [#allocation6], 0 }
   0x4   :  { %16 = vsyncpa [#allocation14], 0  ;;  %s5145_s21 = smov [#allocation7]   ;;  %s5146_s23 = smov [#allocation4]  }
   0x5   :  { %s35_s22 = sshll.u32 %s5145_s21, 4  ;;  %s22_s24 = sshll.u32 %s5146_s23, 4  ;;  %s36_s22 = int_to_ptr.vmem [resolvable:$true] %s35_s22  ;;  %s23_s24 = int_to_ptr.vmem [resolvable:$true] %s22_s24 }
   0x6   :  { %s5003_s25 = scalar_lea.vmem %s36_s22, 128  ;;  %p5008_p1 = scmp.lt.s32.totalorder %s36_s22, %s36_s22 }
   0x7   :  { %p5004_p0 = scmp.ne.s32.totalorder %s36_s22, %s5003_s25  ;;  %p5009_p2 = scmp.lt.s32.totalorder %s5003_s25, %s5003_s25 }
   0x9   :  { %p5010_p3 = por %p5009_p2, %p5008_p1 }
   0xb   :  { %p5011_p4 = pnand %p5010_p3, %p5004_p0 }
   0xd   :  { %5014 = shalt.err (!%p5011_p4)
}
   0xe   :  { %38 = dma.hbm_to_vmem [thread:$0]  %s6770_s1, 128, %s36_s22, [#allocation8]  }
   0xf   :  { %s5023_s28 = scalar_lea.vmem %s23_s24, 4096  ;;  %p5028_p6 = scmp.lt.s32.totalorder %s23_s24, %s23_s24 }
  0x10   :  { %p5024_p5 = scmp.ne.s32.totalorder %s23_s24, %s5023_s28  ;;  %p5029_p7 = scmp.lt.s32.totalorder %s5023_s28, %s5023_s28 }
  0x12   :  { %p5030_p8 = por %p5029_p7, %p5028_p6 }
  0x14   :  { %p5031_p9 = pnand %p5030_p8, %p5024_p5 }
  0x16   :  { %5034 = shalt.err (!%p5031_p9)
}
  0x17   :  { %s5147_s29 = smov 512   ;;  %s5148_s30 = smov 32  }
  0x18   :  { %28 = dma.hbm_to_vmem [thread:$0]  %s6769_s0, 4096, %s23_s24, [#allocation5], %s5147_s29, %s5147_s29, %s5148_s30  }
  0x19   :  { %s5149_s9 = smov [#allocation9]   ;;  %s5150_s11 = smov [#allocation10]  }
  0x1a   :  { %s45_s10 = sshll.u32 %s5149_s9, 4  ;;  %s54_s12 = sshll.u32 %s5150_s11, 4  ;;  %s46_s10 = int_to_ptr.vmem [resolvable:$true] %s45_s10  ;;  %s55_s12 = int_to_ptr.vmem [resolvable:$true] %s54_s12 }
  0x1b   :  { %s5043_s1 = scalar_lea.vmem %s46_s10, 128  ;;  %p5048_p11 = scmp.lt.s32.totalorder %s46_s10, %s46_s10 }
  0x1c   :  { %p5044_p10 = scmp.ne.s32.totalorder %s46_s10, %s5043_s1  ;;  %p5049_p12 = scmp.lt.s32.totalorder %s5043_s1, %s5043_s1 }
  0x1e   :  { %p5050_p13 = por %p5049_p12, %p5048_p11 }
  0x20   :  { %p5051_p0 = pnand %p5050_p13, %p5044_p10 }
  0x22   :  { %5054 = shalt.err (!%p5051_p0)
}
  0x23   :  { %48 = dma.hbm_to_vmem [thread:$0]  %s6771_s2, 128, %s46_s10, [#allocation8]  }
  0x24   :  { %s5063_s15 = scalar_lea.vmem %s55_s12, 8192  ;;  %p5068_p2 = scmp.lt.s32.totalorder %s55_s12, %s55_s12 }
  0x25   :  { %p5064_p1 = scmp.ne.s32.totalorder %s55_s12, %s5063_s15  ;;  %p5069_p3 = scmp.lt.s32.totalorder %s5063_s15, %s5063_s15 }
  0x27   :  { %p5070_p4 = por %p5069_p3, %p5068_p2 }
  0x29   :  { %p5071_p5 = pnand %p5070_p4, %p5064_p1 }
  0x2b   :  { %5074 = shalt.err (!%p5071_p5)
}
  0x2c   :  { %60 = dma.hbm_to_vmem [thread:$0]  %s6772_s3, 8192, %s55_s12, [#allocation11], %s5147_s29, %s5147_s29, %s5148_s30  }
  0x2d   :  { %5135 = dma.done.wait [#allocation5], 4096  }
  0x2e   :  { %5136 = vsyncadd [#allocation5], 4294963200 }
  0x2f   :  { %5137 = dma.done.wait [#allocation8], 256  }
  0x30   :  { %5138 = vsyncadd [#allocation8], 4294967040 }
  0x31   :  { %5139 = dma.done.wait [#allocation11], 8192  }
  0x32   :  { %5140 = vsyncadd [#allocation11], 4294959104  ;;  %v6796_v0 = vmov 0.0   ;;  %vm5152_vm0 = vmmov 0   ;;  %v5211_v1 = vld [vmem:[#allocation10 + $0x1e8] sm:$0xff]  ;;  %v5213_v2 = vld [vmem:[#allocation10 + $0x1e0] sm:$0xff] }
  0x33   :  { %3734 = vmatprep.subr.mxu0 %v6796_v0  ;;  %3769 = vmatprep.subr.mxu1 %v6796_v0  ;;  %v5215_v3 = vld [vmem:[#allocation10 + $0x1c8] sm:$0xff]  ;;  %v5219_v4 = vld [vmem:[#allocation10 + $0x1c0] sm:$0xff]  ;;  %v5333_v33 = vld [vmem:[#allocation7] sm:$0xff]  ;;  %s5153_s2 = smov [#allocation13]   ;;  %s5154_s17 = smov [#allocation12]  }
  0x34   :  { %3766 = vmatprep.mubr.msk.f32.mxu0 %vm5152_vm0, %v6796_v0  ;;  %3801 = vmatprep.mubr.msk.f32.mxu1 %vm5152_vm0, %v6796_v0  ;;  %v5223_v5 = vld [vmem:[#allocation10 + $0x1a8] sm:$0xff]  ;;  %v5225_v6 = vld [vmem:[#allocation10 + $0x1a0] sm:$0xff]  ;;  %v5339_v34 = vld [vmem:[#allocation10 + $0x1f0] sm:$0xff]  ;;  %s3138_s3 = sshll.u32 %s5153_s2, 4  ;;  %s3125_s18 = sshll.u32 %s5154_s17, 4  ;;  %s3139_s3 = int_to_ptr.vmem [resolvable:$true] %s3138_s3  ;;  %s3126_s18 = int_to_ptr.vmem [resolvable:$true] %s3125_s18 }
  0x35   :  { %3735 = vmatpush3.msra.mxu0 %v5211_v1  ;;  %3770 = vmatpush3.msra.mxu1 %v5213_v2  ;;  %v5231_v7 = vld [vmem:[#allocation10 + $0x188] sm:$0xff]  ;;  %v5233_v8 = vld [vmem:[#allocation10 + $0x180] sm:$0xff]  ;;  %v5341_v35 = vld [vmem:[#allocation10 + $0x1f8] sm:$0xff]  ;;  %s5155_s19 = smov [#allocation15]   ;;  %s5075_s21 = scalar_lea.vmem %s3139_s3, 128 }
  0x36   :  { %3736 = vmatprep.subr.mxu0 %v6796_v0  ;;  %3771 = vmatprep.subr.mxu1 %v6796_v0  ;;  %v5239_v9 = vld [vmem:[#allocation10 + $0x168] sm:$0xff]  ;;  %v5241_v10 = vld [vmem:[#allocation10 + $0x160] sm:$0xff]  ;;  %v5347_v36 = vld [vmem:[#allocation10 + $0x1d0] sm:$0xff]  ;;  %s3148_s20 = sshll.u32 %s5155_s19, 4  ;;  %p5076_p6 = scmp.ne.s32.totalorder %s3139_s3, %s5075_s21  ;;  %s3149_s20 = int_to_ptr.vmem [resolvable:$true] %s3148_s20 }
  0x37   :  { %3737 = vmatpush3.msra.mxu0 %v5215_v3  ;;  %3772 = vmatpush3.msra.mxu1 %v5219_v4  ;;  %v5247_v11 = vld [vmem:[#allocation10 + $0x148] sm:$0xff]  ;;  %v5249_v12 = vld [vmem:[#allocation10 + $0x140] sm:$0xff]  ;;  %v5349_v37 = vld [vmem:[#allocation10 + $0x1d8] sm:$0xff]  ;;  %p5080_p7 = scmp.lt.s32.totalorder %s3139_s3, %s3139_s3  ;;  %p5081_p8 = scmp.lt.s32.totalorder %s5075_s21, %s5075_s21 }
  0x38   :  { %3738 = vmatprep.subr.mxu0 %v6796_v0  ;;  %3773 = vmatprep.subr.mxu1 %v6796_v0  ;;  %v5255_v13 = vld [vmem:[#allocation10 + $0x128] sm:$0xff]  ;;  %v5257_v14 = vld [vmem:[#allocation10 + $0x120] sm:$0xff]  ;;  %v5355_v38 = vld [vmem:[#allocation10 + $0x1b0] sm:$0xff] }
  0x39   :  { %3739 = vmatpush3.msra.mxu0 %v5223_v5  ;;  %3774 = vmatpush3.msra.mxu1 %v5225_v6  ;;  %v5263_v15 = vld [vmem:[#allocation10 + $0x108] sm:$0xff]  ;;  %v5265_v16 = vld [vmem:[#allocation10 + $0x100] sm:$0xff]  ;;  %v5357_v39 = vld [vmem:[#allocation10 + $0x1b8] sm:$0xff]  ;;  %p5082_p9 = por %p5081_p8, %p5080_p7 }
  0x3a   :  { %3740 = vmatprep.subr.mxu0 %v6796_v0  ;;  %3775 = vmatprep.subr.mxu1 %v6796_v0  ;;  %6828 = vst [vmem:[#allocation21_spill] sm:$0xff] %v5263_v15  ;;  %6829 = vst [vmem:[#allocation22_spill] sm:$0xff] %v5265_v16  ;;  %v5271_v17 = vld [vmem:[#allocation10 + $0xe8] sm:$0xff]  ;;  %v5273_v18 = vld [vmem:[#allocation10 + $0xe0] sm:$0xff] }
  0x3b   :  { %3741 = vmatpush3.msra.mxu0 %v5231_v7  ;;  %3776 = vmatpush3.msra.mxu1 %v5233_v8  ;;  %6830 = vst [vmem:[#allocation23_spill] sm:$0xff] %v5271_v17  ;;  %6831 = vst [vmem:[#allocation24_spill] sm:$0xff] %v5273_v18  ;;  %v5279_v19 = vld [vmem:[#allocation10 + $0xc8] sm:$0xff]  ;;  %v5281_v20 = vld [vmem:[#allocation10 + $0xc0] sm:$0xff]  ;;  %p5083_p10 = pnand %p5082_p9, %p5076_p6 }
  0x3c   :  { %3742 = vmatprep.subr.mxu0 %v6796_v0  ;;  %3777 = vmatprep.subr.mxu1 %v6796_v0  ;;  %6832 = vst [vmem:[#allocation25_spill] sm:$0xff] %v5279_v19  ;;  %6833 = vst [vmem:[#allocation26_spill] sm:$0xff] %v5281_v20  ;;  %v5287_v21 = vld [vmem:[#allocation10 + $0xa8] sm:$0xff]  ;;  %v5289_v22 = vld [vmem:[#allocation10 + $0xa0] sm:$0xff] }
  0x3d   :  { %3743 = vmatpush3.msra.mxu0 %v5239_v9  ;;  %3778 = vmatpush3.msra.mxu1 %v5241_v10  ;;  %6834 = vst [vmem:[#allocation27_spill] sm:$0xff] %v5287_v21  ;;  %6835 = vst [vmem:[#allocation28_spill] sm:$0xff] %v5289_v22  ;;  %v5295_v23 = vld [vmem:[#allocation10 + $0x88] sm:$0xff]  ;;  %v5297_v24 = vld [vmem:[#allocation10 + $0x80] sm:$0xff] }
  0x3e   :  { %3744 = vmatprep.subr.mxu0 %v6796_v0  ;;  %3779 = vmatprep.subr.mxu1 %v6796_v0  ;;  %6836 = vst [vmem:[#allocation29_spill] sm:$0xff] %v5295_v23  ;;  %6837 = vst [vmem:[#allocation30_spill] sm:$0xff] %v5297_v24  ;;  %v5303_v25 = vld [vmem:[#allocation10 + $0x68] sm:$0xff]  ;;  %v5305_v26 = vld [vmem:[#allocation10 + $0x60] sm:$0xff] }
  0x3f   :  { %3745 = vmatpush3.msra.mxu0 %v5247_v11  ;;  %3780 = vmatpush3.msra.mxu1 %v5249_v12  ;;  %6838 = vst [vmem:[#allocation31_spill] sm:$0xff] %v5303_v25  ;;  %6839 = vst [vmem:[#allocation32_spill] sm:$0xff] %v5305_v26  ;;  %v5311_v27 = vld [vmem:[#allocation10 + $0x48] sm:$0xff]  ;;  %v5313_v28 = vld [vmem:[#allocation10 + $0x40] sm:$0xff] }
  0x40   :  { %3746 = vmatprep.subr.mxu0 %v6796_v0  ;;  %3781 = vmatprep.subr.mxu1 %v6796_v0  ;;  %6840 = vst [vmem:[#allocation33_spill] sm:$0xff] %v5311_v27  ;;  %6841 = vst [vmem:[#allocation34_spill] sm:$0xff] %v5313_v28  ;;  %v5319_v29 = vld [vmem:[#allocation10 + $0x28] sm:$0xff]  ;;  %v5321_v30 = vld [vmem:[#allocation10 + $0x20] sm:$0xff] }
  0x41   :  { %3747 = vmatpush3.msra.mxu0 %v5255_v13  ;;  %3782 = vmatpush3.msra.mxu1 %v5257_v14  ;;  %6842 = vst [vmem:[#allocation35_spill] sm:$0xff] %v5319_v29  ;;  %6843 = vst [vmem:[#allocation36_spill] sm:$0xff] %v5321_v30  ;;  %v5327_v31 = vld [vmem:[#allocation10 + $0x8] sm:$0xff]  ;;  %v5329_v32 = vld [vmem:[#allocation10] sm:$0xff] }
  0x42   :  { %3748 = vmatprep.subr.mxu0 %v6796_v0  ;;  %3783 = vmatprep.subr.mxu1 %v6796_v0  ;;  %6844 = vst [vmem:[#allocation37_spill] sm:$0xff] %v5327_v31  ;;  %6845 = vst [vmem:[#allocation38_spill] sm:$0xff] %v5329_v32  ;;  %v5363_v40 = vld [vmem:[#allocation10 + $0x190] sm:$0xff]  ;;  %v5365_v41 = vld [vmem:[#allocation10 + $0x198] sm:$0xff] }
  0x43   :  { %3749 = vmatpush3.msra.mxu0 %v5263_v15  ;;  %3784 = vmatpush3.msra.mxu1 %v5265_v16  ;;  %v5371_v42 = vld [vmem:[#allocation10 + $0x170] sm:$0xff]  ;;  %v5373_v43 = vld [vmem:[#allocation10 + $0x178] sm:$0xff] }
  0x44   :  { %3750 = vmatprep.subr.mxu0 %v6796_v0  ;;  %3785 = vmatprep.subr.mxu1 %v6796_v0  ;;  %v5379_v44 = vld [vmem:[#allocation10 + $0x150] sm:$0xff]  ;;  %v5381_v45 = vld [vmem:[#allocation10 + $0x158] sm:$0xff] }
  0x45   :  { %3751 = vmatpush3.msra.mxu0 %v5271_v17  ;;  %3786 = vmatpush3.msra.mxu1 %v5273_v18  ;;  %v5387_v46 = vld [vmem:[#allocation10 + $0x130] sm:$0xff]  ;;  %v5389_v47 = vld [vmem:[#allocation10 + $0x138] sm:$0xff] }
  0x46   :  { %3752 = vmatprep.subr.mxu0 %v6796_v0  ;;  %3787 = vmatprep.subr.mxu1 %v6796_v0  ;;  %v5395_v48 = vld [vmem:[#allocation10 + $0x110] sm:$0xff]  ;;  %v5397_v49 = vld [vmem:[#allocation10 + $0x118] sm:$0xff] }
  0x47   :  { %3753 = vmatpush3.msra.mxu0 %v5279_v19  ;;  %3788 = vmatpush3.msra.mxu1 %v5281_v20  ;;  %v5403_v50 = vld [vmem:[#allocation10 + $0xf0] sm:$0xff]  ;;  %v5405_v51 = vld [vmem:[#allocation10 + $0xf8] sm:$0xff] }
  0x48   :  { %3754 = vmatprep.subr.mxu0 %v6796_v0  ;;  %3789 = vmatprep.subr.mxu1 %v6796_v0  ;;  %v5411_v52 = vld [vmem:[#allocation10 + $0xd0] sm:$0xff]  ;;  %v5413_v53 = vld [vmem:[#allocation10 + $0xd8] sm:$0xff] }
  0x49   :  { %3755 = vmatpush3.msra.mxu0 %v5287_v21  ;;  %3790 = vmatpush3.msra.mxu1 %v5289_v22  ;;  %v5419_v54 = vld [vmem:[#allocation10 + $0xb0] sm:$0xff]  ;;  %v5421_v55 = vld [vmem:[#allocation10 + $0xb8] sm:$0xff] }
  0x4a   :  { %3756 = vmatprep.subr.mxu0 %v6796_v0  ;;  %3791 = vmatprep.subr.mxu1 %v6796_v0  ;;  %v5427_v56 = vld [vmem:[#allocation10 + $0x90] sm:$0xff]  ;;  %v5429_v57 = vld [vmem:[#allocation10 + $0x98] sm:$0xff] }
  0x4b   :  { %3757 = vmatpush3.msra.mxu0 %v5295_v23  ;;  %3792 = vmatpush3.msra.mxu1 %v5297_v24  ;;  %6846 = vst [vmem:[#allocation39_spill] sm:$0xff] %v5429_v57  ;;  %v5435_v58 = vld [vmem:[#allocation10 + $0x70] sm:$0xff]  ;;  %v5437_v59 = vld [vmem:[#allocation10 + $0x78] sm:$0xff] }
  0x4c   :  { %3758 = vmatprep.subr.mxu0 %v6796_v0  ;;  %3793 = vmatprep.subr.mxu1 %v6796_v0  ;;  %6847 = vst [vmem:[#allocation40_spill] sm:$0xff] %v5437_v59  ;;  %v5443_v60 = vld [vmem:[#allocation10 + $0x50] sm:$0xff]  ;;  %v5445_v61 = vld [vmem:[#allocation10 + $0x58] sm:$0xff] }
  0x4d   :  { %3759 = vmatpush3.msra.mxu0 %v5303_v25  ;;  %3794 = vmatpush3.msra.mxu1 %v5305_v26  ;;  %v5451_v62 = vld [vmem:[#allocation10 + $0x30] sm:$0xff]  ;;  %v5453_v63 = vld [vmem:[#allocation10 + $0x38] sm:$0xff] }
  0x4e   :  { %3760 = vmatprep.subr.mxu0 %v6796_v0  ;;  %3795 = vmatprep.subr.mxu1 %v6796_v0 }
  0x4f   :  { %3761 = vmatpush3.msra.mxu0 %v5311_v27  ;;  %3796 = vmatpush3.msra.mxu1 %v5313_v28 }
  0x50   :  { %3762 = vmatprep.subr.mxu0 %v6796_v0  ;;  %3797 = vmatprep.subr.mxu1 %v6796_v0 }
  0x51   :  { %3763 = vmatpush3.msra.mxu0 %v5319_v29  ;;  %3798 = vmatpush3.msra.mxu1 %v5321_v30 }
  0x52   :  { %3764 = vmatprep.subr.mxu0 %v6796_v0  ;;  %3799 = vmatprep.subr.mxu1 %v6796_v0 }
  0x53   :  { %3765 = vmatpush3.msra.mxu0 %v5327_v31  ;;  %3800 = vmatpush3.msra.mxu1 %v5329_v32 }
  0x54   :  { %3767 = vmatmul.mubr.f32.vlgmr.msra.gmra.mxu0 %v5333_v33  ;;  %3802 = vmatmul.mubr.f32.vlgmr.msra.gmra.mxu1 %v5333_v33 }
  0x55   :  { %3804 = vmatprep.subr.mxu0 %v6796_v0  ;;  %3839 = vmatprep.subr.mxu1 %v6796_v0 }
  0x56   :  { %3805 = vmatpush3.msra.mxu0 %v5339_v34  ;;  %3840 = vmatpush3.msra.mxu1 %v5341_v35 }
  0x57   :  { %3806 = vmatprep.subr.mxu0 %v6796_v0  ;;  %3841 = vmatprep.subr.mxu1 %v6796_v0 }
  0x58   :  { %3807 = vmatpush3.msra.mxu0 %v5347_v36  ;;  %3842 = vmatpush3.msra.mxu1 %v5349_v37 }
  0x59   :  { %3808 = vmatprep.subr.mxu0 %v6796_v0  ;;  %3843 = vmatprep.subr.mxu1 %v6796_v0 }
  0x5a   :  { %3809 = vmatpush3.msra.mxu0 %v5355_v38  ;;  %3844 = vmatpush3.msra.mxu1 %v5357_v39 }
  0x5b   :  { %3810 = vmatprep.subr.mxu0 %v6796_v0  ;;  %3845 = vmatprep.subr.mxu1 %v6796_v0 }
  0x5c   :  { %3811 = vmatpush3.msra.mxu0 %v5363_v40  ;;  %3846 = vmatpush3.msra.mxu1 %v5365_v41 }
  0x5d   :  { %3812 = vmatprep.subr.mxu0 %v6796_v0  ;;  %3847 = vmatprep.subr.mxu1 %v6796_v0 }
  0x5e   :  { %3813 = vmatpush3.msra.mxu0 %v5371_v42  ;;  %3848 = vmatpush3.msra.mxu1 %v5373_v43 }
  0x5f   :  { %3814 = vmatprep.subr.mxu0 %v6796_v0  ;;  %3849 = vmatprep.subr.mxu1 %v6796_v0 }
  0x60   :  { %3815 = vmatpush3.msra.mxu0 %v5379_v44  ;;  %3850 = vmatpush3.msra.mxu1 %v5381_v45 }
  0x61   :  { %3816 = vmatprep.subr.mxu0 %v6796_v0  ;;  %3851 = vmatprep.subr.mxu1 %v6796_v0 }
  0x62   :  { %3817 = vmatpush3.msra.mxu0 %v5387_v46  ;;  %3852 = vmatpush3.msra.mxu1 %v5389_v47 }
  0x63   :  { %3818 = vmatprep.subr.mxu0 %v6796_v0  ;;  %3853 = vmatprep.subr.mxu1 %v6796_v0 }
  0x64   :  { %3819 = vmatpush3.msra.mxu0 %v5395_v48  ;;  %3854 = vmatpush3.msra.mxu1 %v5397_v49 }
  0x65   :  { %3820 = vmatprep.subr.mxu0 %v6796_v0  ;;  %3855 = vmatprep.subr.mxu1 %v6796_v0 }
  0x66   :  { %3821 = vmatpush3.msra.mxu0 %v5403_v50  ;;  %3856 = vmatpush3.msra.mxu1 %v5405_v51 }
  0x67   :  { %3822 = vmatprep.subr.mxu0 %v6796_v0  ;;  %3857 = vmatprep.subr.mxu1 %v6796_v0 }
  0x68   :  { %3823 = vmatpush3.msra.mxu0 %v5411_v52  ;;  %3858 = vmatpush3.msra.mxu1 %v5413_v53 }
  0x69   :  { %3824 = vmatprep.subr.mxu0 %v6796_v0  ;;  %3859 = vmatprep.subr.mxu1 %v6796_v0 }
  0x6a   :  { %3825 = vmatpush3.msra.mxu0 %v5419_v54  ;;  %3860 = vmatpush3.msra.mxu1 %v5421_v55 }
  0x6b   :  { %3826 = vmatprep.subr.mxu0 %v6796_v0  ;;  %3861 = vmatprep.subr.mxu1 %v6796_v0 }
  0x6c   :  { %3827 = vmatpush3.msra.mxu0 %v5427_v56  ;;  %3862 = vmatpush3.msra.mxu1 %v5429_v57  ;;  %v5459_v57 = vld [vmem:[#allocation10 + $0x10] sm:$0xff] }
  0x6d   :  { %3828 = vmatprep.subr.mxu0 %v6796_v0  ;;  %3863 = vmatprep.subr.mxu1 %v6796_v0 }
  0x6e   :  { %3829 = vmatpush3.msra.mxu0 %v5435_v58  ;;  %3864 = vmatpush3.msra.mxu1 %v5437_v59  ;;  %v5463_v59 = vld [vmem:[#allocation10 + $0x18] sm:$0xff] }
  0x6f   :  { %3830 = vmatprep.subr.mxu0 %v6796_v0  ;;  %3865 = vmatprep.subr.mxu1 %v6796_v0 }
  0x70   :  { %3831 = vmatpush3.msra.mxu0 %v5443_v60  ;;  %3866 = vmatpush3.msra.mxu1 %v5445_v61 }
  0x71   :  { %3832 = vmatprep.subr.mxu0 %v6796_v0  ;;  %3867 = vmatprep.subr.mxu1 %v6796_v0 }
  0x72   :  { %3833 = vmatpush3.msra.mxu0 %v5451_v62  ;;  %3868 = vmatpush3.msra.mxu1 %v5453_v63 }
  0x73   :  { %3834 = vmatprep.subr.mxu0 %v6796_v0  ;;  %3869 = vmatprep.subr.mxu1 %v6796_v0 }
  0x74   :  { %3835 = vmatpush3.msra.mxu0 %v5459_v57  ;;  %3836 = vmatprep.mubr.msk.f32.mxu0 %vm5152_vm0, %v6796_v0 }
  0x75   :  { %3870 = vmatpush3.msra.mxu1 %v5463_v59  ;;  %3871 = vmatprep.mubr.msk.f32.mxu1 %vm5152_vm0, %v6796_v0 }
  0x76   :  { %3837 = vmatmul.mubr.f32.vlgmr.msra.gmra.mxu0 %v5333_v33  ;;  %3872 = vmatmul.mubr.f32.vlgmr.msra.gmra.mxu1 %v5333_v33 }
  0x77   :  { %3874 = vmatprep.subr.mxu0 %v6796_v0  ;;  %3909 = vmatprep.subr.mxu1 %v6796_v0 }
  0x78   :  { %3875 = vmatpush3.msra.mxu0 %v5211_v1  ;;  %3910 = vmatpush3.msra.mxu1 %v5213_v2 }
  0x79   :  { %3876 = vmatprep.subr.mxu0 %v6796_v0  ;;  %3911 = vmatprep.subr.mxu1 %v6796_v0 }
  0x7a   :  { %3877 = vmatpush3.msra.mxu0 %v5215_v3  ;;  %3912 = vmatpush3.msra.mxu1 %v5219_v4 }
  0x7b   :  { %3878 = vmatprep.subr.mxu0 %v6796_v0  ;;  %3913 = vmatprep.subr.mxu1 %v6796_v0 }
  0x7c   :  { %3879 = vmatpush3.msra.mxu0 %v5223_v5  ;;  %3914 = vmatpush3.msra.mxu1 %v5225_v6 }
  0x7d   :  { %3880 = vmatprep.subr.mxu0 %v6796_v0  ;;  %3915 = vmatprep.subr.mxu1 %v6796_v0 }
  0x7e   :  { %3881 = vmatpush3.msra.mxu0 %v5231_v7  ;;  %3916 = vmatpush3.msra.mxu1 %v5233_v8 }
  0x7f   :  { %3882 = vmatprep.subr.mxu0 %v6796_v0  ;;  %3917 = vmatprep.subr.mxu1 %v6796_v0 }
  0x80   :  { %3883 = vmatpush3.msra.mxu0 %v5239_v9  ;;  %3918 = vmatpush3.msra.mxu1 %v5241_v10 }
  0x81   :  { %3884 = vmatprep.subr.mxu0 %v6796_v0  ;;  %3919 = vmatprep.subr.mxu1 %v6796_v0 }
  0x82   :  { %3885 = vmatpush3.msra.mxu0 %v5247_v11  ;;  %3920 = vmatpush3.msra.mxu1 %v5249_v12 }
  0x83   :  { %3886 = vmatprep.subr.mxu0 %v6796_v0  ;;  %3921 = vmatprep.subr.mxu1 %v6796_v0 }
  0x84   :  { %3887 = vmatpush3.msra.mxu0 %v5255_v13  ;;  %3922 = vmatpush3.msra.mxu1 %v5257_v14 }
  0x85   :  { %3888 = vmatprep.subr.mxu0 %v6796_v0  ;;  %3923 = vmatprep.subr.mxu1 %v6796_v0 }
  0x86   :  { %3889 = vmatpush3.msra.mxu0 %v5263_v15  ;;  %3924 = vmatpush3.msra.mxu1 %v5265_v16 }
  0x87   :  { %3890 = vmatprep.subr.mxu0 %v6796_v0  ;;  %3925 = vmatprep.subr.mxu1 %v6796_v0 }
  0x88   :  { %3891 = vmatpush3.msra.mxu0 %v5271_v17  ;;  %3926 = vmatpush3.msra.mxu1 %v5273_v18  ;;  %v363_v18 = vld [vmem:[#allocation4 + $0x18] sm:$0xff] }
  0x89   :  { %3892 = vmatprep.subr.mxu0 %v6796_v0  ;;  %3927 = vmatprep.subr.mxu1 %v6796_v0 }
  0x8a   :  { %3893 = vmatpush3.msra.mxu0 %v5279_v19  ;;  %3928 = vmatpush3.msra.mxu1 %v5281_v20  ;;  %v272_v19 = vld [vmem:[#allocation4 + $0x10] sm:$0xff] }
  0x8b   :  { %3894 = vmatprep.subr.mxu0 %v6796_v0  ;;  %3929 = vmatprep.subr.mxu1 %v6796_v0 }
  0x8c   :  { %3895 = vmatpush3.msra.mxu0 %v5287_v21  ;;  %3930 = vmatpush3.msra.mxu1 %v5289_v22 }
  0x8d   :  { %3896 = vmatprep.subr.mxu0 %v6796_v0  ;;  %3931 = vmatprep.subr.mxu1 %v6796_v0 }
  0x8e   :  { %3897 = vmatpush3.msra.mxu0 %v5295_v23  ;;  %3932 = vmatpush3.msra.mxu1 %v5297_v24 }
  0x8f   :  { %3898 = vmatprep.subr.mxu0 %v6796_v0  ;;  %3933 = vmatprep.subr.mxu1 %v6796_v0 }
  0x90   :  { %3899 = vmatpush3.msra.mxu0 %v5303_v25  ;;  %3934 = vmatpush3.msra.mxu1 %v5305_v26  ;;  %v178_v26 = vld [vmem:[#allocation4] sm:$0xff] }
  0x91   :  { %3900 = vmatprep.subr.mxu0 %v6796_v0  ;;  %3935 = vmatprep.subr.mxu1 %v6796_v0 }
  0x92   :  { %3901 = vmatpush3.msra.mxu0 %v5311_v27  ;;  %3936 = vmatpush3.msra.mxu1 %v5313_v28  ;;  %v83_v27 = vld [vmem:[#allocation4 + $0x8] sm:$0xff] }
  0x93   :  { %3902 = vmatprep.subr.mxu0 %v6796_v0  ;;  %3937 = vmatprep.subr.mxu1 %v6796_v0 }
  0x94   :  { %3903 = vmatpush3.msra.mxu0 %v5319_v29  ;;  %3938 = vmatpush3.msra.mxu1 %v5321_v30 }
  0x95   :  { %3904 = vmatprep.subr.mxu0 %v6796_v0  ;;  %3939 = vmatprep.subr.mxu1 %v6796_v0 }
  0x96   :  { %3905 = vmatpush3.msra.mxu0 %v5327_v31  ;;  %3940 = vmatpush3.msra.mxu1 %v5329_v32 }
  0x97   :  { %3906 = vmatprep.mubr.msk.f32.mxu0 %vm5152_vm0, %v6796_v0  ;;  %3941 = vmatprep.mubr.msk.f32.mxu1 %vm5152_vm0, %v6796_v0 }
  0x98   :  { %3944 = vmatprep.subr.mxu0 %v6796_v0  ;;  %3979 = vmatprep.subr.mxu1 %v6796_v0 }
 0x114   :  { %v166_v33 = vpop.f32.mrf.mxu0  ;;  %v261_v30 = vpop.f32.mrf.mxu1 }
 0x115   :  { %v170_v25 = vadd.f32 %v166_v33, %v83_v27  ;;  %v265_v31 = vadd.f32 %v261_v30, %v178_v26 }
 0x116   :  { %v3768_v29 = vpop.f32.mrf.mxu0  ;;  %v3803_v28 = vpop.f32.mrf.mxu1 }
 0x117   :  { %v3166_v24 = vmul.f32 -1.442695, %v170_v25  ;;  %v3167_v32 = vmul.f32 -1.442695, %v265_v31 }
 0x119   :  { %4867 = vpow2.f32 %v3166_v24  ;;  %v79_v24 = vld [vmem:[#allocation9] sm:$0xff] }
 0x11a   :  { %4869 = vpow2.f32 %v3167_v32 }
 0x126   :  { %v4868_v23 = vpop.eup %4867 }
 0x127   :  { %v4870_v22 = vpop.eup %4869  ;;  %v174_v21 = vadd.f32 1.0, %v4868_v23 }
 0x128   :  { %v269_v20 = vadd.f32 1.0, %v4870_v22 }
 0x129   :  { %4871 = vrcp.f32 %v174_v21  ;;  %v6866_v21 = vld [vmem:[#allocation36_spill] sm:$0xff] }
 0x12a   :  { %4873 = vrcp.f32 %v269_v20  ;;  %v6865_v20 = vld [vmem:[#allocation35_spill] sm:$0xff] }
 0x136   :  { %v355_v17 = vpop.f32.mrf.mxu0  ;;  %v446_v0 = vpop.f32.mrf.mxu1 }
 0x137   :  { %v359_v16 = vadd.f32 %v355_v17, %v272_v19  ;;  %v450_v29 = vadd.f32 %v446_v0, %v363_v18  ;;  %v4872_v25 = vpop.eup %4871  ;;  %v6850_v19 = vld [vmem:[#allocation40_spill] sm:$0xff] }
 0x138   :  { %v3838_v28 = vpop.f32.mrf.mxu0  ;;  %v3873_v15 = vpop.f32.mrf.mxu1  ;;  %v177_v31 = vmul.f32 %v4872_v25, %v79_v24 }
 0x139   :  { %4875 = vtanh.f32 %v359_v16  ;;  %v3168_v26 = vmul.f32 -1.442695, %v450_v29  ;;  %v4874_v27 = vpop.eup %4873  ;;  %v6848_v15 = vmov 0.0   ;;  %v6849_v16 = vld [vmem:[#allocation39_spill] sm:$0xff]  ;;  %v6867_v29 = vld [vmem:[#allocation37_spill] sm:$0xff]  ;;  %v6868_v28 = vld [vmem:[#allocation38_spill] sm:$0xff] }
 0x13b   :  { %4877 = vpow2.f32 %v3168_v26 }
 0x146   :  { %v4876_v30 = vpop.eup %4875 }
 0x147   :  { %v361_v23 = vmul.f32 %v4876_v30, %v4874_v27  ;;  %v461_v30 = vld [vmem:[#allocation4 + $0x28] sm:$0xff] }
 0x148   :  { %v4878_v22 = vpop.eup %4877 }
 0x149   :  { %v5545_v32 = vadd.f32 %v361_v23, %v177_v31  ;;  %v454_v33 = vadd.f32 1.0, %v4878_v22  ;;  %v556_v31 = vld [vmem:[#allocation4 + $0x20] sm:$0xff] }
 0x14b   :  { %4879 = vtanh.f32 %v5545_v32 }
 0x14c   :  { %4881 = vrcp.f32 %v454_v33 }
 0x158   :  { %v4880_v0 = vpop.eup %4879 }
 0x159   :  { %v4882_v17 = vpop.eup %4881 }
 0x15a   :  { %v5548_v18 = vmul.f32 %v4882_v17, %v4880_v0 }
 0x15c   :  { %459 = vst [vmem:[#allocation12] sm:$0xff] %v5548_v18  ;;  %3907 = vmatmul.mubr.f32.vlgmr.msra.gmra.mxu0 %v5548_v18  ;;  %3942 = vmatmul.mubr.f32.vlgmr.msra.gmra.mxu1 %v5548_v18 }
 0x15d   :  { %3945 = vmatpush3.msra.mxu0 %v5339_v34  ;;  %3980 = vmatpush3.msra.mxu1 %v5341_v35 }
 0x15e   :  { %3946 = vmatprep.subr.mxu0 %v6848_v15  ;;  %3981 = vmatprep.subr.mxu1 %v6848_v15 }
 0x15f   :  { %3947 = vmatpush3.msra.mxu0 %v5347_v36  ;;  %3982 = vmatpush3.msra.mxu1 %v5349_v37 }
 0x160   :  { %3948 = vmatprep.subr.mxu0 %v6848_v15  ;;  %3983 = vmatprep.subr.mxu1 %v6848_v15 }
 0x161   :  { %3949 = vmatpush3.msra.mxu0 %v5355_v38  ;;  %3984 = vmatpush3.msra.mxu1 %v5357_v39 }
 0x162   :  { %3950 = vmatprep.subr.mxu0 %v6848_v15  ;;  %3985 = vmatprep.subr.mxu1 %v6848_v15 }
 0x163   :  { %3951 = vmatpush3.msra.mxu0 %v5363_v40  ;;  %3986 = vmatpush3.msra.mxu1 %v5365_v41 }
 0x164   :  { %3952 = vmatprep.subr.mxu0 %v6848_v15  ;;  %3987 = vmatprep.subr.mxu1 %v6848_v15 }
 0x165   :  { %3953 = vmatpush3.msra.mxu0 %v5371_v42  ;;  %3988 = vmatpush3.msra.mxu1 %v5373_v43 }
 0x166   :  { %3954 = vmatprep.subr.mxu0 %v6848_v15  ;;  %3989 = vmatprep.subr.mxu1 %v6848_v15 }
 0x167   :  { %3955 = vmatpush3.msra.mxu0 %v5379_v44  ;;  %3990 = vmatpush3.msra.mxu1 %v5381_v45 }
 0x168   :  { %3956 = vmatprep.subr.mxu0 %v6848_v15  ;;  %3991 = vmatprep.subr.mxu1 %v6848_v15 }
 0x169   :  { %3957 = vmatpush3.msra.mxu0 %v5387_v46  ;;  %3992 = vmatpush3.msra.mxu1 %v5389_v47 }
 0x16a   :  { %3958 = vmatprep.subr.mxu0 %v6848_v15  ;;  %3993 = vmatprep.subr.mxu1 %v6848_v15 }
 0x16b   :  { %3959 = vmatpush3.msra.mxu0 %v5395_v48  ;;  %3994 = vmatpush3.msra.mxu1 %v5397_v49 }
 0x16c   :  { %3960 = vmatprep.subr.mxu0 %v6848_v15  ;;  %3995 = vmatprep.subr.mxu1 %v6848_v15 }
 0x16d   :  { %3961 = vmatpush3.msra.mxu0 %v5403_v50  ;;  %3996 = vmatpush3.msra.mxu1 %v5405_v51 }
 0x16e   :  { %3962 = vmatprep.subr.mxu0 %v6848_v15  ;;  %3997 = vmatprep.subr.mxu1 %v6848_v15 }
 0x16f   :  { %3963 = vmatpush3.msra.mxu0 %v5411_v52  ;;  %3998 = vmatpush3.msra.mxu1 %v5413_v53 }
 0x170   :  { %3964 = vmatprep.subr.mxu0 %v6848_v15  ;;  %3999 = vmatprep.subr.mxu1 %v6848_v15 }
 0x171   :  { %3965 = vmatpush3.msra.mxu0 %v5419_v54  ;;  %4000 = vmatpush3.msra.mxu1 %v5421_v55 }
 0x172   :  { %3966 = vmatprep.subr.mxu0 %v6848_v15  ;;  %4001 = vmatprep.subr.mxu1 %v6848_v15 }
 0x173   :  { %3967 = vmatpush3.msra.mxu0 %v5427_v56  ;;  %4002 = vmatpush3.msra.mxu1 %v6849_v16 }
 0x174   :  { %3968 = vmatprep.subr.mxu0 %v6848_v15  ;;  %4003 = vmatprep.subr.mxu1 %v6848_v15 }
 0x175   :  { %3969 = vmatpush3.msra.mxu0 %v5435_v58  ;;  %4004 = vmatpush3.msra.mxu1 %v6850_v19 }
 0x176   :  { %3970 = vmatprep.subr.mxu0 %v6848_v15  ;;  %4005 = vmatprep.subr.mxu1 %v6848_v15 }
 0x177   :  { %3971 = vmatpush3.msra.mxu0 %v5443_v60  ;;  %4006 = vmatpush3.msra.mxu1 %v5445_v61 }
 0x178   :  { %3972 = vmatprep.subr.mxu0 %v6848_v15  ;;  %4007 = vmatprep.subr.mxu1 %v6848_v15 }
 0x179   :  { %3973 = vmatpush3.msra.mxu0 %v5451_v62  ;;  %4008 = vmatpush3.msra.mxu1 %v5453_v63 }
 0x17a   :  { %3974 = vmatprep.subr.mxu0 %v6848_v15  ;;  %4009 = vmatprep.subr.mxu1 %v6848_v15 }
 0x17b   :  { %3975 = vmatpush3.msra.mxu0 %v5459_v57  ;;  %3976 = vmatprep.mubr.msk.f32.mxu0 %vm5152_vm0, %v6848_v15 }
 0x17c   :  { %4010 = vmatpush3.msra.mxu1 %v5463_v59  ;;  %4011 = vmatprep.mubr.msk.f32.mxu1 %vm5152_vm0, %v6848_v15 }
 0x17d   :  { %3977 = vmatmul.mubr.f32.vlgmr.msra.gmra.mxu0 %v5548_v18  ;;  %4012 = vmatmul.mubr.f32.vlgmr.msra.gmra.mxu1 %v5548_v18 }
 0x17e   :  { %4014 = vmatprep.subr.mxu0 %v6848_v15  ;;  %4049 = vmatprep.subr.mxu1 %v6848_v15 }
 0x17f   :  { %4015 = vmatpush3.msra.mxu0 %v5211_v1  ;;  %4050 = vmatpush3.msra.mxu1 %v5213_v2  ;;  %v6851_v1 = vld [vmem:[#allocation21_spill] sm:$0xff]  ;;  %v6852_v2 = vld [vmem:[#allocation22_spill] sm:$0xff] }
 0x180   :  { %4016 = vmatprep.subr.mxu0 %v6848_v15  ;;  %4051 = vmatprep.subr.mxu1 %v6848_v15 }
 0x181   :  { %4017 = vmatpush3.msra.mxu0 %v5215_v3  ;;  %4052 = vmatpush3.msra.mxu1 %v5219_v4  ;;  %v6853_v3 = vld [vmem:[#allocation23_spill] sm:$0xff]  ;;  %v6854_v4 = vld [vmem:[#allocation24_spill] sm:$0xff] }
 0x182   :  { %4018 = vmatprep.subr.mxu0 %v6848_v15  ;;  %4053 = vmatprep.subr.mxu1 %v6848_v15 }
 0x183   :  { %4019 = vmatpush3.msra.mxu0 %v5223_v5  ;;  %4054 = vmatpush3.msra.mxu1 %v5225_v6  ;;  %v6855_v5 = vld [vmem:[#allocation25_spill] sm:$0xff]  ;;  %v6856_v6 = vld [vmem:[#allocation26_spill] sm:$0xff] }
 0x184   :  { %4020 = vmatprep.subr.mxu0 %v6848_v15  ;;  %4055 = vmatprep.subr.mxu1 %v6848_v15 }
 0x185   :  { %4021 = vmatpush3.msra.mxu0 %v5231_v7  ;;  %4056 = vmatpush3.msra.mxu1 %v5233_v8  ;;  %v6857_v7 = vld [vmem:[#allocation27_spill] sm:$0xff]  ;;  %v6858_v8 = vld [vmem:[#allocation28_spill] sm:$0xff] }
 0x186   :  { %4022 = vmatprep.subr.mxu0 %v6848_v15  ;;  %4057 = vmatprep.subr.mxu1 %v6848_v15 }
 0x187   :  { %4023 = vmatpush3.msra.mxu0 %v5239_v9  ;;  %4058 = vmatpush3.msra.mxu1 %v5241_v10  ;;  %v6859_v9 = vld [vmem:[#allocation29_spill] sm:$0xff]  ;;  %v6860_v10 = vld [vmem:[#allocation30_spill] sm:$0xff] }
 0x188   :  { %4024 = vmatprep.subr.mxu0 %v6848_v15  ;;  %4059 = vmatprep.subr.mxu1 %v6848_v15 }
 0x189   :  { %4025 = vmatpush3.msra.mxu0 %v5247_v11  ;;  %4060 = vmatpush3.msra.mxu1 %v5249_v12  ;;  %v6861_v11 = vld [vmem:[#allocation31_spill] sm:$0xff]  ;;  %v6862_v12 = vld [vmem:[#allocation32_spill] sm:$0xff] }
 0x18a   :  { %4026 = vmatprep.subr.mxu0 %v6848_v15  ;;  %4061 = vmatprep.subr.mxu1 %v6848_v15 }
 0x18b   :  { %4027 = vmatpush3.msra.mxu0 %v5255_v13  ;;  %4062 = vmatpush3.msra.mxu1 %v5257_v14  ;;  %v6863_v13 = vld [vmem:[#allocation33_spill] sm:$0xff]  ;;  %v6864_v14 = vld [vmem:[#allocation34_spill] sm:$0xff] }
 0x18c   :  { %4028 = vmatprep.subr.mxu0 %v6848_v15  ;;  %4063 = vmatprep.subr.mxu1 %v6848_v15 }
 0x18d   :  { %4029 = vmatpush3.msra.mxu0 %v6851_v1  ;;  %4064 = vmatpush3.msra.mxu1 %v6852_v2 }
 0x18e   :  { %4030 = vmatprep.subr.mxu0 %v6848_v15  ;;  %4065 = vmatprep.subr.mxu1 %v6848_v15 }
 0x18f   :  { %4031 = vmatpush3.msra.mxu0 %v6853_v3  ;;  %4066 = vmatpush3.msra.mxu1 %v6854_v4  ;;  %v650_v3 = vld [vmem:[#allocation4 + $0x30] sm:$0xff]  ;;  %v741_v4 = vld [vmem:[#allocation4 + $0x38] sm:$0xff] }
 0x190   :  { %4032 = vmatprep.subr.mxu0 %v6848_v15  ;;  %4067 = vmatprep.subr.mxu1 %v6848_v15 }
 0x191   :  { %4033 = vmatpush3.msra.mxu0 %v6855_v5  ;;  %4068 = vmatpush3.msra.mxu1 %v6856_v6 }
 0x192   :  { %4034 = vmatprep.subr.mxu0 %v6848_v15  ;;  %4069 = vmatprep.subr.mxu1 %v6848_v15 }
 0x193   :  { %4035 = vmatpush3.msra.mxu0 %v6857_v7  ;;  %4070 = vmatpush3.msra.mxu1 %v6858_v8 }
 0x194   :  { %4036 = vmatprep.subr.mxu0 %v6848_v15  ;;  %4071 = vmatprep.subr.mxu1 %v6848_v15 }
 0x195   :  { %4037 = vmatpush3.msra.mxu0 %v6859_v9  ;;  %4072 = vmatpush3.msra.mxu1 %v6860_v10 }
 0x196   :  { %4038 = vmatprep.subr.mxu0 %v6848_v15  ;;  %4073 = vmatprep.subr.mxu1 %v6848_v15 }
 0x197   :  { %4039 = vmatpush3.msra.mxu0 %v6861_v11  ;;  %4074 = vmatpush3.msra.mxu1 %v6862_v12 }
 0x198   :  { %4040 = vmatprep.subr.mxu0 %v6848_v15  ;;  %4075 = vmatprep.subr.mxu1 %v6848_v15 }
 0x199   :  { %4041 = vmatpush3.msra.mxu0 %v6863_v13  ;;  %4076 = vmatpush3.msra.mxu1 %v6864_v14 }
 0x19a   :  { %4042 = vmatprep.subr.mxu0 %v6848_v15  ;;  %4077 = vmatprep.subr.mxu1 %v6848_v15 }
 0x19b   :  { %4043 = vmatpush3.msra.mxu0 %v6865_v20  ;;  %4078 = vmatpush3.msra.mxu1 %v6866_v21 }
 0x19c   :  { %4044 = vmatprep.subr.mxu0 %v6848_v15  ;;  %4079 = vmatprep.subr.mxu1 %v6848_v15 }
 0x19d   :  { %4045 = vmatpush3.msra.mxu0 %v6867_v29  ;;  %4080 = vmatpush3.msra.mxu1 %v6868_v28 }
 0x19e   :  { %4046 = vmatprep.mubr.msk.f32.mxu0 %vm5152_vm0, %v6848_v15  ;;  %4081 = vmatprep.mubr.msk.f32.mxu1 %vm5152_vm0, %v6848_v15 }
 0x19f   :  { %4084 = vmatprep.subr.mxu0 %v6848_v15  ;;  %4119 = vmatprep.subr.mxu1 %v6848_v15 }
 0x21c   :  { %v544_v26 = vpop.f32.mrf.mxu0  ;;  %v639_v25 = vpop.f32.mrf.mxu1 }
 0x21d   :  { %v548_v23 = vadd.f32 %v544_v26, %v461_v30  ;;  %v643_v22 = vadd.f32 %v639_v25, %v556_v31 }
 0x21e   :  { %v3908_v24 = vpop.f32.mrf.mxu0  ;;  %v3943_v27 = vpop.f32.mrf.mxu1 }
 0x21f   :  { %v3169_v33 = vmul.f32 -1.442695, %v548_v23  ;;  %v3170_v0 = vmul.f32 -1.442695, %v643_v22  ;;  %v840_v22 = vld [vmem:[#allocation4 + $0x48] sm:$0xff] }
 0x221   :  { %4883 = vpow2.f32 %v3169_v33  ;;  %v935_v33 = vld [vmem:[#allocation4 + $0x40] sm:$0xff] }
 0x222   :  { %4885 = vpow2.f32 %v3170_v0 }
 0x22e   :  { %v4884_v17 = vpop.eup %4883 }
 0x22f   :  { %v4886_v18 = vpop.eup %4885  ;;  %v552_v1 = vadd.f32 1.0, %v4884_v17 }
 0x230   :  { %v647_v2 = vadd.f32 1.0, %v4886_v18 }
 0x231   :  { %4887 = vrcp.f32 %v552_v1 }
 0x232   :  { %4889 = vrcp.f32 %v647_v2 }
 0x23d   :  { %v733_v5 = vpop.f32.mrf.mxu0  ;;  %v824_v6 = vpop.f32.mrf.mxu1 }
 0x23e   :  { %v737_v7 = vadd.f32 %v733_v5, %v650_v3  ;;  %v828_v8 = vadd.f32 %v824_v6, %v741_v4  ;;  %v4888_v12 = vpop.eup %4887  ;;  %v1029_v6 = vld [vmem:[#allocation4 + $0x50] sm:$0xff] }
 0x23f   :  { %v3978_v9 = vpop.f32.mrf.mxu0  ;;  %v4013_v10 = vpop.f32.mrf.mxu1  ;;  %v555_v20 = vmul.f32 %v4888_v12, %v5545_v32  ;;  %v5890_v32 = vld [vmem:[#allocation10 + $0x8] sm:$0xff] }
 0x240   :  { %4891 = vtanh.f32 %v737_v7  ;;  %v3171_v11 = vmul.f32 -1.442695, %v828_v8  ;;  %v4890_v13 = vpop.eup %4889  ;;  %6886 = vst [vmem:[#allocation36_spill] sm:$0xff] %v5890_v32  ;;  %v1120_v7 = vld [vmem:[#allocation4 + $0x58] sm:$0xff] }
 0x242   :  { %4893 = vpow2.f32 %v3171_v11 }
 0x24d   :  { %v4892_v14 = vpop.eup %4891 }
 0x24e   :  { %v739_v21 = vmul.f32 %v4892_v14, %v4890_v13 }
 0x24f   :  { %v4894_v29 = vpop.eup %4893 }
 0x250   :  { %v5692_v28 = vadd.f32 %v739_v21, %v555_v20  ;;  %v832_v26 = vadd.f32 1.0, %v4894_v29 }
 0x252   :  { %4895 = vtanh.f32 %v5692_v28 }
 0x253   :  { %4897 = vrcp.f32 %v832_v26 }
 0x25f   :  { %v4896_v25 = vpop.eup %4895 }
 0x260   :  { %v4898_v24 = vpop.eup %4897 }
 0x261   :  { %v5695_v27 = vmul.f32 %v4898_v24, %v4896_v25 }
 0x263   :  { %838 = vst [vmem:[#allocation12 + $0x8] sm:$0xff] %v5695_v27  ;;  %4047 = vmatmul.mubr.f32.vlgmr.msra.gmra.mxu0 %v5695_v27  ;;  %4082 = vmatmul.mubr.f32.vlgmr.msra.gmra.mxu1 %v5695_v27 }
 0x264   :  { %4085 = vmatpush3.msra.mxu0 %v5339_v34  ;;  %4120 = vmatpush3.msra.mxu1 %v5341_v35  ;;  %v5774_v34 = vld [vmem:[#allocation10 + $0x1e8] sm:$0xff]  ;;  %v5776_v35 = vld [vmem:[#allocation10 + $0x1e0] sm:$0xff] }
 0x265   :  { %4086 = vmatprep.subr.mxu0 %v6848_v15  ;;  %4121 = vmatprep.subr.mxu1 %v6848_v15 }
 0x266   :  { %4087 = vmatpush3.msra.mxu0 %v5347_v36  ;;  %4122 = vmatpush3.msra.mxu1 %v5349_v37  ;;  %v5782_v36 = vld [vmem:[#allocation10 + $0x1c8] sm:$0xff]  ;;  %v5784_v37 = vld [vmem:[#allocation10 + $0x1c0] sm:$0xff] }
 0x267   :  { %4088 = vmatprep.subr.mxu0 %v6848_v15  ;;  %4123 = vmatprep.subr.mxu1 %v6848_v15 }
 0x268   :  { %4089 = vmatpush3.msra.mxu0 %v5355_v38  ;;  %4124 = vmatpush3.msra.mxu1 %v5357_v39  ;;  %v5790_v38 = vld [vmem:[#allocation10 + $0x1a8] sm:$0xff]  ;;  %v5792_v39 = vld [vmem:[#allocation10 + $0x1a0] sm:$0xff] }
 0x269   :  { %4090 = vmatprep.subr.mxu0 %v6848_v15  ;;  %4125 = vmatprep.subr.mxu1 %v6848_v15 }
 0x26a   :  { %4091 = vmatpush3.msra.mxu0 %v5363_v40  ;;  %4126 = vmatpush3.msra.mxu1 %v5365_v41  ;;  %v5798_v40 = vld [vmem:[#allocation10 + $0x188] sm:$0xff]  ;;  %v5800_v41 = vld [vmem:[#allocation10 + $0x180] sm:$0xff] }
 0x26b   :  { %4092 = vmatprep.subr.mxu0 %v6848_v15  ;;  %4127 = vmatprep.subr.mxu1 %v6848_v15 }
 0x26c   :  { %4093 = vmatpush3.msra.mxu0 %v5371_v42  ;;  %4128 = vmatpush3.msra.mxu1 %v5373_v43  ;;  %v5806_v42 = vld [vmem:[#allocation10 + $0x168] sm:$0xff]  ;;  %v5808_v43 = vld [vmem:[#allocation10 + $0x160] sm:$0xff] }
 0x26d   :  { %4094 = vmatprep.subr.mxu0 %v6848_v15  ;;  %4129 = vmatprep.subr.mxu1 %v6848_v15 }
 0x26e   :  { %4095 = vmatpush3.msra.mxu0 %v5379_v44  ;;  %4130 = vmatpush3.msra.mxu1 %v5381_v45  ;;  %v5814_v44 = vld [vmem:[#allocation10 + $0x148] sm:$0xff]  ;;  %v5816_v45 = vld [vmem:[#allocation10 + $0x140] sm:$0xff] }
 0x26f   :  { %4096 = vmatprep.subr.mxu0 %v6848_v15  ;;  %4131 = vmatprep.subr.mxu1 %v6848_v15 }
 0x270   :  { %4097 = vmatpush3.msra.mxu0 %v5387_v46  ;;  %4132 = vmatpush3.msra.mxu1 %v5389_v47  ;;  %v5822_v46 = vld [vmem:[#allocation10 + $0x128] sm:$0xff]  ;;  %v5824_v47 = vld [vmem:[#allocation10 + $0x120] sm:$0xff] }
 0x271   :  { %4098 = vmatprep.subr.mxu0 %v6848_v15  ;;  %4133 = vmatprep.subr.mxu1 %v6848_v15  ;;  %6869 = vst [vmem:[#allocation39_spill] sm:$0xff] %v5824_v47 }
 0x272   :  { %4099 = vmatpush3.msra.mxu0 %v5395_v48  ;;  %4134 = vmatpush3.msra.mxu1 %v5397_v49  ;;  %v5830_v48 = vld [vmem:[#allocation10 + $0x108] sm:$0xff]  ;;  %v5832_v49 = vld [vmem:[#allocation10 + $0x100] sm:$0xff] }
 0x273   :  { %4100 = vmatprep.subr.mxu0 %v6848_v15  ;;  %4135 = vmatprep.subr.mxu1 %v6848_v15  ;;  %6870 = vst [vmem:[#allocation40_spill] sm:$0xff] %v5830_v48  ;;  %6871 = vst [vmem:[#allocation21_spill] sm:$0xff] %v5832_v49 }
 0x274   :  { %4101 = vmatpush3.msra.mxu0 %v5403_v50  ;;  %4136 = vmatpush3.msra.mxu1 %v5405_v51  ;;  %v5838_v50 = vld [vmem:[#allocation10 + $0xe8] sm:$0xff]  ;;  %v5840_v51 = vld [vmem:[#allocation10 + $0xe0] sm:$0xff] }
 0x275   :  { %4102 = vmatprep.subr.mxu0 %v6848_v15  ;;  %4137 = vmatprep.subr.mxu1 %v6848_v15  ;;  %6872 = vst [vmem:[#allocation22_spill] sm:$0xff] %v5838_v50  ;;  %6873 = vst [vmem:[#allocation23_spill] sm:$0xff] %v5840_v51 }
 0x276   :  { %4103 = vmatpush3.msra.mxu0 %v5411_v52  ;;  %4138 = vmatpush3.msra.mxu1 %v5413_v53  ;;  %v5844_v52 = vld [vmem:[#allocation10 + $0xc8] sm:$0xff]  ;;  %v5846_v53 = vld [vmem:[#allocation10 + $0xc0] sm:$0xff] }
 0x277   :  { %4104 = vmatprep.subr.mxu0 %v6848_v15  ;;  %4139 = vmatprep.subr.mxu1 %v6848_v15  ;;  %6874 = vst [vmem:[#allocation24_spill] sm:$0xff] %v5844_v52  ;;  %6875 = vst [vmem:[#allocation25_spill] sm:$0xff] %v5846_v53 }
 0x278   :  { %4105 = vmatpush3.msra.mxu0 %v5419_v54  ;;  %4140 = vmatpush3.msra.mxu1 %v5421_v55  ;;  %v5850_v54 = vld [vmem:[#allocation10 + $0xa8] sm:$0xff]  ;;  %v5852_v55 = vld [vmem:[#allocation10 + $0xa0] sm:$0xff] }
 0x279   :  { %4106 = vmatprep.subr.mxu0 %v6848_v15  ;;  %4141 = vmatprep.subr.mxu1 %v6848_v15  ;;  %6876 = vst [vmem:[#allocation26_spill] sm:$0xff] %v5850_v54  ;;  %6877 = vst [vmem:[#allocation27_spill] sm:$0xff] %v5852_v55 }
 0x27a   :  { %4107 = vmatpush3.msra.mxu0 %v5427_v56  ;;  %4142 = vmatpush3.msra.mxu1 %v6849_v16  ;;  %v5858_v56 = vld [vmem:[#allocation10 + $0x88] sm:$0xff]  ;;  %v5892_v16 = vld [vmem:[#allocation10] sm:$0xff] }
 0x27b   :  { %4108 = vmatprep.subr.mxu0 %v6848_v15  ;;  %4143 = vmatprep.subr.mxu1 %v6848_v15  ;;  %6878 = vst [vmem:[#allocation28_spill] sm:$0xff] %v5858_v56  ;;  %6887 = vst [vmem:[#allocation37_spill] sm:$0xff] %v5892_v16 }
 0x27c   :  { %4109 = vmatpush3.msra.mxu0 %v5435_v58  ;;  %4144 = vmatpush3.msra.mxu1 %v6850_v19  ;;  %v5866_v58 = vld [vmem:[#allocation10 + $0x68] sm:$0xff] }
 0x27d   :  { %4110 = vmatprep.subr.mxu0 %v6848_v15  ;;  %4145 = vmatprep.subr.mxu1 %v6848_v15  ;;  %6880 = vst [vmem:[#allocation30_spill] sm:$0xff] %v5866_v58 }
 0x27e   :  { %4111 = vmatpush3.msra.mxu0 %v5443_v60  ;;  %4146 = vmatpush3.msra.mxu1 %v5445_v61  ;;  %v5874_v60 = vld [vmem:[#allocation10 + $0x48] sm:$0xff]  ;;  %v5876_v61 = vld [vmem:[#allocation10 + $0x40] sm:$0xff] }
 0x27f   :  { %4112 = vmatprep.subr.mxu0 %v6848_v15  ;;  %4147 = vmatprep.subr.mxu1 %v6848_v15  ;;  %6882 = vst [vmem:[#allocation32_spill] sm:$0xff] %v5874_v60  ;;  %6883 = vst [vmem:[#allocation33_spill] sm:$0xff] %v5876_v61 }
 0x280   :  { %4113 = vmatpush3.msra.mxu0 %v5451_v62  ;;  %4148 = vmatpush3.msra.mxu1 %v5453_v63  ;;  %v5882_v62 = vld [vmem:[#allocation10 + $0x28] sm:$0xff]  ;;  %v5884_v63 = vld [vmem:[#allocation10 + $0x20] sm:$0xff] }
 0x281   :  { %4114 = vmatprep.subr.mxu0 %v6848_v15  ;;  %4149 = vmatprep.subr.mxu1 %v6848_v15  ;;  %6884 = vst [vmem:[#allocation34_spill] sm:$0xff] %v5882_v62  ;;  %6885 = vst [vmem:[#allocation35_spill] sm:$0xff] %v5884_v63 }
 0x282   :  { %4115 = vmatpush3.msra.mxu0 %v5459_v57  ;;  %4116 = vmatprep.mubr.msk.f32.mxu0 %vm5152_vm0, %v6848_v15  ;;  %v5860_v57 = vld [vmem:[#allocation10 + $0x80] sm:$0xff] }
 0x283   :  { %4150 = vmatpush3.msra.mxu1 %v5463_v59  ;;  %4151 = vmatprep.mubr.msk.f32.mxu1 %vm5152_vm0, %v6848_v15  ;;  %6879 = vst [vmem:[#allocation29_spill] sm:$0xff] %v5860_v57  ;;  %v5868_v59 = vld [vmem:[#allocation10 + $0x60] sm:$0xff] }
 0x284   :  { %4117 = vmatmul.mubr.f32.vlgmr.msra.gmra.mxu0 %v5695_v27  ;;  %4152 = vmatmul.mubr.f32.vlgmr.msra.gmra.mxu1 %v5695_v27  ;;  %6881 = vst [vmem:[#allocation31_spill] sm:$0xff] %v5868_v59 }
 0x285   :  { %4154 = vmatprep.subr.mxu0 %v6848_v15  ;;  %4189 = vmatprep.subr.mxu1 %v6848_v15 }
 0x286   :  { %4186 = vmatprep.mubr.msk.f32.mxu0 %vm5152_vm0, %v6848_v15  ;;  %4221 = vmatprep.mubr.msk.f32.mxu1 %vm5152_vm0, %v6848_v15 }
 0x287   :  { %4155 = vmatpush3.msra.mxu0 %v5774_v34  ;;  %4190 = vmatpush3.msra.mxu1 %v5776_v35 }
 0x288   :  { %4156 = vmatprep.subr.mxu0 %v6848_v15  ;;  %4191 = vmatprep.subr.mxu1 %v6848_v15 }
 0x289   :  { %4157 = vmatpush3.msra.mxu0 %v5782_v36  ;;  %4192 = vmatpush3.msra.mxu1 %v5784_v37 }
 0x28a   :  { %4158 = vmatprep.subr.mxu0 %v6848_v15  ;;  %4193 = vmatprep.subr.mxu1 %v6848_v15 }
 0x28b   :  { %4159 = vmatpush3.msra.mxu0 %v5790_v38  ;;  %4194 = vmatpush3.msra.mxu1 %v5792_v39 }
 0x28c   :  { %4160 = vmatprep.subr.mxu0 %v6848_v15  ;;  %4195 = vmatprep.subr.mxu1 %v6848_v15 }
 0x28d   :  { %4161 = vmatpush3.msra.mxu0 %v5798_v40  ;;  %4196 = vmatpush3.msra.mxu1 %v5800_v41 }
 0x28e   :  { %4162 = vmatprep.subr.mxu0 %v6848_v15  ;;  %4197 = vmatprep.subr.mxu1 %v6848_v15 }
 0x28f   :  { %4163 = vmatpush3.msra.mxu0 %v5806_v42  ;;  %4198 = vmatpush3.msra.mxu1 %v5808_v43 }
 0x290   :  { %4164 = vmatprep.subr.mxu0 %v6848_v15  ;;  %4199 = vmatprep.subr.mxu1 %v6848_v15 }
 0x291   :  { %4165 = vmatpush3.msra.mxu0 %v5814_v44  ;;  %4200 = vmatpush3.msra.mxu1 %v5816_v45 }
 0x292   :  { %4166 = vmatprep.subr.mxu0 %v6848_v15  ;;  %4201 = vmatprep.subr.mxu1 %v6848_v15 }
 0x293   :  { %4167 = vmatpush3.msra.mxu0 %v5822_v46  ;;  %4202 = vmatpush3.msra.mxu1 %v5824_v47 }
 0x294   :  { %4168 = vmatprep.subr.mxu0 %v6848_v15  ;;  %4203 = vmatprep.subr.mxu1 %v6848_v15 }
 0x295   :  { %4169 = vmatpush3.msra.mxu0 %v5830_v48  ;;  %4204 = vmatpush3.msra.mxu1 %v5832_v49 }
 0x296   :  { %4170 = vmatprep.subr.mxu0 %v6848_v15  ;;  %4205 = vmatprep.subr.mxu1 %v6848_v15 }
 0x297   :  { %4171 = vmatpush3.msra.mxu0 %v5838_v50  ;;  %4206 = vmatpush3.msra.mxu1 %v5840_v51 }
 0x298   :  { %4172 = vmatprep.subr.mxu0 %v6848_v15  ;;  %4207 = vmatprep.subr.mxu1 %v6848_v15 }
 0x299   :  { %4173 = vmatpush3.msra.mxu0 %v5844_v52  ;;  %4208 = vmatpush3.msra.mxu1 %v5846_v53 }
 0x29a   :  { %4174 = vmatprep.subr.mxu0 %v6848_v15  ;;  %4209 = vmatprep.subr.mxu1 %v6848_v15 }
 0x29b   :  { %4175 = vmatpush3.msra.mxu0 %v5850_v54  ;;  %4210 = vmatpush3.msra.mxu1 %v5852_v55 }
 0x29c   :  { %4176 = vmatprep.subr.mxu0 %v6848_v15  ;;  %4211 = vmatprep.subr.mxu1 %v6848_v15 }
 0x29d   :  { %4177 = vmatpush3.msra.mxu0 %v5858_v56  ;;  %4212 = vmatpush3.msra.mxu1 %v5860_v57 }
 0x29e   :  { %4178 = vmatprep.subr.mxu0 %v6848_v15  ;;  %4213 = vmatprep.subr.mxu1 %v6848_v15 }
 0x29f   :  { %4179 = vmatpush3.msra.mxu0 %v5866_v58  ;;  %4214 = vmatpush3.msra.mxu1 %v5868_v59 }
 0x2a0   :  { %4180 = vmatprep.subr.mxu0 %v6848_v15  ;;  %4215 = vmatprep.subr.mxu1 %v6848_v15 }
 0x2a1   :  { %4181 = vmatpush3.msra.mxu0 %v5874_v60  ;;  %4216 = vmatpush3.msra.mxu1 %v5876_v61 }
 0x2a2   :  { %4182 = vmatprep.subr.mxu0 %v6848_v15  ;;  %4217 = vmatprep.subr.mxu1 %v6848_v15 }
 0x2a3   :  { %4183 = vmatpush3.msra.mxu0 %v5882_v62  ;;  %4218 = vmatpush3.msra.mxu1 %v5884_v63 }
 0x2a4   :  { %4184 = vmatprep.subr.mxu0 %v6848_v15  ;;  %4219 = vmatprep.subr.mxu1 %v6848_v15 }
 0x2a5   :  { %4185 = vmatpush3.msra.mxu0 %v5890_v32  ;;  %4220 = vmatpush3.msra.mxu1 %v5892_v16 }
 0x2a6   :  { %4224 = vmatprep.subr.mxu0 %v6848_v15  ;;  %4259 = vmatprep.subr.mxu1 %v6848_v15 }
 0x323   :  { %v923_v19 = vpop.f32.mrf.mxu0  ;;  %v1018_v30 = vpop.f32.mrf.mxu1 }
 0x324   :  { %v927_v0 = vadd.f32 %v923_v19, %v840_v22  ;;  %v1022_v17 = vadd.f32 %v1018_v30, %v935_v33  ;;  %v5908_v22 = vld [vmem:[#allocation10 + $0x1f0] sm:$0xff]  ;;  %v5910_v33 = vld [vmem:[#allocation10 + $0x1f8] sm:$0xff] }
 0x325   :  { %v4048_v31 = vpop.f32.mrf.mxu0  ;;  %v4083_v23 = vpop.f32.mrf.mxu1 }
 0x326   :  { %v3172_v18 = vmul.f32 -1.442695, %v927_v0  ;;  %v3173_v1 = vmul.f32 -1.442695, %v1022_v17  ;;  %v5917_v0 = vld [vmem:[#allocation10 + $0x1d8] sm:$0xff]  ;;  %v5923_v17 = vld [vmem:[#allocation10 + $0x1b0] sm:$0xff] }
 0x328   :  { %4899 = vpow2.f32 %v3172_v18  ;;  %v5925_v18 = vld [vmem:[#allocation10 + $0x1b8] sm:$0xff] }
 0x329   :  { %4901 = vpow2.f32 %v3173_v1  ;;  %v5931_v1 = vld [vmem:[#allocation10 + $0x190] sm:$0xff] }
 0x335   :  { %v4900_v2 = vpop.eup %4899 }
 0x336   :  { %v4902_v3 = vpop.eup %4901  ;;  %v931_v4 = vadd.f32 1.0, %v4900_v2  ;;  %v5933_v2 = vld [vmem:[#allocation10 + $0x198] sm:$0xff] }
 0x337   :  { %v1026_v5 = vadd.f32 1.0, %v4902_v3  ;;  %v5939_v3 = vld [vmem:[#allocation10 + $0x170] sm:$0xff] }
 0x338   :  { %4903 = vrcp.f32 %v931_v4  ;;  %v5941_v4 = vld [vmem:[#allocation10 + $0x178] sm:$0xff] }
 0x339   :  { %4905 = vrcp.f32 %v1026_v5  ;;  %v5947_v5 = vld [vmem:[#allocation10 + $0x150] sm:$0xff] }
 0x344   :  { %v1112_v8 = vpop.f32.mrf.mxu0  ;;  %v1203_v9 = vpop.f32.mrf.mxu1 }
 0x345   :  { %v1116_v10 = vadd.f32 %v1112_v8, %v1029_v6  ;;  %v1207_v11 = vadd.f32 %v1203_v9, %v1120_v7  ;;  %v4904_v20 = vpop.eup %4903  ;;  %v5949_v6 = vld [vmem:[#allocation10 + $0x158] sm:$0xff]  ;;  %v5955_v7 = vld [vmem:[#allocation10 + $0x130] sm:$0xff] }
 0x346   :  { %v4118_v12 = vpop.f32.mrf.mxu0  ;;  %v4153_v13 = vpop.f32.mrf.mxu1  ;;  %v934_v26 = vmul.f32 %v4904_v20, %v5692_v28  ;;  %v5915_v28 = vld [vmem:[#allocation10 + $0x1d0] sm:$0xff]  ;;  %v5957_v8 = vld [vmem:[#allocation10 + $0x138] sm:$0xff] }
 0x347   :  { %4907 = vtanh.f32 %v1116_v10  ;;  %v3174_v14 = vmul.f32 -1.442695, %v1207_v11  ;;  %v4906_v21 = vpop.eup %4905  ;;  %v5963_v9 = vld [vmem:[#allocation10 + $0x110] sm:$0xff]  ;;  %v5965_v10 = vld [vmem:[#allocation10 + $0x118] sm:$0xff] }
 0x348   :  { %v5971_v11 = vld [vmem:[#allocation10 + $0xf0] sm:$0xff]  ;;  %v5973_v12 = vld [vmem:[#allocation10 + $0xf8] sm:$0xff] }
 0x349   :  { %4909 = vpow2.f32 %v3174_v14  ;;  %v5979_v13 = vld [vmem:[#allocation10 + $0xd0] sm:$0xff]  ;;  %v5981_v14 = vld [vmem:[#allocation10 + $0xd8] sm:$0xff] }
 0x34a   :  { %v5987_v20 = vld [vmem:[#allocation10 + $0xb0] sm:$0xff] }
 0x354   :  { %v4908_v29 = vpop.eup %4907 }
 0x355   :  { %v1118_v25 = vmul.f32 %v4908_v29, %v4906_v21  ;;  %v5989_v21 = vld [vmem:[#allocation10 + $0xb8] sm:$0xff]  ;;  %v5995_v29 = vld [vmem:[#allocation10 + $0x90] sm:$0xff] }
 0x356   :  { %v4910_v24 = vpop.eup %4909  ;;  %6888 = vst [vmem:[#allocation38_spill] sm:$0xff] %v5995_v29 }
 0x357   :  { %v5903_v27 = vadd.f32 %v1118_v25, %v934_v26  ;;  %v1211_v19 = vadd.f32 1.0, %v4910_v24  ;;  %v5997_v26 = vld [vmem:[#allocation10 + $0x98] sm:$0xff]  ;;  %v6003_v25 = vld [vmem:[#allocation10 + $0x70] sm:$0xff] }
 0x358   :  { %6889 = vst [vmem:[#allocation41_spill] sm:$0xff] %v5997_v26  ;;  %v6005_v24 = vld [vmem:[#allocation10 + $0x78] sm:$0xff] }
 0x359   :  { %4911 = vtanh.f32 %v5903_v27  ;;  %6890 = vst [vmem:[#allocation42_spill] sm:$0xff] %v6005_v24 }
 0x35a   :  { %4913 = vrcp.f32 %v1211_v19  ;;  %v6011_v19 = vld [vmem:[#allocation10 + $0x50] sm:$0xff] }
 0x366   :  { %v4912_v30 = vpop.eup %4911 }
 0x367   :  { %v4914_v31 = vpop.eup %4913 }
 0x368   :  { %v5906_v23 = vmul.f32 %v4914_v31, %v4912_v30  ;;  %v6013_v30 = vld [vmem:[#allocation10 + $0x58] sm:$0xff]  ;;  %v6019_v31 = vld [vmem:[#allocation10 + $0x30] sm:$0xff] }
 0x36a   :  { %1217 = vst [vmem:[#allocation12 + $0x10] sm:$0xff] %v5906_v23  ;;  %4187 = vmatmul.mubr.f32.vlgmr.msra.gmra.mxu0 %v5906_v23  ;;  %4222 = vmatmul.mubr.f32.vlgmr.msra.gmra.mxu1 %v5906_v23 }
 0x36b   :  { %4225 = vmatpush3.msra.mxu0 %v5908_v22  ;;  %4260 = vmatpush3.msra.mxu1 %v5910_v33 }
 0x36c   :  { %4226 = vmatprep.subr.mxu0 %v6848_v15  ;;  %4261 = vmatprep.subr.mxu1 %v6848_v15 }
 0x36d   :  { %4227 = vmatpush3.msra.mxu0 %v5915_v28  ;;  %4262 = vmatpush3.msra.mxu1 %v5917_v0 }
 0x36e   :  { %4228 = vmatprep.subr.mxu0 %v6848_v15  ;;  %4263 = vmatprep.subr.mxu1 %v6848_v15 }
 0x36f   :  { %4229 = vmatpush3.msra.mxu0 %v5923_v17  ;;  %4264 = vmatpush3.msra.mxu1 %v5925_v18 }
 0x370   :  { %4230 = vmatprep.subr.mxu0 %v6848_v15  ;;  %4265 = vmatprep.subr.mxu1 %v6848_v15 }
 0x371   :  { %4231 = vmatpush3.msra.mxu0 %v5931_v1  ;;  %4266 = vmatpush3.msra.mxu1 %v5933_v2 }
 0x372   :  { %4232 = vmatprep.subr.mxu0 %v6848_v15  ;;  %4267 = vmatprep.subr.mxu1 %v6848_v15 }
 0x373   :  { %4233 = vmatpush3.msra.mxu0 %v5939_v3  ;;  %4268 = vmatpush3.msra.mxu1 %v5941_v4 }
 0x374   :  { %4234 = vmatprep.subr.mxu0 %v6848_v15  ;;  %4269 = vmatprep.subr.mxu1 %v6848_v15 }
 0x375   :  { %4235 = vmatpush3.msra.mxu0 %v5947_v5  ;;  %4270 = vmatpush3.msra.mxu1 %v5949_v6 }
 0x376   :  { %4236 = vmatprep.subr.mxu0 %v6848_v15  ;;  %4271 = vmatprep.subr.mxu1 %v6848_v15 }
 0x377   :  { %4237 = vmatpush3.msra.mxu0 %v5955_v7  ;;  %4272 = vmatpush3.msra.mxu1 %v5957_v8 }
 0x378   :  { %4238 = vmatprep.subr.mxu0 %v6848_v15  ;;  %4273 = vmatprep.subr.mxu1 %v6848_v15 }
 0x379   :  { %4239 = vmatpush3.msra.mxu0 %v5963_v9  ;;  %4274 = vmatpush3.msra.mxu1 %v5965_v10 }
 0x37a   :  { %4240 = vmatprep.subr.mxu0 %v6848_v15  ;;  %4275 = vmatprep.subr.mxu1 %v6848_v15 }
 0x37b   :  { %4241 = vmatpush3.msra.mxu0 %v5971_v11  ;;  %4276 = vmatpush3.msra.mxu1 %v5973_v12 }
 0x37c   :  { %4242 = vmatprep.subr.mxu0 %v6848_v15  ;;  %4277 = vmatprep.subr.mxu1 %v6848_v15 }
 0x37d   :  { %4243 = vmatpush3.msra.mxu0 %v5979_v13  ;;  %4278 = vmatpush3.msra.mxu1 %v5981_v14 }
 0x37e   :  { %4244 = vmatprep.subr.mxu0 %v6848_v15  ;;  %4279 = vmatprep.subr.mxu1 %v6848_v15 }
 0x37f   :  { %4245 = vmatpush3.msra.mxu0 %v5987_v20  ;;  %4280 = vmatpush3.msra.mxu1 %v5989_v21 }
 0x380   :  { %4246 = vmatprep.subr.mxu0 %v6848_v15  ;;  %4281 = vmatprep.subr.mxu1 %v6848_v15 }
 0x381   :  { %4247 = vmatpush3.msra.mxu0 %v5995_v29  ;;  %4282 = vmatpush3.msra.mxu1 %v5997_v26  ;;  %v6021_v29 = vld [vmem:[#allocation10 + $0x38] sm:$0xff]  ;;  %v6027_v26 = vld [vmem:[#allocation10 + $0x10] sm:$0xff] }
 0x382   :  { %4248 = vmatprep.subr.mxu0 %v6848_v15  ;;  %4283 = vmatprep.subr.mxu1 %v6848_v15 }
 0x383   :  { %4249 = vmatpush3.msra.mxu0 %v6003_v25  ;;  %4284 = vmatpush3.msra.mxu1 %v6005_v24  ;;  %v6031_v24 = vld [vmem:[#allocation10 + $0x18] sm:$0xff] }
 0x384   :  { %4250 = vmatprep.subr.mxu0 %v6848_v15  ;;  %4285 = vmatprep.subr.mxu1 %v6848_v15 }
 0x385   :  { %4251 = vmatpush3.msra.mxu0 %v6011_v19  ;;  %4286 = vmatpush3.msra.mxu1 %v6013_v30 }
 0x386   :  { %4252 = vmatprep.subr.mxu0 %v6848_v15  ;;  %4287 = vmatprep.subr.mxu1 %v6848_v15 }
 0x387   :  { %4253 = vmatpush3.msra.mxu0 %v6019_v31  ;;  %4288 = vmatpush3.msra.mxu1 %v6021_v29 }
 0x388   :  { %4254 = vmatprep.subr.mxu0 %v6848_v15  ;;  %4289 = vmatprep.subr.mxu1 %v6848_v15 }
 0x389   :  { %4255 = vmatpush3.msra.mxu0 %v6027_v26  ;;  %4256 = vmatprep.mubr.msk.f32.mxu0 %vm5152_vm0, %v6848_v15 }
 0x38a   :  { %4290 = vmatpush3.msra.mxu1 %v6031_v24  ;;  %4291 = vmatprep.mubr.msk.f32.mxu1 %vm5152_vm0, %v6848_v15 }
 0x38b   :  { %4257 = vmatmul.mubr.f32.vlgmr.msra.gmra.mxu0 %v5906_v23  ;;  %4292 = vmatmul.mubr.f32.vlgmr.msra.gmra.mxu1 %v5906_v23 }
 0x38c   :  { %4294 = vmatprep.subr.mxu0 %v6848_v15  ;;  %4329 = vmatprep.subr.mxu1 %v6848_v15 }
 0x38d   :  { %4295 = vmatpush3.msra.mxu0 %v5774_v34  ;;  %4330 = vmatpush3.msra.mxu1 %v5776_v35 }
 0x38e   :  { %4296 = vmatprep.subr.mxu0 %v6848_v15  ;;  %4331 = vmatprep.subr.mxu1 %v6848_v15 }
 0x38f   :  { %4297 = vmatpush3.msra.mxu0 %v5782_v36  ;;  %4332 = vmatpush3.msra.mxu1 %v5784_v37 }
 0x390   :  { %4298 = vmatprep.subr.mxu0 %v6848_v15  ;;  %4333 = vmatprep.subr.mxu1 %v6848_v15 }
 0x391   :  { %4299 = vmatpush3.msra.mxu0 %v5790_v38  ;;  %4334 = vmatpush3.msra.mxu1 %v5792_v39 }
 0x392   :  { %4300 = vmatprep.subr.mxu0 %v6848_v15  ;;  %4335 = vmatprep.subr.mxu1 %v6848_v15 }
 0x393   :  { %4301 = vmatpush3.msra.mxu0 %v5798_v40  ;;  %4336 = vmatpush3.msra.mxu1 %v5800_v41 }
 0x394   :  { %4302 = vmatprep.subr.mxu0 %v6848_v15  ;;  %4337 = vmatprep.subr.mxu1 %v6848_v15 }
 0x395   :  { %4303 = vmatpush3.msra.mxu0 %v5806_v42  ;;  %4338 = vmatpush3.msra.mxu1 %v5808_v43 }
 0x396   :  { %4304 = vmatprep.subr.mxu0 %v6848_v15  ;;  %4339 = vmatprep.subr.mxu1 %v6848_v15 }
 0x397   :  { %4305 = vmatpush3.msra.mxu0 %v5814_v44  ;;  %4340 = vmatpush3.msra.mxu1 %v5816_v45 }
 0x398   :  { %4306 = vmatprep.subr.mxu0 %v6848_v15  ;;  %4341 = vmatprep.subr.mxu1 %v6848_v15 }
 0x399   :  { %4307 = vmatpush3.msra.mxu0 %v5822_v46  ;;  %4342 = vmatpush3.msra.mxu1 %v5824_v47 }
 0x39a   :  { %4308 = vmatprep.subr.mxu0 %v6848_v15  ;;  %4343 = vmatprep.subr.mxu1 %v6848_v15 }
 0x39b   :  { %4309 = vmatpush3.msra.mxu0 %v5830_v48  ;;  %4344 = vmatpush3.msra.mxu1 %v5832_v49 }
 0x39c   :  { %4310 = vmatprep.subr.mxu0 %v6848_v15  ;;  %4345 = vmatprep.subr.mxu1 %v6848_v15 }
 0x39d   :  { %4311 = vmatpush3.msra.mxu0 %v5838_v50  ;;  %4346 = vmatpush3.msra.mxu1 %v5840_v51  ;;  %v1499_v51 = vld [vmem:[#allocation4 + $0x78] sm:$0xff] }
 0x39e   :  { %4312 = vmatprep.subr.mxu0 %v6848_v15  ;;  %4347 = vmatprep.subr.mxu1 %v6848_v15 }
 0x39f   :  { %4313 = vmatpush3.msra.mxu0 %v5844_v52  ;;  %4348 = vmatpush3.msra.mxu1 %v5846_v53  ;;  %v1408_v52 = vld [vmem:[#allocation4 + $0x70] sm:$0xff] }
 0x3a0   :  { %4314 = vmatprep.subr.mxu0 %v6848_v15  ;;  %4349 = vmatprep.subr.mxu1 %v6848_v15 }
 0x3a1   :  { %4315 = vmatpush3.msra.mxu0 %v5850_v54  ;;  %4350 = vmatpush3.msra.mxu1 %v5852_v55 }
 0x3a2   :  { %4316 = vmatprep.subr.mxu0 %v6848_v15  ;;  %4351 = vmatprep.subr.mxu1 %v6848_v15 }
 0x3a3   :  { %4317 = vmatpush3.msra.mxu0 %v5858_v56  ;;  %4352 = vmatpush3.msra.mxu1 %v5860_v57 }
 0x3a4   :  { %4318 = vmatprep.subr.mxu0 %v6848_v15  ;;  %4353 = vmatprep.subr.mxu1 %v6848_v15 }
 0x3a5   :  { %4319 = vmatpush3.msra.mxu0 %v5866_v58  ;;  %4354 = vmatpush3.msra.mxu1 %v5868_v59  ;;  %v1314_v59 = vld [vmem:[#allocation4 + $0x60] sm:$0xff] }
 0x3a6   :  { %4320 = vmatprep.subr.mxu0 %v6848_v15  ;;  %4355 = vmatprep.subr.mxu1 %v6848_v15 }
 0x3a7   :  { %4321 = vmatpush3.msra.mxu0 %v5874_v60  ;;  %4356 = vmatpush3.msra.mxu1 %v5876_v61  ;;  %v1219_v60 = vld [vmem:[#allocation4 + $0x68] sm:$0xff] }
 0x3a8   :  { %4322 = vmatprep.subr.mxu0 %v6848_v15  ;;  %4357 = vmatprep.subr.mxu1 %v6848_v15 }
 0x3a9   :  { %4323 = vmatpush3.msra.mxu0 %v5882_v62  ;;  %4358 = vmatpush3.msra.mxu1 %v5884_v63 }
 0x3aa   :  { %4324 = vmatprep.subr.mxu0 %v6848_v15  ;;  %4359 = vmatprep.subr.mxu1 %v6848_v15 }
 0x3ab   :  { %4325 = vmatpush3.msra.mxu0 %v5890_v32  ;;  %4360 = vmatpush3.msra.mxu1 %v5892_v16 }
 0x3ac   :  { %4326 = vmatprep.mubr.msk.f32.mxu0 %vm5152_vm0, %v6848_v15  ;;  %4361 = vmatprep.mubr.msk.f32.mxu1 %vm5152_vm0, %v6848_v15 }
 0x3ad   :  { %4364 = vmatprep.subr.mxu0 %v6848_v15  ;;  %4399 = vmatprep.subr.mxu1 %v6848_v15 }
 0x42a   :  { %v1302_v23 = vpop.f32.mrf.mxu0  ;;  %v1397_v63 = vpop.f32.mrf.mxu1 }
 0x42b   :  { %v1306_v58 = vadd.f32 %v1302_v23, %v1219_v60  ;;  %v1401_v32 = vadd.f32 %v1397_v63, %v1314_v59  ;;  %v6910_v23 = vld [vmem:[#allocation35_spill] sm:$0xff] }
 0x42c   :  { %v4188_v62 = vpop.f32.mrf.mxu0  ;;  %v4223_v61 = vpop.f32.mrf.mxu1 }
 0x42d   :  { %v3175_v57 = vmul.f32 -1.442695, %v1306_v58  ;;  %v3176_v16 = vmul.f32 -1.442695, %v1401_v32 }
 0x42f   :  { %4915 = vpow2.f32 %v3175_v57 }
 0x430   :  { %4917 = vpow2.f32 %v3176_v16 }
 0x43c   :  { %v4916_v56 = vpop.eup %4915 }
 0x43d   :  { %v4918_v55 = vpop.eup %4917  ;;  %v1310_v54 = vadd.f32 1.0, %v4916_v56 }
 0x43e   :  { %v1405_v53 = vadd.f32 1.0, %v4918_v55 }
 0x43f   :  { %4919 = vrcp.f32 %v1310_v54  ;;  %v6908_v54 = vld [vmem:[#allocation33_spill] sm:$0xff] }
 0x440   :  { %4921 = vrcp.f32 %v1405_v53  ;;  %v6907_v53 = vld [vmem:[#allocation32_spill] sm:$0xff] }
 0x44b   :  { %v1491_v50 = vpop.f32.mrf.mxu0  ;;  %v1582_v49 = vpop.f32.mrf.mxu1 }
 0x44c   :  { %v1495_v48 = vadd.f32 %v1491_v50, %v1408_v52  ;;  %v1586_v62 = vadd.f32 %v1582_v49, %v1499_v51  ;;  %v4920_v58 = vpop.eup %4919  ;;  %v6893_v52 = vld [vmem:[#allocation42_spill] sm:$0xff] }
 0x44d   :  { %v4258_v61 = vpop.f32.mrf.mxu0  ;;  %v4293_v47 = vpop.f32.mrf.mxu1  ;;  %v1313_v63 = vmul.f32 %v4920_v58, %v5903_v27  ;;  %v6909_v27 = vld [vmem:[#allocation34_spill] sm:$0xff] }
 0x44e   :  { %4923 = vtanh.f32 %v1495_v48  ;;  %v3177_v59 = vmul.f32 -1.442695, %v1586_v62  ;;  %v4922_v57 = vpop.eup %4921  ;;  %v6891_v47 = vld [vmem:[#allocation38_spill] sm:$0xff]  ;;  %v6892_v48 = vld [vmem:[#allocation41_spill] sm:$0xff]  ;;  %v6911_v62 = vld [vmem:[#allocation36_spill] sm:$0xff] }
 0x44f   :  { %v6912_v61 = vld [vmem:[#allocation37_spill] sm:$0xff] }
 0x450   :  { %4925 = vpow2.f32 %v3177_v59 }
 0x45b   :  { %v4924_v60 = vpop.eup %4923 }
 0x45c   :  { %v1497_v56 = vmul.f32 %v4924_v60, %v4922_v57 }
 0x45d   :  { %v4926_v55 = vpop.eup %4925 }
 0x45e   :  { %v6114_v32 = vadd.f32 %v1497_v56, %v1313_v63  ;;  %v1590_v16 = vadd.f32 1.0, %v4926_v55  ;;  %v1598_v63 = vld [vmem:[#allocation4 + $0x88] sm:$0xff]  ;;  %v1693_v56 = vld [vmem:[#allocation4 + $0x80] sm:$0xff] }
 0x460   :  { %4927 = vtanh.f32 %v6114_v32 }
 0x461   :  { %4929 = vrcp.f32 %v1590_v16 }
 0x46d   :  { %v4928_v49 = vpop.eup %4927 }
 0x46e   :  { %v4930_v50 = vpop.eup %4929 }
 0x46f   :  { %v6117_v51 = vmul.f32 %v4930_v50, %v4928_v49 }
 0x471   :  { %1596 = vst [vmem:[#allocation12 + $0x18] sm:$0xff] %v6117_v51  ;;  %4327 = vmatmul.mubr.f32.vlgmr.msra.gmra.mxu0 %v6117_v51  ;;  %4362 = vmatmul.mubr.f32.vlgmr.msra.gmra.mxu1 %v6117_v51 }
 0x472   :  { %4365 = vmatpush3.msra.mxu0 %v5908_v22  ;;  %4400 = vmatpush3.msra.mxu1 %v5910_v33 }
 0x473   :  { %4366 = vmatprep.subr.mxu0 %v6848_v15  ;;  %4401 = vmatprep.subr.mxu1 %v6848_v15 }
 0x474   :  { %4367 = vmatpush3.msra.mxu0 %v5915_v28  ;;  %4402 = vmatpush3.msra.mxu1 %v5917_v0 }
 0x475   :  { %4368 = vmatprep.subr.mxu0 %v6848_v15  ;;  %4403 = vmatprep.subr.mxu1 %v6848_v15 }
 0x476   :  { %4369 = vmatpush3.msra.mxu0 %v5923_v17  ;;  %4404 = vmatpush3.msra.mxu1 %v5925_v18 }
 0x477   :  { %4370 = vmatprep.subr.mxu0 %v6848_v15  ;;  %4405 = vmatprep.subr.mxu1 %v6848_v15 }
 0x478   :  { %4371 = vmatpush3.msra.mxu0 %v5931_v1  ;;  %4406 = vmatpush3.msra.mxu1 %v5933_v2 }
 0x479   :  { %4372 = vmatprep.subr.mxu0 %v6848_v15  ;;  %4407 = vmatprep.subr.mxu1 %v6848_v15 }
 0x47a   :  { %4373 = vmatpush3.msra.mxu0 %v5939_v3  ;;  %4408 = vmatpush3.msra.mxu1 %v5941_v4 }
 0x47b   :  { %4374 = vmatprep.subr.mxu0 %v6848_v15  ;;  %4409 = vmatprep.subr.mxu1 %v6848_v15 }
 0x47c   :  { %4375 = vmatpush3.msra.mxu0 %v5947_v5  ;;  %4410 = vmatpush3.msra.mxu1 %v5949_v6 }
 0x47d   :  { %4376 = vmatprep.subr.mxu0 %v6848_v15  ;;  %4411 = vmatprep.subr.mxu1 %v6848_v15 }
 0x47e   :  { %4377 = vmatpush3.msra.mxu0 %v5955_v7  ;;  %4412 = vmatpush3.msra.mxu1 %v5957_v8 }
 0x47f   :  { %4378 = vmatprep.subr.mxu0 %v6848_v15  ;;  %4413 = vmatprep.subr.mxu1 %v6848_v15 }
 0x480   :  { %4379 = vmatpush3.msra.mxu0 %v5963_v9  ;;  %4414 = vmatpush3.msra.mxu1 %v5965_v10 }
 0x481   :  { %4380 = vmatprep.subr.mxu0 %v6848_v15  ;;  %4415 = vmatprep.subr.mxu1 %v6848_v15 }
 0x482   :  { %4381 = vmatpush3.msra.mxu0 %v5971_v11  ;;  %4416 = vmatpush3.msra.mxu1 %v5973_v12 }
 0x483   :  { %4382 = vmatprep.subr.mxu0 %v6848_v15  ;;  %4417 = vmatprep.subr.mxu1 %v6848_v15 }
 0x484   :  { %4383 = vmatpush3.msra.mxu0 %v5979_v13  ;;  %4418 = vmatpush3.msra.mxu1 %v5981_v14 }
 0x485   :  { %4384 = vmatprep.subr.mxu0 %v6848_v15  ;;  %4419 = vmatprep.subr.mxu1 %v6848_v15 }
 0x486   :  { %4385 = vmatpush3.msra.mxu0 %v5987_v20  ;;  %4420 = vmatpush3.msra.mxu1 %v5989_v21 }
 0x487   :  { %4386 = vmatprep.subr.mxu0 %v6848_v15  ;;  %4421 = vmatprep.subr.mxu1 %v6848_v15 }
 0x488   :  { %4387 = vmatpush3.msra.mxu0 %v6891_v47  ;;  %4422 = vmatpush3.msra.mxu1 %v6892_v48 }
 0x489   :  { %4388 = vmatprep.subr.mxu0 %v6848_v15  ;;  %4423 = vmatprep.subr.mxu1 %v6848_v15 }
 0x48a   :  { %4389 = vmatpush3.msra.mxu0 %v6003_v25  ;;  %4424 = vmatpush3.msra.mxu1 %v6893_v52 }
 0x48b   :  { %4390 = vmatprep.subr.mxu0 %v6848_v15  ;;  %4425 = vmatprep.subr.mxu1 %v6848_v15 }
 0x48c   :  { %4391 = vmatpush3.msra.mxu0 %v6011_v19  ;;  %4426 = vmatpush3.msra.mxu1 %v6013_v30 }
 0x48d   :  { %4392 = vmatprep.subr.mxu0 %v6848_v15  ;;  %4427 = vmatprep.subr.mxu1 %v6848_v15 }
 0x48e   :  { %4393 = vmatpush3.msra.mxu0 %v6019_v31  ;;  %4428 = vmatpush3.msra.mxu1 %v6021_v29 }
 0x48f   :  { %4394 = vmatprep.subr.mxu0 %v6848_v15  ;;  %4429 = vmatprep.subr.mxu1 %v6848_v15 }
 0x490   :  { %4395 = vmatpush3.msra.mxu0 %v6027_v26  ;;  %4396 = vmatprep.mubr.msk.f32.mxu0 %vm5152_vm0, %v6848_v15 }
 0x491   :  { %4430 = vmatpush3.msra.mxu1 %v6031_v24  ;;  %4431 = vmatprep.mubr.msk.f32.mxu1 %vm5152_vm0, %v6848_v15 }
 0x492   :  { %4397 = vmatmul.mubr.f32.vlgmr.msra.gmra.mxu0 %v6117_v51  ;;  %4432 = vmatmul.mubr.f32.vlgmr.msra.gmra.mxu1 %v6117_v51 }
 0x493   :  { %4434 = vmatprep.subr.mxu0 %v6848_v15  ;;  %4469 = vmatprep.subr.mxu1 %v6848_v15 }
 0x494   :  { %4435 = vmatpush3.msra.mxu0 %v5774_v34  ;;  %4470 = vmatpush3.msra.mxu1 %v5776_v35  ;;  %v6894_v34 = vld [vmem:[#allocation39_spill] sm:$0xff]  ;;  %v6895_v35 = vld [vmem:[#allocation40_spill] sm:$0xff] }
 0x495   :  { %4436 = vmatprep.subr.mxu0 %v6848_v15  ;;  %4471 = vmatprep.subr.mxu1 %v6848_v15 }
 0x496   :  { %4437 = vmatpush3.msra.mxu0 %v5782_v36  ;;  %4472 = vmatpush3.msra.mxu1 %v5784_v37  ;;  %v6896_v36 = vld [vmem:[#allocation21_spill] sm:$0xff]  ;;  %v6897_v37 = vld [vmem:[#allocation22_spill] sm:$0xff] }
 0x497   :  { %4438 = vmatprep.subr.mxu0 %v6848_v15  ;;  %4473 = vmatprep.subr.mxu1 %v6848_v15 }
 0x498   :  { %4439 = vmatpush3.msra.mxu0 %v5790_v38  ;;  %4474 = vmatpush3.msra.mxu1 %v5792_v39  ;;  %v6898_v38 = vld [vmem:[#allocation23_spill] sm:$0xff]  ;;  %v6899_v39 = vld [vmem:[#allocation24_spill] sm:$0xff] }
 0x499   :  { %4440 = vmatprep.subr.mxu0 %v6848_v15  ;;  %4475 = vmatprep.subr.mxu1 %v6848_v15 }
 0x49a   :  { %4441 = vmatpush3.msra.mxu0 %v5798_v40  ;;  %4476 = vmatpush3.msra.mxu1 %v5800_v41  ;;  %v6900_v40 = vld [vmem:[#allocation25_spill] sm:$0xff]  ;;  %v6901_v41 = vld [vmem:[#allocation26_spill] sm:$0xff] }
 0x49b   :  { %4442 = vmatprep.subr.mxu0 %v6848_v15  ;;  %4477 = vmatprep.subr.mxu1 %v6848_v15 }
 0x49c   :  { %4443 = vmatpush3.msra.mxu0 %v5806_v42  ;;  %4478 = vmatpush3.msra.mxu1 %v5808_v43  ;;  %v6902_v42 = vld [vmem:[#allocation27_spill] sm:$0xff]  ;;  %v6903_v43 = vld [vmem:[#allocation28_spill] sm:$0xff] }
 0x49d   :  { %4444 = vmatprep.subr.mxu0 %v6848_v15  ;;  %4479 = vmatprep.subr.mxu1 %v6848_v15 }
 0x49e   :  { %4445 = vmatpush3.msra.mxu0 %v5814_v44  ;;  %4480 = vmatpush3.msra.mxu1 %v5816_v45  ;;  %v6904_v44 = vld [vmem:[#allocation29_spill] sm:$0xff]  ;;  %v6905_v45 = vld [vmem:[#allocation30_spill] sm:$0xff] }
 0x49f   :  { %4446 = vmatprep.subr.mxu0 %v6848_v15  ;;  %4481 = vmatprep.subr.mxu1 %v6848_v15 }
 0x4a0   :  { %4447 = vmatpush3.msra.mxu0 %v5822_v46  ;;  %4482 = vmatpush3.msra.mxu1 %v6894_v34  ;;  %v6906_v46 = vld [vmem:[#allocation31_spill] sm:$0xff] }
 0x4a1   :  { %4448 = vmatprep.subr.mxu0 %v6848_v15  ;;  %4483 = vmatprep.subr.mxu1 %v6848_v15 }
 0x4a2   :  { %4449 = vmatpush3.msra.mxu0 %v6895_v35  ;;  %4484 = vmatpush3.msra.mxu1 %v6896_v36 }
 0x4a3   :  { %4450 = vmatprep.subr.mxu0 %v6848_v15  ;;  %4485 = vmatprep.subr.mxu1 %v6848_v15 }
 0x4a4   :  { %4451 = vmatpush3.msra.mxu0 %v6897_v37  ;;  %4486 = vmatpush3.msra.mxu1 %v6898_v38  ;;  %v1787_v37 = vld [vmem:[#allocation4 + $0x90] sm:$0xff]  ;;  %v1878_v38 = vld [vmem:[#allocation4 + $0x98] sm:$0xff] }
 0x4a5   :  { %4452 = vmatprep.subr.mxu0 %v6848_v15  ;;  %4487 = vmatprep.subr.mxu1 %v6848_v15 }
 0x4a6   :  { %4453 = vmatpush3.msra.mxu0 %v6899_v39  ;;  %4488 = vmatpush3.msra.mxu1 %v6900_v40 }
 0x4a7   :  { %4454 = vmatprep.subr.mxu0 %v6848_v15  ;;  %4489 = vmatprep.subr.mxu1 %v6848_v15 }
 0x4a8   :  { %4455 = vmatpush3.msra.mxu0 %v6901_v41  ;;  %4490 = vmatpush3.msra.mxu1 %v6902_v42 }
 0x4a9   :  { %4456 = vmatprep.subr.mxu0 %v6848_v15  ;;  %4491 = vmatprep.subr.mxu1 %v6848_v15 }
 0x4aa   :  { %4457 = vmatpush3.msra.mxu0 %v6903_v43  ;;  %4492 = vmatpush3.msra.mxu1 %v6904_v44 }
 0x4ab   :  { %4458 = vmatprep.subr.mxu0 %v6848_v15  ;;  %4493 = vmatprep.subr.mxu1 %v6848_v15 }
 0x4ac   :  { %4459 = vmatpush3.msra.mxu0 %v6905_v45  ;;  %4494 = vmatpush3.msra.mxu1 %v6906_v46 }
 0x4ad   :  { %4460 = vmatprep.subr.mxu0 %v6848_v15  ;;  %4495 = vmatprep.subr.mxu1 %v6848_v15 }
 0x4ae   :  { %4461 = vmatpush3.msra.mxu0 %v6907_v53  ;;  %4496 = vmatpush3.msra.mxu1 %v6908_v54 }
 0x4af   :  { %4462 = vmatprep.subr.mxu0 %v6848_v15  ;;  %4497 = vmatprep.subr.mxu1 %v6848_v15 }
 0x4b0   :  { %4463 = vmatpush3.msra.mxu0 %v6909_v27  ;;  %4498 = vmatpush3.msra.mxu1 %v6910_v23 }
 0x4b1   :  { %4464 = vmatprep.subr.mxu0 %v6848_v15  ;;  %4499 = vmatprep.subr.mxu1 %v6848_v15 }
 0x4b2   :  { %4465 = vmatpush3.msra.mxu0 %v6911_v62  ;;  %4500 = vmatpush3.msra.mxu1 %v6912_v61 }
 0x4b3   :  { %4466 = vmatprep.mubr.msk.f32.mxu0 %vm5152_vm0, %v6848_v15  ;;  %4501 = vmatprep.mubr.msk.f32.mxu1 %vm5152_vm0, %v6848_v15 }
 0x4b4   :  { %4504 = vmatprep.subr.mxu0 %v6848_v15  ;;  %4539 = vmatprep.subr.mxu1 %v6848_v15 }
 0x531   :  { %v1681_v59 = vpop.f32.mrf.mxu0  ;;  %v1776_v58 = vpop.f32.mrf.mxu1 }
 0x532   :  { %v1685_v55 = vadd.f32 %v1681_v59, %v1598_v63  ;;  %v1780_v16 = vadd.f32 %v1776_v58, %v1693_v56 }
 0x533   :  { %v4328_v57 = vpop.f32.mrf.mxu0  ;;  %v4363_v60 = vpop.f32.mrf.mxu1 }
 0x534   :  { %v3178_v49 = vmul.f32 -1.442695, %v1685_v55  ;;  %v3179_v50 = vmul.f32 -1.442695, %v1780_v16  ;;  %v1977_v16 = vld [vmem:[#allocation4 + $0xa8] sm:$0xff] }
 0x536   :  { %4931 = vpow2.f32 %v3178_v49  ;;  %v2072_v49 = vld [vmem:[#allocation4 + $0xa0] sm:$0xff] }
 0x537   :  { %4933 = vpow2.f32 %v3179_v50 }
 0x543   :  { %v4932_v51 = vpop.eup %4931 }
 0x544   :  { %v4934_v34 = vpop.eup %4933  ;;  %v1689_v35 = vadd.f32 1.0, %v4932_v51 }
 0x545   :  { %v1784_v36 = vadd.f32 1.0, %v4934_v34 }
 0x546   :  { %4935 = vrcp.f32 %v1689_v35 }
 0x547   :  { %4937 = vrcp.f32 %v1784_v36 }
 0x552   :  { %v1870_v39 = vpop.f32.mrf.mxu0  ;;  %v1961_v40 = vpop.f32.mrf.mxu1 }
 0x553   :  { %v1874_v41 = vadd.f32 %v1870_v39, %v1787_v37  ;;  %v1965_v42 = vadd.f32 %v1961_v40, %v1878_v38  ;;  %v4936_v46 = vpop.eup %4935  ;;  %v2166_v40 = vld [vmem:[#allocation4 + $0xb0] sm:$0xff] }
 0x554   :  { %v4398_v43 = vpop.f32.mrf.mxu0  ;;  %v4433_v44 = vpop.f32.mrf.mxu1  ;;  %v1692_v27 = vmul.f32 %v4936_v46, %v6114_v32  ;;  %v6453_v32 = vld [vmem:[#allocation10 + $0x20] sm:$0xff] }
 0x555   :  { %4939 = vtanh.f32 %v1874_v41  ;;  %v3180_v45 = vmul.f32 -1.442695, %v1965_v42  ;;  %v4938_v53 = vpop.eup %4937  ;;  %v2257_v41 = vld [vmem:[#allocation4 + $0xb8] sm:$0xff] }
 0x557   :  { %4941 = vpow2.f32 %v3180_v45 }
 0x562   :  { %v4940_v54 = vpop.eup %4939 }
 0x563   :  { %v1876_v23 = vmul.f32 %v4940_v54, %v4938_v53 }
 0x564   :  { %v4942_v62 = vpop.eup %4941 }
 0x565   :  { %v6261_v61 = vadd.f32 %v1876_v23, %v1692_v27  ;;  %v1969_v59 = vadd.f32 1.0, %v4942_v62 }
 0x567   :  { %4943 = vtanh.f32 %v6261_v61 }
 0x568   :  { %4945 = vrcp.f32 %v1969_v59 }
 0x574   :  { %v4944_v58 = vpop.eup %4943 }
 0x575   :  { %v4946_v57 = vpop.eup %4945 }
 0x576   :  { %v6264_v60 = vmul.f32 %v4946_v57, %v4944_v58 }
 0x578   :  { %1975 = vst [vmem:[#allocation12 + $0x20] sm:$0xff] %v6264_v60  ;;  %4467 = vmatmul.mubr.f32.vlgmr.msra.gmra.mxu0 %v6264_v60  ;;  %4502 = vmatmul.mubr.f32.vlgmr.msra.gmra.mxu1 %v6264_v60 }
 0x579   :  { %4505 = vmatpush3.msra.mxu0 %v5908_v22  ;;  %4540 = vmatpush3.msra.mxu1 %v5910_v33  ;;  %v6343_v22 = vld [vmem:[#allocation10 + $0x1e8] sm:$0xff]  ;;  %v6345_v33 = vld [vmem:[#allocation10 + $0x1e0] sm:$0xff] }
 0x57a   :  { %4506 = vmatprep.subr.mxu0 %v6848_v15  ;;  %4541 = vmatprep.subr.mxu1 %v6848_v15 }
 0x57b   :  { %4507 = vmatpush3.msra.mxu0 %v5915_v28  ;;  %4542 = vmatpush3.msra.mxu1 %v5917_v0  ;;  %v6351_v28 = vld [vmem:[#allocation10 + $0x1c8] sm:$0xff]  ;;  %v6353_v0 = vld [vmem:[#allocation10 + $0x1c0] sm:$0xff] }
 0x57c   :  { %4508 = vmatprep.subr.mxu0 %v6848_v15  ;;  %4543 = vmatprep.subr.mxu1 %v6848_v15 }
 0x57d   :  { %4509 = vmatpush3.msra.mxu0 %v5923_v17  ;;  %4544 = vmatpush3.msra.mxu1 %v5925_v18  ;;  %v6359_v17 = vld [vmem:[#allocation10 + $0x1a8] sm:$0xff]  ;;  %v6361_v18 = vld [vmem:[#allocation10 + $0x1a0] sm:$0xff] }
 0x57e   :  { %4510 = vmatprep.subr.mxu0 %v6848_v15  ;;  %4545 = vmatprep.subr.mxu1 %v6848_v15 }
 0x57f   :  { %4511 = vmatpush3.msra.mxu0 %v5931_v1  ;;  %4546 = vmatpush3.msra.mxu1 %v5933_v2  ;;  %v6367_v1 = vld [vmem:[#allocation10 + $0x188] sm:$0xff]  ;;  %v6369_v2 = vld [vmem:[#allocation10 + $0x180] sm:$0xff] }
 0x580   :  { %4512 = vmatprep.subr.mxu0 %v6848_v15  ;;  %4547 = vmatprep.subr.mxu1 %v6848_v15 }
 0x581   :  { %4513 = vmatpush3.msra.mxu0 %v5939_v3  ;;  %4548 = vmatpush3.msra.mxu1 %v5941_v4  ;;  %v6375_v3 = vld [vmem:[#allocation10 + $0x168] sm:$0xff]  ;;  %v6377_v4 = vld [vmem:[#allocation10 + $0x160] sm:$0xff] }
 0x582   :  { %4514 = vmatprep.subr.mxu0 %v6848_v15  ;;  %4549 = vmatprep.subr.mxu1 %v6848_v15 }
 0x583   :  { %4515 = vmatpush3.msra.mxu0 %v5947_v5  ;;  %4550 = vmatpush3.msra.mxu1 %v5949_v6  ;;  %v6383_v5 = vld [vmem:[#allocation10 + $0x148] sm:$0xff]  ;;  %v6385_v6 = vld [vmem:[#allocation10 + $0x140] sm:$0xff] }
 0x584   :  { %4516 = vmatprep.subr.mxu0 %v6848_v15  ;;  %4551 = vmatprep.subr.mxu1 %v6848_v15 }
 0x585   :  { %4517 = vmatpush3.msra.mxu0 %v5955_v7  ;;  %4552 = vmatpush3.msra.mxu1 %v5957_v8  ;;  %v6391_v7 = vld [vmem:[#allocation10 + $0x128] sm:$0xff]  ;;  %v6393_v8 = vld [vmem:[#allocation10 + $0x120] sm:$0xff] }
 0x586   :  { %4518 = vmatprep.subr.mxu0 %v6848_v15  ;;  %4553 = vmatprep.subr.mxu1 %v6848_v15 }
 0x587   :  { %4519 = vmatpush3.msra.mxu0 %v5963_v9  ;;  %4554 = vmatpush3.msra.mxu1 %v5965_v10  ;;  %v6399_v9 = vld [vmem:[#allocation10 + $0x108] sm:$0xff]  ;;  %v6401_v10 = vld [vmem:[#allocation10 + $0x100] sm:$0xff] }
 0x588   :  { %4520 = vmatprep.subr.mxu0 %v6848_v15  ;;  %4555 = vmatprep.subr.mxu1 %v6848_v15 }
 0x589   :  { %4521 = vmatpush3.msra.mxu0 %v5971_v11  ;;  %4556 = vmatpush3.msra.mxu1 %v5973_v12  ;;  %v6407_v11 = vld [vmem:[#allocation10 + $0xe8] sm:$0xff]  ;;  %v6409_v12 = vld [vmem:[#allocation10 + $0xe0] sm:$0xff] }
 0x58a   :  { %4522 = vmatprep.subr.mxu0 %v6848_v15  ;;  %4557 = vmatprep.subr.mxu1 %v6848_v15 }
 0x58b   :  { %4523 = vmatpush3.msra.mxu0 %v5979_v13  ;;  %4558 = vmatpush3.msra.mxu1 %v5981_v14  ;;  %v6413_v13 = vld [vmem:[#allocation10 + $0xc8] sm:$0xff]  ;;  %v6415_v14 = vld [vmem:[#allocation10 + $0xc0] sm:$0xff] }
 0x58c   :  { %4524 = vmatprep.subr.mxu0 %v6848_v15  ;;  %4559 = vmatprep.subr.mxu1 %v6848_v15 }
 0x58d   :  { %4525 = vmatpush3.msra.mxu0 %v5987_v20  ;;  %4560 = vmatpush3.msra.mxu1 %v5989_v21  ;;  %v6419_v20 = vld [vmem:[#allocation10 + $0xa8] sm:$0xff]  ;;  %v6421_v21 = vld [vmem:[#allocation10 + $0xa0] sm:$0xff] }
 0x58e   :  { %4526 = vmatprep.subr.mxu0 %v6848_v15  ;;  %4561 = vmatprep.subr.mxu1 %v6848_v15 }
 0x58f   :  { %4527 = vmatpush3.msra.mxu0 %v6891_v47  ;;  %4562 = vmatpush3.msra.mxu1 %v6892_v48  ;;  %v6459_v47 = vld [vmem:[#allocation10 + $0x8] sm:$0xff]  ;;  %v6461_v48 = vld [vmem:[#allocation10] sm:$0xff] }
 0x590   :  { %4528 = vmatprep.subr.mxu0 %v6848_v15  ;;  %4563 = vmatprep.subr.mxu1 %v6848_v15 }
 0x591   :  { %4529 = vmatpush3.msra.mxu0 %v6003_v25  ;;  %4564 = vmatpush3.msra.mxu1 %v6893_v52  ;;  %v6435_v25 = vld [vmem:[#allocation10 + $0x68] sm:$0xff] }
 0x592   :  { %4530 = vmatprep.subr.mxu0 %v6848_v15  ;;  %4565 = vmatprep.subr.mxu1 %v6848_v15 }
 0x593   :  { %4531 = vmatpush3.msra.mxu0 %v6011_v19  ;;  %4566 = vmatpush3.msra.mxu1 %v6013_v30  ;;  %v6443_v19 = vld [vmem:[#allocation10 + $0x48] sm:$0xff]  ;;  %v6445_v30 = vld [vmem:[#allocation10 + $0x40] sm:$0xff] }
 0x594   :  { %4532 = vmatprep.subr.mxu0 %v6848_v15  ;;  %4567 = vmatprep.subr.mxu1 %v6848_v15 }
 0x595   :  { %4533 = vmatpush3.msra.mxu0 %v6019_v31  ;;  %4568 = vmatpush3.msra.mxu1 %v6021_v29  ;;  %v6427_v29 = vld [vmem:[#allocation10 + $0x88] sm:$0xff] }
 0x596   :  { %4534 = vmatprep.subr.mxu0 %v6848_v15  ;;  %4569 = vmatprep.subr.mxu1 %v6848_v15  ;;  %v6451_v31 = vld [vmem:[#allocation10 + $0x28] sm:$0xff] }
 0x597   :  { %4535 = vmatpush3.msra.mxu0 %v6027_v26  ;;  %4536 = vmatprep.mubr.msk.f32.mxu0 %vm5152_vm0, %v6848_v15  ;;  %v6429_v26 = vld [vmem:[#allocation10 + $0x80] sm:$0xff] }
 0x598   :  { %4570 = vmatpush3.msra.mxu1 %v6031_v24  ;;  %4571 = vmatprep.mubr.msk.f32.mxu1 %vm5152_vm0, %v6848_v15  ;;  %v6437_v24 = vld [vmem:[#allocation10 + $0x60] sm:$0xff] }
 0x599   :  { %4537 = vmatmul.mubr.f32.vlgmr.msra.gmra.mxu0 %v6264_v60  ;;  %4572 = vmatmul.mubr.f32.vlgmr.msra.gmra.mxu1 %v6264_v60 }
 0x59a   :  { %4574 = vmatprep.subr.mxu0 %v6848_v15  ;;  %4609 = vmatprep.subr.mxu1 %v6848_v15 }
 0x59b   :  { %4606 = vmatprep.mubr.msk.f32.mxu0 %vm5152_vm0, %v6848_v15  ;;  %4641 = vmatprep.mubr.msk.f32.mxu1 %vm5152_vm0, %v6848_v15 }
 0x59c   :  { %4575 = vmatpush3.msra.mxu0 %v6343_v22  ;;  %4610 = vmatpush3.msra.mxu1 %v6345_v33 }
 0x59d   :  { %4576 = vmatprep.subr.mxu0 %v6848_v15  ;;  %4611 = vmatprep.subr.mxu1 %v6848_v15 }
 0x59e   :  { %4577 = vmatpush3.msra.mxu0 %v6351_v28  ;;  %4612 = vmatpush3.msra.mxu1 %v6353_v0 }
 0x59f   :  { %4578 = vmatprep.subr.mxu0 %v6848_v15  ;;  %4613 = vmatprep.subr.mxu1 %v6848_v15 }
 0x5a0   :  { %4579 = vmatpush3.msra.mxu0 %v6359_v17  ;;  %4614 = vmatpush3.msra.mxu1 %v6361_v18 }
 0x5a1   :  { %4580 = vmatprep.subr.mxu0 %v6848_v15  ;;  %4615 = vmatprep.subr.mxu1 %v6848_v15 }
 0x5a2   :  { %4581 = vmatpush3.msra.mxu0 %v6367_v1  ;;  %4616 = vmatpush3.msra.mxu1 %v6369_v2 }
 0x5a3   :  { %4582 = vmatprep.subr.mxu0 %v6848_v15  ;;  %4617 = vmatprep.subr.mxu1 %v6848_v15 }
 0x5a4   :  { %4583 = vmatpush3.msra.mxu0 %v6375_v3  ;;  %4618 = vmatpush3.msra.mxu1 %v6377_v4 }
 0x5a5   :  { %4584 = vmatprep.subr.mxu0 %v6848_v15  ;;  %4619 = vmatprep.subr.mxu1 %v6848_v15 }
 0x5a6   :  { %4585 = vmatpush3.msra.mxu0 %v6383_v5  ;;  %4620 = vmatpush3.msra.mxu1 %v6385_v6 }
 0x5a7   :  { %4586 = vmatprep.subr.mxu0 %v6848_v15  ;;  %4621 = vmatprep.subr.mxu1 %v6848_v15 }
 0x5a8   :  { %4587 = vmatpush3.msra.mxu0 %v6391_v7  ;;  %4622 = vmatpush3.msra.mxu1 %v6393_v8 }
 0x5a9   :  { %4588 = vmatprep.subr.mxu0 %v6848_v15  ;;  %4623 = vmatprep.subr.mxu1 %v6848_v15 }
 0x5aa   :  { %4589 = vmatpush3.msra.mxu0 %v6399_v9  ;;  %4624 = vmatpush3.msra.mxu1 %v6401_v10 }
 0x5ab   :  { %4590 = vmatprep.subr.mxu0 %v6848_v15  ;;  %4625 = vmatprep.subr.mxu1 %v6848_v15 }
 0x5ac   :  { %4591 = vmatpush3.msra.mxu0 %v6407_v11  ;;  %4626 = vmatpush3.msra.mxu1 %v6409_v12 }
 0x5ad   :  { %4592 = vmatprep.subr.mxu0 %v6848_v15  ;;  %4627 = vmatprep.subr.mxu1 %v6848_v15 }
 0x5ae   :  { %4593 = vmatpush3.msra.mxu0 %v6413_v13  ;;  %4628 = vmatpush3.msra.mxu1 %v6415_v14 }
 0x5af   :  { %4594 = vmatprep.subr.mxu0 %v6848_v15  ;;  %4629 = vmatprep.subr.mxu1 %v6848_v15 }
 0x5b0   :  { %4595 = vmatpush3.msra.mxu0 %v6419_v20  ;;  %4630 = vmatpush3.msra.mxu1 %v6421_v21 }
 0x5b1   :  { %4596 = vmatprep.subr.mxu0 %v6848_v15  ;;  %4631 = vmatprep.subr.mxu1 %v6848_v15 }
 0x5b2   :  { %4597 = vmatpush3.msra.mxu0 %v6427_v29  ;;  %4632 = vmatpush3.msra.mxu1 %v6429_v26 }
 0x5b3   :  { %4598 = vmatprep.subr.mxu0 %v6848_v15  ;;  %4633 = vmatprep.subr.mxu1 %v6848_v15 }
 0x5b4   :  { %4599 = vmatpush3.msra.mxu0 %v6435_v25  ;;  %4634 = vmatpush3.msra.mxu1 %v6437_v24 }
 0x5b5   :  { %4600 = vmatprep.subr.mxu0 %v6848_v15  ;;  %4635 = vmatprep.subr.mxu1 %v6848_v15 }
 0x5b6   :  { %4601 = vmatpush3.msra.mxu0 %v6443_v19  ;;  %4636 = vmatpush3.msra.mxu1 %v6445_v30 }
 0x5b7   :  { %4602 = vmatprep.subr.mxu0 %v6848_v15  ;;  %4637 = vmatprep.subr.mxu1 %v6848_v15 }
 0x5b8   :  { %4603 = vmatpush3.msra.mxu0 %v6451_v31  ;;  %4638 = vmatpush3.msra.mxu1 %v6453_v32 }
 0x5b9   :  { %4604 = vmatprep.subr.mxu0 %v6848_v15  ;;  %4639 = vmatprep.subr.mxu1 %v6848_v15 }
 0x5ba   :  { %4605 = vmatpush3.msra.mxu0 %v6459_v47  ;;  %4640 = vmatpush3.msra.mxu1 %v6461_v48 }
 0x5bb   :  { %4644 = vmatprep.subr.mxu0 %v6848_v15  ;;  %4679 = vmatprep.subr.mxu1 %v6848_v15 }
 0x638   :  { %v2060_v52 = vpop.f32.mrf.mxu0  ;;  %v2155_v63 = vpop.f32.mrf.mxu1 }
 0x639   :  { %v2064_v50 = vadd.f32 %v2060_v52, %v1977_v16  ;;  %v2159_v51 = vadd.f32 %v2155_v63, %v2072_v49  ;;  %v6477_v16 = vld [vmem:[#allocation10 + $0x1f0] sm:$0xff]  ;;  %v6479_v49 = vld [vmem:[#allocation10 + $0x1f8] sm:$0xff] }
 0x63a   :  { %v4468_v56 = vpop.f32.mrf.mxu0  ;;  %v4503_v55 = vpop.f32.mrf.mxu1 }
 0x63b   :  { %v3181_v34 = vmul.f32 -1.442695, %v2064_v50  ;;  %v3182_v35 = vmul.f32 -1.442695, %v2159_v51  ;;  %v6486_v50 = vld [vmem:[#allocation10 + $0x1d8] sm:$0xff]  ;;  %v6492_v51 = vld [vmem:[#allocation10 + $0x1b0] sm:$0xff] }
 0x63d   :  { %4947 = vpow2.f32 %v3181_v34  ;;  %v6494_v34 = vld [vmem:[#allocation10 + $0x1b8] sm:$0xff] }
 0x63e   :  { %4949 = vpow2.f32 %v3182_v35  ;;  %v6500_v35 = vld [vmem:[#allocation10 + $0x190] sm:$0xff] }
 0x64a   :  { %v4948_v36 = vpop.eup %4947 }
 0x64b   :  { %v4950_v37 = vpop.eup %4949  ;;  %v2068_v38 = vadd.f32 1.0, %v4948_v36  ;;  %v6502_v36 = vld [vmem:[#allocation10 + $0x198] sm:$0xff] }
 0x64c   :  { %v2163_v39 = vadd.f32 1.0, %v4950_v37  ;;  %v6508_v37 = vld [vmem:[#allocation10 + $0x170] sm:$0xff] }
 0x64d   :  { %4951 = vrcp.f32 %v2068_v38  ;;  %v6510_v38 = vld [vmem:[#allocation10 + $0x178] sm:$0xff] }
 0x64e   :  { %4953 = vrcp.f32 %v2163_v39  ;;  %v6516_v39 = vld [vmem:[#allocation10 + $0x150] sm:$0xff] }
 0x659   :  { %v2249_v42 = vpop.f32.mrf.mxu0  ;;  %v2340_v43 = vpop.f32.mrf.mxu1 }
 0x65a   :  { %v2253_v44 = vadd.f32 %v2249_v42, %v2166_v40  ;;  %v2344_v45 = vadd.f32 %v2340_v43, %v2257_v41  ;;  %v4952_v27 = vpop.eup %4951  ;;  %v6518_v40 = vld [vmem:[#allocation10 + $0x158] sm:$0xff]  ;;  %v6524_v41 = vld [vmem:[#allocation10 + $0x130] sm:$0xff] }
 0x65b   :  { %v4538_v46 = vpop.f32.mrf.mxu0  ;;  %v4573_v53 = vpop.f32.mrf.mxu1  ;;  %v2071_v59 = vmul.f32 %v4952_v27, %v6261_v61  ;;  %v6484_v61 = vld [vmem:[#allocation10 + $0x1d0] sm:$0xff]  ;;  %v6526_v42 = vld [vmem:[#allocation10 + $0x138] sm:$0xff] }
 0x65c   :  { %4955 = vtanh.f32 %v2253_v44  ;;  %v3183_v54 = vmul.f32 -1.442695, %v2344_v45  ;;  %v4954_v23 = vpop.eup %4953  ;;  %v6532_v43 = vld [vmem:[#allocation10 + $0x110] sm:$0xff]  ;;  %v6534_v44 = vld [vmem:[#allocation10 + $0x118] sm:$0xff] }
 0x65d   :  { %v6540_v45 = vld [vmem:[#allocation10 + $0xf0] sm:$0xff]  ;;  %v6542_v46 = vld [vmem:[#allocation10 + $0xf8] sm:$0xff] }
 0x65e   :  { %4957 = vpow2.f32 %v3183_v54  ;;  %v6548_v53 = vld [vmem:[#allocation10 + $0xd0] sm:$0xff]  ;;  %v6550_v54 = vld [vmem:[#allocation10 + $0xd8] sm:$0xff] }
 0x65f   :  { %v6556_v27 = vld [vmem:[#allocation10 + $0xb0] sm:$0xff] }
 0x669   :  { %v4956_v62 = vpop.eup %4955 }
 0x66a   :  { %v2255_v58 = vmul.f32 %v4956_v62, %v4954_v23  ;;  %v6558_v23 = vld [vmem:[#allocation10 + $0xb8] sm:$0xff]  ;;  %v6564_v62 = vld [vmem:[#allocation10 + $0x90] sm:$0xff] }
 0x66b   :  { %v4958_v57 = vpop.eup %4957  ;;  %6913 = vst [vmem:[#allocation38_spill] sm:$0xff] %v6564_v62 }
 0x66c   :  { %v6472_v60 = vadd.f32 %v2255_v58, %v2071_v59  ;;  %v2348_v52 = vadd.f32 1.0, %v4958_v57  ;;  %v6566_v59 = vld [vmem:[#allocation10 + $0x98] sm:$0xff]  ;;  %v6572_v58 = vld [vmem:[#allocation10 + $0x70] sm:$0xff] }
 0x66d   :  { %6914 = vst [vmem:[#allocation41_spill] sm:$0xff] %v6566_v59  ;;  %v6574_v57 = vld [vmem:[#allocation10 + $0x78] sm:$0xff] }
 0x66e   :  { %4959 = vtanh.f32 %v6472_v60  ;;  %6915 = vst [vmem:[#allocation42_spill] sm:$0xff] %v6574_v57 }
 0x66f   :  { %4961 = vrcp.f32 %v2348_v52  ;;  %v6580_v52 = vld [vmem:[#allocation10 + $0x50] sm:$0xff] }
 0x67b   :  { %v4960_v63 = vpop.eup %4959 }
 0x67c   :  { %v4962_v56 = vpop.eup %4961 }
 0x67d   :  { %v6475_v55 = vmul.f32 %v4962_v56, %v4960_v63  ;;  %v6582_v63 = vld [vmem:[#allocation10 + $0x58] sm:$0xff]  ;;  %v6588_v56 = vld [vmem:[#allocation10 + $0x30] sm:$0xff] }
 0x67f   :  { %2354 = vst [vmem:[#allocation12 + $0x28] sm:$0xff] %v6475_v55  ;;  %4607 = vmatmul.mubr.f32.vlgmr.msra.gmra.mxu0 %v6475_v55  ;;  %4642 = vmatmul.mubr.f32.vlgmr.msra.gmra.mxu1 %v6475_v55 }
 0x680   :  { %4645 = vmatpush3.msra.mxu0 %v6477_v16  ;;  %4680 = vmatpush3.msra.mxu1 %v6479_v49 }
 0x681   :  { %4646 = vmatprep.subr.mxu0 %v6848_v15  ;;  %4681 = vmatprep.subr.mxu1 %v6848_v15 }
 0x682   :  { %4647 = vmatpush3.msra.mxu0 %v6484_v61  ;;  %4682 = vmatpush3.msra.mxu1 %v6486_v50 }
 0x683   :  { %4648 = vmatprep.subr.mxu0 %v6848_v15  ;;  %4683 = vmatprep.subr.mxu1 %v6848_v15 }
 0x684   :  { %4649 = vmatpush3.msra.mxu0 %v6492_v51  ;;  %4684 = vmatpush3.msra.mxu1 %v6494_v34 }
 0x685   :  { %4650 = vmatprep.subr.mxu0 %v6848_v15  ;;  %4685 = vmatprep.subr.mxu1 %v6848_v15 }
 0x686   :  { %4651 = vmatpush3.msra.mxu0 %v6500_v35  ;;  %4686 = vmatpush3.msra.mxu1 %v6502_v36 }
 0x687   :  { %4652 = vmatprep.subr.mxu0 %v6848_v15  ;;  %4687 = vmatprep.subr.mxu1 %v6848_v15 }
 0x688   :  { %4653 = vmatpush3.msra.mxu0 %v6508_v37  ;;  %4688 = vmatpush3.msra.mxu1 %v6510_v38 }
 0x689   :  { %4654 = vmatprep.subr.mxu0 %v6848_v15  ;;  %4689 = vmatprep.subr.mxu1 %v6848_v15 }
 0x68a   :  { %4655 = vmatpush3.msra.mxu0 %v6516_v39  ;;  %4690 = vmatpush3.msra.mxu1 %v6518_v40 }
 0x68b   :  { %4656 = vmatprep.subr.mxu0 %v6848_v15  ;;  %4691 = vmatprep.subr.mxu1 %v6848_v15 }
 0x68c   :  { %4657 = vmatpush3.msra.mxu0 %v6524_v41  ;;  %4692 = vmatpush3.msra.mxu1 %v6526_v42 }
 0x68d   :  { %4658 = vmatprep.subr.mxu0 %v6848_v15  ;;  %4693 = vmatprep.subr.mxu1 %v6848_v15 }
 0x68e   :  { %4659 = vmatpush3.msra.mxu0 %v6532_v43  ;;  %4694 = vmatpush3.msra.mxu1 %v6534_v44 }
 0x68f   :  { %4660 = vmatprep.subr.mxu0 %v6848_v15  ;;  %4695 = vmatprep.subr.mxu1 %v6848_v15 }
 0x690   :  { %4661 = vmatpush3.msra.mxu0 %v6540_v45  ;;  %4696 = vmatpush3.msra.mxu1 %v6542_v46 }
 0x691   :  { %4662 = vmatprep.subr.mxu0 %v6848_v15  ;;  %4697 = vmatprep.subr.mxu1 %v6848_v15 }
 0x692   :  { %4663 = vmatpush3.msra.mxu0 %v6548_v53  ;;  %4698 = vmatpush3.msra.mxu1 %v6550_v54 }
 0x693   :  { %4664 = vmatprep.subr.mxu0 %v6848_v15  ;;  %4699 = vmatprep.subr.mxu1 %v6848_v15 }
 0x694   :  { %4665 = vmatpush3.msra.mxu0 %v6556_v27  ;;  %4700 = vmatpush3.msra.mxu1 %v6558_v23 }
 0x695   :  { %4666 = vmatprep.subr.mxu0 %v6848_v15  ;;  %4701 = vmatprep.subr.mxu1 %v6848_v15 }
 0x696   :  { %4667 = vmatpush3.msra.mxu0 %v6564_v62  ;;  %4702 = vmatpush3.msra.mxu1 %v6566_v59  ;;  %v6590_v62 = vld [vmem:[#allocation10 + $0x38] sm:$0xff]  ;;  %v6596_v59 = vld [vmem:[#allocation10 + $0x10] sm:$0xff] }
 0x697   :  { %4668 = vmatprep.subr.mxu0 %v6848_v15  ;;  %4703 = vmatprep.subr.mxu1 %v6848_v15 }
 0x698   :  { %4669 = vmatpush3.msra.mxu0 %v6572_v58  ;;  %4704 = vmatpush3.msra.mxu1 %v6574_v57  ;;  %v6600_v57 = vld [vmem:[#allocation10 + $0x18] sm:$0xff] }
 0x699   :  { %4670 = vmatprep.subr.mxu0 %v6848_v15  ;;  %4705 = vmatprep.subr.mxu1 %v6848_v15 }
 0x69a   :  { %4671 = vmatpush3.msra.mxu0 %v6580_v52  ;;  %4706 = vmatpush3.msra.mxu1 %v6582_v63 }
 0x69b   :  { %4672 = vmatprep.subr.mxu0 %v6848_v15  ;;  %4707 = vmatprep.subr.mxu1 %v6848_v15 }
 0x69c   :  { %4673 = vmatpush3.msra.mxu0 %v6588_v56  ;;  %4708 = vmatpush3.msra.mxu1 %v6590_v62 }
 0x69d   :  { %4674 = vmatprep.subr.mxu0 %v6848_v15  ;;  %4709 = vmatprep.subr.mxu1 %v6848_v15 }
 0x69e   :  { %4675 = vmatpush3.msra.mxu0 %v6596_v59  ;;  %4676 = vmatprep.mubr.msk.f32.mxu0 %vm5152_vm0, %v6848_v15 }
 0x69f   :  { %4710 = vmatpush3.msra.mxu1 %v6600_v57  ;;  %4711 = vmatprep.mubr.msk.f32.mxu1 %vm5152_vm0, %v6848_v15 }
 0x6a0   :  { %4677 = vmatmul.mubr.f32.vlgmr.msra.gmra.mxu0 %v6475_v55  ;;  %4712 = vmatmul.mubr.f32.vlgmr.msra.gmra.mxu1 %v6475_v55 }
 0x6a1   :  { %4714 = vmatprep.subr.mxu0 %v6848_v15  ;;  %4749 = vmatprep.subr.mxu1 %v6848_v15 }
 0x6a2   :  { %4715 = vmatpush3.msra.mxu0 %v6343_v22  ;;  %4750 = vmatpush3.msra.mxu1 %v6345_v33 }
 0x6a3   :  { %4716 = vmatprep.subr.mxu0 %v6848_v15  ;;  %4751 = vmatprep.subr.mxu1 %v6848_v15 }
 0x6a4   :  { %4717 = vmatpush3.msra.mxu0 %v6351_v28  ;;  %4752 = vmatpush3.msra.mxu1 %v6353_v0 }
 0x6a5   :  { %4718 = vmatprep.subr.mxu0 %v6848_v15  ;;  %4753 = vmatprep.subr.mxu1 %v6848_v15 }
 0x6a6   :  { %4719 = vmatpush3.msra.mxu0 %v6359_v17  ;;  %4754 = vmatpush3.msra.mxu1 %v6361_v18  ;;  %v2356_v17 = vld [vmem:[#allocation4 + $0xc8] sm:$0xff]  ;;  %v2451_v18 = vld [vmem:[#allocation4 + $0xc0] sm:$0xff] }
 0x6a7   :  { %4720 = vmatprep.subr.mxu0 %v6848_v15  ;;  %4755 = vmatprep.subr.mxu1 %v6848_v15 }
 0x6a8   :  { %4721 = vmatpush3.msra.mxu0 %v6367_v1  ;;  %4756 = vmatpush3.msra.mxu1 %v6369_v2 }
 0x6a9   :  { %4722 = vmatprep.subr.mxu0 %v6848_v15  ;;  %4757 = vmatprep.subr.mxu1 %v6848_v15 }
 0x6aa   :  { %4723 = vmatpush3.msra.mxu0 %v6375_v3  ;;  %4758 = vmatpush3.msra.mxu1 %v6377_v4 }
 0x6ab   :  { %4724 = vmatprep.subr.mxu0 %v6848_v15  ;;  %4759 = vmatprep.subr.mxu1 %v6848_v15 }
 0x6ac   :  { %4725 = vmatpush3.msra.mxu0 %v6383_v5  ;;  %4760 = vmatpush3.msra.mxu1 %v6385_v6 }
 0x6ad   :  { %4726 = vmatprep.subr.mxu0 %v6848_v15  ;;  %4761 = vmatprep.subr.mxu1 %v6848_v15 }
 0x6ae   :  { %4727 = vmatpush3.msra.mxu0 %v6391_v7  ;;  %4762 = vmatpush3.msra.mxu1 %v6393_v8 }
 0x6af   :  { %4728 = vmatprep.subr.mxu0 %v6848_v15  ;;  %4763 = vmatprep.subr.mxu1 %v6848_v15 }
 0x6b0   :  { %4729 = vmatpush3.msra.mxu0 %v6399_v9  ;;  %4764 = vmatpush3.msra.mxu1 %v6401_v10  ;;  %v2545_v9 = vld [vmem:[#allocation4 + $0xd0] sm:$0xff]  ;;  %v2636_v10 = vld [vmem:[#allocation4 + $0xd8] sm:$0xff] }
 0x6b1   :  { %4730 = vmatprep.subr.mxu0 %v6848_v15  ;;  %4765 = vmatprep.subr.mxu1 %v6848_v15 }
 0x6b2   :  { %4731 = vmatpush3.msra.mxu0 %v6407_v11  ;;  %4766 = vmatpush3.msra.mxu1 %v6409_v12 }
 0x6b3   :  { %4732 = vmatprep.subr.mxu0 %v6848_v15  ;;  %4767 = vmatprep.subr.mxu1 %v6848_v15 }
 0x6b4   :  { %4733 = vmatpush3.msra.mxu0 %v6413_v13  ;;  %4768 = vmatpush3.msra.mxu1 %v6415_v14 }
 0x6b5   :  { %4734 = vmatprep.subr.mxu0 %v6848_v15  ;;  %4769 = vmatprep.subr.mxu1 %v6848_v15 }
 0x6b6   :  { %4735 = vmatpush3.msra.mxu0 %v6419_v20  ;;  %4770 = vmatpush3.msra.mxu1 %v6421_v21 }
 0x6b7   :  { %4736 = vmatprep.subr.mxu0 %v6848_v15  ;;  %4771 = vmatprep.subr.mxu1 %v6848_v15 }
 0x6b8   :  { %4737 = vmatpush3.msra.mxu0 %v6427_v29  ;;  %4772 = vmatpush3.msra.mxu1 %v6429_v26 }
 0x6b9   :  { %4738 = vmatprep.subr.mxu0 %v6848_v15  ;;  %4773 = vmatprep.subr.mxu1 %v6848_v15 }
 0x6ba   :  { %4739 = vmatpush3.msra.mxu0 %v6435_v25  ;;  %4774 = vmatpush3.msra.mxu1 %v6437_v24 }
 0x6bb   :  { %4740 = vmatprep.subr.mxu0 %v6848_v15  ;;  %4775 = vmatprep.subr.mxu1 %v6848_v15 }
 0x6bc   :  { %4741 = vmatpush3.msra.mxu0 %v6443_v19  ;;  %4776 = vmatpush3.msra.mxu1 %v6445_v30 }
 0x6bd   :  { %4742 = vmatprep.subr.mxu0 %v6848_v15  ;;  %4777 = vmatprep.subr.mxu1 %v6848_v15 }
 0x6be   :  { %4743 = vmatpush3.msra.mxu0 %v6451_v31  ;;  %4778 = vmatpush3.msra.mxu1 %v6453_v32 }
 0x6bf   :  { %4744 = vmatprep.subr.mxu0 %v6848_v15  ;;  %4779 = vmatprep.subr.mxu1 %v6848_v15 }
 0x6c0   :  { %4745 = vmatpush3.msra.mxu0 %v6459_v47  ;;  %4780 = vmatpush3.msra.mxu1 %v6461_v48 }
 0x6c1   :  { %4746 = vmatprep.mubr.msk.f32.mxu0 %vm5152_vm0, %v6848_v15  ;;  %4781 = vmatprep.mubr.msk.f32.mxu1 %vm5152_vm0, %v6848_v15 }
 0x6c2   :  { %4784 = vmatprep.subr.mxu0 %v6848_v15  ;;  %4819 = vmatprep.subr.mxu1 %v6848_v15 }
 0x73f   :  { %v2439_v22 = vpop.f32.mrf.mxu0  ;;  %v2534_v33 = vpop.f32.mrf.mxu1 }
 0x740   :  { %v2443_v1 = vadd.f32 %v2439_v22, %v2356_v17  ;;  %v2538_v2 = vadd.f32 %v2534_v33, %v2451_v18 }
 0x741   :  { %v4608_v28 = vpop.f32.mrf.mxu0  ;;  %v4643_v0 = vpop.f32.mrf.mxu1 }
 0x742   :  { %v3184_v3 = vmul.f32 -1.442695, %v2443_v1  ;;  %v3185_v4 = vmul.f32 -1.442695, %v2538_v2 }
 0x744   :  { %4963 = vpow2.f32 %v3184_v3 }
 0x745   :  { %4965 = vpow2.f32 %v3185_v4 }
 0x751   :  { %v4964_v5 = vpop.eup %4963 }
 0x752   :  { %v4966_v6 = vpop.eup %4965  ;;  %v2447_v7 = vadd.f32 1.0, %v4964_v5 }
 0x753   :  { %v2542_v8 = vadd.f32 1.0, %v4966_v6 }
 0x754   :  { %4967 = vrcp.f32 %v2447_v7 }
 0x755   :  { %4969 = vrcp.f32 %v2542_v8 }
 0x760   :  { %v2628_v11 = vpop.f32.mrf.mxu0  ;;  %v2719_v12 = vpop.f32.mrf.mxu1 }
 0x761   :  { %v2632_v13 = vadd.f32 %v2628_v11, %v2545_v9  ;;  %v2723_v14 = vadd.f32 %v2719_v12, %v2636_v10  ;;  %v4968_v26 = vpop.eup %4967 }
 0x762   :  { %v4678_v20 = vpop.f32.mrf.mxu0  ;;  %v4713_v21 = vpop.f32.mrf.mxu1  ;;  %v2450_v19 = vmul.f32 %v4968_v26, %v6472_v60  ;;  %v6916_v60 = vld [vmem:[#allocation38_spill] sm:$0xff] }
 0x763   :  { %4971 = vtanh.f32 %v2632_v13  ;;  %v3186_v29 = vmul.f32 -1.442695, %v2723_v14  ;;  %v4970_v25 = vpop.eup %4969 }
 0x765   :  { %4973 = vpow2.f32 %v3186_v29 }
 0x770   :  { %v4972_v24 = vpop.eup %4971 }
 0x771   :  { %v2634_v30 = vmul.f32 %v4972_v24, %v4970_v25 }
 0x772   :  { %v4974_v31 = vpop.eup %4973 }
 0x773   :  { %v6683_v32 = vadd.f32 %v2634_v30, %v2450_v19  ;;  %v2727_v47 = vadd.f32 1.0, %v4974_v31 }
 0x775   :  { %4975 = vtanh.f32 %v6683_v32 }
 0x776   :  { %4977 = vrcp.f32 %v2727_v47 }
 0x782   :  { %v4976_v48 = vpop.eup %4975 }
 0x783   :  { %v4978_v55 = vpop.eup %4977 }
 0x784   :  { %v6686_v22 = vmul.f32 %v4978_v55, %v4976_v48 }
 0x786   :  { %2733 = vst [vmem:[#allocation12 + $0x30] sm:$0xff] %v6686_v22  ;;  %4747 = vmatmul.mubr.f32.vlgmr.msra.gmra.mxu0 %v6686_v22  ;;  %4782 = vmatmul.mubr.f32.vlgmr.msra.gmra.mxu1 %v6686_v22 }
 0x787   :  { %4785 = vmatpush3.msra.mxu0 %v6477_v16  ;;  %4820 = vmatpush3.msra.mxu1 %v6479_v49  ;;  %v6917_v16 = vld [vmem:[#allocation41_spill] sm:$0xff]  ;;  %v6918_v49 = vld [vmem:[#allocation42_spill] sm:$0xff] }
 0x788   :  { %4786 = vmatprep.subr.mxu0 %v6848_v15  ;;  %4821 = vmatprep.subr.mxu1 %v6848_v15 }
 0x789   :  { %4787 = vmatpush3.msra.mxu0 %v6484_v61  ;;  %4822 = vmatpush3.msra.mxu1 %v6486_v50 }
 0x78a   :  { %4788 = vmatprep.subr.mxu0 %v6848_v15  ;;  %4823 = vmatprep.subr.mxu1 %v6848_v15 }
 0x78b   :  { %4789 = vmatpush3.msra.mxu0 %v6492_v51  ;;  %4824 = vmatpush3.msra.mxu1 %v6494_v34 }
 0x78c   :  { %4790 = vmatprep.subr.mxu0 %v6848_v15  ;;  %4825 = vmatprep.subr.mxu1 %v6848_v15 }
 0x78d   :  { %4791 = vmatpush3.msra.mxu0 %v6500_v35  ;;  %4826 = vmatpush3.msra.mxu1 %v6502_v36  ;;  %v2735_v35 = vld [vmem:[#allocation4 + $0xe8] sm:$0xff]  ;;  %v2830_v36 = vld [vmem:[#allocation4 + $0xe0] sm:$0xff] }
 0x78e   :  { %4792 = vmatprep.subr.mxu0 %v6848_v15  ;;  %4827 = vmatprep.subr.mxu1 %v6848_v15 }
 0x78f   :  { %4793 = vmatpush3.msra.mxu0 %v6508_v37  ;;  %4828 = vmatpush3.msra.mxu1 %v6510_v38 }
 0x790   :  { %4794 = vmatprep.subr.mxu0 %v6848_v15  ;;  %4829 = vmatprep.subr.mxu1 %v6848_v15 }
 0x791   :  { %4795 = vmatpush3.msra.mxu0 %v6516_v39  ;;  %4830 = vmatpush3.msra.mxu1 %v6518_v40 }
 0x792   :  { %4796 = vmatprep.subr.mxu0 %v6848_v15  ;;  %4831 = vmatprep.subr.mxu1 %v6848_v15 }
 0x793   :  { %4797 = vmatpush3.msra.mxu0 %v6524_v41  ;;  %4832 = vmatpush3.msra.mxu1 %v6526_v42 }
 0x794   :  { %4798 = vmatprep.subr.mxu0 %v6848_v15  ;;  %4833 = vmatprep.subr.mxu1 %v6848_v15 }
 0x795   :  { %4799 = vmatpush3.msra.mxu0 %v6532_v43  ;;  %4834 = vmatpush3.msra.mxu1 %v6534_v44  ;;  %v2924_v44 = vld [vmem:[#allocation4 + $0xf0] sm:$0xff] }
 0x796   :  { %4800 = vmatprep.subr.mxu0 %v6848_v15  ;;  %4835 = vmatprep.subr.mxu1 %v6848_v15 }
 0x797   :  { %4801 = vmatpush3.msra.mxu0 %v6540_v45  ;;  %4836 = vmatpush3.msra.mxu1 %v6542_v46  ;;  %v3015_v45 = vld [vmem:[#allocation4 + $0xf8] sm:$0xff] }
 0x798   :  { %4802 = vmatprep.subr.mxu0 %v6848_v15  ;;  %4837 = vmatprep.subr.mxu1 %v6848_v15 }
 0x799   :  { %4803 = vmatpush3.msra.mxu0 %v6548_v53  ;;  %4838 = vmatpush3.msra.mxu1 %v6550_v54 }
 0x79a   :  { %4804 = vmatprep.subr.mxu0 %v6848_v15  ;;  %4839 = vmatprep.subr.mxu1 %v6848_v15 }
 0x79b   :  { %4805 = vmatpush3.msra.mxu0 %v6556_v27  ;;  %4840 = vmatpush3.msra.mxu1 %v6558_v23 }
 0x79c   :  { %4806 = vmatprep.subr.mxu0 %v6848_v15  ;;  %4841 = vmatprep.subr.mxu1 %v6848_v15 }
 0x79d   :  { %4807 = vmatpush3.msra.mxu0 %v6916_v60  ;;  %4842 = vmatpush3.msra.mxu1 %v6917_v16 }
 0x79e   :  { %4808 = vmatprep.subr.mxu0 %v6848_v15  ;;  %4843 = vmatprep.subr.mxu1 %v6848_v15 }
 0x79f   :  { %4809 = vmatpush3.msra.mxu0 %v6572_v58  ;;  %4844 = vmatpush3.msra.mxu1 %v6918_v49 }
 0x7a0   :  { %4810 = vmatprep.subr.mxu0 %v6848_v15  ;;  %4845 = vmatprep.subr.mxu1 %v6848_v15 }
 0x7a1   :  { %4811 = vmatpush3.msra.mxu0 %v6580_v52  ;;  %4846 = vmatpush3.msra.mxu1 %v6582_v63 }
 0x7a2   :  { %4812 = vmatprep.subr.mxu0 %v6848_v15  ;;  %4847 = vmatprep.subr.mxu1 %v6848_v15 }
 0x7a3   :  { %4813 = vmatpush3.msra.mxu0 %v6588_v56  ;;  %4848 = vmatpush3.msra.mxu1 %v6590_v62 }
 0x7a4   :  { %4814 = vmatprep.subr.mxu0 %v6848_v15  ;;  %4849 = vmatprep.subr.mxu1 %v6848_v15 }
 0x7a5   :  { %4815 = vmatpush3.msra.mxu0 %v6596_v59  ;;  %4816 = vmatprep.mubr.msk.f32.mxu0 %vm5152_vm0, %v6848_v15 }
 0x7a6   :  { %4850 = vmatpush3.msra.mxu1 %v6600_v57  ;;  %4851 = vmatprep.mubr.msk.f32.mxu1 %vm5152_vm0, %v6848_v15 }
 0x7a7   :  { %4817 = vmatmul.mubr.f32.vlgmr.msra.gmra.mxu0 %v6686_v22  ;;  %4852 = vmatmul.mubr.f32.vlgmr.msra.gmra.mxu1 %v6686_v22 }
 0x846   :  { %v2818_v61 = vpop.f32.mrf.mxu0  ;;  %v2913_v50 = vpop.f32.mrf.mxu1 }
 0x847   :  { %v2822_v37 = vadd.f32 %v2818_v61, %v2735_v35  ;;  %v2917_v38 = vadd.f32 %v2913_v50, %v2830_v36 }
 0x848   :  { %v4748_v51 = vpop.f32.mrf.mxu0  ;;  %v4783_v34 = vpop.f32.mrf.mxu1 }
 0x849   :  { %v3187_v39 = vmul.f32 -1.442695, %v2822_v37  ;;  %v3188_v40 = vmul.f32 -1.442695, %v2917_v38 }
 0x84b   :  { %4979 = vpow2.f32 %v3187_v39 }
 0x84c   :  { %4981 = vpow2.f32 %v3188_v40 }
 0x858   :  { %v4980_v41 = vpop.eup %4979 }
 0x859   :  { %v4982_v42 = vpop.eup %4981  ;;  %v2826_v43 = vadd.f32 1.0, %v4980_v41 }
 0x85a   :  { %v2921_v15 = vadd.f32 1.0, %v4982_v42 }
 0x85b   :  { %4983 = vrcp.f32 %v2826_v43 }
 0x85c   :  { %4985 = vrcp.f32 %v2921_v15 }
 0x867   :  { %v3007_v46 = vpop.f32.mrf.mxu0  ;;  %v3098_v53 = vpop.f32.mrf.mxu1 }
 0x868   :  { %v3011_v54 = vadd.f32 %v3007_v46, %v2924_v44  ;;  %v3102_v27 = vadd.f32 %v3098_v53, %v3015_v45  ;;  %v4984_v58 = vpop.eup %4983 }
 0x869   :  { %v4818_v23 = vpop.f32.mrf.mxu0  ;;  %v4853_v62 = vpop.f32.mrf.mxu1  ;;  %v2829_v63 = vmul.f32 %v4984_v58, %v6683_v32 }
 0x86a   :  { %4987 = vtanh.f32 %v3011_v54  ;;  %v3189_v59 = vmul.f32 -1.442695, %v3102_v27  ;;  %v4986_v57 = vpop.eup %4985 }
 0x86c   :  { %4989 = vpow2.f32 %v3189_v59 }
 0x877   :  { %v4988_v52 = vpop.eup %4987 }
 0x878   :  { %v3013_v56 = vmul.f32 %v4988_v52, %v4986_v57 }
 0x879   :  { %v4990_v33 = vpop.eup %4989 }
 0x87a   :  { %v3014_v28 = vadd.f32 %v3013_v56, %v2829_v63  ;;  %v3106_v0 = vadd.f32 1.0, %v4990_v33 }
 0x87c   :  { %3119 = vst [vmem:[#allocation15] sm:$0xff] %v3014_v28  ;;  %4991 = vrcp.f32 %v3106_v0 }
 0x87d   :  { %4993 = vtanh.f32 %v3014_v28 }
 0x889   :  { %v4992_v17 = vpop.eup %4991 }
 0x88a   :  { %v4994_v18 = vpop.eup %4993 }
 0x88b   :  { %v3110_v1 = vmul.f32 %v4994_v18, %v4992_v17 }
 0x88d   :  { %3112 = vst [vmem:[#allocation12 + $0x38] sm:$0xff] %v3110_v1  ;;  %3118 = vst [vmem:[#allocation13] sm:$0xff] %v3110_v1 }
 0x88e   :  { %5086 = shalt.err (!%p5083_p10)
}
 0x88f   :  { %3141 = dma.vmem_to_hbm [thread:$0]  %s3139_s3, 128, %s6774_s5, [#allocation14]  }
 0x890   :  { %s5095_s24 = scalar_lea.vmem %s3126_s18, 1024  ;;  %p5100_p12 = scmp.lt.s32.totalorder %s3126_s18, %s3126_s18 }
 0x891   :  { %p5096_p11 = scmp.ne.s32.totalorder %s3126_s18, %s5095_s24  ;;  %p5101_p13 = scmp.lt.s32.totalorder %s5095_s24, %s5095_s24 }
 0x893   :  { %p5102_p0 = por %p5101_p13, %p5100_p12 }
 0x895   :  { %p5103_p1 = pnand %p5102_p0, %p5096_p11 }
 0x897   :  { %5106 = shalt.err (!%p5103_p1)
}
 0x898   :  { %s5156_s25 = smov 128   ;;  %s5157_s26 = smov 8  }
 0x899   :  { %3131 = dma.vmem_to_hbm [thread:$0]  %s3126_s18, 1024, %s6773_s4, [#allocation6], %s5156_s25, %s5156_s25, %s5157_s26  }
 0x89a   :  { %s5115_s29 = scalar_lea.vmem %s3149_s20, 128  ;;  %p5120_p3 = scmp.lt.s32.totalorder %s3149_s20, %s3149_s20 }
 0x89b   :  { %p5116_p2 = scmp.ne.s32.totalorder %s3149_s20, %s5115_s29  ;;  %p5121_p4 = scmp.lt.s32.totalorder %s5115_s29, %s5115_s29 }
 0x89d   :  { %p5122_p5 = por %p5121_p4, %p5120_p3 }
 0x89f   :  { %p5123_p6 = pnand %p5122_p5, %p5116_p2 }
 0x8a1   :  { %5126 = shalt.err (!%p5123_p6)
}
 0x8a2   :  { %3151 = dma.vmem_to_hbm [thread:$0]  %s3149_s20, 128, %s6775_s6, [#allocation14]  }
 0x8a3   :  { %5141 = dma.done.wait [#allocation6], 1024  }
 0x8a4   :  { %5142 = vsyncadd [#allocation6], 4294966272 }
 0x8a5   :  { %5143 = dma.done.wait [#allocation14], 256  }
 0x8a6   :  { %5144 = vsyncadd [#allocation14], 4294967040 }
 0x8a7   :  { %3161 = vsyncpa [#allocation5], 1 }
 0x8a8   :  { %3162 = vsyncpa [#allocation8], 1 }
 0x8a9   :  { %3163 = vsyncpa [#allocation11], 1 }
 0x8aa   :  { %3164 = vsyncpa [#allocation6], 1 }
 0x8ab   :  { %3165 = vsyncpa [#allocation14], 1 }

// kernel: tpu_custom_call.1
= control target key start
LH: loop header
LB: loop body
LE: loop exit
PB: predicated region body
PF: predicated region fallthrough
CT: control target
= control target key end

     0   :  { %12 = vsyncpa [#allocation5], 0  ;;  %s6769_s0 = inlined_call_operand.hbm [shape: f32[8,8,512], index: 0, kind: input, shape index: {}]   ;;  %s6770_s1 = inlined_call_operand.hbm [shape: f32[8,128], index: 1, kind: input, shape index: {}]   ;;  %s6771_s2 = inlined_call_operand.hbm [shape: f32[8,128], index: 2, kind: input, shape index: {}]   ;;  %s6772_s3 = inlined_call_operand.hbm [shape: f32[128,512], index: 3, kind: input, shape index: {}]   ;;  %s6773_s4 = inlined_call_operand.hbm [shape: f32[8,8,128], index: 4, kind: output, shape index: {0}]   ;;  %s6774_s5 = inlined_call_operand.hbm [shape: f32[8,128], index: 5, kind: output, shape index: {1}]   ;;  %s6775_s6 = inlined_call_operand.hbm [shape: f32[8,128], index: 6, kind: output, shape index: {2}]  }
   0x1   :  { %13 = vsyncpa [#allocation8], 0 }
   0x2   :  { %14 = vsyncpa [#allocation11], 0 }
   0x3   :  { %15 = vsyncpa [#allocation6], 0 }
   0x4   :  { %16 = vsyncpa [#allocation14], 0  ;;  %s5145_s21 = smov [#allocation7]   ;;  %s5146_s23 = smov [#allocation4]  }
   0x5   :  { %s35_s22 = sshll.u32 %s5145_s21, 4  ;;  %s22_s24 = sshll.u32 %s5146_s23, 4  ;;  %s36_s22 = int_to_ptr.vmem [resolvable:$true] %s35_s22  ;;  %s23_s24 = int_to_ptr.vmem [resolvable:$true] %s22_s24 }
   0x6   :  { %s5003_s25 = scalar_lea.vmem %s36_s22, 128  ;;  %p5008_p1 = scmp.lt.s32.totalorder %s36_s22, %s36_s22 }
   0x7   :  { %p5004_p0 = scmp.ne.s32.totalorder %s36_s22, %s5003_s25  ;;  %p5009_p2 = scmp.lt.s32.totalorder %s5003_s25, %s5003_s25 }
   0x9   :  { %p5010_p3 = por %p5009_p2, %p5008_p1 }
   0xb   :  { %p5011_p4 = pnand %p5010_p3, %p5004_p0 }
   0xd   :  { %5014 = shalt.err (!%p5011_p4)
}
   0xe   :  { %38 = dma.hbm_to_vmem [thread:$0]  %s6770_s1, 128, %s36_s22, [#allocation8]  }
   0xf   :  { %s5023_s28 = scalar_lea.vmem %s23_s24, 4096  ;;  %p5028_p6 = scmp.lt.s32.totalorder %s23_s24, %s23_s24 }
  0x10   :  { %p5024_p5 = scmp.ne.s32.totalorder %s23_s24, %s5023_s28  ;;  %p5029_p7 = scmp.lt.s32.totalorder %s5023_s28, %s5023_s28 }
  0x12   :  { %p5030_p8 = por %p5029_p7, %p5028_p6 }
  0x14   :  { %p5031_p9 = pnand %p5030_p8, %p5024_p5 }
  0x16   :  { %5034 = shalt.err (!%p5031_p9)
}
  0x17   :  { %s5147_s29 = smov 512   ;;  %s5148_s30 = smov 32  }
  0x18   :  { %28 = dma.hbm_to_vmem [thread:$0]  %s6769_s0, 4096, %s23_s24, [#allocation5], %s5147_s29, %s5147_s29, %s5148_s30  }
  0x19   :  { %s5149_s9 = smov [#allocation9]   ;;  %s5150_s11 = smov [#allocation10]  }
  0x1a   :  { %s45_s10 = sshll.u32 %s5149_s9, 4  ;;  %s54_s12 = sshll.u32 %s5150_s11, 4  ;;  %s46_s10 = int_to_ptr.vmem [resolvable:$true] %s45_s10  ;;  %s55_s12 = int_to_ptr.vmem [resolvable:$true] %s54_s12 }
  0x1b   :  { %s5043_s1 = scalar_lea.vmem %s46_s10, 128  ;;  %p5048_p11 = scmp.lt.s32.totalorder %s46_s10, %s46_s10 }
  0x1c   :  { %p5044_p10 = scmp.ne.s32.totalorder %s46_s10, %s5043_s1  ;;  %p5049_p12 = scmp.lt.s32.totalorder %s5043_s1, %s5043_s1 }
  0x1e   :  { %p5050_p13 = por %p5049_p12, %p5048_p11 }
  0x20   :  { %p5051_p0 = pnand %p5050_p13, %p5044_p10 }
  0x22   :  { %5054 = shalt.err (!%p5051_p0)
}
  0x23   :  { %48 = dma.hbm_to_vmem [thread:$0]  %s6771_s2, 128, %s46_s10, [#allocation8]  }
  0x24   :  { %s5063_s15 = scalar_lea.vmem %s55_s12, 8192  ;;  %p5068_p2 = scmp.lt.s32.totalorder %s55_s12, %s55_s12 }
  0x25   :  { %p5064_p1 = scmp.ne.s32.totalorder %s55_s12, %s5063_s15  ;;  %p5069_p3 = scmp.lt.s32.totalorder %s5063_s15, %s5063_s15 }
  0x27   :  { %p5070_p4 = por %p5069_p3, %p5068_p2 }
  0x29   :  { %p5071_p5 = pnand %p5070_p4, %p5064_p1 }
  0x2b   :  { %5074 = shalt.err (!%p5071_p5)
}
  0x2c   :  { %60 = dma.hbm_to_vmem [thread:$0]  %s6772_s3, 8192, %s55_s12, [#allocation11], %s5147_s29, %s5147_s29, %s5148_s30  }
  0x2d   :  { %5135 = dma.done.wait [#allocation5], 4096  }
  0x2e   :  { %5136 = vsyncadd [#allocation5], 4294963200 }
  0x2f   :  { %5137 = dma.done.wait [#allocation8], 256  }
  0x30   :  { %5138 = vsyncadd [#allocation8], 4294967040 }
  0x31   :  { %5139 = dma.done.wait [#allocation11], 8192  }
  0x32   :  { %5140 = vsyncadd [#allocation11], 4294959104  ;;  %v6796_v0 = vmov 0.0   ;;  %vm5152_vm0 = vmmov 0   ;;  %v5211_v1 = vld [vmem:[#allocation10 + $0x1e8] sm:$0xff]  ;;  %v5213_v2 = vld [vmem:[#allocation10 + $0x1e0] sm:$0xff] }
  0x33   :  { %3734 = vmatprep.subr.mxu0 %v6796_v0  ;;  %3769 = vmatprep.subr.mxu1 %v6796_v0  ;;  %v5215_v3 = vld [vmem:[#allocation10 + $0x1c8] sm:$0xff]  ;;  %v5219_v4 = vld [vmem:[#allocation10 + $0x1c0] sm:$0xff]  ;;  %v5333_v33 = vld [vmem:[#allocation7] sm:$0xff]  ;;  %s5153_s2 = smov [#allocation13]   ;;  %s5154_s17 = smov [#allocation12]  }
  0x34   :  { %3766 = vmatprep.mubr.msk.f32.mxu0 %vm5152_vm0, %v6796_v0  ;;  %3801 = vmatprep.mubr.msk.f32.mxu1 %vm5152_vm0, %v6796_v0  ;;  %v5223_v5 = vld [vmem:[#allocation10 + $0x1a8] sm:$0xff]  ;;  %v5225_v6 = vld [vmem:[#allocation10 + $0x1a0] sm:$0xff]  ;;  %v5339_v34 = vld [vmem:[#allocation10 + $0x1f0] sm:$0xff]  ;;  %s3138_s3 = sshll.u32 %s5153_s2, 4  ;;  %s3125_s18 = sshll.u32 %s5154_s17, 4  ;;  %s3139_s3 = int_to_ptr.vmem [resolvable:$true] %s3138_s3  ;;  %s3126_s18 = int_to_ptr.vmem [resolvable:$true] %s3125_s18 }
  0x35   :  { %3735 = vmatpush3.msra.mxu0 %v5211_v1  ;;  %3770 = vmatpush3.msra.mxu1 %v5213_v2  ;;  %v5231_v7 = vld [vmem:[#allocation10 + $0x188] sm:$0xff]  ;;  %v5233_v8 = vld [vmem:[#allocation10 + $0x180] sm:$0xff]  ;;  %v5341_v35 = vld [vmem:[#allocation10 + $0x1f8] sm:$0xff]  ;;  %s5155_s19 = smov [#allocation15]   ;;  %s5075_s21 = scalar_lea.vmem %s3139_s3, 128 }
  0x36   :  { %3736 = vmatprep.subr.mxu0 %v6796_v0  ;;  %3771 = vmatprep.subr.mxu1 %v6796_v0  ;;  %v5239_v9 = vld [vmem:[#allocation10 + $0x168] sm:$0xff]  ;;  %v5241_v10 = vld [vmem:[#allocation10 + $0x160] sm:$0xff]  ;;  %v5347_v36 = vld [vmem:[#allocation10 + $0x1d0] sm:$0xff]  ;;  %s3148_s20 = sshll.u32 %s5155_s19, 4  ;;  %p5076_p6 = scmp.ne.s32.totalorder %s3139_s3, %s5075_s21  ;;  %s3149_s20 = int_to_ptr.vmem [resolvable:$true] %s3148_s20 }
  0x37   :  { %3737 = vmatpush3.msra.mxu0 %v5215_v3  ;;  %3772 = vmatpush3.msra.mxu1 %v5219_v4  ;;  %v5247_v11 = vld [vmem:[#allocation10 + $0x148] sm:$0xff]  ;;  %v5249_v12 = vld [vmem:[#allocation10 + $0x140] sm:$0xff]  ;;  %v5349_v37 = vld [vmem:[#allocation10 + $0x1d8] sm:$0xff]  ;;  %p5080_p7 = scmp.lt.s32.totalorder %s3139_s3, %s3139_s3  ;;  %p5081_p8 = scmp.lt.s32.totalorder %s5075_s21, %s5075_s21 }
  0x38   :  { %3738 = vmatprep.subr.mxu0 %v6796_v0  ;;  %3773 = vmatprep.subr.mxu1 %v6796_v0  ;;  %v5255_v13 = vld [vmem:[#allocation10 + $0x128] sm:$0xff]  ;;  %v5257_v14 = vld [vmem:[#allocation10 + $0x120] sm:$0xff]  ;;  %v5355_v38 = vld [vmem:[#allocation10 + $0x1b0] sm:$0xff] }
  0x39   :  { %3739 = vmatpush3.msra.mxu0 %v5223_v5  ;;  %3774 = vmatpush3.msra.mxu1 %v5225_v6  ;;  %v5263_v15 = vld [vmem:[#allocation10 + $0x108] sm:$0xff]  ;;  %v5265_v16 = vld [vmem:[#allocation10 + $0x100] sm:$0xff]  ;;  %v5357_v39 = vld [vmem:[#allocation10 + $0x1b8] sm:$0xff]  ;;  %p5082_p9 = por %p5081_p8, %p5080_p7 }
  0x3a   :  { %3740 = vmatprep.subr.mxu0 %v6796_v0  ;;  %3775 = vmatprep.subr.mxu1 %v6796_v0  ;;  %6828 = vst [vmem:[#allocation21_spill] sm:$0xff] %v5263_v15  ;;  %6829 = vst [vmem:[#allocation22_spill] sm:$0xff] %v5265_v16  ;;  %v5271_v17 = vld [vmem:[#allocation10 + $0xe8] sm:$0xff]  ;;  %v5273_v18 = vld [vmem:[#allocation10 + $0xe0] sm:$0xff] }
  0x3b   :  { %3741 = vmatpush3.msra.mxu0 %v5231_v7  ;;  %3776 = vmatpush3.msra.mxu1 %v5233_v8  ;;  %6830 = vst [vmem:[#allocation23_spill] sm:$0xff] %v5271_v17  ;;  %6831 = vst [vmem:[#allocation24_spill] sm:$0xff] %v5273_v18  ;;  %v5279_v19 = vld [vmem:[#allocation10 + $0xc8] sm:$0xff]  ;;  %v5281_v20 = vld [vmem:[#allocation10 + $0xc0] sm:$0xff]  ;;  %p5083_p10 = pnand %p5082_p9, %p5076_p6 }
  0x3c   :  { %3742 = vmatprep.subr.mxu0 %v6796_v0  ;;  %3777 = vmatprep.subr.mxu1 %v6796_v0  ;;  %6832 = vst [vmem:[#allocation25_spill] sm:$0xff] %v5279_v19  ;;  %6833 = vst [vmem:[#allocation26_spill] sm:$0xff] %v5281_v20  ;;  %v5287_v21 = vld [vmem:[#allocation10 + $0xa8] sm:$0xff]  ;;  %v5289_v22 = vld [vmem:[#allocation10 + $0xa0] sm:$0xff] }
  0x3d   :  { %3743 = vmatpush3.msra.mxu0 %v5239_v9  ;;  %3778 = vmatpush3.msra.mxu1 %v5241_v10  ;;  %6834 = vst [vmem:[#allocation27_spill] sm:$0xff] %v5287_v21  ;;  %6835 = vst [vmem:[#allocation28_spill] sm:$0xff] %v5289_v22  ;;  %v5295_v23 = vld [vmem:[#allocation10 + $0x88] sm:$0xff]  ;;  %v5297_v24 = vld [vmem:[#allocation10 + $0x80] sm:$0xff] }
  0x3e   :  { %3744 = vmatprep.subr.mxu0 %v6796_v0  ;;  %3779 = vmatprep.subr.mxu1 %v6796_v0  ;;  %6836 = vst [vmem:[#allocation29_spill] sm:$0xff] %v5295_v23  ;;  %6837 = vst [vmem:[#allocation30_spill] sm:$0xff] %v5297_v24  ;;  %v5303_v25 = vld [vmem:[#allocation10 + $0x68] sm:$0xff]  ;;  %v5305_v26 = vld [vmem:[#allocation10 + $0x60] sm:$0xff] }
  0x3f   :  { %3745 = vmatpush3.msra.mxu0 %v5247_v11  ;;  %3780 = vmatpush3.msra.mxu1 %v5249_v12  ;;  %6838 = vst [vmem:[#allocation31_spill] sm:$0xff] %v5303_v25  ;;  %6839 = vst [vmem:[#allocation32_spill] sm:$0xff] %v5305_v26  ;;  %v5311_v27 = vld [vmem:[#allocation10 + $0x48] sm:$0xff]  ;;  %v5313_v28 = vld [vmem:[#allocation10 + $0x40] sm:$0xff] }
  0x40   :  { %3746 = vmatprep.subr.mxu0 %v6796_v0  ;;  %3781 = vmatprep.subr.mxu1 %v6796_v0  ;;  %6840 = vst [vmem:[#allocation33_spill] sm:$0xff] %v5311_v27  ;;  %6841 = vst [vmem:[#allocation34_spill] sm:$0xff] %v5313_v28  ;;  %v5319_v29 = vld [vmem:[#allocation10 + $0x28] sm:$0xff]  ;;  %v5321_v30 = vld [vmem:[#allocation10 + $0x20] sm:$0xff] }
  0x41   :  { %3747 = vmatpush3.msra.mxu0 %v5255_v13  ;;  %3782 = vmatpush3.msra.mxu1 %v5257_v14  ;;  %6842 = vst [vmem:[#allocation35_spill] sm:$0xff] %v5319_v29  ;;  %6843 = vst [vmem:[#allocation36_spill] sm:$0xff] %v5321_v30  ;;  %v5327_v31 = vld [vmem:[#allocation10 + $0x8] sm:$0xff]  ;;  %v5329_v32 = vld [vmem:[#allocation10] sm:$0xff] }
  0x42   :  { %3748 = vmatprep.subr.mxu0 %v6796_v0  ;;  %3783 = vmatprep.subr.mxu1 %v6796_v0  ;;  %6844 = vst [vmem:[#allocation37_spill] sm:$0xff] %v5327_v31  ;;  %6845 = vst [vmem:[#allocation38_spill] sm:$0xff] %v5329_v32  ;;  %v5363_v40 = vld [vmem:[#allocation10 + $0x190] sm:$0xff]  ;;  %v5365_v41 = vld [vmem:[#allocation10 + $0x198] sm:$0xff] }
  0x43   :  { %3749 = vmatpush3.msra.mxu0 %v5263_v15  ;;  %3784 = vmatpush3.msra.mxu1 %v5265_v16  ;;  %v5371_v42 = vld [vmem:[#allocation10 + $0x170] sm:$0xff]  ;;  %v5373_v43 = vld [vmem:[#allocation10 + $0x178] sm:$0xff] }
  0x44   :  { %3750 = vmatprep.subr.mxu0 %v6796_v0  ;;  %3785 = vmatprep.subr.mxu1 %v6796_v0  ;;  %v5379_v44 = vld [vmem:[#allocation10 + $0x150] sm:$0xff]  ;;  %v5381_v45 = vld [vmem:[#allocation10 + $0x158] sm:$0xff] }
  0x45   :  { %3751 = vmatpush3.msra.mxu0 %v5271_v17  ;;  %3786 = vmatpush3.msra.mxu1 %v5273_v18  ;;  %v5387_v46 = vld [vmem:[#allocation10 + $0x130] sm:$0xff]  ;;  %v5389_v47 = vld [vmem:[#allocation10 + $0x138] sm:$0xff] }
  0x46   :  { %3752 = vmatprep.subr.mxu0 %v6796_v0  ;;  %3787 = vmatprep.subr.mxu1 %v6796_v0  ;;  %v5395_v48 = vld [vmem:[#allocation10 + $0x110] sm:$0xff]  ;;  %v5397_v49 = vld [vmem:[#allocation10 + $0x118] sm:$0xff] }
  0x47   :  { %3753 = vmatpush3.msra.mxu0 %v5279_v19  ;;  %3788 = vmatpush3.msra.mxu1 %v5281_v20  ;;  %v5403_v50 = vld [vmem:[#allocation10 + $0xf0] sm:$0xff]  ;;  %v5405_v51 = vld [vmem:[#allocation10 + $0xf8] sm:$0xff] }
  0x48   :  { %3754 = vmatprep.subr.mxu0 %v6796_v0  ;;  %3789 = vmatprep.subr.mxu1 %v6796_v0  ;;  %v5411_v52 = vld [vmem:[#allocation10 + $0xd0] sm:$0xff]  ;;  %v5413_v53 = vld [vmem:[#allocation10 + $0xd8] sm:$0xff] }
  0x49   :  { %3755 = vmatpush3.msra.mxu0 %v5287_v21  ;;  %3790 = vmatpush3.msra.mxu1 %v5289_v22  ;;  %v5419_v54 = vld [vmem:[#allocation10 + $0xb0] sm:$0xff]  ;;  %v5421_v55 = vld [vmem:[#allocation10 + $0xb8] sm:$0xff] }
  0x4a   :  { %3756 = vmatprep.subr.mxu0 %v6796_v0  ;;  %3791 = vmatprep.subr.mxu1 %v6796_v0  ;;  %v5427_v56 = vld [vmem:[#allocation10 + $0x90] sm:$0xff]  ;;  %v5429_v57 = vld [vmem:[#allocation10 + $0x98] sm:$0xff] }
  0x4b   :  { %3757 = vmatpush3.msra.mxu0 %v5295_v23  ;;  %3792 = vmatpush3.msra.mxu1 %v5297_v24  ;;  %6846 = vst [vmem:[#allocation39_spill] sm:$0xff] %v5429_v57  ;;  %v5435_v58 = vld [vmem:[#allocation10 + $0x70] sm:$0xff]  ;;  %v5437_v59 = vld [vmem:[#allocation10 + $0x78] sm:$0xff] }
  0x4c   :  { %3758 = vmatprep.subr.mxu0 %v6796_v0  ;;  %3793 = vmatprep.subr.mxu1 %v6796_v0  ;;  %6847 = vst [vmem:[#allocation40_spill] sm:$0xff] %v5437_v59  ;;  %v5443_v60 = vld [vmem:[#allocation10 + $0x50] sm:$0xff]  ;;  %v5445_v61 = vld [vmem:[#allocation10 + $0x58] sm:$0xff] }
  0x4d   :  { %3759 = vmatpush3.msra.mxu0 %v5303_v25  ;;  %3794 = vmatpush3.msra.mxu1 %v5305_v26  ;;  %v5451_v62 = vld [vmem:[#allocation10 + $0x30] sm:$0xff]  ;;  %v5453_v63 = vld [vmem:[#allocation10 + $0x38] sm:$0xff] }
  0x4e   :  { %3760 = vmatprep.subr.mxu0 %v6796_v0  ;;  %3795 = vmatprep.subr.mxu1 %v6796_v0 }
  0x4f   :  { %3761 = vmatpush3.msra.mxu0 %v5311_v27  ;;  %3796 = vmatpush3.msra.mxu1 %v5313_v28 }
  0x50   :  { %3762 = vmatprep.subr.mxu0 %v6796_v0  ;;  %3797 = vmatprep.subr.mxu1 %v6796_v0 }
  0x51   :  { %3763 = vmatpush3.msra.mxu0 %v5319_v29  ;;  %3798 = vmatpush3.msra.mxu1 %v5321_v30 }
  0x52   :  { %3764 = vmatprep.subr.mxu0 %v6796_v0  ;;  %3799 = vmatprep.subr.mxu1 %v6796_v0 }
  0x53   :  { %3765 = vmatpush3.msra.mxu0 %v5327_v31  ;;  %3800 = vmatpush3.msra.mxu1 %v5329_v32 }
  0x54   :  { %3767 = vmatmul.mubr.f32.vlgmr.msra.gmra.mxu0 %v5333_v33  ;;  %3802 = vmatmul.mubr.f32.vlgmr.msra.gmra.mxu1 %v5333_v33 }
  0x55   :  { %3804 = vmatprep.subr.mxu0 %v6796_v0  ;;  %3839 = vmatprep.subr.mxu1 %v6796_v0 }
  0x56   :  { %3805 = vmatpush3.msra.mxu0 %v5339_v34  ;;  %3840 = vmatpush3.msra.mxu1 %v5341_v35 }
  0x57   :  { %3806 = vmatprep.subr.mxu0 %v6796_v0  ;;  %3841 = vmatprep.subr.mxu1 %v6796_v0 }
  0x58   :  { %3807 = vmatpush3.msra.mxu0 %v5347_v36  ;;  %3842 = vmatpush3.msra.mxu1 %v5349_v37 }
  0x59   :  { %3808 = vmatprep.subr.mxu0 %v6796_v0  ;;  %3843 = vmatprep.subr.mxu1 %v6796_v0 }
  0x5a   :  { %3809 = vmatpush3.msra.mxu0 %v5355_v38  ;;  %3844 = vmatpush3.msra.mxu1 %v5357_v39 }
  0x5b   :  { %3810 = vmatprep.subr.mxu0 %v6796_v0  ;;  %3845 = vmatprep.subr.mxu1 %v6796_v0 }
  0x5c   :  { %3811 = vmatpush3.msra.mxu0 %v5363_v40  ;;  %3846 = vmatpush3.msra.mxu1 %v5365_v41 }
  0x5d   :  { %3812 = vmatprep.subr.mxu0 %v6796_v0  ;;  %3847 = vmatprep.subr.mxu1 %v6796_v0 }
  0x5e   :  { %3813 = vmatpush3.msra.mxu0 %v5371_v42  ;;  %3848 = vmatpush3.msra.mxu1 %v5373_v43 }
  0x5f   :  { %3814 = vmatprep.subr.mxu0 %v6796_v0  ;;  %3849 = vmatprep.subr.mxu1 %v6796_v0 }
  0x60   :  { %3815 = vmatpush3.msra.mxu0 %v5379_v44  ;;  %3850 = vmatpush3.msra.mxu1 %v5381_v45 }
  0x61   :  { %3816 = vmatprep.subr.mxu0 %v6796_v0  ;;  %3851 = vmatprep.subr.mxu1 %v6796_v0 }
  0x62   :  { %3817 = vmatpush3.msra.mxu0 %v5387_v46  ;;  %3852 = vmatpush3.msra.mxu1 %v5389_v47 }
  0x63   :  { %3818 = vmatprep.subr.mxu0 %v6796_v0  ;;  %3853 = vmatprep.subr.mxu1 %v6796_v0 }
  0x64   :  { %3819 = vmatpush3.msra.mxu0 %v5395_v48  ;;  %3854 = vmatpush3.msra.mxu1 %v5397_v49 }
  0x65   :  { %3820 = vmatprep.subr.mxu0 %v6796_v0  ;;  %3855 = vmatprep.subr.mxu1 %v6796_v0 }
  0x66   :  { %3821 = vmatpush3.msra.mxu0 %v5403_v50  ;;  %3856 = vmatpush3.msra.mxu1 %v5405_v51 }
  0x67   :  { %3822 = vmatprep.subr.mxu0 %v6796_v0  ;;  %3857 = vmatprep.subr.mxu1 %v6796_v0 }
  0x68   :  { %3823 = vmatpush3.msra.mxu0 %v5411_v52  ;;  %3858 = vmatpush3.msra.mxu1 %v5413_v53 }
  0x69   :  { %3824 = vmatprep.subr.mxu0 %v6796_v0  ;;  %3859 = vmatprep.subr.mxu1 %v6796_v0 }
  0x6a   :  { %3825 = vmatpush3.msra.mxu0 %v5419_v54  ;;  %3860 = vmatpush3.msra.mxu1 %v5421_v55 }
  0x6b   :  { %3826 = vmatprep.subr.mxu0 %v6796_v0  ;;  %3861 = vmatprep.subr.mxu1 %v6796_v0 }
  0x6c   :  { %3827 = vmatpush3.msra.mxu0 %v5427_v56  ;;  %3862 = vmatpush3.msra.mxu1 %v5429_v57  ;;  %v5459_v57 = vld [vmem:[#allocation10 + $0x10] sm:$0xff] }
  0x6d   :  { %3828 = vmatprep.subr.mxu0 %v6796_v0  ;;  %3863 = vmatprep.subr.mxu1 %v6796_v0 }
  0x6e   :  { %3829 = vmatpush3.msra.mxu0 %v5435_v58  ;;  %3864 = vmatpush3.msra.mxu1 %v5437_v59  ;;  %v5463_v59 = vld [vmem:[#allocation10 + $0x18] sm:$0xff] }
  0x6f   :  { %3830 = vmatprep.subr.mxu0 %v6796_v0  ;;  %3865 = vmatprep.subr.mxu1 %v6796_v0 }
  0x70   :  { %3831 = vmatpush3.msra.mxu0 %v5443_v60  ;;  %3866 = vmatpush3.msra.mxu1 %v5445_v61 }
  0x71   :  { %3832 = vmatprep.subr.mxu0 %v6796_v0  ;;  %3867 = vmatprep.subr.mxu1 %v6796_v0 }
  0x72   :  { %3833 = vmatpush3.msra.mxu0 %v5451_v62  ;;  %3868 = vmatpush3.msra.mxu1 %v5453_v63 }
  0x73   :  { %3834 = vmatprep.subr.mxu0 %v6796_v0  ;;  %3869 = vmatprep.subr.mxu1 %v6796_v0 }
  0x74   :  { %3835 = vmatpush3.msra.mxu0 %v5459_v57  ;;  %3836 = vmatprep.mubr.msk.f32.mxu0 %vm5152_vm0, %v6796_v0 }
  0x75   :  { %3870 = vmatpush3.msra.mxu1 %v5463_v59  ;;  %3871 = vmatprep.mubr.msk.f32.mxu1 %vm5152_vm0, %v6796_v0 }
  0x76   :  { %3837 = vmatmul.mubr.f32.vlgmr.msra.gmra.mxu0 %v5333_v33  ;;  %3872 = vmatmul.mubr.f32.vlgmr.msra.gmra.mxu1 %v5333_v33 }
  0x77   :  { %3874 = vmatprep.subr.mxu0 %v6796_v0  ;;  %3909 = vmatprep.subr.mxu1 %v6796_v0 }
  0x78   :  { %3875 = vmatpush3.msra.mxu0 %v5211_v1  ;;  %3910 = vmatpush3.msra.mxu1 %v5213_v2 }
  0x79   :  { %3876 = vmatprep.subr.mxu0 %v6796_v0  ;;  %3911 = vmatprep.subr.mxu1 %v6796_v0 }
  0x7a   :  { %3877 = vmatpush3.msra.mxu0 %v5215_v3  ;;  %3912 = vmatpush3.msra.mxu1 %v5219_v4 }
  0x7b   :  { %3878 = vmatprep.subr.mxu0 %v6796_v0  ;;  %3913 = vmatprep.subr.mxu1 %v6796_v0 }
  0x7c   :  { %3879 = vmatpush3.msra.mxu0 %v5223_v5  ;;  %3914 = vmatpush3.msra.mxu1 %v5225_v6 }
  0x7d   :  { %3880 = vmatprep.subr.mxu0 %v6796_v0  ;;  %3915 = vmatprep.subr.mxu1 %v6796_v0 }
  0x7e   :  { %3881 = vmatpush3.msra.mxu0 %v5231_v7  ;;  %3916 = vmatpush3.msra.mxu1 %v5233_v8 }
  0x7f   :  { %3882 = vmatprep.subr.mxu0 %v6796_v0  ;;  %3917 = vmatprep.subr.mxu1 %v6796_v0 }
  0x80   :  { %3883 = vmatpush3.msra.mxu0 %v5239_v9  ;;  %3918 = vmatpush3.msra.mxu1 %v5241_v10 }
  0x81   :  { %3884 = vmatprep.subr.mxu0 %v6796_v0  ;;  %3919 = vmatprep.subr.mxu1 %v6796_v0 }
  0x82   :  { %3885 = vmatpush3.msra.mxu0 %v5247_v11  ;;  %3920 = vmatpush3.msra.mxu1 %v5249_v12 }
  0x83   :  { %3886 = vmatprep.subr.mxu0 %v6796_v0  ;;  %3921 = vmatprep.subr.mxu1 %v6796_v0 }
  0x84   :  { %3887 = vmatpush3.msra.mxu0 %v5255_v13  ;;  %3922 = vmatpush3.msra.mxu1 %v5257_v14 }
  0x85   :  { %3888 = vmatprep.subr.mxu0 %v6796_v0  ;;  %3923 = vmatprep.subr.mxu1 %v6796_v0 }
  0x86   :  { %3889 = vmatpush3.msra.mxu0 %v5263_v15  ;;  %3924 = vmatpush3.msra.mxu1 %v5265_v16 }
  0x87   :  { %3890 = vmatprep.subr.mxu0 %v6796_v0  ;;  %3925 = vmatprep.subr.mxu1 %v6796_v0 }
  0x88   :  { %3891 = vmatpush3.msra.mxu0 %v5271_v17  ;;  %3926 = vmatpush3.msra.mxu1 %v5273_v18  ;;  %v363_v18 = vld [vmem:[#allocation4 + $0x18] sm:$0xff] }
  0x89   :  { %3892 = vmatprep.subr.mxu0 %v6796_v0  ;;  %3927 = vmatprep.subr.mxu1 %v6796_v0 }
  0x8a   :  { %3893 = vmatpush3.msra.mxu0 %v5279_v19  ;;  %3928 = vmatpush3.msra.mxu1 %v5281_v20  ;;  %v272_v19 = vld [vmem:[#allocation4 + $0x10] sm:$0xff] }
  0x8b   :  { %3894 = vmatprep.subr.mxu0 %v6796_v0  ;;  %3929 = vmatprep.subr.mxu1 %v6796_v0 }
  0x8c   :  { %3895 = vmatpush3.msra.mxu0 %v5287_v21  ;;  %3930 = vmatpush3.msra.mxu1 %v5289_v22 }
  0x8d   :  { %3896 = vmatprep.subr.mxu0 %v6796_v0  ;;  %3931 = vmatprep.subr.mxu1 %v6796_v0 }
  0x8e   :  { %3897 = vmatpush3.msra.mxu0 %v5295_v23  ;;  %3932 = vmatpush3.msra.mxu1 %v5297_v24 }
  0x8f   :  { %3898 = vmatprep.subr.mxu0 %v6796_v0  ;;  %3933 = vmatprep.subr.mxu1 %v6796_v0 }
  0x90   :  { %3899 = vmatpush3.msra.mxu0 %v5303_v25  ;;  %3934 = vmatpush3.msra.mxu1 %v5305_v26  ;;  %v178_v26 = vld [vmem:[#allocation4] sm:$0xff] }
  0x91   :  { %3900 = vmatprep.subr.mxu0 %v6796_v0  ;;  %3935 = vmatprep.subr.mxu1 %v6796_v0 }
  0x92   :  { %3901 = vmatpush3.msra.mxu0 %v5311_v27  ;;  %3936 = vmatpush3.msra.mxu1 %v5313_v28  ;;  %v83_v27 = vld [vmem:[#allocation4 + $0x8] sm:$0xff] }
  0x93   :  { %3902 = vmatprep.subr.mxu0 %v6796_v0  ;;  %3937 = vmatprep.subr.mxu1 %v6796_v0 }
  0x94   :  { %3903 = vmatpush3.msra.mxu0 %v5319_v29  ;;  %3938 = vmatpush3.msra.mxu1 %v5321_v30 }
  0x95   :  { %3904 = vmatprep.subr.mxu0 %v6796_v0  ;;  %3939 = vmatprep.subr.mxu1 %v6796_v0 }
  0x96   :  { %3905 = vmatpush3.msra.mxu0 %v5327_v31  ;;  %3940 = vmatpush3.msra.mxu1 %v5329_v32 }
  0x97   :  { %3906 = vmatprep.mubr.msk.f32.mxu0 %vm5152_vm0, %v6796_v0  ;;  %3941 = vmatprep.mubr.msk.f32.mxu1 %vm5152_vm0, %v6796_v0 }
  0x98   :  { %3944 = vmatprep.subr.mxu0 %v6796_v0  ;;  %3979 = vmatprep.subr.mxu1 %v6796_v0 }
 0x114   :  { %v166_v33 = vpop.f32.mrf.mxu0  ;;  %v261_v30 = vpop.f32.mrf.mxu1 }
 0x115   :  { %v170_v25 = vadd.f32 %v166_v33, %v83_v27  ;;  %v265_v31 = vadd.f32 %v261_v30, %v178_v26 }
 0x116   :  { %v3768_v29 = vpop.f32.mrf.mxu0  ;;  %v3803_v28 = vpop.f32.mrf.mxu1 }
 0x117   :  { %v3166_v24 = vmul.f32 -1.442695, %v170_v25  ;;  %v3167_v32 = vmul.f32 -1.442695, %v265_v31 }
 0x119   :  { %4867 = vpow2.f32 %v3166_v24  ;;  %v79_v24 = vld [vmem:[#allocation9] sm:$0xff] }
 0x11a   :  { %4869 = vpow2.f32 %v3167_v32 }
 0x126   :  { %v4868_v23 = vpop.eup %4867 }
 0x127   :  { %v4870_v22 = vpop.eup %4869  ;;  %v174_v21 = vadd.f32 1.0, %v4868_v23 }
 0x128   :  { %v269_v20 = vadd.f32 1.0, %v4870_v22 }
 0x129   :  { %4871 = vrcp.f32 %v174_v21  ;;  %v6866_v21 = vld [vmem:[#allocation36_spill] sm:$0xff] }
 0x12a   :  { %4873 = vrcp.f32 %v269_v20  ;;  %v6865_v20 = vld [vmem:[#allocation35_spill] sm:$0xff] }
 0x136   :  { %v355_v17 = vpop.f32.mrf.mxu0  ;;  %v446_v0 = vpop.f32.mrf.mxu1 }
 0x137   :  { %v359_v16 = vadd.f32 %v355_v17, %v272_v19  ;;  %v450_v29 = vadd.f32 %v446_v0, %v363_v18  ;;  %v4872_v25 = vpop.eup %4871  ;;  %v6850_v19 = vld [vmem:[#allocation40_spill] sm:$0xff] }
 0x138   :  { %v3838_v28 = vpop.f32.mrf.mxu0  ;;  %v3873_v15 = vpop.f32.mrf.mxu1  ;;  %v177_v31 = vmul.f32 %v4872_v25, %v79_v24 }
 0x139   :  { %4875 = vtanh.f32 %v359_v16  ;;  %v3168_v26 = vmul.f32 -1.442695, %v450_v29  ;;  %v4874_v27 = vpop.eup %4873  ;;  %v6848_v15 = vmov 0.0   ;;  %v6849_v16 = vld [vmem:[#allocation39_spill] sm:$0xff]  ;;  %v6867_v29 = vld [vmem:[#allocation37_spill] sm:$0xff]  ;;  %v6868_v28 = vld [vmem:[#allocation38_spill] sm:$0xff] }
 0x13b   :  { %4877 = vpow2.f32 %v3168_v26 }
 0x146   :  { %v4876_v30 = vpop.eup %4875 }
 0x147   :  { %v361_v23 = vmul.f32 %v4876_v30, %v4874_v27  ;;  %v461_v30 = vld [vmem:[#allocation4 + $0x28] sm:$0xff] }
 0x148   :  { %v4878_v22 = vpop.eup %4877 }
 0x149   :  { %v5545_v32 = vadd.f32 %v361_v23, %v177_v31  ;;  %v454_v33 = vadd.f32 1.0, %v4878_v22  ;;  %v556_v31 = vld [vmem:[#allocation4 + $0x20] sm:$0xff] }
 0x14b   :  { %4879 = vtanh.f32 %v5545_v32 }
 0x14c   :  { %4881 = vrcp.f32 %v454_v33 }
 0x158   :  { %v4880_v0 = vpop.eup %4879 }
 0x159   :  { %v4882_v17 = vpop.eup %4881 }
 0x15a   :  { %v5548_v18 = vmul.f32 %v4882_v17, %v4880_v0 }
 0x15c   :  { %459 = vst [vmem:[#allocation12] sm:$0xff] %v5548_v18  ;;  %3907 = vmatmul.mubr.f32.vlgmr.msra.gmra.mxu0 %v5548_v18  ;;  %3942 = vmatmul.mubr.f32.vlgmr.msra.gmra.mxu1 %v5548_v18 }
 0x15d   :  { %3945 = vmatpush3.msra.mxu0 %v5339_v34  ;;  %3980 = vmatpush3.msra.mxu1 %v5341_v35 }
 0x15e   :  { %3946 = vmatprep.subr.mxu0 %v6848_v15  ;;  %3981 = vmatprep.subr.mxu1 %v6848_v15 }
 0x15f   :  { %3947 = vmatpush3.msra.mxu0 %v5347_v36  ;;  %3982 = vmatpush3.msra.mxu1 %v5349_v37 }
 0x160   :  { %3948 = vmatprep.subr.mxu0 %v6848_v15  ;;  %3983 = vmatprep.subr.mxu1 %v6848_v15 }
 0x161   :  { %3949 = vmatpush3.msra.mxu0 %v5355_v38  ;;  %3984 = vmatpush3.msra.mxu1 %v5357_v39 }
 0x162   :  { %3950 = vmatprep.subr.mxu0 %v6848_v15  ;;  %3985 = vmatprep.subr.mxu1 %v6848_v15 }
 0x163   :  { %3951 = vmatpush3.msra.mxu0 %v5363_v40  ;;  %3986 = vmatpush3.msra.mxu1 %v5365_v41 }
 0x164   :  { %3952 = vmatprep.subr.mxu0 %v6848_v15  ;;  %3987 = vmatprep.subr.mxu1 %v6848_v15 }
 0x165   :  { %3953 = vmatpush3.msra.mxu0 %v5371_v42  ;;  %3988 = vmatpush3.msra.mxu1 %v5373_v43 }
 0x166   :  { %3954 = vmatprep.subr.mxu0 %v6848_v15  ;;  %3989 = vmatprep.subr.mxu1 %v6848_v15 }
 0x167   :  { %3955 = vmatpush3.msra.mxu0 %v5379_v44  ;;  %3990 = vmatpush3.msra.mxu1 %v5381_v45 }
 0x168   :  { %3956 = vmatprep.subr.mxu0 %v6848_v15  ;;  %3991 = vmatprep.subr.mxu1 %v6848_v15 }
 0x169   :  { %3957 = vmatpush3.msra.mxu0 %v5387_v46  ;;  %3992 = vmatpush3.msra.mxu1 %v5389_v47 }
 0x16a   :  { %3958 = vmatprep.subr.mxu0 %v6848_v15  ;;  %3993 = vmatprep.subr.mxu1 %v6848_v15 }
 0x16b   :  { %3959 = vmatpush3.msra.mxu0 %v5395_v48  ;;  %3994 = vmatpush3.msra.mxu1 %v5397_v49 }
 0x16c   :  { %3960 = vmatprep.subr.mxu0 %v6848_v15  ;;  %3995 = vmatprep.subr.mxu1 %v6848_v15 }
 0x16d   :  { %3961 = vmatpush3.msra.mxu0 %v5403_v50  ;;  %3996 = vmatpush3.msra.mxu1 %v5405_v51 }
 0x16e   :  { %3962 = vmatprep.subr.mxu0 %v6848_v15  ;;  %3997 = vmatprep.subr.mxu1 %v6848_v15 }
 0x16f   :  { %3963 = vmatpush3.msra.mxu0 %v5411_v52  ;;  %3998 = vmatpush3.msra.mxu1 %v5413_v53 }
 0x170   :  { %3964 = vmatprep.subr.mxu0 %v6848_v15  ;;  %3999 = vmatprep.subr.mxu1 %v6848_v15 }
 0x171   :  { %3965 = vmatpush3.msra.mxu0 %v5419_v54  ;;  %4000 = vmatpush3.msra.mxu1 %v5421_v55 }
 0x172   :  { %3966 = vmatprep.subr.mxu0 %v6848_v15  ;;  %4001 = vmatprep.subr.mxu1 %v6848_v15 }
 0x173   :  { %3967 = vmatpush3.msra.mxu0 %v5427_v56  ;;  %4002 = vmatpush3.msra.mxu1 %v6849_v16 }
 0x174   :  { %3968 = vmatprep.subr.mxu0 %v6848_v15  ;;  %4003 = vmatprep.subr.mxu1 %v6848_v15 }
 0x175   :  { %3969 = vmatpush3.msra.mxu0 %v5435_v58  ;;  %4004 = vmatpush3.msra.mxu1 %v6850_v19 }
 0x176   :  { %3970 = vmatprep.subr.mxu0 %v6848_v15  ;;  %4005 = vmatprep.subr.mxu1 %v6848_v15 }
 0x177   :  { %3971 = vmatpush3.msra.mxu0 %v5443_v60  ;;  %4006 = vmatpush3.msra.mxu1 %v5445_v61 }
 0x178   :  { %3972 = vmatprep.subr.mxu0 %v6848_v15  ;;  %4007 = vmatprep.subr.mxu1 %v6848_v15 }
 0x179   :  { %3973 = vmatpush3.msra.mxu0 %v5451_v62  ;;  %4008 = vmatpush3.msra.mxu1 %v5453_v63 }
 0x17a   :  { %3974 = vmatprep.subr.mxu0 %v6848_v15  ;;  %4009 = vmatprep.subr.mxu1 %v6848_v15 }
 0x17b   :  { %3975 = vmatpush3.msra.mxu0 %v5459_v57  ;;  %3976 = vmatprep.mubr.msk.f32.mxu0 %vm5152_vm0, %v6848_v15 }
 0x17c   :  { %4010 = vmatpush3.msra.mxu1 %v5463_v59  ;;  %4011 = vmatprep.mubr.msk.f32.mxu1 %vm5152_vm0, %v6848_v15 }
 0x17d   :  { %3977 = vmatmul.mubr.f32.vlgmr.msra.gmra.mxu0 %v5548_v18  ;;  %4012 = vmatmul.mubr.f32.vlgmr.msra.gmra.mxu1 %v5548_v18 }
 0x17e   :  { %4014 = vmatprep.subr.mxu0 %v6848_v15  ;;  %4049 = vmatprep.subr.mxu1 %v6848_v15 }
 0x17f   :  { %4015 = vmatpush3.msra.mxu0 %v5211_v1  ;;  %4050 = vmatpush3.msra.mxu1 %v5213_v2  ;;  %v6851_v1 = vld [vmem:[#allocation21_spill] sm:$0xff]  ;;  %v6852_v2 = vld [vmem:[#allocation22_spill] sm:$0xff] }
 0x180   :  { %4016 = vmatprep.subr.mxu0 %v6848_v15  ;;  %4051 = vmatprep.subr.mxu1 %v6848_v15 }
 0x181   :  { %4017 = vmatpush3.msra.mxu0 %v5215_v3  ;;  %4052 = vmatpush3.msra.mxu1 %v5219_v4  ;;  %v6853_v3 = vld [vmem:[#allocation23_spill] sm:$0xff]  ;;  %v6854_v4 = vld [vmem:[#allocation24_spill] sm:$0xff] }
 0x182   :  { %4018 = vmatprep.subr.mxu0 %v6848_v15  ;;  %4053 = vmatprep.subr.mxu1 %v6848_v15 }
 0x183   :  { %4019 = vmatpush3.msra.mxu0 %v5223_v5  ;;  %4054 = vmatpush3.msra.mxu1 %v5225_v6  ;;  %v6855_v5 = vld [vmem:[#allocation25_spill] sm:$0xff]  ;;  %v6856_v6 = vld [vmem:[#allocation26_spill] sm:$0xff] }
 0x184   :  { %4020 = vmatprep.subr.mxu0 %v6848_v15  ;;  %4055 = vmatprep.subr.mxu1 %v6848_v15 }
 0x185   :  { %4021 = vmatpush3.msra.mxu0 %v5231_v7  ;;  %4056 = vmatpush3.msra.mxu1 %v5233_v8  ;;  %v6857_v7 = vld [vmem:[#allocation27_spill] sm:$0xff]  ;;  %v6858_v8 = vld [vmem:[#allocation28_spill] sm:$0xff] }
 0x186   :  { %4022 = vmatprep.subr.mxu0 %v6848_v15  ;;  %4057 = vmatprep.subr.mxu1 %v6848_v15 }
 0x187   :  { %4023 = vmatpush3.msra.mxu0 %v5239_v9  ;;  %4058 = vmatpush3.msra.mxu1 %v5241_v10  ;;  %v6859_v9 = vld [vmem:[#allocation29_spill] sm:$0xff]  ;;  %v6860_v10 = vld [vmem:[#allocation30_spill] sm:$0xff] }
 0x188   :  { %4024 = vmatprep.subr.mxu0 %v6848_v15  ;;  %4059 = vmatprep.subr.mxu1 %v6848_v15 }
 0x189   :  { %4025 = vmatpush3.msra.mxu0 %v5247_v11  ;;  %4060 = vmatpush3.msra.mxu1 %v5249_v12  ;;  %v6861_v11 = vld [vmem:[#allocation31_spill] sm:$0xff]  ;;  %v6862_v12 = vld [vmem:[#allocation32_spill] sm:$0xff] }
 0x18a   :  { %4026 = vmatprep.subr.mxu0 %v6848_v15  ;;  %4061 = vmatprep.subr.mxu1 %v6848_v15 }
 0x18b   :  { %4027 = vmatpush3.msra.mxu0 %v5255_v13  ;;  %4062 = vmatpush3.msra.mxu1 %v5257_v14  ;;  %v6863_v13 = vld [vmem:[#allocation33_spill] sm:$0xff]  ;;  %v6864_v14 = vld [vmem:[#allocation34_spill] sm:$0xff] }
 0x18c   :  { %4028 = vmatprep.subr.mxu0 %v6848_v15  ;;  %4063 = vmatprep.subr.mxu1 %v6848_v15 }
 0x18d   :  { %4029 = vmatpush3.msra.mxu0 %v6851_v1  ;;  %4064 = vmatpush3.msra.mxu1 %v6852_v2 }
 0x18e   :  { %4030 = vmatprep.subr.mxu0 %v6848_v15  ;;  %4065 = vmatprep.subr.mxu1 %v6848_v15 }
 0x18f   :  { %4031 = vmatpush3.msra.mxu0 %v6853_v3  ;;  %4066 = vmatpush3.msra.mxu1 %v6854_v4  ;;  %v650_v3 = vld [vmem:[#allocation4 + $0x30] sm:$0xff]  ;;  %v741_v4 = vld [vmem:[#allocation4 + $0x38] sm:$0xff] }
 0x190   :  { %4032 = vmatprep.subr.mxu0 %v6848_v15  ;;  %4067 = vmatprep.subr.mxu1 %v6848_v15 }
 0x191   :  { %4033 = vmatpush3.msra.mxu0 %v6855_v5  ;;  %4068 = vmatpush3.msra.mxu1 %v6856_v6 }
 0x192   :  { %4034 = vmatprep.subr.mxu0 %v6848_v15  ;;  %4069 = vmatprep.subr.mxu1 %v6848_v15 }
 0x193   :  { %4035 = vmatpush3.msra.mxu0 %v6857_v7  ;;  %4070 = vmatpush3.msra.mxu1 %v6858_v8 }
 0x194   :  { %4036 = vmatprep.subr.mxu0 %v6848_v15  ;;  %4071 = vmatprep.subr.mxu1 %v6848_v15 }
 0x195   :  { %4037 = vmatpush3.msra.mxu0 %v6859_v9  ;;  %4072 = vmatpush3.msra.mxu1 %v6860_v10 }
 0x196   :  { %4038 = vmatprep.subr.mxu0 %v6848_v15  ;;  %4073 = vmatprep.subr.mxu1 %v6848_v15 }
 0x197   :  { %4039 = vmatpush3.msra.mxu0 %v6861_v11  ;;  %4074 = vmatpush3.msra.mxu1 %v6862_v12 }
 0x198   :  { %4040 = vmatprep.subr.mxu0 %v6848_v15  ;;  %4075 = vmatprep.subr.mxu1 %v6848_v15 }
 0x199   :  { %4041 = vmatpush3.msra.mxu0 %v6863_v13  ;;  %4076 = vmatpush3.msra.mxu1 %v6864_v14 }
 0x19a   :  { %4042 = vmatprep.subr.mxu0 %v6848_v15  ;;  %4077 = vmatprep.subr.mxu1 %v6848_v15 }
 0x19b   :  { %4043 = vmatpush3.msra.mxu0 %v6865_v20  ;;  %4078 = vmatpush3.msra.mxu1 %v6866_v21 }
 0x19c   :  { %4044 = vmatprep.subr.mxu0 %v6848_v15  ;;  %4079 = vmatprep.subr.mxu1 %v6848_v15 }
 0x19d   :  { %4045 = vmatpush3.msra.mxu0 %v6867_v29  ;;  %4080 = vmatpush3.msra.mxu1 %v6868_v28 }
 0x19e   :  { %4046 = vmatprep.mubr.msk.f32.mxu0 %vm5152_vm0, %v6848_v15  ;;  %4081 = vmatprep.mubr.msk.f32.mxu1 %vm5152_vm0, %v6848_v15 }
 0x19f   :  { %4084 = vmatprep.subr.mxu0 %v6848_v15  ;;  %4119 = vmatprep.subr.mxu1 %v6848_v15 }
 0x21c   :  { %v544_v26 = vpop.f32.mrf.mxu0  ;;  %v639_v25 = vpop.f32.mrf.mxu1 }
 0x21d   :  { %v548_v23 = vadd.f32 %v544_v26, %v461_v30  ;;  %v643_v22 = vadd.f32 %v639_v25, %v556_v31 }
 0x21e   :  { %v3908_v24 = vpop.f32.mrf.mxu0  ;;  %v3943_v27 = vpop.f32.mrf.mxu1 }
 0x21f   :  { %v3169_v33 = vmul.f32 -1.442695, %v548_v23  ;;  %v3170_v0 = vmul.f32 -1.442695, %v643_v22  ;;  %v840_v22 = vld [vmem:[#allocation4 + $0x48] sm:$0xff] }
 0x221   :  { %4883 = vpow2.f32 %v3169_v33  ;;  %v935_v33 = vld [vmem:[#allocation4 + $0x40] sm:$0xff] }
 0x222   :  { %4885 = vpow2.f32 %v3170_v0 }
 0x22e   :  { %v4884_v17 = vpop.eup %4883 }
 0x22f   :  { %v4886_v18 = vpop.eup %4885  ;;  %v552_v1 = vadd.f32 1.0, %v4884_v17 }
 0x230   :  { %v647_v2 = vadd.f32 1.0, %v4886_v18 }
 0x231   :  { %4887 = vrcp.f32 %v552_v1 }
 0x232   :  { %4889 = vrcp.f32 %v647_v2 }
 0x23d   :  { %v733_v5 = vpop.f32.mrf.mxu0  ;;  %v824_v6 = vpop.f32.mrf.mxu1 }
 0x23e   :  { %v737_v7 = vadd.f32 %v733_v5, %v650_v3  ;;  %v828_v8 = vadd.f32 %v824_v6, %v741_v4  ;;  %v4888_v12 = vpop.eup %4887  ;;  %v1029_v6 = vld [vmem:[#allocation4 + $0x50] sm:$0xff] }
 0x23f   :  { %v3978_v9 = vpop.f32.mrf.mxu0  ;;  %v4013_v10 = vpop.f32.mrf.mxu1  ;;  %v555_v20 = vmul.f32 %v4888_v12, %v5545_v32  ;;  %v5890_v32 = vld [vmem:[#allocation10 + $0x8] sm:$0xff] }
 0x240   :  { %4891 = vtanh.f32 %v737_v7  ;;  %v3171_v11 = vmul.f32 -1.442695, %v828_v8  ;;  %v4890_v13 = vpop.eup %4889  ;;  %6886 = vst [vmem:[#allocation36_spill] sm:$0xff] %v5890_v32  ;;  %v1120_v7 = vld [vmem:[#allocation4 + $0x58] sm:$0xff] }
 0x242   :  { %4893 = vpow2.f32 %v3171_v11 }
 0x24d   :  { %v4892_v14 = vpop.eup %4891 }
 0x24e   :  { %v739_v21 = vmul.f32 %v4892_v14, %v4890_v13 }
 0x24f   :  { %v4894_v29 = vpop.eup %4893 }
 0x250   :  { %v5692_v28 = vadd.f32 %v739_v21, %v555_v20  ;;  %v832_v26 = vadd.f32 1.0, %v4894_v29 }
 0x252   :  { %4895 = vtanh.f32 %v5692_v28 }
 0x253   :  { %4897 = vrcp.f32 %v832_v26 }
 0x25f   :  { %v4896_v25 = vpop.eup %4895 }
 0x260   :  { %v4898_v24 = vpop.eup %4897 }
 0x261   :  { %v5695_v27 = vmul.f32 %v4898_v24, %v4896_v25 }
 0x263   :  { %838 = vst [vmem:[#allocation12 + $0x8] sm:$0xff] %v5695_v27  ;;  %4047 = vmatmul.mubr.f32.vlgmr.msra.gmra.mxu0 %v5695_v27  ;;  %4082 = vmatmul.mubr.f32.vlgmr.msra.gmra.mxu1 %v5695_v27 }
 0x264   :  { %4085 = vmatpush3.msra.mxu0 %v5339_v34  ;;  %4120 = vmatpush3.msra.mxu1 %v5341_v35  ;;  %v5774_v34 = vld [vmem:[#allocation10 + $0x1e8] sm:$0xff]  ;;  %v5776_v35 = vld [vmem:[#allocation10 + $0x1e0] sm:$0xff] }
 0x265   :  { %4086 = vmatprep.subr.mxu0 %v6848_v15  ;;  %4121 = vmatprep.subr.mxu1 %v6848_v15 }
 0x266   :  { %4087 = vmatpush3.msra.mxu0 %v5347_v36  ;;  %4122 = vmatpush3.msra.mxu1 %v5349_v37  ;;  %v5782_v36 = vld [vmem:[#allocation10 + $0x1c8] sm:$0xff]  ;;  %v5784_v37 = vld [vmem:[#allocation10 + $0x1c0] sm:$0xff] }
 0x267   :  { %4088 = vmatprep.subr.mxu0 %v6848_v15  ;;  %4123 = vmatprep.subr.mxu1 %v6848_v15 }
 0x268   :  { %4089 = vmatpush3.msra.mxu0 %v5355_v38  ;;  %4124 = vmatpush3.msra.mxu1 %v5357_v39  ;;  %v5790_v38 = vld [vmem:[#allocation10 + $0x1a8] sm:$0xff]  ;;  %v5792_v39 = vld [vmem:[#allocation10 + $0x1a0] sm:$0xff] }
 0x269   :  { %4090 = vmatprep.subr.mxu0 %v6848_v15  ;;  %4125 = vmatprep.subr.mxu1 %v6848_v15 }
 0x26a   :  { %4091 = vmatpush3.msra.mxu0 %v5363_v40  ;;  %4126 = vmatpush3.msra.mxu1 %v5365_v41  ;;  %v5798_v40 = vld [vmem:[#allocation10 + $0x188] sm:$0xff]  ;;  %v5800_v41 = vld [vmem:[#allocation10 + $0x180] sm:$0xff] }
 0x26b   :  { %4092 = vmatprep.subr.mxu0 %v6848_v15  ;;  %4127 = vmatprep.subr.mxu1 %v6848_v15 }
 0x26c   :  { %4093 = vmatpush3.msra.mxu0 %v5371_v42  ;;  %4128 = vmatpush3.msra.mxu1 %v5373_v43  ;;  %v5806_v42 = vld [vmem:[#allocation10 + $0x168] sm:$0xff]  ;;  %v5808_v43 = vld [vmem:[#allocation10 + $0x160] sm:$0xff] }
 0x26d   :  { %4094 = vmatprep.subr.mxu0 %v6848_v15  ;;  %4129 = vmatprep.subr.mxu1 %v6848_v15 }
 0x26e   :  { %4095 = vmatpush3.msra.mxu0 %v5379_v44  ;;  %4130 = vmatpush3.msra.mxu1 %v5381_v45  ;;  %v5814_v44 = vld [vmem:[#allocation10 + $0x148] sm:$0xff]  ;;  %v5816_v45 = vld [vmem:[#allocation10 + $0x140] sm:$0xff] }
 0x26f   :  { %4096 = vmatprep.subr.mxu0 %v6848_v15  ;;  %4131 = vmatprep.subr.mxu1 %v6848_v15 }
 0x270   :  { %4097 = vmatpush3.msra.mxu0 %v5387_v46  ;;  %4132 = vmatpush3.msra.mxu1 %v5389_v47  ;;  %v5822_v46 = vld [vmem:[#allocation10 + $0x128] sm:$0xff]  ;;  %v5824_v47 = vld [vmem:[#allocation10 + $0x120] sm:$0xff] }
 0x271   :  { %4098 = vmatprep.subr.mxu0 %v6848_v15  ;;  %4133 = vmatprep.subr.mxu1 %v6848_v15  ;;  %6869 = vst [vmem:[#allocation39_spill] sm:$0xff] %v5824_v47 }
 0x272   :  { %4099 = vmatpush3.msra.mxu0 %v5395_v48  ;;  %4134 = vmatpush3.msra.mxu1 %v5397_v49  ;;  %v5830_v48 = vld [vmem:[#allocation10 + $0x108] sm:$0xff]  ;;  %v5832_v49 = vld [vmem:[#allocation10 + $0x100] sm:$0xff] }
 0x273   :  { %4100 = vmatprep.subr.mxu0 %v6848_v15  ;;  %4135 = vmatprep.subr.mxu1 %v6848_v15  ;;  %6870 = vst [vmem:[#allocation40_spill] sm:$0xff] %v5830_v48  ;;  %6871 = vst [vmem:[#allocation21_spill] sm:$0xff] %v5832_v49 }
 0x274   :  { %4101 = vmatpush3.msra.mxu0 %v5403_v50  ;;  %4136 = vmatpush3.msra.mxu1 %v5405_v51  ;;  %v5838_v50 = vld [vmem:[#allocation10 + $0xe8] sm:$0xff]  ;;  %v5840_v51 = vld [vmem:[#allocation10 + $0xe0] sm:$0xff] }
 0x275   :  { %4102 = vmatprep.subr.mxu0 %v6848_v15  ;;  %4137 = vmatprep.subr.mxu1 %v6848_v15  ;;  %6872 = vst [vmem:[#allocation22_spill] sm:$0xff] %v5838_v50  ;;  %6873 = vst [vmem:[#allocation23_spill] sm:$0xff] %v5840_v51 }
 0x276   :  { %4103 = vmatpush3.msra.mxu0 %v5411_v52  ;;  %4138 = vmatpush3.msra.mxu1 %v5413_v53  ;;  %v5844_v52 = vld [vmem:[#allocation10 + $0xc8] sm:$0xff]  ;;  %v5846_v53 = vld [vmem:[#allocation10 + $0xc0] sm:$0xff] }
 0x277   :  { %4104 = vmatprep.subr.mxu0 %v6848_v15  ;;  %4139 = vmatprep.subr.mxu1 %v6848_v15  ;;  %6874 = vst [vmem:[#allocation24_spill] sm:$0xff] %v5844_v52  ;;  %6875 = vst [vmem:[#allocation25_spill] sm:$0xff] %v5846_v53 }
 0x278   :  { %4105 = vmatpush3.msra.mxu0 %v5419_v54  ;;  %4140 = vmatpush3.msra.mxu1 %v5421_v55  ;;  %v5850_v54 = vld [vmem:[#allocation10 + $0xa8] sm:$0xff]  ;;  %v5852_v55 = vld [vmem:[#allocation10 + $0xa0] sm:$0xff] }
 0x279   :  { %4106 = vmatprep.subr.mxu0 %v6848_v15  ;;  %4141 = vmatprep.subr.mxu1 %v6848_v15  ;;  %6876 = vst [vmem:[#allocation26_spill] sm:$0xff] %v5850_v54  ;;  %6877 = vst [vmem:[#allocation27_spill] sm:$0xff] %v5852_v55 }
 0x27a   :  { %4107 = vmatpush3.msra.mxu0 %v5427_v56  ;;  %4142 = vmatpush3.msra.mxu1 %v6849_v16  ;;  %v5858_v56 = vld [vmem:[#allocation10 + $0x88] sm:$0xff]  ;;  %v5892_v16 = vld [vmem:[#allocation10] sm:$0xff] }
 0x27b   :  { %4108 = vmatprep.subr.mxu0 %v6848_v15  ;;  %4143 = vmatprep.subr.mxu1 %v6848_v15  ;;  %6878 = vst [vmem:[#allocation28_spill] sm:$0xff] %v5858_v56  ;;  %6887 = vst [vmem:[#allocation37_spill] sm:$0xff] %v5892_v16 }
 0x27c   :  { %4109 = vmatpush3.msra.mxu0 %v5435_v58  ;;  %4144 = vmatpush3.msra.mxu1 %v6850_v19  ;;  %v5866_v58 = vld [vmem:[#allocation10 + $0x68] sm:$0xff] }
 0x27d   :  { %4110 = vmatprep.subr.mxu0 %v6848_v15  ;;  %4145 = vmatprep.subr.mxu1 %v6848_v15  ;;  %6880 = vst [vmem:[#allocation30_spill] sm:$0xff] %v5866_v58 }
 0x27e   :  { %4111 = vmatpush3.msra.mxu0 %v5443_v60  ;;  %4146 = vmatpush3.msra.mxu1 %v5445_v61  ;;  %v5874_v60 = vld [vmem:[#allocation10 + $0x48] sm:$0xff]  ;;  %v5876_v61 = vld [vmem:[#allocation10 + $0x40] sm:$0xff] }
 0x27f   :  { %4112 = vmatprep.subr.mxu0 %v6848_v15  ;;  %4147 = vmatprep.subr.mxu1 %v6848_v15  ;;  %6882 = vst [vmem:[#allocation32_spill] sm:$0xff] %v5874_v60  ;;  %6883 = vst [vmem:[#allocation33_spill] sm:$0xff] %v5876_v61 }
 0x280   :  { %4113 = vmatpush3.msra.mxu0 %v5451_v62  ;;  %4148 = vmatpush3.msra.mxu1 %v5453_v63  ;;  %v5882_v62 = vld [vmem:[#allocation10 + $0x28] sm:$0xff]  ;;  %v5884_v63 = vld [vmem:[#allocation10 + $0x20] sm:$0xff] }
 0x281   :  { %4114 = vmatprep.subr.mxu0 %v6848_v15  ;;  %4149 = vmatprep.subr.mxu1 %v6848_v15  ;;  %6884 = vst [vmem:[#allocation34_spill] sm:$0xff] %v5882_v62  ;;  %6885 = vst [vmem:[#allocation35_spill] sm:$0xff] %v5884_v63 }
 0x282   :  { %4115 = vmatpush3.msra.mxu0 %v5459_v57  ;;  %4116 = vmatprep.mubr.msk.f32.mxu0 %vm5152_vm0, %v6848_v15  ;;  %v5860_v57 = vld [vmem:[#allocation10 + $0x80] sm:$0xff] }
 0x283   :  { %4150 = vmatpush3.msra.mxu1 %v5463_v59  ;;  %4151 = vmatprep.mubr.msk.f32.mxu1 %vm5152_vm0, %v6848_v15  ;;  %6879 = vst [vmem:[#allocation29_spill] sm:$0xff] %v5860_v57  ;;  %v5868_v59 = vld [vmem:[#allocation10 + $0x60] sm:$0xff] }
 0x284   :  { %4117 = vmatmul.mubr.f32.vlgmr.msra.gmra.mxu0 %v5695_v27  ;;  %4152 = vmatmul.mubr.f32.vlgmr.msra.gmra.mxu1 %v5695_v27  ;;  %6881 = vst [vmem:[#allocation31_spill] sm:$0xff] %v5868_v59 }
 0x285   :  { %4154 = vmatprep.subr.mxu0 %v6848_v15  ;;  %4189 = vmatprep.subr.mxu1 %v6848_v15 }
 0x286   :  { %4186 = vmatprep.mubr.msk.f32.mxu0 %vm5152_vm0, %v6848_v15  ;;  %4221 = vmatprep.mubr.msk.f32.mxu1 %vm5152_vm0, %v6848_v15 }
 0x287   :  { %4155 = vmatpush3.msra.mxu0 %v5774_v34  ;;  %4190 = vmatpush3.msra.mxu1 %v5776_v35 }
 0x288   :  { %4156 = vmatprep.subr.mxu0 %v6848_v15  ;;  %4191 = vmatprep.subr.mxu1 %v6848_v15 }
 0x289   :  { %4157 = vmatpush3.msra.mxu0 %v5782_v36  ;;  %4192 = vmatpush3.msra.mxu1 %v5784_v37 }
 0x28a   :  { %4158 = vmatprep.subr.mxu0 %v6848_v15  ;;  %4193 = vmatprep.subr.mxu1 %v6848_v15 }
 0x28b   :  { %4159 = vmatpush3.msra.mxu0 %v5790_v38  ;;  %4194 = vmatpush3.msra.mxu1 %v5792_v39 }
 0x28c   :  { %4160 = vmatprep.subr.mxu0 %v6848_v15  ;;  %4195 = vmatprep.subr.mxu1 %v6848_v15 }
 0x28d   :  { %4161 = vmatpush3.msra.mxu0 %v5798_v40  ;;  %4196 = vmatpush3.msra.mxu1 %v5800_v41 }
 0x28e   :  { %4162 = vmatprep.subr.mxu0 %v6848_v15  ;;  %4197 = vmatprep.subr.mxu1 %v6848_v15 }
 0x28f   :  { %4163 = vmatpush3.msra.mxu0 %v5806_v42  ;;  %4198 = vmatpush3.msra.mxu1 %v5808_v43 }
 0x290   :  { %4164 = vmatprep.subr.mxu0 %v6848_v15  ;;  %4199 = vmatprep.subr.mxu1 %v6848_v15 }
 0x291   :  { %4165 = vmatpush3.msra.mxu0 %v5814_v44  ;;  %4200 = vmatpush3.msra.mxu1 %v5816_v45 }
 0x292   :  { %4166 = vmatprep.subr.mxu0 %v6848_v15  ;;  %4201 = vmatprep.subr.mxu1 %v6848_v15 }
 0x293   :  { %4167 = vmatpush3.msra.mxu0 %v5822_v46  ;;  %4202 = vmatpush3.msra.mxu1 %v5824_v47 }
 0x294   :  { %4168 = vmatprep.subr.mxu0 %v6848_v15  ;;  %4203 = vmatprep.subr.mxu1 %v6848_v15 }
 0x295   :  { %4169 = vmatpush3.msra.mxu0 %v5830_v48  ;;  %4204 = vmatpush3.msra.mxu1 %v5832_v49 }
 0x296   :  { %4170 = vmatprep.subr.mxu0 %v6848_v15  ;;  %4205 = vmatprep.subr.mxu1 %v6848_v15 }
 0x297   :  { %4171 = vmatpush3.msra.mxu0 %v5838_v50  ;;  %4206 = vmatpush3.msra.mxu1 %v5840_v51 }
 0x298   :  { %4172 = vmatprep.subr.mxu0 %v6848_v15  ;;  %4207 = vmatprep.subr.mxu1 %v6848_v15 }
 0x299   :  { %4173 = vmatpush3.msra.mxu0 %v5844_v52  ;;  %4208 = vmatpush3.msra.mxu1 %v5846_v53 }
 0x29a   :  { %4174 = vmatprep.subr.mxu0 %v6848_v15  ;;  %4209 = vmatprep.subr.mxu1 %v6848_v15 }
 0x29b   :  { %4175 = vmatpush3.msra.mxu0 %v5850_v54  ;;  %4210 = vmatpush3.msra.mxu1 %v5852_v55 }
 0x29c   :  { %4176 = vmatprep.subr.mxu0 %v6848_v15  ;;  %4211 = vmatprep.subr.mxu1 %v6848_v15 }
 0x29d   :  { %4177 = vmatpush3.msra.mxu0 %v5858_v56  ;;  %4212 = vmatpush3.msra.mxu1 %v5860_v57 }
 0x29e   :  { %4178 = vmatprep.subr.mxu0 %v6848_v15  ;;  %4213 = vmatprep.subr.mxu1 %v6848_v15 }
 0x29f   :  { %4179 = vmatpush3.msra.mxu0 %v5866_v58  ;;  %4214 = vmatpush3.msra.mxu1 %v5868_v59 }
 0x2a0   :  { %4180 = vmatprep.subr.mxu0 %v6848_v15  ;;  %4215 = vmatprep.subr.mxu1 %v6848_v15 }
 0x2a1   :  { %4181 = vmatpush3.msra.mxu0 %v5874_v60  ;;  %4216 = vmatpush3.msra.mxu1 %v5876_v61 }
 0x2a2   :  { %4182 = vmatprep.subr.mxu0 %v6848_v15  ;;  %4217 = vmatprep.subr.mxu1 %v6848_v15 }
 0x2a3   :  { %4183 = vmatpush3.msra.mxu0 %v5882_v62  ;;  %4218 = vmatpush3.msra.mxu1 %v5884_v63 }
 0x2a4   :  { %4184 = vmatprep.subr.mxu0 %v6848_v15  ;;  %4219 = vmatprep.subr.mxu1 %v6848_v15 }
 0x2a5   :  { %4185 = vmatpush3.msra.mxu0 %v5890_v32  ;;  %4220 = vmatpush3.msra.mxu1 %v5892_v16 }
 0x2a6   :  { %4224 = vmatprep.subr.mxu0 %v6848_v15  ;;  %4259 = vmatprep.subr.mxu1 %v6848_v15 }
 0x323   :  { %v923_v19 = vpop.f32.mrf.mxu0  ;;  %v1018_v30 = vpop.f32.mrf.mxu1 }
 0x324   :  { %v927_v0 = vadd.f32 %v923_v19, %v840_v22  ;;  %v1022_v17 = vadd.f32 %v1018_v30, %v935_v33  ;;  %v5908_v22 = vld [vmem:[#allocation10 + $0x1f0] sm:$0xff]  ;;  %v5910_v33 = vld [vmem:[#allocation10 + $0x1f8] sm:$0xff] }
 0x325   :  { %v4048_v31 = vpop.f32.mrf.mxu0  ;;  %v4083_v23 = vpop.f32.mrf.mxu1 }
 0x326   :  { %v3172_v18 = vmul.f32 -1.442695, %v927_v0  ;;  %v3173_v1 = vmul.f32 -1.442695, %v1022_v17  ;;  %v5917_v0 = vld [vmem:[#allocation10 + $0x1d8] sm:$0xff]  ;;  %v5923_v17 = vld [vmem:[#allocation10 + $0x1b0] sm:$0xff] }
 0x328   :  { %4899 = vpow2.f32 %v3172_v18  ;;  %v5925_v18 = vld [vmem:[#allocation10 + $0x1b8] sm:$0xff] }
 0x329   :  { %4901 = vpow2.f32 %v3173_v1  ;;  %v5931_v1 = vld [vmem:[#allocation10 + $0x190] sm:$0xff] }
 0x335   :  { %v4900_v2 = vpop.eup %4899 }
 0x336   :  { %v4902_v3 = vpop.eup %4901  ;;  %v931_v4 = vadd.f32 1.0, %v4900_v2  ;;  %v5933_v2 = vld [vmem:[#allocation10 + $0x198] sm:$0xff] }
 0x337   :  { %v1026_v5 = vadd.f32 1.0, %v4902_v3  ;;  %v5939_v3 = vld [vmem:[#allocation10 + $0x170] sm:$0xff] }
 0x338   :  { %4903 = vrcp.f32 %v931_v4  ;;  %v5941_v4 = vld [vmem:[#allocation10 + $0x178] sm:$0xff] }
 0x339   :  { %4905 = vrcp.f32 %v1026_v5  ;;  %v5947_v5 = vld [vmem:[#allocation10 + $0x150] sm:$0xff] }
 0x344   :  { %v1112_v8 = vpop.f32.mrf.mxu0  ;;  %v1203_v9 = vpop.f32.mrf.mxu1 }
 0x345   :  { %v1116_v10 = vadd.f32 %v1112_v8, %v1029_v6  ;;  %v1207_v11 = vadd.f32 %v1203_v9, %v1120_v7  ;;  %v4904_v20 = vpop.eup %4903  ;;  %v5949_v6 = vld [vmem:[#allocation10 + $0x158] sm:$0xff]  ;;  %v5955_v7 = vld [vmem:[#allocation10 + $0x130] sm:$0xff] }
 0x346   :  { %v4118_v12 = vpop.f32.mrf.mxu0  ;;  %v4153_v13 = vpop.f32.mrf.mxu1  ;;  %v934_v26 = vmul.f32 %v4904_v20, %v5692_v28  ;;  %v5915_v28 = vld [vmem:[#allocation10 + $0x1d0] sm:$0xff]  ;;  %v5957_v8 = vld [vmem:[#allocation10 + $0x138] sm:$0xff] }
 0x347   :  { %4907 = vtanh.f32 %v1116_v10  ;;  %v3174_v14 = vmul.f32 -1.442695, %v1207_v11  ;;  %v4906_v21 = vpop.eup %4905  ;;  %v5963_v9 = vld [vmem:[#allocation10 + $0x110] sm:$0xff]  ;;  %v5965_v10 = vld [vmem:[#allocation10 + $0x118] sm:$0xff] }
 0x348   :  { %v5971_v11 = vld [vmem:[#allocation10 + $0xf0] sm:$0xff]  ;;  %v5973_v12 = vld [vmem:[#allocation10 + $0xf8] sm:$0xff] }
 0x349   :  { %4909 = vpow2.f32 %v3174_v14  ;;  %v5979_v13 = vld [vmem:[#allocation10 + $0xd0] sm:$0xff]  ;;  %v5981_v14 = vld [vmem:[#allocation10 + $0xd8] sm:$0xff] }
 0x34a   :  { %v5987_v20 = vld [vmem:[#allocation10 + $0xb0] sm:$0xff] }
 0x354   :  { %v4908_v29 = vpop.eup %4907 }
 0x355   :  { %v1118_v25 = vmul.f32 %v4908_v29, %v4906_v21  ;;  %v5989_v21 = vld [vmem:[#allocation10 + $0xb8] sm:$0xff]  ;;  %v5995_v29 = vld [vmem:[#allocation10 + $0x90] sm:$0xff] }
 0x356   :  { %v4910_v24 = vpop.eup %4909  ;;  %6888 = vst [vmem:[#allocation38_spill] sm:$0xff] %v5995_v29 }
 0x357   :  { %v5903_v27 = vadd.f32 %v1118_v25, %v934_v26  ;;  %v1211_v19 = vadd.f32 1.0, %v4910_v24  ;;  %v5997_v26 = vld [vmem:[#allocation10 + $0x98] sm:$0xff]  ;;  %v6003_v25 = vld [vmem:[#allocation10 + $0x70] sm:$0xff] }
 0x358   :  { %6889 = vst [vmem:[#allocation41_spill] sm:$0xff] %v5997_v26  ;;  %v6005_v24 = vld [vmem:[#allocation10 + $0x78] sm:$0xff] }
 0x359   :  { %4911 = vtanh.f32 %v5903_v27  ;;  %6890 = vst [vmem:[#allocation42_spill] sm:$0xff] %v6005_v24 }
 0x35a   :  { %4913 = vrcp.f32 %v1211_v19  ;;  %v6011_v19 = vld [vmem:[#allocation10 + $0x50] sm:$0xff] }
 0x366   :  { %v4912_v30 = vpop.eup %4911 }
 0x367   :  { %v4914_v31 = vpop.eup %4913 }
 0x368   :  { %v5906_v23 = vmul.f32 %v4914_v31, %v4912_v30  ;;  %v6013_v30 = vld [vmem:[#allocation10 + $0x58] sm:$0xff]  ;;  %v6019_v31 = vld [vmem:[#allocation10 + $0x30] sm:$0xff] }
 0x36a   :  { %1217 = vst [vmem:[#allocation12 + $0x10] sm:$0xff] %v5906_v23  ;;  %4187 = vmatmul.mubr.f32.vlgmr.msra.gmra.mxu0 %v5906_v23  ;;  %4222 = vmatmul.mubr.f32.vlgmr.msra.gmra.mxu1 %v5906_v23 }
 0x36b   :  { %4225 = vmatpush3.msra.mxu0 %v5908_v22  ;;  %4260 = vmatpush3.msra.mxu1 %v5910_v33 }
 0x36c   :  { %4226 = vmatprep.subr.mxu0 %v6848_v15  ;;  %4261 = vmatprep.subr.mxu1 %v6848_v15 }
 0x36d   :  { %4227 = vmatpush3.msra.mxu0 %v5915_v28  ;;  %4262 = vmatpush3.msra.mxu1 %v5917_v0 }
 0x36e   :  { %4228 = vmatprep.subr.mxu0 %v6848_v15  ;;  %4263 = vmatprep.subr.mxu1 %v6848_v15 }
 0x36f   :  { %4229 = vmatpush3.msra.mxu0 %v5923_v17  ;;  %4264 = vmatpush3.msra.mxu1 %v5925_v18 }
 0x370   :  { %4230 = vmatprep.subr.mxu0 %v6848_v15  ;;  %4265 = vmatprep.subr.mxu1 %v6848_v15 }
 0x371   :  { %4231 = vmatpush3.msra.mxu0 %v5931_v1  ;;  %4266 = vmatpush3.msra.mxu1 %v5933_v2 }
 0x372   :  { %4232 = vmatprep.subr.mxu0 %v6848_v15  ;;  %4267 = vmatprep.subr.mxu1 %v6848_v15 }
 0x373   :  { %4233 = vmatpush3.msra.mxu0 %v5939_v3  ;;  %4268 = vmatpush3.msra.mxu1 %v5941_v4 }
 0x374   :  { %4234 = vmatprep.subr.mxu0 %v6848_v15  ;;  %4269 = vmatprep.subr.mxu1 %v6848_v15 }
 0x375   :  { %4235 = vmatpush3.msra.mxu0 %v5947_v5  ;;  %4270 = vmatpush3.msra.mxu1 %v5949_v6 }
 0x376   :  { %4236 = vmatprep.subr.mxu0 %v6848_v15  ;;  %4271 = vmatprep.subr.mxu1 %v6848_v15 }
 0x377   :  { %4237 = vmatpush3.msra.mxu0 %v5955_v7  ;;  %4272 = vmatpush3.msra.mxu1 %v5957_v8 }
 0x378   :  { %4238 = vmatprep.subr.mxu0 %v6848_v15  ;;  %4273 = vmatprep.subr.mxu1 %v6848_v15 }
 0x379   :  { %4239 = vmatpush3.msra.mxu0 %v5963_v9  ;;  %4274 = vmatpush3.msra.mxu1 %v5965_v10 }
 0x37a   :  { %4240 = vmatprep.subr.mxu0 %v6848_v15  ;;  %4275 = vmatprep.subr.mxu1 %v6848_v15 }
 0x37b   :  { %4241 = vmatpush3.msra.mxu0 %v5971_v11  ;;  %4276 = vmatpush3.msra.mxu1 %v5973_v12 }
 0x37c   :  { %4242 = vmatprep.subr.mxu0 %v6848_v15  ;;  %4277 = vmatprep.subr.mxu1 %v6848_v15 }
 0x37d   :  { %4243 = vmatpush3.msra.mxu0 %v5979_v13  ;;  %4278 = vmatpush3.msra.mxu1 %v5981_v14 }
 0x37e   :  { %4244 = vmatprep.subr.mxu0 %v6848_v15  ;;  %4279 = vmatprep.subr.mxu1 %v6848_v15 }
 0x37f   :  { %4245 = vmatpush3.msra.mxu0 %v5987_v20  ;;  %4280 = vmatpush3.msra.mxu1 %v5989_v21 }
 0x380   :  { %4246 = vmatprep.subr.mxu0 %v6848_v15  ;;  %4281 = vmatprep.subr.mxu1 %v6848_v15 }
 0x381   :  { %4247 = vmatpush3.msra.mxu0 %v5995_v29  ;;  %4282 = vmatpush3.msra.mxu1 %v5997_v26  ;;  %v6021_v29 = vld [vmem:[#allocation10 + $0x38] sm:$0xff]  ;;  %v6027_v26 = vld [vmem:[#allocation10 + $0x10] sm:$0xff] }
 0x382   :  { %4248 = vmatprep.subr.mxu0 %v6848_v15  ;;  %4283 = vmatprep.subr.mxu1 %v6848_v15 }
 0x383   :  { %4249 = vmatpush3.msra.mxu0 %v6003_v25  ;;  %4284 = vmatpush3.msra.mxu1 %v6005_v24  ;;  %v6031_v24 = vld [vmem:[#allocation10 + $0x18] sm:$0xff] }
 0x384   :  { %4250 = vmatprep.subr.mxu0 %v6848_v15  ;;  %4285 = vmatprep.subr.mxu1 %v6848_v15 }
 0x385   :  { %4251 = vmatpush3.msra.mxu0 %v6011_v19  ;;  %4286 = vmatpush3.msra.mxu1 %v6013_v30 }
 0x386   :  { %4252 = vmatprep.subr.mxu0 %v6848_v15  ;;  %4287 = vmatprep.subr.mxu1 %v6848_v15 }
 0x387   :  { %4253 = vmatpush3.msra.mxu0 %v6019_v31  ;;  %4288 = vmatpush3.msra.mxu1 %v6021_v29 }
 0x388   :  { %4254 = vmatprep.subr.mxu0 %v6848_v15  ;;  %4289 = vmatprep.subr.mxu1 %v6848_v15 }
 0x389   :  { %4255 = vmatpush3.msra.mxu0 %v6027_v26  ;;  %4256 = vmatprep.mubr.msk.f32.mxu0 %vm5152_vm0, %v6848_v15 }
 0x38a   :  { %4290 = vmatpush3.msra.mxu1 %v6031_v24  ;;  %4291 = vmatprep.mubr.msk.f32.mxu1 %vm5152_vm0, %v6848_v15 }
 0x38b   :  { %4257 = vmatmul.mubr.f32.vlgmr.msra.gmra.mxu0 %v5906_v23  ;;  %4292 = vmatmul.mubr.f32.vlgmr.msra.gmra.mxu1 %v5906_v23 }
 0x38c   :  { %4294 = vmatprep.subr.mxu0 %v6848_v15  ;;  %4329 = vmatprep.subr.mxu1 %v6848_v15 }
 0x38d   :  { %4295 = vmatpush3.msra.mxu0 %v5774_v34  ;;  %4330 = vmatpush3.msra.mxu1 %v5776_v35 }
 0x38e   :  { %4296 = vmatprep.subr.mxu0 %v6848_v15  ;;  %4331 = vmatprep.subr.mxu1 %v6848_v15 }
 0x38f   :  { %4297 = vmatpush3.msra.mxu0 %v5782_v36  ;;  %4332 = vmatpush3.msra.mxu1 %v5784_v37 }
 0x390   :  { %4298 = vmatprep.subr.mxu0 %v6848_v15  ;;  %4333 = vmatprep.subr.mxu1 %v6848_v15 }
 0x391   :  { %4299 = vmatpush3.msra.mxu0 %v5790_v38  ;;  %4334 = vmatpush3.msra.mxu1 %v5792_v39 }
 0x392   :  { %4300 = vmatprep.subr.mxu0 %v6848_v15  ;;  %4335 = vmatprep.subr.mxu1 %v6848_v15 }
 0x393   :  { %4301 = vmatpush3.msra.mxu0 %v5798_v40  ;;  %4336 = vmatpush3.msra.mxu1 %v5800_v41 }
 0x394   :  { %4302 = vmatprep.subr.mxu0 %v6848_v15  ;;  %4337 = vmatprep.subr.mxu1 %v6848_v15 }
 0x395   :  { %4303 = vmatpush3.msra.mxu0 %v5806_v42  ;;  %4338 = vmatpush3.msra.mxu1 %v5808_v43 }
 0x396   :  { %4304 = vmatprep.subr.mxu0 %v6848_v15  ;;  %4339 = vmatprep.subr.mxu1 %v6848_v15 }
 0x397   :  { %4305 = vmatpush3.msra.mxu0 %v5814_v44  ;;  %4340 = vmatpush3.msra.mxu1 %v5816_v45 }
 0x398   :  { %4306 = vmatprep.subr.mxu0 %v6848_v15  ;;  %4341 = vmatprep.subr.mxu1 %v6848_v15 }
 0x399   :  { %4307 = vmatpush3.msra.mxu0 %v5822_v46  ;;  %4342 = vmatpush3.msra.mxu1 %v5824_v47 }
 0x39a   :  { %4308 = vmatprep.subr.mxu0 %v6848_v15  ;;  %4343 = vmatprep.subr.mxu1 %v6848_v15 }
 0x39b   :  { %4309 = vmatpush3.msra.mxu0 %v5830_v48  ;;  %4344 = vmatpush3.msra.mxu1 %v5832_v49 }
 0x39c   :  { %4310 = vmatprep.subr.mxu0 %v6848_v15  ;;  %4345 = vmatprep.subr.mxu1 %v6848_v15 }
 0x39d   :  { %4311 = vmatpush3.msra.mxu0 %v5838_v50  ;;  %4346 = vmatpush3.msra.mxu1 %v5840_v51  ;;  %v1499_v51 = vld [vmem:[#allocation4 + $0x78] sm:$0xff] }
 0x39e   :  { %4312 = vmatprep.subr.mxu0 %v6848_v15  ;;  %4347 = vmatprep.subr.mxu1 %v6848_v15 }
 0x39f   :  { %4313 = vmatpush3.msra.mxu0 %v5844_v52  ;;  %4348 = vmatpush3.msra.mxu1 %v5846_v53  ;;  %v1408_v52 = vld [vmem:[#allocation4 + $0x70] sm:$0xff] }
 0x3a0   :  { %4314 = vmatprep.subr.mxu0 %v6848_v15  ;;  %4349 = vmatprep.subr.mxu1 %v6848_v15 }
 0x3a1   :  { %4315 = vmatpush3.msra.mxu0 %v5850_v54  ;;  %4350 = vmatpush3.msra.mxu1 %v5852_v55 }
 0x3a2   :  { %4316 = vmatprep.subr.mxu0 %v6848_v15  ;;  %4351 = vmatprep.subr.mxu1 %v6848_v15 }
 0x3a3   :  { %4317 = vmatpush3.msra.mxu0 %v5858_v56  ;;  %4352 = vmatpush3.msra.mxu1 %v5860_v57 }
 0x3a4   :  { %4318 = vmatprep.subr.mxu0 %v6848_v15  ;;  %4353 = vmatprep.subr.mxu1 %v6848_v15 }
 0x3a5   :  { %4319 = vmatpush3.msra.mxu0 %v5866_v58  ;;  %4354 = vmatpush3.msra.mxu1 %v5868_v59  ;;  %v1314_v59 = vld [vmem:[#allocation4 + $0x60] sm:$0xff] }
 0x3a6   :  { %4320 = vmatprep.subr.mxu0 %v6848_v15  ;;  %4355 = vmatprep.subr.mxu1 %v6848_v15 }
 0x3a7   :  { %4321 = vmatpush3.msra.mxu0 %v5874_v60  ;;  %4356 = vmatpush3.msra.mxu1 %v5876_v61  ;;  %v1219_v60 = vld [vmem:[#allocation4 + $0x68] sm:$0xff] }
 0x3a8   :  { %4322 = vmatprep.subr.mxu0 %v6848_v15  ;;  %4357 = vmatprep.subr.mxu1 %v6848_v15 }
 0x3a9   :  { %4323 = vmatpush3.msra.mxu0 %v5882_v62  ;;  %4358 = vmatpush3.msra.mxu1 %v5884_v63 }
 0x3aa   :  { %4324 = vmatprep.subr.mxu0 %v6848_v15  ;;  %4359 = vmatprep.subr.mxu1 %v6848_v15 }
 0x3ab   :  { %4325 = vmatpush3.msra.mxu0 %v5890_v32  ;;  %4360 = vmatpush3.msra.mxu1 %v5892_v16 }
 0x3ac   :  { %4326 = vmatprep.mubr.msk.f32.mxu0 %vm5152_vm0, %v6848_v15  ;;  %4361 = vmatprep.mubr.msk.f32.mxu1 %vm5152_vm0, %v6848_v15 }
 0x3ad   :  { %4364 = vmatprep.subr.mxu0 %v6848_v15  ;;  %4399 = vmatprep.subr.mxu1 %v6848_v15 }
 0x42a   :  { %v1302_v23 = vpop.f32.mrf.mxu0  ;;  %v1397_v63 = vpop.f32.mrf.mxu1 }
 0x42b   :  { %v1306_v58 = vadd.f32 %v1302_v23, %v1219_v60  ;;  %v1401_v32 = vadd.f32 %v1397_v63, %v1314_v59  ;;  %v6910_v23 = vld [vmem:[#allocation35_spill] sm:$0xff] }
 0x42c   :  { %v4188_v62 = vpop.f32.mrf.mxu0  ;;  %v4223_v61 = vpop.f32.mrf.mxu1 }
 0x42d   :  { %v3175_v57 = vmul.f32 -1.442695, %v1306_v58  ;;  %v3176_v16 = vmul.f32 -1.442695, %v1401_v32 }
 0x42f   :  { %4915 = vpow2.f32 %v3175_v57 }
 0x430   :  { %4917 = vpow2.f32 %v3176_v16 }
 0x43c   :  { %v4916_v56 = vpop.eup %4915 }
 0x43d   :  { %v4918_v55 = vpop.eup %4917  ;;  %v1310_v54 = vadd.f32 1.0, %v4916_v56 }
 0x43e   :  { %v1405_v53 = vadd.f32 1.0, %v4918_v55 }
 0x43f   :  { %4919 = vrcp.f32 %v1310_v54  ;;  %v6908_v54 = vld [vmem:[#allocation33_spill] sm:$0xff] }
 0x440   :  { %4921 = vrcp.f32 %v1405_v53  ;;  %v6907_v53 = vld [vmem:[#allocation32_spill] sm:$0xff] }
 0x44b   :  { %v1491_v50 = vpop.f32.mrf.mxu0  ;;  %v1582_v49 = vpop.f32.mrf.mxu1 }
 0x44c   :  { %v1495_v48 = vadd.f32 %v1491_v50, %v1408_v52  ;;  %v1586_v62 = vadd.f32 %v1582_v49, %v1499_v51  ;;  %v4920_v58 = vpop.eup %4919  ;;  %v6893_v52 = vld [vmem:[#allocation42_spill] sm:$0xff] }
 0x44d   :  { %v4258_v61 = vpop.f32.mrf.mxu0  ;;  %v4293_v47 = vpop.f32.mrf.mxu1  ;;  %v1313_v63 = vmul.f32 %v4920_v58, %v5903_v27  ;;  %v6909_v27 = vld [vmem:[#allocation34_spill] sm:$0xff] }
 0x44e   :  { %4923 = vtanh.f32 %v1495_v48  ;;  %v3177_v59 = vmul.f32 -1.442695, %v1586_v62  ;;  %v4922_v57 = vpop.eup %4921  ;;  %v6891_v47 = vld [vmem:[#allocation38_spill] sm:$0xff]  ;;  %v6892_v48 = vld [vmem:[#allocation41_spill] sm:$0xff]  ;;  %v6911_v62 = vld [vmem:[#allocation36_spill] sm:$0xff] }
 0x44f   :  { %v6912_v61 = vld [vmem:[#allocation37_spill] sm:$0xff] }
 0x450   :  { %4925 = vpow2.f32 %v3177_v59 }
 0x45b   :  { %v4924_v60 = vpop.eup %4923 }
 0x45c   :  { %v1497_v56 = vmul.f32 %v4924_v60, %v4922_v57 }
 0x45d   :  { %v4926_v55 = vpop.eup %4925 }
 0x45e   :  { %v6114_v32 = vadd.f32 %v1497_v56, %v1313_v63  ;;  %v1590_v16 = vadd.f32 1.0, %v4926_v55  ;;  %v1598_v63 = vld [vmem:[#allocation4 + $0x88] sm:$0xff]  ;;  %v1693_v56 = vld [vmem:[#allocation4 + $0x80] sm:$0xff] }
 0x460   :  { %4927 = vtanh.f32 %v6114_v32 }
 0x461   :  { %4929 = vrcp.f32 %v1590_v16 }
 0x46d   :  { %v4928_v49 = vpop.eup %4927 }
 0x46e   :  { %v4930_v50 = vpop.eup %4929 }
 0x46f   :  { %v6117_v51 = vmul.f32 %v4930_v50, %v4928_v49 }
 0x471   :  { %1596 = vst [vmem:[#allocation12 + $0x18] sm:$0xff] %v6117_v51  ;;  %4327 = vmatmul.mubr.f32.vlgmr.msra.gmra.mxu0 %v6117_v51  ;;  %4362 = vmatmul.mubr.f32.vlgmr.msra.gmra.mxu1 %v6117_v51 }
 0x472   :  { %4365 = vmatpush3.msra.mxu0 %v5908_v22  ;;  %4400 = vmatpush3.msra.mxu1 %v5910_v33 }
 0x473   :  { %4366 = vmatprep.subr.mxu0 %v6848_v15  ;;  %4401 = vmatprep.subr.mxu1 %v6848_v15 }
 0x474   :  { %4367 = vmatpush3.msra.mxu0 %v5915_v28  ;;  %4402 = vmatpush3.msra.mxu1 %v5917_v0 }
 0x475   :  { %4368 = vmatprep.subr.mxu0 %v6848_v15  ;;  %4403 = vmatprep.subr.mxu1 %v6848_v15 }
 0x476   :  { %4369 = vmatpush3.msra.mxu0 %v5923_v17  ;;  %4404 = vmatpush3.msra.mxu1 %v5925_v18 }
 0x477   :  { %4370 = vmatprep.subr.mxu0 %v6848_v15  ;;  %4405 = vmatprep.subr.mxu1 %v6848_v15 }
 0x478   :  { %4371 = vmatpush3.msra.mxu0 %v5931_v1  ;;  %4406 = vmatpush3.msra.mxu1 %v5933_v2 }
 0x479   :  { %4372 = vmatprep.subr.mxu0 %v6848_v15  ;;  %4407 = vmatprep.subr.mxu1 %v6848_v15 }
 0x47a   :  { %4373 = vmatpush3.msra.mxu0 %v5939_v3  ;;  %4408 = vmatpush3.msra.mxu1 %v5941_v4 }
 0x47b   :  { %4374 = vmatprep.subr.mxu0 %v6848_v15  ;;  %4409 = vmatprep.subr.mxu1 %v6848_v15 }
 0x47c   :  { %4375 = vmatpush3.msra.mxu0 %v5947_v5  ;;  %4410 = vmatpush3.msra.mxu1 %v5949_v6 }
 0x47d   :  { %4376 = vmatprep.subr.mxu0 %v6848_v15  ;;  %4411 = vmatprep.subr.mxu1 %v6848_v15 }
 0x47e   :  { %4377 = vmatpush3.msra.mxu0 %v5955_v7  ;;  %4412 = vmatpush3.msra.mxu1 %v5957_v8 }
 0x47f   :  { %4378 = vmatprep.subr.mxu0 %v6848_v15  ;;  %4413 = vmatprep.subr.mxu1 %v6848_v15 }
 0x480   :  { %4379 = vmatpush3.msra.mxu0 %v5963_v9  ;;  %4414 = vmatpush3.msra.mxu1 %v5965_v10 }
 0x481   :  { %4380 = vmatprep.subr.mxu0 %v6848_v15  ;;  %4415 = vmatprep.subr.mxu1 %v6848_v15 }
 0x482   :  { %4381 = vmatpush3.msra.mxu0 %v5971_v11  ;;  %4416 = vmatpush3.msra.mxu1 %v5973_v12 }
 0x483   :  { %4382 = vmatprep.subr.mxu0 %v6848_v15  ;;  %4417 = vmatprep.subr.mxu1 %v6848_v15 }
 0x484   :  { %4383 = vmatpush3.msra.mxu0 %v5979_v13  ;;  %4418 = vmatpush3.msra.mxu1 %v5981_v14 }
 0x485   :  { %4384 = vmatprep.subr.mxu0 %v6848_v15  ;;  %4419 = vmatprep.subr.mxu1 %v6848_v15 }
 0x486   :  { %4385 = vmatpush3.msra.mxu0 %v5987_v20  ;;  %4420 = vmatpush3.msra.mxu1 %v5989_v21 }
 0x487   :  { %4386 = vmatprep.subr.mxu0 %v6848_v15  ;;  %4421 = vmatprep.subr.mxu1 %v6848_v15 }
 0x488   :  { %4387 = vmatpush3.msra.mxu0 %v6891_v47  ;;  %4422 = vmatpush3.msra.mxu1 %v6892_v48 }
 0x489   :  { %4388 = vmatprep.subr.mxu0 %v6848_v15  ;;  %4423 = vmatprep.subr.mxu1 %v6848_v15 }
 0x48a   :  { %4389 = vmatpush3.msra.mxu0 %v6003_v25  ;;  %4424 = vmatpush3.msra.mxu1 %v6893_v52 }
 0x48b   :  { %4390 = vmatprep.subr.mxu0 %v6848_v15  ;;  %4425 = vmatprep.subr.mxu1 %v6848_v15 }
 0x48c   :  { %4391 = vmatpush3.msra.mxu0 %v6011_v19  ;;  %4426 = vmatpush3.msra.mxu1 %v6013_v30 }
 0x48d   :  { %4392 = vmatprep.subr.mxu0 %v6848_v15  ;;  %4427 = vmatprep.subr.mxu1 %v6848_v15 }
 0x48e   :  { %4393 = vmatpush3.msra.mxu0 %v6019_v31  ;;  %4428 = vmatpush3.msra.mxu1 %v6021_v29 }
 0x48f   :  { %4394 = vmatprep.subr.mxu0 %v6848_v15  ;;  %4429 = vmatprep.subr.mxu1 %v6848_v15 }
 0x490   :  { %4395 = vmatpush3.msra.mxu0 %v6027_v26  ;;  %4396 = vmatprep.mubr.msk.f32.mxu0 %vm5152_vm0, %v6848_v15 }
 0x491   :  { %4430 = vmatpush3.msra.mxu1 %v6031_v24  ;;  %4431 = vmatprep.mubr.msk.f32.mxu1 %vm5152_vm0, %v6848_v15 }
 0x492   :  { %4397 = vmatmul.mubr.f32.vlgmr.msra.gmra.mxu0 %v6117_v51  ;;  %4432 = vmatmul.mubr.f32.vlgmr.msra.gmra.mxu1 %v6117_v51 }
 0x493   :  { %4434 = vmatprep.subr.mxu0 %v6848_v15  ;;  %4469 = vmatprep.subr.mxu1 %v6848_v15 }
 0x494   :  { %4435 = vmatpush3.msra.mxu0 %v5774_v34  ;;  %4470 = vmatpush3.msra.mxu1 %v5776_v35  ;;  %v6894_v34 = vld [vmem:[#allocation39_spill] sm:$0xff]  ;;  %v6895_v35 = vld [vmem:[#allocation40_spill] sm:$0xff] }
 0x495   :  { %4436 = vmatprep.subr.mxu0 %v6848_v15  ;;  %4471 = vmatprep.subr.mxu1 %v6848_v15 }
 0x496   :  { %4437 = vmatpush3.msra.mxu0 %v5782_v36  ;;  %4472 = vmatpush3.msra.mxu1 %v5784_v37  ;;  %v6896_v36 = vld [vmem:[#allocation21_spill] sm:$0xff]  ;;  %v6897_v37 = vld [vmem:[#allocation22_spill] sm:$0xff] }
 0x497   :  { %4438 = vmatprep.subr.mxu0 %v6848_v15  ;;  %4473 = vmatprep.subr.mxu1 %v6848_v15 }
 0x498   :  { %4439 = vmatpush3.msra.mxu0 %v5790_v38  ;;  %4474 = vmatpush3.msra.mxu1 %v5792_v39  ;;  %v6898_v38 = vld [vmem:[#allocation23_spill] sm:$0xff]  ;;  %v6899_v39 = vld [vmem:[#allocation24_spill] sm:$0xff] }
 0x499   :  { %4440 = vmatprep.subr.mxu0 %v6848_v15  ;;  %4475 = vmatprep.subr.mxu1 %v6848_v15 }
 0x49a   :  { %4441 = vmatpush3.msra.mxu0 %v5798_v40  ;;  %4476 = vmatpush3.msra.mxu1 %v5800_v41  ;;  %v6900_v40 = vld [vmem:[#allocation25_spill] sm:$0xff]  ;;  %v6901_v41 = vld [vmem:[#allocation26_spill] sm:$0xff] }
 0x49b   :  { %4442 = vmatprep.subr.mxu0 %v6848_v15  ;;  %4477 = vmatprep.subr.mxu1 %v6848_v15 }
 0x49c   :  { %4443 = vmatpush3.msra.mxu0 %v5806_v42  ;;  %4478 = vmatpush3.msra.mxu1 %v5808_v43  ;;  %v6902_v42 = vld [vmem:[#allocation27_spill] sm:$0xff]  ;;  %v6903_v43 = vld [vmem:[#allocation28_spill] sm:$0xff] }
 0x49d   :  { %4444 = vmatprep.subr.mxu0 %v6848_v15  ;;  %4479 = vmatprep.subr.mxu1 %v6848_v15 }
 0x49e   :  { %4445 = vmatpush3.msra.mxu0 %v5814_v44  ;;  %4480 = vmatpush3.msra.mxu1 %v5816_v45  ;;  %v6904_v44 = vld [vmem:[#allocation29_spill] sm:$0xff]  ;;  %v6905_v45 = vld [vmem:[#allocation30_spill] sm:$0xff] }
 0x49f   :  { %4446 = vmatprep.subr.mxu0 %v6848_v15  ;;  %4481 = vmatprep.subr.mxu1 %v6848_v15 }
 0x4a0   :  { %4447 = vmatpush3.msra.mxu0 %v5822_v46  ;;  %4482 = vmatpush3.msra.mxu1 %v6894_v34  ;;  %v6906_v46 = vld [vmem:[#allocation31_spill] sm:$0xff] }
 0x4a1   :  { %4448 = vmatprep.subr.mxu0 %v6848_v15  ;;  %4483 = vmatprep.subr.mxu1 %v6848_v15 }
 0x4a2   :  { %4449 = vmatpush3.msra.mxu0 %v6895_v35  ;;  %4484 = vmatpush3.msra.mxu1 %v6896_v36 }
 0x4a3   :  { %4450 = vmatprep.subr.mxu0 %v6848_v15  ;;  %4485 = vmatprep.subr.mxu1 %v6848_v15 }
 0x4a4   :  { %4451 = vmatpush3.msra.mxu0 %v6897_v37  ;;  %4486 = vmatpush3.msra.mxu1 %v6898_v38  ;;  %v1787_v37 = vld [vmem:[#allocation4 + $0x90] sm:$0xff]  ;;  %v1878_v38 = vld [vmem:[#allocation4 + $0x98] sm:$0xff] }
 0x4a5   :  { %4452 = vmatprep.subr.mxu0 %v6848_v15  ;;  %4487 = vmatprep.subr.mxu1 %v6848_v15 }
 0x4a6   :  { %4453 = vmatpush3.msra.mxu0 %v6899_v39  ;;  %4488 = vmatpush3.msra.mxu1 %v6900_v40 }
 0x4a7   :  { %4454 = vmatprep.subr.mxu0 %v6848_v15  ;;  %4489 = vmatprep.subr.mxu1 %v6848_v15 }
 0x4a8   :  { %4455 = vmatpush3.msra.mxu0 %v6901_v41  ;;  %4490 = vmatpush3.msra.mxu1 %v6902_v42 }
 0x4a9   :  { %4456 = vmatprep.subr.mxu0 %v6848_v15  ;;  %4491 = vmatprep.subr.mxu1 %v6848_v15 }
 0x4aa   :  { %4457 = vmatpush3.msra.mxu0 %v6903_v43  ;;  %4492 = vmatpush3.msra.mxu1 %v6904_v44 }
 0x4ab   :  { %4458 = vmatprep.subr.mxu0 %v6848_v15  ;;  %4493 = vmatprep.subr.mxu1 %v6848_v15 }
 0x4ac   :  { %4459 = vmatpush3.msra.mxu0 %v6905_v45  ;;  %4494 = vmatpush3.msra.mxu1 %v6906_v46 }
 0x4ad   :  { %4460 = vmatprep.subr.mxu0 %v6848_v15  ;;  %4495 = vmatprep.subr.mxu1 %v6848_v15 }
 0x4ae   :  { %4461 = vmatpush3.msra.mxu0 %v6907_v53  ;;  %4496 = vmatpush3.msra.mxu1 %v6908_v54 }
 0x4af   :  { %4462 = vmatprep.subr.mxu0 %v6848_v15  ;;  %4497 = vmatprep.subr.mxu1 %v6848_v15 }
 0x4b0   :  { %4463 = vmatpush3.msra.mxu0 %v6909_v27  ;;  %4498 = vmatpush3.msra.mxu1 %v6910_v23 }
 0x4b1   :  { %4464 = vmatprep.subr.mxu0 %v6848_v15  ;;  %4499 = vmatprep.subr.mxu1 %v6848_v15 }
 0x4b2   :  { %4465 = vmatpush3.msra.mxu0 %v6911_v62  ;;  %4500 = vmatpush3.msra.mxu1 %v6912_v61 }
 0x4b3   :  { %4466 = vmatprep.mubr.msk.f32.mxu0 %vm5152_vm0, %v6848_v15  ;;  %4501 = vmatprep.mubr.msk.f32.mxu1 %vm5152_vm0, %v6848_v15 }
 0x4b4   :  { %4504 = vmatprep.subr.mxu0 %v6848_v15  ;;  %4539 = vmatprep.subr.mxu1 %v6848_v15 }
 0x531   :  { %v1681_v59 = vpop.f32.mrf.mxu0  ;;  %v1776_v58 = vpop.f32.mrf.mxu1 }
 0x532   :  { %v1685_v55 = vadd.f32 %v1681_v59, %v1598_v63  ;;  %v1780_v16 = vadd.f32 %v1776_v58, %v1693_v56 }
 0x533   :  { %v4328_v57 = vpop.f32.mrf.mxu0  ;;  %v4363_v60 = vpop.f32.mrf.mxu1 }
 0x534   :  { %v3178_v49 = vmul.f32 -1.442695, %v1685_v55  ;;  %v3179_v50 = vmul.f32 -1.442695, %v1780_v16  ;;  %v1977_v16 = vld [vmem:[#allocation4 + $0xa8] sm:$0xff] }
 0x536   :  { %4931 = vpow2.f32 %v3178_v49  ;;  %v2072_v49 = vld [vmem:[#allocation4 + $0xa0] sm:$0xff] }
 0x537   :  { %4933 = vpow2.f32 %v3179_v50 }
 0x543   :  { %v4932_v51 = vpop.eup %4931 }
 0x544   :  { %v4934_v34 = vpop.eup %4933  ;;  %v1689_v35 = vadd.f32 1.0, %v4932_v51 }
 0x545   :  { %v1784_v36 = vadd.f32 1.0, %v4934_v34 }
 0x546   :  { %4935 = vrcp.f32 %v1689_v35 }
 0x547   :  { %4937 = vrcp.f32 %v1784_v36 }
 0x552   :  { %v1870_v39 = vpop.f32.mrf.mxu0  ;;  %v1961_v40 = vpop.f32.mrf.mxu1 }
 0x553   :  { %v1874_v41 = vadd.f32 %v1870_v39, %v1787_v37  ;;  %v1965_v42 = vadd.f32 %v1961_v40, %v1878_v38  ;;  %v4936_v46 = vpop.eup %4935  ;;  %v2166_v40 = vld [vmem:[#allocation4 + $0xb0] sm:$0xff] }
 0x554   :  { %v4398_v43 = vpop.f32.mrf.mxu0  ;;  %v4433_v44 = vpop.f32.mrf.mxu1  ;;  %v1692_v27 = vmul.f32 %v4936_v46, %v6114_v32  ;;  %v6453_v32 = vld [vmem:[#allocation10 + $0x20] sm:$0xff] }
 0x555   :  { %4939 = vtanh.f32 %v1874_v41  ;;  %v3180_v45 = vmul.f32 -1.442695, %v1965_v42  ;;  %v4938_v53 = vpop.eup %4937  ;;  %v2257_v41 = vld [vmem:[#allocation4 + $0xb8] sm:$0xff] }
 0x557   :  { %4941 = vpow2.f32 %v3180_v45 }
 0x562   :  { %v4940_v54 = vpop.eup %4939 }
 0x563   :  { %v1876_v23 = vmul.f32 %v4940_v54, %v4938_v53 }
 0x564   :  { %v4942_v62 = vpop.eup %4941 }
 0x565   :  { %v6261_v61 = vadd.f32 %v1876_v23, %v1692_v27  ;;  %v1969_v59 = vadd.f32 1.0, %v4942_v62 }
 0x567   :  { %4943 = vtanh.f32 %v6261_v61 }
 0x568   :  { %4945 = vrcp.f32 %v1969_v59 }
 0x574   :  { %v4944_v58 = vpop.eup %4943 }
 0x575   :  { %v4946_v57 = vpop.eup %4945 }
 0x576   :  { %v6264_v60 = vmul.f32 %v4946_v57, %v4944_v58 }
 0x578   :  { %1975 = vst [vmem:[#allocation12 + $0x20] sm:$0xff] %v6264_v60  ;;  %4467 = vmatmul.mubr.f32.vlgmr.msra.gmra.mxu0 %v6264_v60  ;;  %4502 = vmatmul.mubr.f32.vlgmr.msra.gmra.mxu1 %v6264_v60 }
 0x579   :  { %4505 = vmatpush3.msra.mxu0 %v5908_v22  ;;  %4540 = vmatpush3.msra.mxu1 %v5910_v33  ;;  %v6343_v22 = vld [vmem:[#allocation10 + $0x1e8] sm:$0xff]  ;;  %v6345_v33 = vld [vmem:[#allocation10 + $0x1e0] sm:$0xff] }
 0x57a   :  { %4506 = vmatprep.subr.mxu0 %v6848_v15  ;;  %4541 = vmatprep.subr.mxu1 %v6848_v15 }
 0x57b   :  { %4507 = vmatpush3.msra.mxu0 %v5915_v28  ;;  %4542 = vmatpush3.msra.mxu1 %v5917_v0  ;;  %v6351_v28 = vld [vmem:[#allocation10 + $0x1c8] sm:$0xff]  ;;  %v6353_v0 = vld [vmem:[#allocation10 + $0x1c0] sm:$0xff] }
 0x57c   :  { %4508 = vmatprep.subr.mxu0 %v6848_v15  ;;  %4543 = vmatprep.subr.mxu1 %v6848_v15 }
 0x57d   :  { %4509 = vmatpush3.msra.mxu0 %v5923_v17  ;;  %4544 = vmatpush3.msra.mxu1 %v5925_v18  ;;  %v6359_v17 = vld [vmem:[#allocation10 + $0x1a8] sm:$0xff]  ;;  %v6361_v18 = vld [vmem:[#allocation10 + $0x1a0] sm:$0xff] }
 0x57e   :  { %4510 = vmatprep.subr.mxu0 %v6848_v15  ;;  %4545 = vmatprep.subr.mxu1 %v6848_v15 }
 0x57f   :  { %4511 = vmatpush3.msra.mxu0 %v5931_v1  ;;  %4546 = vmatpush3.msra.mxu1 %v5933_v2  ;;  %v6367_v1 = vld [vmem:[#allocation10 + $0x188] sm:$0xff]  ;;  %v6369_v2 = vld [vmem:[#allocation10 + $0x180] sm:$0xff] }
 0x580   :  { %4512 = vmatprep.subr.mxu0 %v6848_v15  ;;  %4547 = vmatprep.subr.mxu1 %v6848_v15 }
 0x581   :  { %4513 = vmatpush3.msra.mxu0 %v5939_v3  ;;  %4548 = vmatpush3.msra.mxu1 %v5941_v4  ;;  %v6375_v3 = vld [vmem:[#allocation10 + $0x168] sm:$0xff]  ;;  %v6377_v4 = vld [vmem:[#allocation10 + $0x160] sm:$0xff] }
 0x582   :  { %4514 = vmatprep.subr.mxu0 %v6848_v15  ;;  %4549 = vmatprep.subr.mxu1 %v6848_v15 }
 0x583   :  { %4515 = vmatpush3.msra.mxu0 %v5947_v5  ;;  %4550 = vmatpush3.msra.mxu1 %v5949_v6  ;;  %v6383_v5 = vld [vmem:[#allocation10 + $0x148] sm:$0xff]  ;;  %v6385_v6 = vld [vmem:[#allocation10 + $0x140] sm:$0xff] }
 0x584   :  { %4516 = vmatprep.subr.mxu0 %v6848_v15  ;;  %4551 = vmatprep.subr.mxu1 %v6848_v15 }
 0x585   :  { %4517 = vmatpush3.msra.mxu0 %v5955_v7  ;;  %4552 = vmatpush3.msra.mxu1 %v5957_v8  ;;  %v6391_v7 = vld [vmem:[#allocation10 + $0x128] sm:$0xff]  ;;  %v6393_v8 = vld [vmem:[#allocation10 + $0x120] sm:$0xff] }
 0x586   :  { %4518 = vmatprep.subr.mxu0 %v6848_v15  ;;  %4553 = vmatprep.subr.mxu1 %v6848_v15 }
 0x587   :  { %4519 = vmatpush3.msra.mxu0 %v5963_v9  ;;  %4554 = vmatpush3.msra.mxu1 %v5965_v10  ;;  %v6399_v9 = vld [vmem:[#allocation10 + $0x108] sm:$0xff]  ;;  %v6401_v10 = vld [vmem:[#allocation10 + $0x100] sm:$0xff] }
 0x588   :  { %4520 = vmatprep.subr.mxu0 %v6848_v15  ;;  %4555 = vmatprep.subr.mxu1 %v6848_v15 }
 0x589   :  { %4521 = vmatpush3.msra.mxu0 %v5971_v11  ;;  %4556 = vmatpush3.msra.mxu1 %v5973_v12  ;;  %v6407_v11 = vld [vmem:[#allocation10 + $0xe8] sm:$0xff]  ;;  %v6409_v12 = vld [vmem:[#allocation10 + $0xe0] sm:$0xff] }
 0x58a   :  { %4522 = vmatprep.subr.mxu0 %v6848_v15  ;;  %4557 = vmatprep.subr.mxu1 %v6848_v15 }
 0x58b   :  { %4523 = vmatpush3.msra.mxu0 %v5979_v13  ;;  %4558 = vmatpush3.msra.mxu1 %v5981_v14  ;;  %v6413_v13 = vld [vmem:[#allocation10 + $0xc8] sm:$0xff]  ;;  %v6415_v14 = vld [vmem:[#allocation10 + $0xc0] sm:$0xff] }
 0x58c   :  { %4524 = vmatprep.subr.mxu0 %v6848_v15  ;;  %4559 = vmatprep.subr.mxu1 %v6848_v15 }
 0x58d   :  { %4525 = vmatpush3.msra.mxu0 %v5987_v20  ;;  %4560 = vmatpush3.msra.mxu1 %v5989_v21  ;;  %v6419_v20 = vld [vmem:[#allocation10 + $0xa8] sm:$0xff]  ;;  %v6421_v21 = vld [vmem:[#allocation10 + $0xa0] sm:$0xff] }
 0x58e   :  { %4526 = vmatprep.subr.mxu0 %v6848_v15  ;;  %4561 = vmatprep.subr.mxu1 %v6848_v15 }
 0x58f   :  { %4527 = vmatpush3.msra.mxu0 %v6891_v47  ;;  %4562 = vmatpush3.msra.mxu1 %v6892_v48  ;;  %v6459_v47 = vld [vmem:[#allocation10 + $0x8] sm:$0xff]  ;;  %v6461_v48 = vld [vmem:[#allocation10] sm:$0xff] }
 0x590   :  { %4528 = vmatprep.subr.mxu0 %v6848_v15  ;;  %4563 = vmatprep.subr.mxu1 %v6848_v15 }
 0x591   :  { %4529 = vmatpush3.msra.mxu0 %v6003_v25  ;;  %4564 = vmatpush3.msra.mxu1 %v6893_v52  ;;  %v6435_v25 = vld [vmem:[#allocation10 + $0x68] sm:$0xff] }
 0x592   :  { %4530 = vmatprep.subr.mxu0 %v6848_v15  ;;  %4565 = vmatprep.subr.mxu1 %v6848_v15 }
 0x593   :  { %4531 = vmatpush3.msra.mxu0 %v6011_v19  ;;  %4566 = vmatpush3.msra.mxu1 %v6013_v30  ;;  %v6443_v19 = vld [vmem:[#allocation10 + $0x48] sm:$0xff]  ;;  %v6445_v30 = vld [vmem:[#allocation10 + $0x40] sm:$0xff] }
 0x594   :  { %4532 = vmatprep.subr.mxu0 %v6848_v15  ;;  %4567 = vmatprep.subr.mxu1 %v6848_v15 }
 0x595   :  { %4533 = vmatpush3.msra.mxu0 %v6019_v31  ;;  %4568 = vmatpush3.msra.mxu1 %v6021_v29  ;;  %v6427_v29 = vld [vmem:[#allocation10 + $0x88] sm:$0xff] }
 0x596   :  { %4534 = vmatprep.subr.mxu0 %v6848_v15  ;;  %4569 = vmatprep.subr.mxu1 %v6848_v15  ;;  %v6451_v31 = vld [vmem:[#allocation10 + $0x28] sm:$0xff] }
 0x597   :  { %4535 = vmatpush3.msra.mxu0 %v6027_v26  ;;  %4536 = vmatprep.mubr.msk.f32.mxu0 %vm5152_vm0, %v6848_v15  ;;  %v6429_v26 = vld [vmem:[#allocation10 + $0x80] sm:$0xff] }
 0x598   :  { %4570 = vmatpush3.msra.mxu1 %v6031_v24  ;;  %4571 = vmatprep.mubr.msk.f32.mxu1 %vm5152_vm0, %v6848_v15  ;;  %v6437_v24 = vld [vmem:[#allocation10 + $0x60] sm:$0xff] }
 0x599   :  { %4537 = vmatmul.mubr.f32.vlgmr.msra.gmra.mxu0 %v6264_v60  ;;  %4572 = vmatmul.mubr.f32.vlgmr.msra.gmra.mxu1 %v6264_v60 }
 0x59a   :  { %4574 = vmatprep.subr.mxu0 %v6848_v15  ;;  %4609 = vmatprep.subr.mxu1 %v6848_v15 }
 0x59b   :  { %4606 = vmatprep.mubr.msk.f32.mxu0 %vm5152_vm0, %v6848_v15  ;;  %4641 = vmatprep.mubr.msk.f32.mxu1 %vm5152_vm0, %v6848_v15 }
 0x59c   :  { %4575 = vmatpush3.msra.mxu0 %v6343_v22  ;;  %4610 = vmatpush3.msra.mxu1 %v6345_v33 }
 0x59d   :  { %4576 = vmatprep.subr.mxu0 %v6848_v15  ;;  %4611 = vmatprep.subr.mxu1 %v6848_v15 }
 0x59e   :  { %4577 = vmatpush3.msra.mxu0 %v6351_v28  ;;  %4612 = vmatpush3.msra.mxu1 %v6353_v0 }
 0x59f   :  { %4578 = vmatprep.subr.mxu0 %v6848_v15  ;;  %4613 = vmatprep.subr.mxu1 %v6848_v15 }
 0x5a0   :  { %4579 = vmatpush3.msra.mxu0 %v6359_v17  ;;  %4614 = vmatpush3.msra.mxu1 %v6361_v18 }
 0x5a1   :  { %4580 = vmatprep.subr.mxu0 %v6848_v15  ;;  %4615 = vmatprep.subr.mxu1 %v6848_v15 }
 0x5a2   :  { %4581 = vmatpush3.msra.mxu0 %v6367_v1  ;;  %4616 = vmatpush3.msra.mxu1 %v6369_v2 }
 0x5a3   :  { %4582 = vmatprep.subr.mxu0 %v6848_v15  ;;  %4617 = vmatprep.subr.mxu1 %v6848_v15 }
 0x5a4   :  { %4583 = vmatpush3.msra.mxu0 %v6375_v3  ;;  %4618 = vmatpush3.msra.mxu1 %v6377_v4 }
 0x5a5   :  { %4584 = vmatprep.subr.mxu0 %v6848_v15  ;;  %4619 = vmatprep.subr.mxu1 %v6848_v15 }
 0x5a6   :  { %4585 = vmatpush3.msra.mxu0 %v6383_v5  ;;  %4620 = vmatpush3.msra.mxu1 %v6385_v6 }
 0x5a7   :  { %4586 = vmatprep.subr.mxu0 %v6848_v15  ;;  %4621 = vmatprep.subr.mxu1 %v6848_v15 }
 0x5a8   :  { %4587 = vmatpush3.msra.mxu0 %v6391_v7  ;;  %4622 = vmatpush3.msra.mxu1 %v6393_v8 }
 0x5a9   :  { %4588 = vmatprep.subr.mxu0 %v6848_v15  ;;  %4623 = vmatprep.subr.mxu1 %v6848_v15 }
 0x5aa   :  { %4589 = vmatpush3.msra.mxu0 %v6399_v9  ;;  %4624 = vmatpush3.msra.mxu1 %v6401_v10 }
 0x5ab   :  { %4590 = vmatprep.subr.mxu0 %v6848_v15  ;;  %4625 = vmatprep.subr.mxu1 %v6848_v15 }
 0x5ac   :  { %4591 = vmatpush3.msra.mxu0 %v6407_v11  ;;  %4626 = vmatpush3.msra.mxu1 %v6409_v12 }
 0x5ad   :  { %4592 = vmatprep.subr.mxu0 %v6848_v15  ;;  %4627 = vmatprep.subr.mxu1 %v6848_v15 }
 0x5ae   :  { %4593 = vmatpush3.msra.mxu0 %v6413_v13  ;;  %4628 = vmatpush3.msra.mxu1 %v6415_v14 }
 0x5af   :  { %4594 = vmatprep.subr.mxu0 %v6848_v15  ;;  %4629 = vmatprep.subr.mxu1 %v6848_v15 }
 0x5b0   :  { %4595 = vmatpush3.msra.mxu0 %v6419_v20  ;;  %4630 = vmatpush3.msra.mxu1 %v6421_v21 }
 0x5b1   :  { %4596 = vmatprep.subr.mxu0 %v6848_v15  ;;  %4631 = vmatprep.subr.mxu1 %v6848_v15 }
 0x5b2   :  { %4597 = vmatpush3.msra.mxu0 %v6427_v29  ;;  %4632 = vmatpush3.msra.mxu1 %v6429_v26 }
 0x5b3   :  { %4598 = vmatprep.subr.mxu0 %v6848_v15  ;;  %4633 = vmatprep.subr.mxu1 %v6848_v15 }
 0x5b4   :  { %4599 = vmatpush3.msra.mxu0 %v6435_v25  ;;  %4634 = vmatpush3.msra.mxu1 %v6437_v24 }
 0x5b5   :  { %4600 = vmatprep.subr.mxu0 %v6848_v15  ;;  %4635 = vmatprep.subr.mxu1 %v6848_v15 }
 0x5b6   :  { %4601 = vmatpush3.msra.mxu0 %v6443_v19  ;;  %4636 = vmatpush3.msra.mxu1 %v6445_v30 }
 0x5b7   :  { %4602 = vmatprep.subr.mxu0 %v6848_v15  ;;  %4637 = vmatprep.subr.mxu1 %v6848_v15 }
 0x5b8   :  { %4603 = vmatpush3.msra.mxu0 %v6451_v31  ;;  %4638 = vmatpush3.msra.mxu1 %v6453_v32 }
 0x5b9   :  { %4604 = vmatprep.subr.mxu0 %v6848_v15  ;;  %4639 = vmatprep.subr.mxu1 %v6848_v15 }
 0x5ba   :  { %4605 = vmatpush3.msra.mxu0 %v6459_v47  ;;  %4640 = vmatpush3.msra.mxu1 %v6461_v48 }
 0x5bb   :  { %4644 = vmatprep.subr.mxu0 %v6848_v15  ;;  %4679 = vmatprep.subr.mxu1 %v6848_v15 }
 0x638   :  { %v2060_v52 = vpop.f32.mrf.mxu0  ;;  %v2155_v63 = vpop.f32.mrf.mxu1 }
 0x639   :  { %v2064_v50 = vadd.f32 %v2060_v52, %v1977_v16  ;;  %v2159_v51 = vadd.f32 %v2155_v63, %v2072_v49  ;;  %v6477_v16 = vld [vmem:[#allocation10 + $0x1f0] sm:$0xff]  ;;  %v6479_v49 = vld [vmem:[#allocation10 + $0x1f8] sm:$0xff] }
 0x63a   :  { %v4468_v56 = vpop.f32.mrf.mxu0  ;;  %v4503_v55 = vpop.f32.mrf.mxu1 }
 0x63b   :  { %v3181_v34 = vmul.f32 -1.442695, %v2064_v50  ;;  %v3182_v35 = vmul.f32 -1.442695, %v2159_v51  ;;  %v6486_v50 = vld [vmem:[#allocation10 + $0x1d8] sm:$0xff]  ;;  %v6492_v51 = vld [vmem:[#allocation10 + $0x1b0] sm:$0xff] }
 0x63d   :  { %4947 = vpow2.f32 %v3181_v34  ;;  %v6494_v34 = vld [vmem:[#allocation10 + $0x1b8] sm:$0xff] }
 0x63e   :  { %4949 = vpow2.f32 %v3182_v35  ;;  %v6500_v35 = vld [vmem:[#allocation10 + $0x190] sm:$0xff] }
 0x64a   :  { %v4948_v36 = vpop.eup %4947 }
 0x64b   :  { %v4950_v37 = vpop.eup %4949  ;;  %v2068_v38 = vadd.f32 1.0, %v4948_v36  ;;  %v6502_v36 = vld [vmem:[#allocation10 + $0x198] sm:$0xff] }
 0x64c   :  { %v2163_v39 = vadd.f32 1.0, %v4950_v37  ;;  %v6508_v37 = vld [vmem:[#allocation10 + $0x170] sm:$0xff] }
 0x64d   :  { %4951 = vrcp.f32 %v2068_v38  ;;  %v6510_v38 = vld [vmem:[#allocation10 + $0x178] sm:$0xff] }
 0x64e   :  { %4953 = vrcp.f32 %v2163_v39  ;;  %v6516_v39 = vld [vmem:[#allocation10 + $0x150] sm:$0xff] }
 0x659   :  { %v2249_v42 = vpop.f32.mrf.mxu0  ;;  %v2340_v43 = vpop.f32.mrf.mxu1 }
 0x65a   :  { %v2253_v44 = vadd.f32 %v2249_v42, %v2166_v40  ;;  %v2344_v45 = vadd.f32 %v2340_v43, %v2257_v41  ;;  %v4952_v27 = vpop.eup %4951  ;;  %v6518_v40 = vld [vmem:[#allocation10 + $0x158] sm:$0xff]  ;;  %v6524_v41 = vld [vmem:[#allocation10 + $0x130] sm:$0xff] }
 0x65b   :  { %v4538_v46 = vpop.f32.mrf.mxu0  ;;  %v4573_v53 = vpop.f32.mrf.mxu1  ;;  %v2071_v59 = vmul.f32 %v4952_v27, %v6261_v61  ;;  %v6484_v61 = vld [vmem:[#allocation10 + $0x1d0] sm:$0xff]  ;;  %v6526_v42 = vld [vmem:[#allocation10 + $0x138] sm:$0xff] }
 0x65c   :  { %4955 = vtanh.f32 %v2253_v44  ;;  %v3183_v54 = vmul.f32 -1.442695, %v2344_v45  ;;  %v4954_v23 = vpop.eup %4953  ;;  %v6532_v43 = vld [vmem:[#allocation10 + $0x110] sm:$0xff]  ;;  %v6534_v44 = vld [vmem:[#allocation10 + $0x118] sm:$0xff] }
 0x65d   :  { %v6540_v45 = vld [vmem:[#allocation10 + $0xf0] sm:$0xff]  ;;  %v6542_v46 = vld [vmem:[#allocation10 + $0xf8] sm:$0xff] }
 0x65e   :  { %4957 = vpow2.f32 %v3183_v54  ;;  %v6548_v53 = vld [vmem:[#allocation10 + $0xd0] sm:$0xff]  ;;  %v6550_v54 = vld [vmem:[#allocation10 + $0xd8] sm:$0xff] }
 0x65f   :  { %v6556_v27 = vld [vmem:[#allocation10 + $0xb0] sm:$0xff] }
 0x669   :  { %v4956_v62 = vpop.eup %4955 }
 0x66a   :  { %v2255_v58 = vmul.f32 %v4956_v62, %v4954_v23  ;;  %v6558_v23 = vld [vmem:[#allocation10 + $0xb8] sm:$0xff]  ;;  %v6564_v62 = vld [vmem:[#allocation10 + $0x90] sm:$0xff] }
 0x66b   :  { %v4958_v57 = vpop.eup %4957  ;;  %6913 = vst [vmem:[#allocation38_spill] sm:$0xff] %v6564_v62 }
 0x66c   :  { %v6472_v60 = vadd.f32 %v2255_v58, %v2071_v59  ;;  %v2348_v52 = vadd.f32 1.0, %v4958_v57  ;;  %v6566_v59 = vld [vmem:[#allocation10 + $0x98] sm:$0xff]  ;;  %v6572_v58 = vld [vmem:[#allocation10 + $0x70] sm:$0xff] }
 0x66d   :  { %6914 = vst [vmem:[#allocation41_spill] sm:$0xff] %v6566_v59  ;;  %v6574_v57 = vld [vmem:[#allocation10 + $0x78] sm:$0xff] }
 0x66e   :  { %4959 = vtanh.f32 %v6472_v60  ;;  %6915 = vst [vmem:[#allocation42_spill] sm:$0xff] %v6574_v57 }
 0x66f   :  { %4961 = vrcp.f32 %v2348_v52  ;;  %v6580_v52 = vld [vmem:[#allocation10 + $0x50] sm:$0xff] }
 0x67b   :  { %v4960_v63 = vpop.eup %4959 }
 0x67c   :  { %v4962_v56 = vpop.eup %4961 }
 0x67d   :  { %v6475_v55 = vmul.f32 %v4962_v56, %v4960_v63  ;;  %v6582_v63 = vld [vmem:[#allocation10 + $0x58] sm:$0xff]  ;;  %v6588_v56 = vld [vmem:[#allocation10 + $0x30] sm:$0xff] }
 0x67f   :  { %2354 = vst [vmem:[#allocation12 + $0x28] sm:$0xff] %v6475_v55  ;;  %4607 = vmatmul.mubr.f32.vlgmr.msra.gmra.mxu0 %v6475_v55  ;;  %4642 = vmatmul.mubr.f32.vlgmr.msra.gmra.mxu1 %v6475_v55 }
 0x680   :  { %4645 = vmatpush3.msra.mxu0 %v6477_v16  ;;  %4680 = vmatpush3.msra.mxu1 %v6479_v49 }
 0x681   :  { %4646 = vmatprep.subr.mxu0 %v6848_v15  ;;  %4681 = vmatprep.subr.mxu1 %v6848_v15 }
 0x682   :  { %4647 = vmatpush3.msra.mxu0 %v6484_v61  ;;  %4682 = vmatpush3.msra.mxu1 %v6486_v50 }
 0x683   :  { %4648 = vmatprep.subr.mxu0 %v6848_v15  ;;  %4683 = vmatprep.subr.mxu1 %v6848_v15 }
 0x684   :  { %4649 = vmatpush3.msra.mxu0 %v6492_v51  ;;  %4684 = vmatpush3.msra.mxu1 %v6494_v34 }
 0x685   :  { %4650 = vmatprep.subr.mxu0 %v6848_v15  ;;  %4685 = vmatprep.subr.mxu1 %v6848_v15 }
 0x686   :  { %4651 = vmatpush3.msra.mxu0 %v6500_v35  ;;  %4686 = vmatpush3.msra.mxu1 %v6502_v36 }
 0x687   :  { %4652 = vmatprep.subr.mxu0 %v6848_v15  ;;  %4687 = vmatprep.subr.mxu1 %v6848_v15 }
 0x688   :  { %4653 = vmatpush3.msra.mxu0 %v6508_v37  ;;  %4688 = vmatpush3.msra.mxu1 %v6510_v38 }
 0x689   :  { %4654 = vmatprep.subr.mxu0 %v6848_v15  ;;  %4689 = vmatprep.subr.mxu1 %v6848_v15 }
 0x68a   :  { %4655 = vmatpush3.msra.mxu0 %v6516_v39  ;;  %4690 = vmatpush3.msra.mxu1 %v6518_v40 }
 0x68b   :  { %4656 = vmatprep.subr.mxu0 %v6848_v15  ;;  %4691 = vmatprep.subr.mxu1 %v6848_v15 }
 0x68c   :  { %4657 = vmatpush3.msra.mxu0 %v6524_v41  ;;  %4692 = vmatpush3.msra.mxu1 %v6526_v42 }
 0x68d   :  { %4658 = vmatprep.subr.mxu0 %v6848_v15  ;;  %4693 = vmatprep.subr.mxu1 %v6848_v15 }
 0x68e   :  { %4659 = vmatpush3.msra.mxu0 %v6532_v43  ;;  %4694 = vmatpush3.msra.mxu1 %v6534_v44 }
 0x68f   :  { %4660 = vmatprep.subr.mxu0 %v6848_v15  ;;  %4695 = vmatprep.subr.mxu1 %v6848_v15 }
 0x690   :  { %4661 = vmatpush3.msra.mxu0 %v6540_v45  ;;  %4696 = vmatpush3.msra.mxu1 %v6542_v46 }
 0x691   :  { %4662 = vmatprep.subr.mxu0 %v6848_v15  ;;  %4697 = vmatprep.subr.mxu1 %v6848_v15 }
 0x692   :  { %4663 = vmatpush3.msra.mxu0 %v6548_v53  ;;  %4698 = vmatpush3.msra.mxu1 %v6550_v54 }
 0x693   :  { %4664 = vmatprep.subr.mxu0 %v6848_v15  ;;  %4699 = vmatprep.subr.mxu1 %v6848_v15 }
 0x694   :  { %4665 = vmatpush3.msra.mxu0 %v6556_v27  ;;  %4700 = vmatpush3.msra.mxu1 %v6558_v23 }
 0x695   :  { %4666 = vmatprep.subr.mxu0 %v6848_v15  ;;  %4701 = vmatprep.subr.mxu1 %v6848_v15 }
 0x696   :  { %4667 = vmatpush3.msra.mxu0 %v6564_v62  ;;  %4702 = vmatpush3.msra.mxu1 %v6566_v59  ;;  %v6590_v62 = vld [vmem:[#allocation10 + $0x38] sm:$0xff]  ;;  %v6596_v59 = vld [vmem:[#allocation10 + $0x10] sm:$0xff] }
 0x697   :  { %4668 = vmatprep.subr.mxu0 %v6848_v15  ;;  %4703 = vmatprep.subr.mxu1 %v6848_v15 }
 0x698   :  { %4669 = vmatpush3.msra.mxu0 %v6572_v58  ;;  %4704 = vmatpush3.msra.mxu1 %v6574_v57  ;;  %v6600_v57 = vld [vmem:[#allocation10 + $0x18] sm:$0xff] }
 0x699   :  { %4670 = vmatprep.subr.mxu0 %v6848_v15  ;;  %4705 = vmatprep.subr.mxu1 %v6848_v15 }
 0x69a   :  { %4671 = vmatpush3.msra.mxu0 %v6580_v52  ;;  %4706 = vmatpush3.msra.mxu1 %v6582_v63 }
 0x69b   :  { %4672 = vmatprep.subr.mxu0 %v6848_v15  ;;  %4707 = vmatprep.subr.mxu1 %v6848_v15 }
 0x69c   :  { %4673 = vmatpush3.msra.mxu0 %v6588_v56  ;;  %4708 = vmatpush3.msra.mxu1 %v6590_v62 }
 0x69d   :  { %4674 = vmatprep.subr.mxu0 %v6848_v15  ;;  %4709 = vmatprep.subr.mxu1 %v6848_v15 }
 0x69e   :  { %4675 = vmatpush3.msra.mxu0 %v6596_v59  ;;  %4676 = vmatprep.mubr.msk.f32.mxu0 %vm5152_vm0, %v6848_v15 }
 0x69f   :  { %4710 = vmatpush3.msra.mxu1 %v6600_v57  ;;  %4711 = vmatprep.mubr.msk.f32.mxu1 %vm5152_vm0, %v6848_v15 }
 0x6a0   :  { %4677 = vmatmul.mubr.f32.vlgmr.msra.gmra.mxu0 %v6475_v55  ;;  %4712 = vmatmul.mubr.f32.vlgmr.msra.gmra.mxu1 %v6475_v55 }
 0x6a1   :  { %4714 = vmatprep.subr.mxu0 %v6848_v15  ;;  %4749 = vmatprep.subr.mxu1 %v6848_v15 }
 0x6a2   :  { %4715 = vmatpush3.msra.mxu0 %v6343_v22  ;;  %4750 = vmatpush3.msra.mxu1 %v6345_v33 }
 0x6a3   :  { %4716 = vmatprep.subr.mxu0 %v6848_v15  ;;  %4751 = vmatprep.subr.mxu1 %v6848_v15 }
 0x6a4   :  { %4717 = vmatpush3.msra.mxu0 %v6351_v28  ;;  %4752 = vmatpush3.msra.mxu1 %v6353_v0 }
 0x6a5   :  { %4718 = vmatprep.subr.mxu0 %v6848_v15  ;;  %4753 = vmatprep.subr.mxu1 %v6848_v15 }
 0x6a6   :  { %4719 = vmatpush3.msra.mxu0 %v6359_v17  ;;  %4754 = vmatpush3.msra.mxu1 %v6361_v18  ;;  %v2356_v17 = vld [vmem:[#allocation4 + $0xc8] sm:$0xff]  ;;  %v2451_v18 = vld [vmem:[#allocation4 + $0xc0] sm:$0xff] }
 0x6a7   :  { %4720 = vmatprep.subr.mxu0 %v6848_v15  ;;  %4755 = vmatprep.subr.mxu1 %v6848_v15 }
 0x6a8   :  { %4721 = vmatpush3.msra.mxu0 %v6367_v1  ;;  %4756 = vmatpush3.msra.mxu1 %v6369_v2 }
 0x6a9   :  { %4722 = vmatprep.subr.mxu0 %v6848_v15  ;;  %4757 = vmatprep.subr.mxu1 %v6848_v15 }
 0x6aa   :  { %4723 = vmatpush3.msra.mxu0 %v6375_v3  ;;  %4758 = vmatpush3.msra.mxu1 %v6377_v4 }
 0x6ab   :  { %4724 = vmatprep.subr.mxu0 %v6848_v15  ;;  %4759 = vmatprep.subr.mxu1 %v6848_v15 }
 0x6ac   :  { %4725 = vmatpush3.msra.mxu0 %v6383_v5  ;;  %4760 = vmatpush3.msra.mxu1 %v6385_v6 }
 0x6ad   :  { %4726 = vmatprep.subr.mxu0 %v6848_v15  ;;  %4761 = vmatprep.subr.mxu1 %v6848_v15 }
 0x6ae   :  { %4727 = vmatpush3.msra.mxu0 %v6391_v7  ;;  %4762 = vmatpush3.msra.mxu1 %v6393_v8 }
 0x6af   :  { %4728 = vmatprep.subr.mxu0 %v6848_v15  ;;  %4763 = vmatprep.subr.mxu1 %v6848_v15 }
 0x6b0   :  { %4729 = vmatpush3.msra.mxu0 %v6399_v9  ;;  %4764 = vmatpush3.msra.mxu1 %v6401_v10  ;;  %v2545_v9 = vld [vmem:[#allocation4 + $0xd0] sm:$0xff]  ;;  %v2636_v10 = vld [vmem:[#allocation4 + $0xd8] sm:$0xff] }
 0x6b1   :  { %4730 = vmatprep.subr.mxu0 %v6848_v15  ;;  %4765 = vmatprep.subr.mxu1 %v6848_v15 }
 0x6b2   :  { %4731 = vmatpush3.msra.mxu0 %v6407_v11  ;;  %4766 = vmatpush3.msra.mxu1 %v6409_v12 }
 0x6b3   :  { %4732 = vmatprep.subr.mxu0 %v6848_v15  ;;  %4767 = vmatprep.subr.mxu1 %v6848_v15 }
 0x6b4   :  { %4733 = vmatpush3.msra.mxu0 %v6413_v13  ;;  %4768 = vmatpush3.msra.mxu1 %v6415_v14 }
 0x6b5   :  { %4734 = vmatprep.subr.mxu0 %v6848_v15  ;;  %4769 = vmatprep.subr.mxu1 %v6848_v15 }
 0x6b6   :  { %4735 = vmatpush3.msra.mxu0 %v6419_v20  ;;  %4770 = vmatpush3.msra.mxu1 %v6421_v21 }
 0x6b7   :  { %4736 = vmatprep.subr.mxu0 %v6848_v15  ;;  %4771 = vmatprep.subr.mxu1 %v6848_v15 }
 0x6b8   :  { %4737 = vmatpush3.msra.mxu0 %v6427_v29  ;;  %4772 = vmatpush3.msra.mxu1 %v6429_v26 }
 0x6b9   :  { %4738 = vmatprep.subr.mxu0 %v6848_v15  ;;  %4773 = vmatprep.subr.mxu1 %v6848_v15 }
 0x6ba   :  { %4739 = vmatpush3.msra.mxu0 %v6435_v25  ;;  %4774 = vmatpush3.msra.mxu1 %v6437_v24 }
 0x6bb   :  { %4740 = vmatprep.subr.mxu0 %v6848_v15  ;;  %4775 = vmatprep.subr.mxu1 %v6848_v15 }
 0x6bc   :  { %4741 = vmatpush3.msra.mxu0 %v6443_v19  ;;  %4776 = vmatpush3.msra.mxu1 %v6445_v30 }
 0x6bd   :  { %4742 = vmatprep.subr.mxu0 %v6848_v15  ;;  %4777 = vmatprep.subr.mxu1 %v6848_v15 }
 0x6be   :  { %4743 = vmatpush3.msra.mxu0 %v6451_v31  ;;  %4778 = vmatpush3.msra.mxu1 %v6453_v32 }
 0x6bf   :  { %4744 = vmatprep.subr.mxu0 %v6848_v15  ;;  %4779 = vmatprep.subr.mxu1 %v6848_v15 }
 0x6c0   :  { %4745 = vmatpush3.msra.mxu0 %v6459_v47  ;;  %4780 = vmatpush3.msra.mxu1 %v6461_v48 }
 0x6c1   :  { %4746 = vmatprep.mubr.msk.f32.mxu0 %vm5152_vm0, %v6848_v15  ;;  %4781 = vmatprep.mubr.msk.f32.mxu1 %vm5152_vm0, %v6848_v15 }
 0x6c2   :  { %4784 = vmatprep.subr.mxu0 %v6848_v15  ;;  %4819 = vmatprep.subr.mxu1 %v6848_v15 }
 0x73f   :  { %v2439_v22 = vpop.f32.mrf.mxu0  ;;  %v2534_v33 = vpop.f32.mrf.mxu1 }
 0x740   :  { %v2443_v1 = vadd.f32 %v2439_v22, %v2356_v17  ;;  %v2538_v2 = vadd.f32 %v2534_v33, %v2451_v18 }
 0x741   :  { %v4608_v28 = vpop.f32.mrf.mxu0  ;;  %v4643_v0 = vpop.f32.mrf.mxu1 }
 0x742   :  { %v3184_v3 = vmul.f32 -1.442695, %v2443_v1  ;;  %v3185_v4 = vmul.f32 -1.442695, %v2538_v2 }
 0x744   :  { %4963 = vpow2.f32 %v3184_v3 }
 0x745   :  { %4965 = vpow2.f32 %v3185_v4 }
 0x751   :  { %v4964_v5 = vpop.eup %4963 }
 0x752   :  { %v4966_v6 = vpop.eup %4965  ;;  %v2447_v7 = vadd.f32 1.0, %v4964_v5 }
 0x753   :  { %v2542_v8 = vadd.f32 1.0, %v4966_v6 }
 0x754   :  { %4967 = vrcp.f32 %v2447_v7 }
 0x755   :  { %4969 = vrcp.f32 %v2542_v8 }
 0x760   :  { %v2628_v11 = vpop.f32.mrf.mxu0  ;;  %v2719_v12 = vpop.f32.mrf.mxu1 }
 0x761   :  { %v2632_v13 = vadd.f32 %v2628_v11, %v2545_v9  ;;  %v2723_v14 = vadd.f32 %v2719_v12, %v2636_v10  ;;  %v4968_v26 = vpop.eup %4967 }
 0x762   :  { %v4678_v20 = vpop.f32.mrf.mxu0  ;;  %v4713_v21 = vpop.f32.mrf.mxu1  ;;  %v2450_v19 = vmul.f32 %v4968_v26, %v6472_v60  ;;  %v6916_v60 = vld [vmem:[#allocation38_spill] sm:$0xff] }
 0x763   :  { %4971 = vtanh.f32 %v2632_v13  ;;  %v3186_v29 = vmul.f32 -1.442695, %v2723_v14  ;;  %v4970_v25 = vpop.eup %4969 }
 0x765   :  { %4973 = vpow2.f32 %v3186_v29 }
 0x770   :  { %v4972_v24 = vpop.eup %4971 }
 0x771   :  { %v2634_v30 = vmul.f32 %v4972_v24, %v4970_v25 }
 0x772   :  { %v4974_v31 = vpop.eup %4973 }
 0x773   :  { %v6683_v32 = vadd.f32 %v2634_v30, %v2450_v19  ;;  %v2727_v47 = vadd.f32 1.0, %v4974_v31 }
 0x775   :  { %4975 = vtanh.f32 %v6683_v32 }
 0x776   :  { %4977 = vrcp.f32 %v2727_v47 }
 0x782   :  { %v4976_v48 = vpop.eup %4975 }
 0x783   :  { %v4978_v55 = vpop.eup %4977 }
 0x784   :  { %v6686_v22 = vmul.f32 %v4978_v55, %v4976_v48 }
 0x786   :  { %2733 = vst [vmem:[#allocation12 + $0x30] sm:$0xff] %v6686_v22  ;;  %4747 = vmatmul.mubr.f32.vlgmr.msra.gmra.mxu0 %v6686_v22  ;;  %4782 = vmatmul.mubr.f32.vlgmr.msra.gmra.mxu1 %v6686_v22 }
 0x787   :  { %4785 = vmatpush3.msra.mxu0 %v6477_v16  ;;  %4820 = vmatpush3.msra.mxu1 %v6479_v49  ;;  %v6917_v16 = vld [vmem:[#allocation41_spill] sm:$0xff]  ;;  %v6918_v49 = vld [vmem:[#allocation42_spill] sm:$0xff] }
 0x788   :  { %4786 = vmatprep.subr.mxu0 %v6848_v15  ;;  %4821 = vmatprep.subr.mxu1 %v6848_v15 }
 0x789   :  { %4787 = vmatpush3.msra.mxu0 %v6484_v61  ;;  %4822 = vmatpush3.msra.mxu1 %v6486_v50 }
 0x78a   :  { %4788 = vmatprep.subr.mxu0 %v6848_v15  ;;  %4823 = vmatprep.subr.mxu1 %v6848_v15 }
 0x78b   :  { %4789 = vmatpush3.msra.mxu0 %v6492_v51  ;;  %4824 = vmatpush3.msra.mxu1 %v6494_v34 }
 0x78c   :  { %4790 = vmatprep.subr.mxu0 %v6848_v15  ;;  %4825 = vmatprep.subr.mxu1 %v6848_v15 }
 0x78d   :  { %4791 = vmatpush3.msra.mxu0 %v6500_v35  ;;  %4826 = vmatpush3.msra.mxu1 %v6502_v36  ;;  %v2735_v35 = vld [vmem:[#allocation4 + $0xe8] sm:$0xff]  ;;  %v2830_v36 = vld [vmem:[#allocation4 + $0xe0] sm:$0xff] }
 0x78e   :  { %4792 = vmatprep.subr.mxu0 %v6848_v15  ;;  %4827 = vmatprep.subr.mxu1 %v6848_v15 }
 0x78f   :  { %4793 = vmatpush3.msra.mxu0 %v6508_v37  ;;  %4828 = vmatpush3.msra.mxu1 %v6510_v38 }
 0x790   :  { %4794 = vmatprep.subr.mxu0 %v6848_v15  ;;  %4829 = vmatprep.subr.mxu1 %v6848_v15 }
 0x791   :  { %4795 = vmatpush3.msra.mxu0 %v6516_v39  ;;  %4830 = vmatpush3.msra.mxu1 %v6518_v40 }
 0x792   :  { %4796 = vmatprep.subr.mxu0 %v6848_v15  ;;  %4831 = vmatprep.subr.mxu1 %v6848_v15 }
 0x793   :  { %4797 = vmatpush3.msra.mxu0 %v6524_v41  ;;  %4832 = vmatpush3.msra.mxu1 %v6526_v42 }
 0x794   :  { %4798 = vmatprep.subr.mxu0 %v6848_v15  ;;  %4833 = vmatprep.subr.mxu1 %v6848_v15 }
 0x795   :  { %4799 = vmatpush3.msra.mxu0 %v6532_v43  ;;  %4834 = vmatpush3.msra.mxu1 %v6534_v44  ;;  %v2924_v44 = vld [vmem:[#allocation4 + $0xf0] sm:$0xff] }
 0x796   :  { %4800 = vmatprep.subr.mxu0 %v6848_v15  ;;  %4835 = vmatprep.subr.mxu1 %v6848_v15 }
 0x797   :  { %4801 = vmatpush3.msra.mxu0 %v6540_v45  ;;  %4836 = vmatpush3.msra.mxu1 %v6542_v46  ;;  %v3015_v45 = vld [vmem:[#allocation4 + $0xf8] sm:$0xff] }
 0x798   :  { %4802 = vmatprep.subr.mxu0 %v6848_v15  ;;  %4837 = vmatprep.subr.mxu1 %v6848_v15 }
 0x799   :  { %4803 = vmatpush3.msra.mxu0 %v6548_v53  ;;  %4838 = vmatpush3.msra.mxu1 %v6550_v54 }
 0x79a   :  { %4804 = vmatprep.subr.mxu0 %v6848_v15  ;;  %4839 = vmatprep.subr.mxu1 %v6848_v15 }
 0x79b   :  { %4805 = vmatpush3.msra.mxu0 %v6556_v27  ;;  %4840 = vmatpush3.msra.mxu1 %v6558_v23 }
 0x79c   :  { %4806 = vmatprep.subr.mxu0 %v6848_v15  ;;  %4841 = vmatprep.subr.mxu1 %v6848_v15 }
 0x79d   :  { %4807 = vmatpush3.msra.mxu0 %v6916_v60  ;;  %4842 = vmatpush3.msra.mxu1 %v6917_v16 }
 0x79e   :  { %4808 = vmatprep.subr.mxu0 %v6848_v15  ;;  %4843 = vmatprep.subr.mxu1 %v6848_v15 }
 0x79f   :  { %4809 = vmatpush3.msra.mxu0 %v6572_v58  ;;  %4844 = vmatpush3.msra.mxu1 %v6918_v49 }
 0x7a0   :  { %4810 = vmatprep.subr.mxu0 %v6848_v15  ;;  %4845 = vmatprep.subr.mxu1 %v6848_v15 }
 0x7a1   :  { %4811 = vmatpush3.msra.mxu0 %v6580_v52  ;;  %4846 = vmatpush3.msra.mxu1 %v6582_v63 }
 0x7a2   :  { %4812 = vmatprep.subr.mxu0 %v6848_v15  ;;  %4847 = vmatprep.subr.mxu1 %v6848_v15 }
 0x7a3   :  { %4813 = vmatpush3.msra.mxu0 %v6588_v56  ;;  %4848 = vmatpush3.msra.mxu1 %v6590_v62 }
 0x7a4   :  { %4814 = vmatprep.subr.mxu0 %v6848_v15  ;;  %4849 = vmatprep.subr.mxu1 %v6848_v15 }
 0x7a5   :  { %4815 = vmatpush3.msra.mxu0 %v6596_v59  ;;  %4816 = vmatprep.mubr.msk.f32.mxu0 %vm5152_vm0, %v6848_v15 }
 0x7a6   :  { %4850 = vmatpush3.msra.mxu1 %v6600_v57  ;;  %4851 = vmatprep.mubr.msk.f32.mxu1 %vm5152_vm0, %v6848_v15 }
 0x7a7   :  { %4817 = vmatmul.mubr.f32.vlgmr.msra.gmra.mxu0 %v6686_v22  ;;  %4852 = vmatmul.mubr.f32.vlgmr.msra.gmra.mxu1 %v6686_v22 }
 0x846   :  { %v2818_v61 = vpop.f32.mrf.mxu0  ;;  %v2913_v50 = vpop.f32.mrf.mxu1 }
 0x847   :  { %v2822_v37 = vadd.f32 %v2818_v61, %v2735_v35  ;;  %v2917_v38 = vadd.f32 %v2913_v50, %v2830_v36 }
 0x848   :  { %v4748_v51 = vpop.f32.mrf.mxu0  ;;  %v4783_v34 = vpop.f32.mrf.mxu1 }
 0x849   :  { %v3187_v39 = vmul.f32 -1.442695, %v2822_v37  ;;  %v3188_v40 = vmul.f32 -1.442695, %v2917_v38 }
 0x84b   :  { %4979 = vpow2.f32 %v3187_v39 }
 0x84c   :  { %4981 = vpow2.f32 %v3188_v40 }
 0x858   :  { %v4980_v41 = vpop.eup %4979 }
 0x859   :  { %v4982_v42 = vpop.eup %4981  ;;  %v2826_v43 = vadd.f32 1.0, %v4980_v41 }
 0x85a   :  { %v2921_v15 = vadd.f32 1.0, %v4982_v42 }
 0x85b   :  { %4983 = vrcp.f32 %v2826_v43 }
 0x85c   :  { %4985 = vrcp.f32 %v2921_v15 }
 0x867   :  { %v3007_v46 = vpop.f32.mrf.mxu0  ;;  %v3098_v53 = vpop.f32.mrf.mxu1 }
 0x868   :  { %v3011_v54 = vadd.f32 %v3007_v46, %v2924_v44  ;;  %v3102_v27 = vadd.f32 %v3098_v53, %v3015_v45  ;;  %v4984_v58 = vpop.eup %4983 }
 0x869   :  { %v4818_v23 = vpop.f32.mrf.mxu0  ;;  %v4853_v62 = vpop.f32.mrf.mxu1  ;;  %v2829_v63 = vmul.f32 %v4984_v58, %v6683_v32 }
 0x86a   :  { %4987 = vtanh.f32 %v3011_v54  ;;  %v3189_v59 = vmul.f32 -1.442695, %v3102_v27  ;;  %v4986_v57 = vpop.eup %4985 }
 0x86c   :  { %4989 = vpow2.f32 %v3189_v59 }
 0x877   :  { %v4988_v52 = vpop.eup %4987 }
 0x878   :  { %v3013_v56 = vmul.f32 %v4988_v52, %v4986_v57 }
 0x879   :  { %v4990_v33 = vpop.eup %4989 }
 0x87a   :  { %v3014_v28 = vadd.f32 %v3013_v56, %v2829_v63  ;;  %v3106_v0 = vadd.f32 1.0, %v4990_v33 }
 0x87c   :  { %3119 = vst [vmem:[#allocation15] sm:$0xff] %v3014_v28  ;;  %4991 = vrcp.f32 %v3106_v0 }
 0x87d   :  { %4993 = vtanh.f32 %v3014_v28 }
 0x889   :  { %v4992_v17 = vpop.eup %4991 }
 0x88a   :  { %v4994_v18 = vpop.eup %4993 }
 0x88b   :  { %v3110_v1 = vmul.f32 %v4994_v18, %v4992_v17 }
 0x88d   :  { %3112 = vst [vmem:[#allocation12 + $0x38] sm:$0xff] %v3110_v1  ;;  %3118 = vst [vmem:[#allocation13] sm:$0xff] %v3110_v1 }
 0x88e   :  { %5086 = shalt.err (!%p5083_p10)
}
 0x88f   :  { %3141 = dma.vmem_to_hbm [thread:$0]  %s3139_s3, 128, %s6774_s5, [#allocation14]  }
 0x890   :  { %s5095_s24 = scalar_lea.vmem %s3126_s18, 1024  ;;  %p5100_p12 = scmp.lt.s32.totalorder %s3126_s18, %s3126_s18 }
 0x891   :  { %p5096_p11 = scmp.ne.s32.totalorder %s3126_s18, %s5095_s24  ;;  %p5101_p13 = scmp.lt.s32.totalorder %s5095_s24, %s5095_s24 }
 0x893   :  { %p5102_p0 = por %p5101_p13, %p5100_p12 }
 0x895   :  { %p5103_p1 = pnand %p5102_p0, %p5096_p11 }
 0x897   :  { %5106 = shalt.err (!%p5103_p1)
}
 0x898   :  { %s5156_s25 = smov 128   ;;  %s5157_s26 = smov 8  }
 0x899   :  { %3131 = dma.vmem_to_hbm [thread:$0]  %s3126_s18, 1024, %s6773_s4, [#allocation6], %s5156_s25, %s5156_s25, %s5157_s26  }
 0x89a   :  { %s5115_s29 = scalar_lea.vmem %s3149_s20, 128  ;;  %p5120_p3 = scmp.lt.s32.totalorder %s3149_s20, %s3149_s20 }
 0x89b   :  { %p5116_p2 = scmp.ne.s32.totalorder %s3149_s20, %s5115_s29  ;;  %p5121_p4 = scmp.lt.s32.totalorder %s5115_s29, %s5115_s29 }
 0x89d   :  { %p5122_p5 = por %p5121_p4, %p5120_p3 }
 0x89f   :  { %p5123_p6 = pnand %p5122_p5, %p5116_p2 }
 0x8a1   :  { %5126 = shalt.err (!%p5123_p6)
}
 0x8a2   :  { %3151 = dma.vmem_to_hbm [thread:$0]  %s3149_s20, 128, %s6775_s6, [#allocation14]  }
 0x8a3   :  { %5141 = dma.done.wait [#allocation6], 1024  }
 0x8a4   :  { %5142 = vsyncadd [#allocation6], 4294966272 }
 0x8a5   :  { %5143 = dma.done.wait [#allocation14], 256  }
 0x8a6   :  { %5144 = vsyncadd [#allocation14], 4294967040 }
 0x8a7   :  { %3161 = vsyncpa [#allocation5], 1 }
 0x8a8   :  { %3162 = vsyncpa [#allocation8], 1 }
 0x8a9   :  { %3163 = vsyncpa [#allocation11], 1 }
 0x8aa   :  { %3164 = vsyncpa [#allocation6], 1 }
 0x8ab   :  { %3165 = vsyncpa [#allocation14], 1 }

</bundles_post_ra>
